<compile_context>
chip_gen: v5e
topology: v5e:2x2
jax: 0.10.0
libtpu: 0.0.40
codegen_flags: <defaults>
</compile_context>

<pallas_src>
import functools

import jax
import jax.numpy as jnp
from jax.experimental import pallas as pl
from jax.experimental.pallas import tpu as pltpu


# ------------------------------ in-kernel helpers ------------------------------

def _maxpool2x2(x):
    """2x2 max pool, stride 2, on an NHWC value.

    Uses only static slices, elementwise max and concatenation so it lowers
    cleanly on Mosaic.  Executed once per pooling stage inside the fused
    kernel, so its cost is negligible."""
    n, h, w, c = x.shape
    rows = [jnp.maximum(x[:, 2 * i:2 * i + 1, :, :], x[:, 2 * i + 1:2 * i + 2, :, :])
            for i in range(h // 2)]
    x = jnp.concatenate(rows, axis=1)                       # (n, h//2, w, c)
    cols = [jnp.maximum(x[:, :, 2 * j:2 * j + 1, :], x[:, :, 2 * j + 1:2 * j + 2, :])
            for j in range(w // 2)]
    return jnp.concatenate(cols, axis=2)                    # (n, h//2, w//2, c)


# --------------------------------- fused kernel ---------------------------------

def _fused_resnet_kernel(n_block, H, W, Cin, Cb,
                         x_ref, c1w_ref, c1b_ref, rw_ref, gamma_ref, beta_ref,
                         w1_ref, b1_ref, w2_ref, b2_ref, o_ref,
                         xpad1_ref, patch1_ref, act_ref, xpad2_ref, patchr_ref,
                         flat_ref):
    N = x_ref.shape[0]
    Hh, Wh = H // 2, W // 2
    Hq, Wq = H // 4, W // 4

    # ---- stage 1: conv1 (3x3 'same', with bias) + ReLU + 2x2 max-pool ----------
    xpad1_ref[...] = jnp.zeros(xpad1_ref.shape, xpad1_ref.dtype)
    xpad1_ref[:, 1:H + 1, 1:W + 1, :] = x_ref[...]          # halo stays zero
    rows1 = N * H * W
    for dh in range(3):                                     # im2col pack (K = 9*Cin)
        for dw in range(3):
            t = 3 * dh + dw
            patch1_ref[:, t * Cin:(t + 1) * Cin] = (
                xpad1_ref[:, dh:dh + H, dw:dw + W, :].reshape(rows1, Cin))
    y = jnp.dot(patch1_ref[...], c1w_ref[...],
                preferred_element_type=jnp.float32) + c1b_ref[...]
    y = jnp.maximum(y, 0.0).reshape(N, H, W, Cb)
    act_ref[...] = _maxpool2x2(y)                           # (N, Hh, Wh, Cb)

    # ---- stage 2: n_block shared-weight ResBlocks (weights resident in VMEM) ---
    xpad2_ref[...] = jnp.zeros(xpad2_ref.shape, xpad2_ref.dtype)
    rowsr = N * Hh * Wh
    inv_cnt = 1.0 / float(rowsr)

    def res_body(_, carry):
        xpad2_ref[:, 1:Hh + 1, 1:Wh + 1, :] = act_ref[...]  # in-VMEM halo pad
        for dh in range(3):                                 # im2col pack (K = 9*Cb)
            for dw in range(3):
                t = 3 * dh + dw
                patchr_ref[:, t * Cb:(t + 1) * Cb] = (
                    xpad2_ref[:, dh:dh + Hh, dw:dw + Wh, :].reshape(rowsr, Cb))
        conv = jnp.dot(patchr_ref[...], rw_ref[...],
                       preferred_element_type=jnp.float32)  # (rowsr, Cb) f32
        # BatchNorm2d (training mode): single-pass batch stats over N*H*W,
        # biased variance, eps = 1e-5.
        s = jnp.sum(conv, axis=0, keepdims=True)
        ss = jnp.sum(conv * conv, axis=0, keepdims=True)
        mean = s * inv_cnt
        var = ss * inv_cnt - mean * mean
        bn = (conv - mean) * jax.lax.rsqrt(var + 1e-5) * gamma_ref[...] + beta_ref[...]
        out = jnp.maximum(bn, 0.0) + act_ref[...].reshape(rowsr, Cb)   # residual
        act_ref[...] = out.reshape(N, Hh, Wh, Cb)
        return carry

    jax.lax.fori_loop(0, n_block, res_body, 0)

    # ---- stage 3: second 2x2 max-pool fused with the HWC flatten ----------------
    a = act_ref[...]
    for ho in range(Hq):
        for wo in range(Wq):
            p00 = a[:, 2 * ho:2 * ho + 1, 2 * wo:2 * wo + 1, :]
            p01 = a[:, 2 * ho:2 * ho + 1, 2 * wo + 1:2 * wo + 2, :]
            p10 = a[:, 2 * ho + 1:2 * ho + 2, 2 * wo:2 * wo + 1, :]
            p11 = a[:, 2 * ho + 1:2 * ho + 2, 2 * wo + 1:2 * wo + 2, :]
            m = jnp.maximum(jnp.maximum(p00, p01), jnp.maximum(p10, p11))
            t = ho * Wq + wo
            flat_ref[:, t * Cb:(t + 1) * Cb] = m.reshape(N, Cb)

    # ---- stage 4: head: Linear -> ReLU -> Linear -> softmax(-1) -----------------
    h1 = jnp.dot(flat_ref[...], w1_ref[...],
                 preferred_element_type=jnp.float32) + b1_ref[...]
    h1 = jnp.maximum(h1, 0.0)
    logits = jnp.dot(h1, w2_ref[...], preferred_element_type=jnp.float32) + b2_ref[...]
    mx = jnp.max(logits, axis=-1, keepdims=True)
    e = jnp.exp(logits - mx)
    o_ref[...] = (e / jnp.sum(e, axis=-1, keepdims=True)).astype(o_ref.dtype)


# ------------------------------- pallas_call glue --------------------------------

@functools.partial(jax.jit, static_argnames=("n_block",))
def resnet_forward(x_nchw, conv1_w, conv1_b, res_w, gamma, beta, w1, b1, w2, b2,
                   n_block):
    x = jnp.transpose(x_nchw, (0, 2, 3, 1)).astype(jnp.float32)   # NCHW -> NHWC
    N, H, W, Cin = x.shape
    Cb = conv1_w.shape[-1]
    n_classes = w2.shape[-1]
    Hh, Wh = H // 2, W // 2
    Hq, Wq = H // 4, W // 4

    c1w = conv1_w.reshape(9 * Cin, Cb)     # HWIO -> (kh*kw*Cin, Cout), matches im2col
    rw = res_w.reshape(9 * Cb, Cb)

    kernel = functools.partial(_fused_resnet_kernel, n_block, H, W, Cin, Cb)
    return pl.pallas_call(
        kernel,
        out_shape=jax.ShapeDtypeStruct((N, n_classes), jnp.float32),
        scratch_shapes=[
            pltpu.VMEM((N, H + 2, W + 2, Cin), jnp.float32),       # padded input
            pltpu.VMEM((N * H * W, 9 * Cin), jnp.float32),         # conv1 im2col patches
            pltpu.VMEM((N, Hh, Wh, Cb), jnp.float32),              # resident activation
            pltpu.VMEM((N, Hh + 2, Wh + 2, Cb), jnp.float32),      # padded activation
            pltpu.VMEM((N * Hh * Wh, 9 * Cb), jnp.float32),        # resblock im2col patches
            pltpu.VMEM((N, Hq * Wq * Cb), jnp.float32),            # pooled + flattened
        ],
    )(x, c1w, conv1_b, rw, gamma, beta, w1, b1, w2, b2)


# --------------------------- pure-JAX reference check ----------------------------

def reference_forward(x_nhwc, p, n_block):
    dn = jax.lax.conv_dimension_numbers(x_nhwc.shape, p["conv1_w"].shape,
                                        ("NHWC", "HWIO", "NHWC"))
    y = jax.lax.conv_general_dilated(x_nhwc, p["conv1_w"], (1, 1), "SAME",
                                     dimension_numbers=dn)
    y = jnp.maximum(y + p["conv1_b"].reshape(1, 1, 1, -1), 0.0)
    y = jax.lax.reduce_window(y, -jnp.inf, jax.lax.max, (1, 2, 2, 1), (1, 2, 2, 1), "VALID")
    for _ in range(n_block):
        dn2 = jax.lax.conv_dimension_numbers(y.shape, p["res_w"].shape,
                                             ("NHWC", "HWIO", "NHWC"))
        c = jax.lax.conv_general_dilated(y, p["res_w"], (1, 1), "SAME",
                                         dimension_numbers=dn2)
        mean = jnp.mean(c, axis=(0, 1, 2), keepdims=True)
        var = jnp.mean((c - mean) ** 2, axis=(0, 1, 2), keepdims=True)
        bn = (c - mean) * jax.lax.rsqrt(var + 1e-5) * p["gamma"].reshape(1, 1, 1, -1) \
             + p["beta"].reshape(1, 1, 1, -1)
        y = jnp.maximum(bn, 0.0) + y
    y = jax.lax.reduce_window(y, -jnp.inf, jax.lax.max, (1, 2, 2, 1), (1, 2, 2, 1), "VALID")
    flat = y.reshape(y.shape[0], -1)
    h1 = jnp.maximum(flat @ p["w1"] + p["b1"], 0.0)
    return jax.nn.softmax(h1 @ p["w2"] + p["b2"], axis=-1)


# ------------------------------------ main ----------------------------------------

if __name__ == "__main__":
    # Small shapes consistent with the module: input_shape=(3, 16, 16),
    # output_classes=10, n_block=3, block_chan=32, batch=2.
    N, Cin, H, W = 2, 3, 16, 16
    Cb = 32
    n_block = 3
    n_classes = 10
    D1 = n_classes * 4
    Hq, Wq = H // 4, W // 4

    key = jax.random.PRNGKey(0)
    ks = jax.random.split(key, 8)
    conv1_w = jax.random.normal(ks[0], (3, 3, Cin, Cb), jnp.float32) / jnp.sqrt(9.0 * Cin)
    conv1_b = jax.random.normal(ks[1], (1, Cb), jnp.float32) * 0.1
    # kaiming_normal_(nonlinearity='relu'): std = sqrt(2 / (Cin*kh*kw))
    res_w = jax.random.normal(ks[2], (3, 3, Cb, Cb), jnp.float32) * jnp.sqrt(2.0 / (9.0 * Cb))
    gamma = jnp.full((1, Cb), 0.5, jnp.float32)       # BatchNorm weight = 0.5
    beta = jnp.zeros((1, Cb), jnp.float32)            # BatchNorm bias = 0
    # l1 weight in PyTorch layout (out, Cb*Hq*Wq) with CHW-flatten columns, then
    # permuted to HWC-flatten column order (our NHWC layout) and transposed.
    w1_torch = jax.random.normal(ks[3], (D1, Cb * Hq * Wq), jnp.float32) * 0.05
    w1 = jnp.transpose(w1_torch.reshape(D1, Cb, Hq, Wq), (0, 2, 3, 1)) \
            .reshape(D1, Hq * Wq * Cb).T
    b1 = jax.random.normal(ks[4], (1, D1), jnp.float32) * 0.05
    w2 = (jax.random.normal(ks[5], (n_classes, D1), jnp.float32) * 0.05).T
    b2 = jax.random.normal(ks[6], (1, n_classes), jnp.float32) * 0.05

    x_nchw = jax.random.normal(ks[7], (N, Cin, H, W), jnp.float32)

    out = resnet_forward(x_nchw, conv1_w, conv1_b, res_w, gamma, beta,
                         w1, b1, w2, b2, n_block)
    out = jax.block_until_ready(out)

    # sanity: shape, softmax normalization, and agreement with pure-JAX reference
    x_nhwc = jnp.transpose(x_nchw, (0, 2, 3, 1))
    ref = reference_forward(
        x_nhwc,
        dict(conv1_w=conv1_w, conv1_b=conv1_b, res_w=res_w, gamma=gamma,
             beta=beta, w1=w1, b1=b1, w2=w2, b2=b2),
        n_block)
    assert out.shape == (N, n_classes)
    assert bool(jnp.allclose(jnp.sum(out, axis=-1), 1.0, atol=1e-4))
    assert bool(jnp.allclose(out, ref, atol=1e-4, rtol=1e-4))
    print("KERNEL_OK")
</pallas_src>

<mosaic_0001>
module attributes {stable_mosaic.version = 11 : i64} {
  func.func @_fused_resnet_kernel(%arg0: memref<2x16x16x3xf32, #tpu.memory_space<vmem>>, %arg1: memref<27x32xf32, #tpu.memory_space<vmem>>, %arg2: memref<1x32xf32, #tpu.memory_space<vmem>>, %arg3: memref<288x32xf32, #tpu.memory_space<vmem>>, %arg4: memref<1x32xf32, #tpu.memory_space<vmem>>, %arg5: memref<1x32xf32, #tpu.memory_space<vmem>>, %arg6: memref<512x40xf32, #tpu.memory_space<vmem>>, %arg7: memref<1x40xf32, #tpu.memory_space<vmem>>, %arg8: memref<40x10xf32, #tpu.memory_space<vmem>>, %arg9: memref<1x10xf32, #tpu.memory_space<vmem>>, %arg10: memref<2x10xf32, #tpu.memory_space<vmem>>, %arg11: memref<2x18x18x3xf32, #tpu.memory_space<vmem>>, %arg12: memref<512x27xf32, #tpu.memory_space<vmem>>, %arg13: memref<2x8x8x32xf32, #tpu.memory_space<vmem>>, %arg14: memref<2x10x10x32xf32, #tpu.memory_space<vmem>>, %arg15: memref<128x288xf32, #tpu.memory_space<vmem>>, %arg16: memref<2x512xf32, #tpu.memory_space<vmem>>) attributes {dimension_semantics = [], scalar_prefetch = 0 : i64, scratch_operands = 6 : i64, tpu.core_type = #tpu.core_type<tc>} {
    %cst = arith.constant 0.000000e+00 : f32
    %0 = vector.broadcast %cst : f32 to vector<2x18x18x3xf32>
    %c0 = arith.constant 0 : index
    %c0_0 = arith.constant 0 : index
    %c0_1 = arith.constant 0 : index
    %c0_2 = arith.constant 0 : index
    %1 = vector.load %arg11[%c0, %c0_0, %c0_1, %c0_2] : memref<2x18x18x3xf32, #tpu.memory_space<vmem>>, vector<2x18x18x3xf32>
    tpu.vector_store %arg11[%c0, %c0_0, %c0_1, %c0_2], %0 {strides = array<i32>} : memref<2x18x18x3xf32, #tpu.memory_space<vmem>>, vector<2x18x18x3xf32>,
    %c0_3 = arith.constant 0 : index
    %c0_4 = arith.constant 0 : index
    %c0_5 = arith.constant 0 : index
    %c0_6 = arith.constant 0 : index
    %2 = vector.load %arg0[%c0_3, %c0_4, %c0_5, %c0_6] : memref<2x16x16x3xf32, #tpu.memory_space<vmem>>, vector<2x16x16x3xf32>
    %c0_7 = arith.constant 0 : index
    %c1 = arith.constant 1 : index
    %c1_8 = arith.constant 1 : index
    %c0_9 = arith.constant 0 : index
    %3 = vector.load %arg11[%c0_7, %c1, %c1_8, %c0_9] : memref<2x18x18x3xf32, #tpu.memory_space<vmem>>, vector<2x16x16x3xf32>
    tpu.vector_store %arg11[%c0_7, %c1, %c1_8, %c0_9], %2 {strides = array<i32>} : memref<2x18x18x3xf32, #tpu.memory_space<vmem>>, vector<2x16x16x3xf32>,
    %c0_10 = arith.constant 0 : index
    %c0_11 = arith.constant 0 : index
    %c0_12 = arith.constant 0 : index
    %c0_13 = arith.constant 0 : index
    %4 = vector.load %arg11[%c0_10, %c0_11, %c0_12, %c0_13] : memref<2x18x18x3xf32, #tpu.memory_space<vmem>>, vector<2x16x16x3xf32>
    %5 = vector.shape_cast %4 : vector<2x16x16x3xf32> to vector<512x3xf32>
    %c0_14 = arith.constant 0 : index
    %c0_15 = arith.constant 0 : index
    %6 = vector.load %arg12[%c0_14, %c0_15] : memref<512x27xf32, #tpu.memory_space<vmem>>, vector<512x3xf32>
    tpu.vector_store %arg12[%c0_14, %c0_15], %5 {strides = array<i32>} : memref<512x27xf32, #tpu.memory_space<vmem>>, vector<512x3xf32>,
    %c0_16 = arith.constant 0 : index
    %c0_17 = arith.constant 0 : index
    %c1_18 = arith.constant 1 : index
    %c0_19 = arith.constant 0 : index
    %7 = vector.load %arg11[%c0_16, %c0_17, %c1_18, %c0_19] : memref<2x18x18x3xf32, #tpu.memory_space<vmem>>, vector<2x16x16x3xf32>
    %8 = vector.shape_cast %7 : vector<2x16x16x3xf32> to vector<512x3xf32>
    %c0_20 = arith.constant 0 : index
    %c3 = arith.constant 3 : index
    %9 = vector.load %arg12[%c0_20, %c3] : memref<512x27xf32, #tpu.memory_space<vmem>>, vector<512x3xf32>
    tpu.vector_store %arg12[%c0_20, %c3], %8 {strides = array<i32>} : memref<512x27xf32, #tpu.memory_space<vmem>>, vector<512x3xf32>,
    %c0_21 = arith.constant 0 : index
    %c0_22 = arith.constant 0 : index
    %c2 = arith.constant 2 : index
    %c0_23 = arith.constant 0 : index
    %10 = vector.load %arg11[%c0_21, %c0_22, %c2, %c0_23] : memref<2x18x18x3xf32, #tpu.memory_space<vmem>>, vector<2x16x16x3xf32>
    %11 = vector.shape_cast %10 : vector<2x16x16x3xf32> to vector<512x3xf32>
    %c0_24 = arith.constant 0 : index
    %c6 = arith.constant 6 : index
    %12 = vector.load %arg12[%c0_24, %c6] : memref<512x27xf32, #tpu.memory_space<vmem>>, vector<512x3xf32>
    tpu.vector_store %arg12[%c0_24, %c6], %11 {strides = array<i32>} : memref<512x27xf32, #tpu.memory_space<vmem>>, vector<512x3xf32>,
    %c0_25 = arith.constant 0 : index
    %c1_26 = arith.constant 1 : index
    %c0_27 = arith.constant 0 : index
    %c0_28 = arith.constant 0 : index
    %13 = vector.load %arg11[%c0_25, %c1_26, %c0_27, %c0_28] : memref<2x18x18x3xf32, #tpu.memory_space<vmem>>, vector<2x16x16x3xf32>
    %14 = vector.shape_cast %13 : vector<2x16x16x3xf32> to vector<512x3xf32>
    %c0_29 = arith.constant 0 : index
    %c9 = arith.constant 9 : index
    %15 = vector.load %arg12[%c0_29, %c9] : memref<512x27xf32, #tpu.memory_space<vmem>>, vector<512x3xf32>
    tpu.vector_store %arg12[%c0_29, %c9], %14 {strides = array<i32>} : memref<512x27xf32, #tpu.memory_space<vmem>>, vector<512x3xf32>,
    %c0_30 = arith.constant 0 : index
    %c1_31 = arith.constant 1 : index
    %c1_32 = arith.constant 1 : index
    %c0_33 = arith.constant 0 : index
    %16 = vector.load %arg11[%c0_30, %c1_31, %c1_32, %c0_33] : memref<2x18x18x3xf32, #tpu.memory_space<vmem>>, vector<2x16x16x3xf32>
    %17 = vector.shape_cast %16 : vector<2x16x16x3xf32> to vector<512x3xf32>
    %c0_34 = arith.constant 0 : index
    %c12 = arith.constant 12 : index
    %18 = vector.load %arg12[%c0_34, %c12] : memref<512x27xf32, #tpu.memory_space<vmem>>, vector<512x3xf32>
    tpu.vector_store %arg12[%c0_34, %c12], %17 {strides = array<i32>} : memref<512x27xf32, #tpu.memory_space<vmem>>, vector<512x3xf32>,
    %c0_35 = arith.constant 0 : index
    %c1_36 = arith.constant 1 : index
    %c2_37 = arith.constant 2 : index
    %c0_38 = arith.constant 0 : index
    %19 = vector.load %arg11[%c0_35, %c1_36, %c2_37, %c0_38] : memref<2x18x18x3xf32, #tpu.memory_space<vmem>>, vector<2x16x16x3xf32>
    %20 = vector.shape_cast %19 : vector<2x16x16x3xf32> to vector<512x3xf32>
    %c0_39 = arith.constant 0 : index
    %c15 = arith.constant 15 : index
    %21 = vector.load %arg12[%c0_39, %c15] : memref<512x27xf32, #tpu.memory_space<vmem>>, vector<512x3xf32>
    tpu.vector_store %arg12[%c0_39, %c15], %20 {strides = array<i32>} : memref<512x27xf32, #tpu.memory_space<vmem>>, vector<512x3xf32>,
    %c0_40 = arith.constant 0 : index
    %c2_41 = arith.constant 2 : index
    %c0_42 = arith.constant 0 : index
    %c0_43 = arith.constant 0 : index
    %22 = vector.load %arg11[%c0_40, %c2_41, %c0_42, %c0_43] : memref<2x18x18x3xf32, #tpu.memory_space<vmem>>, vector<2x16x16x3xf32>
    %23 = vector.shape_cast %22 : vector<2x16x16x3xf32> to vector<512x3xf32>
    %c0_44 = arith.constant 0 : index
    %c18 = arith.constant 18 : index
    %24 = vector.load %arg12[%c0_44, %c18] : memref<512x27xf32, #tpu.memory_space<vmem>>, vector<512x3xf32>
    tpu.vector_store %arg12[%c0_44, %c18], %23 {strides = array<i32>} : memref<512x27xf32, #tpu.memory_space<vmem>>, vector<512x3xf32>,
    %c0_45 = arith.constant 0 : index
    %c2_46 = arith.constant 2 : index
    %c1_47 = arith.constant 1 : index
    %c0_48 = arith.constant 0 : index
    %25 = vector.load %arg11[%c0_45, %c2_46, %c1_47, %c0_48] : memref<2x18x18x3xf32, #tpu.memory_space<vmem>>, vector<2x16x16x3xf32>
    %26 = vector.shape_cast %25 : vector<2x16x16x3xf32> to vector<512x3xf32>
    %c0_49 = arith.constant 0 : index
    %c21 = arith.constant 21 : index
    %27 = vector.load %arg12[%c0_49, %c21] : memref<512x27xf32, #tpu.memory_space<vmem>>, vector<512x3xf32>
    tpu.vector_store %arg12[%c0_49, %c21], %26 {strides = array<i32>} : memref<512x27xf32, #tpu.memory_space<vmem>>, vector<512x3xf32>,
    %c0_50 = arith.constant 0 : index
    %c2_51 = arith.constant 2 : index
    %c2_52 = arith.constant 2 : index
    %c0_53 = arith.constant 0 : index
    %28 = vector.load %arg11[%c0_50, %c2_51, %c2_52, %c0_53] : memref<2x18x18x3xf32, #tpu.memory_space<vmem>>, vector<2x16x16x3xf32>
    %29 = vector.shape_cast %28 : vector<2x16x16x3xf32> to vector<512x3xf32>
    %c0_54 = arith.constant 0 : index
    %c24 = arith.constant 24 : index
    %30 = vector.load %arg12[%c0_54, %c24] : memref<512x27xf32, #tpu.memory_space<vmem>>, vector<512x3xf32>
    tpu.vector_store %arg12[%c0_54, %c24], %29 {strides = array<i32>} : memref<512x27xf32, #tpu.memory_space<vmem>>, vector<512x3xf32>,
    %c0_55 = arith.constant 0 : index
    %c0_56 = arith.constant 0 : index
    %31 = vector.load %arg12[%c0_55, %c0_56] : memref<512x27xf32, #tpu.memory_space<vmem>>, vector<512x27xf32>
    %c0_57 = arith.constant 0 : index
    %c0_58 = arith.constant 0 : index
    %32 = vector.load %arg1[%c0_57, %c0_58] : memref<27x32xf32, #tpu.memory_space<vmem>>, vector<27x32xf32>
    %cst_59 = arith.constant dense<0.000000e+00> : vector<512x32xf32>
    %33 = tpu.matmul %31, %32, %cst_59 {dimension_numbers = #tpu.dot_dimension_numbers<[1], [0], [0], [1], [0, 0, 1, 1], [], []>} : vector<512x27xf32>, vector<27x32xf32>, vector<512x32xf32> -> vector<512x32xf32>
    %c0_60 = arith.constant 0 : index
    %c0_61 = arith.constant 0 : index
    %34 = vector.load %arg2[%c0_60, %c0_61] : memref<1x32xf32, #tpu.memory_space<vmem>>, vector<1x32xf32>
    %35 = vector.broadcast %34 : vector<1x32xf32> to vector<512x32xf32>
    %36 = arith.addf %33, %35 : vector<512x32xf32>
    %cst_62 = arith.constant 0.000000e+00 : f32
    %37 = vector.broadcast %cst_62 : f32 to vector<512x32xf32>
    %38 = arith.maximumf %36, %37 : vector<512x32xf32>
    %39 = vector.shape_cast %38 : vector<512x32xf32> to vector<2x16x16x32xf32>
    %40 = vector.extract_strided_slice %39 {offsets = [0, 0, 0, 0], sizes = [2, 1, 16, 32], strides = [1, 1, 1, 1]} : vector<2x16x16x32xf32> to vector<2x1x16x32xf32>
    %41 = vector.extract_strided_slice %39 {offsets = [0, 1, 0, 0], sizes = [2, 1, 16, 32], strides = [1, 1, 1, 1]} : vector<2x16x16x32xf32> to vector<2x1x16x32xf32>
    %42 = arith.maximumf %40, %41 : vector<2x1x16x32xf32>
    %43 = vector.extract_strided_slice %39 {offsets = [0, 2, 0, 0], sizes = [2, 1, 16, 32], strides = [1, 1, 1, 1]} : vector<2x16x16x32xf32> to vector<2x1x16x32xf32>
    %44 = vector.extract_strided_slice %39 {offsets = [0, 3, 0, 0], sizes = [2, 1, 16, 32], strides = [1, 1, 1, 1]} : vector<2x16x16x32xf32> to vector<2x1x16x32xf32>
    %45 = arith.maximumf %43, %44 : vector<2x1x16x32xf32>
    %46 = vector.extract_strided_slice %39 {offsets = [0, 4, 0, 0], sizes = [2, 1, 16, 32], strides = [1, 1, 1, 1]} : vector<2x16x16x32xf32> to vector<2x1x16x32xf32>
    %47 = vector.extract_strided_slice %39 {offsets = [0, 5, 0, 0], sizes = [2, 1, 16, 32], strides = [1, 1, 1, 1]} : vector<2x16x16x32xf32> to vector<2x1x16x32xf32>
    %48 = arith.maximumf %46, %47 : vector<2x1x16x32xf32>
    %49 = vector.extract_strided_slice %39 {offsets = [0, 6, 0, 0], sizes = [2, 1, 16, 32], strides = [1, 1, 1, 1]} : vector<2x16x16x32xf32> to vector<2x1x16x32xf32>
    %50 = vector.extract_strided_slice %39 {offsets = [0, 7, 0, 0], sizes = [2, 1, 16, 32], strides = [1, 1, 1, 1]} : vector<2x16x16x32xf32> to vector<2x1x16x32xf32>
    %51 = arith.maximumf %49, %50 : vector<2x1x16x32xf32>
    %52 = vector.extract_strided_slice %39 {offsets = [0, 8, 0, 0], sizes = [2, 1, 16, 32], strides = [1, 1, 1, 1]} : vector<2x16x16x32xf32> to vector<2x1x16x32xf32>
    %53 = vector.extract_strided_slice %39 {offsets = [0, 9, 0, 0], sizes = [2, 1, 16, 32], strides = [1, 1, 1, 1]} : vector<2x16x16x32xf32> to vector<2x1x16x32xf32>
    %54 = arith.maximumf %52, %53 : vector<2x1x16x32xf32>
    %55 = vector.extract_strided_slice %39 {offsets = [0, 10, 0, 0], sizes = [2, 1, 16, 32], strides = [1, 1, 1, 1]} : vector<2x16x16x32xf32> to vector<2x1x16x32xf32>
    %56 = vector.extract_strided_slice %39 {offsets = [0, 11, 0, 0], sizes = [2, 1, 16, 32], strides = [1, 1, 1, 1]} : vector<2x16x16x32xf32> to vector<2x1x16x32xf32>
    %57 = arith.maximumf %55, %56 : vector<2x1x16x32xf32>
    %58 = vector.extract_strided_slice %39 {offsets = [0, 12, 0, 0], sizes = [2, 1, 16, 32], strides = [1, 1, 1, 1]} : vector<2x16x16x32xf32> to vector<2x1x16x32xf32>
    %59 = vector.extract_strided_slice %39 {offsets = [0, 13, 0, 0], sizes = [2, 1, 16, 32], strides = [1, 1, 1, 1]} : vector<2x16x16x32xf32> to vector<2x1x16x32xf32>
    %60 = arith.maximumf %58, %59 : vector<2x1x16x32xf32>
    %61 = vector.extract_strided_slice %39 {offsets = [0, 14, 0, 0], sizes = [2, 1, 16, 32], strides = [1, 1, 1, 1]} : vector<2x16x16x32xf32> to vector<2x1x16x32xf32>
    %62 = vector.extract_strided_slice %39 {offsets = [0, 15, 0, 0], sizes = [2, 1, 16, 32], strides = [1, 1, 1, 1]} : vector<2x16x16x32xf32> to vector<2x1x16x32xf32>
    %63 = arith.maximumf %61, %62 : vector<2x1x16x32xf32>
    %64 = tpu.concatenate %42, %45, %48, %51, %54, %57, %60, %63 in 1 : vector<2x1x16x32xf32>, vector<2x1x16x32xf32>, vector<2x1x16x32xf32>, vector<2x1x16x32xf32>, vector<2x1x16x32xf32>, vector<2x1x16x32xf32>, vector<2x1x16x32xf32>, vector<2x1x16x32xf32> -> vector<2x8x16x32xf32>
    %65 = vector.extract_strided_slice %64 {offsets = [0, 0, 0, 0], sizes = [2, 8, 1, 32], strides = [1, 1, 1, 1]} : vector<2x8x16x32xf32> to vector<2x8x1x32xf32>
    %66 = vector.extract_strided_slice %64 {offsets = [0, 0, 1, 0], sizes = [2, 8, 1, 32], strides = [1, 1, 1, 1]} : vector<2x8x16x32xf32> to vector<2x8x1x32xf32>
    %67 = arith.maximumf %65, %66 : vector<2x8x1x32xf32>
    %68 = vector.extract_strided_slice %64 {offsets = [0, 0, 2, 0], sizes = [2, 8, 1, 32], strides = [1, 1, 1, 1]} : vector<2x8x16x32xf32> to vector<2x8x1x32xf32>
    %69 = vector.extract_strided_slice %64 {offsets = [0, 0, 3, 0], sizes = [2, 8, 1, 32], strides = [1, 1, 1, 1]} : vector<2x8x16x32xf32> to vector<2x8x1x32xf32>
    %70 = arith.maximumf %68, %69 : vector<2x8x1x32xf32>
    %71 = vector.extract_strided_slice %64 {offsets = [0, 0, 4, 0], sizes = [2, 8, 1, 32], strides = [1, 1, 1, 1]} : vector<2x8x16x32xf32> to vector<2x8x1x32xf32>
    %72 = vector.extract_strided_slice %64 {offsets = [0, 0, 5, 0], sizes = [2, 8, 1, 32], strides = [1, 1, 1, 1]} : vector<2x8x16x32xf32> to vector<2x8x1x32xf32>
    %73 = arith.maximumf %71, %72 : vector<2x8x1x32xf32>
    %74 = vector.extract_strided_slice %64 {offsets = [0, 0, 6, 0], sizes = [2, 8, 1, 32], strides = [1, 1, 1, 1]} : vector<2x8x16x32xf32> to vector<2x8x1x32xf32>
    %75 = vector.extract_strided_slice %64 {offsets = [0, 0, 7, 0], sizes = [2, 8, 1, 32], strides = [1, 1, 1, 1]} : vector<2x8x16x32xf32> to vector<2x8x1x32xf32>
    %76 = arith.maximumf %74, %75 : vector<2x8x1x32xf32>
    %77 = vector.extract_strided_slice %64 {offsets = [0, 0, 8, 0], sizes = [2, 8, 1, 32], strides = [1, 1, 1, 1]} : vector<2x8x16x32xf32> to vector<2x8x1x32xf32>
    %78 = vector.extract_strided_slice %64 {offsets = [0, 0, 9, 0], sizes = [2, 8, 1, 32], strides = [1, 1, 1, 1]} : vector<2x8x16x32xf32> to vector<2x8x1x32xf32>
    %79 = arith.maximumf %77, %78 : vector<2x8x1x32xf32>
    %80 = vector.extract_strided_slice %64 {offsets = [0, 0, 10, 0], sizes = [2, 8, 1, 32], strides = [1, 1, 1, 1]} : vector<2x8x16x32xf32> to vector<2x8x1x32xf32>
    %81 = vector.extract_strided_slice %64 {offsets = [0, 0, 11, 0], sizes = [2, 8, 1, 32], strides = [1, 1, 1, 1]} : vector<2x8x16x32xf32> to vector<2x8x1x32xf32>
    %82 = arith.maximumf %80, %81 : vector<2x8x1x32xf32>
    %83 = vector.extract_strided_slice %64 {offsets = [0, 0, 12, 0], sizes = [2, 8, 1, 32], strides = [1, 1, 1, 1]} : vector<2x8x16x32xf32> to vector<2x8x1x32xf32>
    %84 = vector.extract_strided_slice %64 {offsets = [0, 0, 13, 0], sizes = [2, 8, 1, 32], strides = [1, 1, 1, 1]} : vector<2x8x16x32xf32> to vector<2x8x1x32xf32>
    %85 = arith.maximumf %83, %84 : vector<2x8x1x32xf32>
    %86 = vector.extract_strided_slice %64 {offsets = [0, 0, 14, 0], sizes = [2, 8, 1, 32], strides = [1, 1, 1, 1]} : vector<2x8x16x32xf32> to vector<2x8x1x32xf32>
    %87 = vector.extract_strided_slice %64 {offsets = [0, 0, 15, 0], sizes = [2, 8, 1, 32], strides = [1, 1, 1, 1]} : vector<2x8x16x32xf32> to vector<2x8x1x32xf32>
    %88 = arith.maximumf %86, %87 : vector<2x8x1x32xf32>
    %89 = tpu.concatenate %67, %70, %73, %76, %79, %82, %85, %88 in 2 : vector<2x8x1x32xf32>, vector<2x8x1x32xf32>, vector<2x8x1x32xf32>, vector<2x8x1x32xf32>, vector<2x8x1x32xf32>, vector<2x8x1x32xf32>, vector<2x8x1x32xf32>, vector<2x8x1x32xf32> -> vector<2x8x8x32xf32>
    %c0_63 = arith.constant 0 : index
    %c0_64 = arith.constant 0 : index
    %c0_65 = arith.constant 0 : index
    %c0_66 = arith.constant 0 : index
    %90 = vector.load %arg13[%c0_63, %c0_64, %c0_65, %c0_66] : memref<2x8x8x32xf32, #tpu.memory_space<vmem>>, vector<2x8x8x32xf32>
    tpu.vector_store %arg13[%c0_63, %c0_64, %c0_65, %c0_66], %89 {strides = array<i32>} : memref<2x8x8x32xf32, #tpu.memory_space<vmem>>, vector<2x8x8x32xf32>,
    %cst_67 = arith.constant 0.000000e+00 : f32
    %91 = vector.broadcast %cst_67 : f32 to vector<2x10x10x32xf32>
    %c0_68 = arith.constant 0 : index
    %c0_69 = arith.constant 0 : index
    %c0_70 = arith.constant 0 : index
    %c0_71 = arith.constant 0 : index
    %92 = vector.load %arg14[%c0_68, %c0_69, %c0_70, %c0_71] : memref<2x10x10x32xf32, #tpu.memory_space<vmem>>, vector<2x10x10x32xf32>
    tpu.vector_store %arg14[%c0_68, %c0_69, %c0_70, %c0_71], %91 {strides = array<i32>} : memref<2x10x10x32xf32, #tpu.memory_space<vmem>>, vector<2x10x10x32xf32>,
    %c0_i32 = arith.constant 0 : i32
    %c3_i32 = arith.constant 3 : i32
    %93 = arith.addi %c0_i32, %c3_i32 : i32
    %c1_i32 = arith.constant 1 : i32
    scf.for %arg17 = %c0_i32 to %93 step %c1_i32  : i32 {
      %c0_110 = arith.constant 0 : index
      %c0_111 = arith.constant 0 : index
      %c0_112 = arith.constant 0 : index
      %c0_113 = arith.constant 0 : index
      %262 = vector.load %arg13[%c0_110, %c0_111, %c0_112, %c0_113] : memref<2x8x8x32xf32, #tpu.memory_space<vmem>>, vector<2x8x8x32xf32>
      %c0_114 = arith.constant 0 : index
      %c1_115 = arith.constant 1 : index
      %c1_116 = arith.constant 1 : index
      %c0_117 = arith.constant 0 : index
      %263 = vector.load %arg14[%c0_114, %c1_115, %c1_116, %c0_117] : memref<2x10x10x32xf32, #tpu.memory_space<vmem>>, vector<2x8x8x32xf32>
      tpu.vector_store %arg14[%c0_114, %c1_115, %c1_116, %c0_117], %262 {strides = array<i32>} : memref<2x10x10x32xf32, #tpu.memory_space<vmem>>, vector<2x8x8x32xf32>,
      %c0_118 = arith.constant 0 : index
      %c0_119 = arith.constant 0 : index
      %c0_120 = arith.constant 0 : index
      %c0_121 = arith.constant 0 : index
      %264 = vector.load %arg14[%c0_118, %c0_119, %c0_120, %c0_121] : memref<2x10x10x32xf32, #tpu.memory_space<vmem>>, vector<2x8x8x32xf32>
      %265 = vector.shape_cast %264 : vector<2x8x8x32xf32> to vector<128x32xf32>
      %c0_122 = arith.constant 0 : index
      %c0_123 = arith.constant 0 : index
      %266 = vector.load %arg15[%c0_122, %c0_123] : memref<128x288xf32, #tpu.memory_space<vmem>>, vector<128x32xf32>
      tpu.vector_store %arg15[%c0_122, %c0_123], %265 {strides = array<i32>} : memref<128x288xf32, #tpu.memory_space<vmem>>, vector<128x32xf32>,
      %c0_124 = arith.constant 0 : index
      %c0_125 = arith.constant 0 : index
      %c1_126 = arith.constant 1 : index
      %c0_127 = arith.constant 0 : index
      %267 = vector.load %arg14[%c0_124, %c0_125, %c1_126, %c0_127] : memref<2x10x10x32xf32, #tpu.memory_space<vmem>>, vector<2x8x8x32xf32>
      %268 = vector.shape_cast %267 : vector<2x8x8x32xf32> to vector<128x32xf32>
      %c0_128 = arith.constant 0 : index
      %c32_129 = arith.constant 32 : index
      %269 = vector.load %arg15[%c0_128, %c32_129] : memref<128x288xf32, #tpu.memory_space<vmem>>, vector<128x32xf32>
      tpu.vector_store %arg15[%c0_128, %c32_129], %268 {strides = array<i32>} : memref<128x288xf32, #tpu.memory_space<vmem>>, vector<128x32xf32>,
      %c0_130 = arith.constant 0 : index
      %c0_131 = arith.constant 0 : index
      %c2_132 = arith.constant 2 : index
      %c0_133 = arith.constant 0 : index
      %270 = vector.load %arg14[%c0_130, %c0_131, %c2_132, %c0_133] : memref<2x10x10x32xf32, #tpu.memory_space<vmem>>, vector<2x8x8x32xf32>
      %271 = vector.shape_cast %270 : vector<2x8x8x32xf32> to vector<128x32xf32>
      %c0_134 = arith.constant 0 : index
      %c64_135 = arith.constant 64 : index
      %272 = vector.load %arg15[%c0_134, %c64_135] : memref<128x288xf32, #tpu.memory_space<vmem>>, vector<128x32xf32>
      tpu.vector_store %arg15[%c0_134, %c64_135], %271 {strides = array<i32>} : memref<128x288xf32, #tpu.memory_space<vmem>>, vector<128x32xf32>,
      %c0_136 = arith.constant 0 : index
      %c1_137 = arith.constant 1 : index
      %c0_138 = arith.constant 0 : index
      %c0_139 = arith.constant 0 : index
      %273 = vector.load %arg14[%c0_136, %c1_137, %c0_138, %c0_139] : memref<2x10x10x32xf32, #tpu.memory_space<vmem>>, vector<2x8x8x32xf32>
      %274 = vector.shape_cast %273 : vector<2x8x8x32xf32> to vector<128x32xf32>
      %c0_140 = arith.constant 0 : index
      %c96_141 = arith.constant 96 : index
      %275 = vector.load %arg15[%c0_140, %c96_141] : memref<128x288xf32, #tpu.memory_space<vmem>>, vector<128x32xf32>
      tpu.vector_store %arg15[%c0_140, %c96_141], %274 {strides = array<i32>} : memref<128x288xf32, #tpu.memory_space<vmem>>, vector<128x32xf32>,
      %c0_142 = arith.constant 0 : index
      %c1_143 = arith.constant 1 : index
      %c1_144 = arith.constant 1 : index
      %c0_145 = arith.constant 0 : index
      %276 = vector.load %arg14[%c0_142, %c1_143, %c1_144, %c0_145] : memref<2x10x10x32xf32, #tpu.memory_space<vmem>>, vector<2x8x8x32xf32>
      %277 = vector.shape_cast %276 : vector<2x8x8x32xf32> to vector<128x32xf32>
      %c0_146 = arith.constant 0 : index
      %c128_147 = arith.constant 128 : index
      %278 = vector.load %arg15[%c0_146, %c128_147] : memref<128x288xf32, #tpu.memory_space<vmem>>, vector<128x32xf32>
      tpu.vector_store %arg15[%c0_146, %c128_147], %277 {strides = array<i32>} : memref<128x288xf32, #tpu.memory_space<vmem>>, vector<128x32xf32>,
      %c0_148 = arith.constant 0 : index
      %c1_149 = arith.constant 1 : index
      %c2_150 = arith.constant 2 : index
      %c0_151 = arith.constant 0 : index
      %279 = vector.load %arg14[%c0_148, %c1_149, %c2_150, %c0_151] : memref<2x10x10x32xf32, #tpu.memory_space<vmem>>, vector<2x8x8x32xf32>
      %280 = vector.shape_cast %279 : vector<2x8x8x32xf32> to vector<128x32xf32>
      %c0_152 = arith.constant 0 : index
      %c160_153 = arith.constant 160 : index
      %281 = vector.load %arg15[%c0_152, %c160_153] : memref<128x288xf32, #tpu.memory_space<vmem>>, vector<128x32xf32>
      tpu.vector_store %arg15[%c0_152, %c160_153], %280 {strides = array<i32>} : memref<128x288xf32, #tpu.memory_space<vmem>>, vector<128x32xf32>,
      %c0_154 = arith.constant 0 : index
      %c2_155 = arith.constant 2 : index
      %c0_156 = arith.constant 0 : index
      %c0_157 = arith.constant 0 : index
      %282 = vector.load %arg14[%c0_154, %c2_155, %c0_156, %c0_157] : memref<2x10x10x32xf32, #tpu.memory_space<vmem>>, vector<2x8x8x32xf32>
      %283 = vector.shape_cast %282 : vector<2x8x8x32xf32> to vector<128x32xf32>
      %c0_158 = arith.constant 0 : index
      %c192_159 = arith.constant 192 : index
      %284 = vector.load %arg15[%c0_158, %c192_159] : memref<128x288xf32, #tpu.memory_space<vmem>>, vector<128x32xf32>
      tpu.vector_store %arg15[%c0_158, %c192_159], %283 {strides = array<i32>} : memref<128x288xf32, #tpu.memory_space<vmem>>, vector<128x32xf32>,
      %c0_160 = arith.constant 0 : index
      %c2_161 = arith.constant 2 : index
      %c1_162 = arith.constant 1 : index
      %c0_163 = arith.constant 0 : index
      %285 = vector.load %arg14[%c0_160, %c2_161, %c1_162, %c0_163] : memref<2x10x10x32xf32, #tpu.memory_space<vmem>>, vector<2x8x8x32xf32>
      %286 = vector.shape_cast %285 : vector<2x8x8x32xf32> to vector<128x32xf32>
      %c0_164 = arith.constant 0 : index
      %c224_165 = arith.constant 224 : index
      %287 = vector.load %arg15[%c0_164, %c224_165] : memref<128x288xf32, #tpu.memory_space<vmem>>, vector<128x32xf32>
      tpu.vector_store %arg15[%c0_164, %c224_165], %286 {strides = array<i32>} : memref<128x288xf32, #tpu.memory_space<vmem>>, vector<128x32xf32>,
      %c0_166 = arith.constant 0 : index
      %c2_167 = arith.constant 2 : index
      %c2_168 = arith.constant 2 : index
      %c0_169 = arith.constant 0 : index
      %288 = vector.load %arg14[%c0_166, %c2_167, %c2_168, %c0_169] : memref<2x10x10x32xf32, #tpu.memory_space<vmem>>, vector<2x8x8x32xf32>
      %289 = vector.shape_cast %288 : vector<2x8x8x32xf32> to vector<128x32xf32>
      %c0_170 = arith.constant 0 : index
      %c256_171 = arith.constant 256 : index
      %290 = vector.load %arg15[%c0_170, %c256_171] : memref<128x288xf32, #tpu.memory_space<vmem>>, vector<128x32xf32>
      tpu.vector_store %arg15[%c0_170, %c256_171], %289 {strides = array<i32>} : memref<128x288xf32, #tpu.memory_space<vmem>>, vector<128x32xf32>,
      %c0_172 = arith.constant 0 : index
      %c0_173 = arith.constant 0 : index
      %291 = vector.load %arg15[%c0_172, %c0_173] : memref<128x288xf32, #tpu.memory_space<vmem>>, vector<128x288xf32>
      %c0_174 = arith.constant 0 : index
      %c0_175 = arith.constant 0 : index
      %292 = vector.load %arg3[%c0_174, %c0_175] : memref<288x32xf32, #tpu.memory_space<vmem>>, vector<288x32xf32>
      %cst_176 = arith.constant dense<0.000000e+00> : vector<128x32xf32>
      %293 = tpu.matmul %291, %292, %cst_176 {dimension_numbers = #tpu.dot_dimension_numbers<[1], [0], [0], [1], [0, 0, 1, 1], [], []>} : vector<128x288xf32>, vector<288x32xf32>, vector<128x32xf32> -> vector<128x32xf32>
      %cst_177 = arith.constant dense<0.000000e+00> : vector<32xf32>
      %294 = vector.multi_reduction <add>, %293, %cst_177 [0] : vector<128x32xf32> to vector<32xf32>
      %295 = vector.shape_cast %294 : vector<32xf32> to vector<1x32xf32>
      %296 = arith.mulf %293, %293 : vector<128x32xf32>
      %cst_178 = arith.constant dense<0.000000e+00> : vector<32xf32>
      %297 = vector.multi_reduction <add>, %296, %cst_178 [0] : vector<128x32xf32> to vector<32xf32>
      %298 = vector.shape_cast %297 : vector<32xf32> to vector<1x32xf32>
      %cst_179 = arith.constant 7.812500e-03 : f32
      %299 = vector.broadcast %cst_179 : f32 to vector<1x32xf32>
      %300 = arith.mulf %295, %299 : vector<1x32xf32>
      %cst_180 = arith.constant 7.812500e-03 : f32
      %301 = vector.broadcast %cst_180 : f32 to vector<1x32xf32>
      %302 = arith.mulf %298, %301 : vector<1x32xf32>
      %303 = arith.mulf %300, %300 : vector<1x32xf32>
      %304 = arith.subf %302, %303 : vector<1x32xf32>
      %305 = vector.broadcast %300 : vector<1x32xf32> to vector<128x32xf32>
      %306 = arith.subf %293, %305 : vector<128x32xf32>
      %cst_181 = arith.constant 9.99999974E-6 : f32
      %307 = vector.broadcast %cst_181 : f32 to vector<1x32xf32>
      %308 = arith.addf %304, %307 : vector<1x32xf32>
      %309 = math.rsqrt %308 : vector<1x32xf32>
      %310 = vector.broadcast %309 : vector<1x32xf32> to vector<128x32xf32>
      %311 = arith.mulf %306, %310 : vector<128x32xf32>
      %c0_182 = arith.constant 0 : index
      %c0_183 = arith.constant 0 : index
      %312 = vector.load %arg4[%c0_182, %c0_183] : memref<1x32xf32, #tpu.memory_space<vmem>>, vector<1x32xf32>
      %313 = vector.broadcast %312 : vector<1x32xf32> to vector<128x32xf32>
      %314 = arith.mulf %311, %313 : vector<128x32xf32>
      %c0_184 = arith.constant 0 : index
      %c0_185 = arith.constant 0 : index
      %315 = vector.load %arg5[%c0_184, %c0_185] : memref<1x32xf32, #tpu.memory_space<vmem>>, vector<1x32xf32>
      %316 = vector.broadcast %315 : vector<1x32xf32> to vector<128x32xf32>
      %317 = arith.addf %314, %316 : vector<128x32xf32>
      %cst_186 = arith.constant 0.000000e+00 : f32
      %318 = vector.broadcast %cst_186 : f32 to vector<128x32xf32>
      %319 = arith.maximumf %317, %318 : vector<128x32xf32>
      %c0_187 = arith.constant 0 : index
      %c0_188 = arith.constant 0 : index
      %c0_189 = arith.constant 0 : index
      %c0_190 = arith.constant 0 : index
      %320 = vector.load %arg13[%c0_187, %c0_188, %c0_189, %c0_190] : memref<2x8x8x32xf32, #tpu.memory_space<vmem>>, vector<2x8x8x32xf32>
      %321 = vector.shape_cast %320 : vector<2x8x8x32xf32> to vector<128x32xf32>
      %322 = arith.addf %319, %321 : vector<128x32xf32>
      %323 = vector.shape_cast %322 : vector<128x32xf32> to vector<2x8x8x32xf32>
      %c0_191 = arith.constant 0 : index
      %c0_192 = arith.constant 0 : index
      %c0_193 = arith.constant 0 : index
      %c0_194 = arith.constant 0 : index
      %324 = vector.load %arg13[%c0_191, %c0_192, %c0_193, %c0_194] : memref<2x8x8x32xf32, #tpu.memory_space<vmem>>, vector<2x8x8x32xf32>
      tpu.vector_store %arg13[%c0_191, %c0_192, %c0_193, %c0_194], %323 {strides = array<i32>} : memref<2x8x8x32xf32, #tpu.memory_space<vmem>>, vector<2x8x8x32xf32>,
    }
    %c0_72 = arith.constant 0 : index
    %c0_73 = arith.constant 0 : index
    %c0_74 = arith.constant 0 : index
    %c0_75 = arith.constant 0 : index
    %94 = vector.load %arg13[%c0_72, %c0_73, %c0_74, %c0_75] : memref<2x8x8x32xf32, #tpu.memory_space<vmem>>, vector<2x8x8x32xf32>
    %95 = vector.extract_strided_slice %94 {offsets = [0, 0, 0, 0], sizes = [2, 1, 1, 32], strides = [1, 1, 1, 1]} : vector<2x8x8x32xf32> to vector<2x1x1x32xf32>
    %96 = vector.extract_strided_slice %94 {offsets = [0, 0, 1, 0], sizes = [2, 1, 1, 32], strides = [1, 1, 1, 1]} : vector<2x8x8x32xf32> to vector<2x1x1x32xf32>
    %97 = vector.extract_strided_slice %94 {offsets = [0, 1, 0, 0], sizes = [2, 1, 1, 32], strides = [1, 1, 1, 1]} : vector<2x8x8x32xf32> to vector<2x1x1x32xf32>
    %98 = vector.extract_strided_slice %94 {offsets = [0, 1, 1, 0], sizes = [2, 1, 1, 32], strides = [1, 1, 1, 1]} : vector<2x8x8x32xf32> to vector<2x1x1x32xf32>
    %99 = arith.maximumf %95, %96 : vector<2x1x1x32xf32>
    %100 = arith.maximumf %97, %98 : vector<2x1x1x32xf32>
    %101 = arith.maximumf %99, %100 : vector<2x1x1x32xf32>
    %102 = vector.shape_cast %101 : vector<2x1x1x32xf32> to vector<2x32xf32>
    %c0_76 = arith.constant 0 : index
    %c0_77 = arith.constant 0 : index
    %103 = vector.load %arg16[%c0_76, %c0_77] : memref<2x512xf32, #tpu.memory_space<vmem>>, vector<2x32xf32>
    tpu.vector_store %arg16[%c0_76, %c0_77], %102 {strides = array<i32>} : memref<2x512xf32, #tpu.memory_space<vmem>>, vector<2x32xf32>,
    %104 = vector.extract_strided_slice %94 {offsets = [0, 0, 2, 0], sizes = [2, 1, 1, 32], strides = [1, 1, 1, 1]} : vector<2x8x8x32xf32> to vector<2x1x1x32xf32>
    %105 = vector.extract_strided_slice %94 {offsets = [0, 0, 3, 0], sizes = [2, 1, 1, 32], strides = [1, 1, 1, 1]} : vector<2x8x8x32xf32> to vector<2x1x1x32xf32>
    %106 = vector.extract_strided_slice %94 {offsets = [0, 1, 2, 0], sizes = [2, 1, 1, 32], strides = [1, 1, 1, 1]} : vector<2x8x8x32xf32> to vector<2x1x1x32xf32>
    %107 = vector.extract_strided_slice %94 {offsets = [0, 1, 3, 0], sizes = [2, 1, 1, 32], strides = [1, 1, 1, 1]} : vector<2x8x8x32xf32> to vector<2x1x1x32xf32>
    %108 = arith.maximumf %104, %105 : vector<2x1x1x32xf32>
    %109 = arith.maximumf %106, %107 : vector<2x1x1x32xf32>
    %110 = arith.maximumf %108, %109 : vector<2x1x1x32xf32>
    %111 = vector.shape_cast %110 : vector<2x1x1x32xf32> to vector<2x32xf32>
    %c0_78 = arith.constant 0 : index
    %c32 = arith.constant 32 : index
    %112 = vector.load %arg16[%c0_78, %c32] : memref<2x512xf32, #tpu.memory_space<vmem>>, vector<2x32xf32>
    tpu.vector_store %arg16[%c0_78, %c32], %111 {strides = array<i32>} : memref<2x512xf32, #tpu.memory_space<vmem>>, vector<2x32xf32>,
    %113 = vector.extract_strided_slice %94 {offsets = [0, 0, 4, 0], sizes = [2, 1, 1, 32], strides = [1, 1, 1, 1]} : vector<2x8x8x32xf32> to vector<2x1x1x32xf32>
    %114 = vector.extract_strided_slice %94 {offsets = [0, 0, 5, 0], sizes = [2, 1, 1, 32], strides = [1, 1, 1, 1]} : vector<2x8x8x32xf32> to vector<2x1x1x32xf32>
    %115 = vector.extract_strided_slice %94 {offsets = [0, 1, 4, 0], sizes = [2, 1, 1, 32], strides = [1, 1, 1, 1]} : vector<2x8x8x32xf32> to vector<2x1x1x32xf32>
    %116 = vector.extract_strided_slice %94 {offsets = [0, 1, 5, 0], sizes = [2, 1, 1, 32], strides = [1, 1, 1, 1]} : vector<2x8x8x32xf32> to vector<2x1x1x32xf32>
    %117 = arith.maximumf %113, %114 : vector<2x1x1x32xf32>
    %118 = arith.maximumf %115, %116 : vector<2x1x1x32xf32>
    %119 = arith.maximumf %117, %118 : vector<2x1x1x32xf32>
    %120 = vector.shape_cast %119 : vector<2x1x1x32xf32> to vector<2x32xf32>
    %c0_79 = arith.constant 0 : index
    %c64 = arith.constant 64 : index
    %121 = vector.load %arg16[%c0_79, %c64] : memref<2x512xf32, #tpu.memory_space<vmem>>, vector<2x32xf32>
    tpu.vector_store %arg16[%c0_79, %c64], %120 {strides = array<i32>} : memref<2x512xf32, #tpu.memory_space<vmem>>, vector<2x32xf32>,
    %122 = vector.extract_strided_slice %94 {offsets = [0, 0, 6, 0], sizes = [2, 1, 1, 32], strides = [1, 1, 1, 1]} : vector<2x8x8x32xf32> to vector<2x1x1x32xf32>
    %123 = vector.extract_strided_slice %94 {offsets = [0, 0, 7, 0], sizes = [2, 1, 1, 32], strides = [1, 1, 1, 1]} : vector<2x8x8x32xf32> to vector<2x1x1x32xf32>
    %124 = vector.extract_strided_slice %94 {offsets = [0, 1, 6, 0], sizes = [2, 1, 1, 32], strides = [1, 1, 1, 1]} : vector<2x8x8x32xf32> to vector<2x1x1x32xf32>
    %125 = vector.extract_strided_slice %94 {offsets = [0, 1, 7, 0], sizes = [2, 1, 1, 32], strides = [1, 1, 1, 1]} : vector<2x8x8x32xf32> to vector<2x1x1x32xf32>
    %126 = arith.maximumf %122, %123 : vector<2x1x1x32xf32>
    %127 = arith.maximumf %124, %125 : vector<2x1x1x32xf32>
    %128 = arith.maximumf %126, %127 : vector<2x1x1x32xf32>
    %129 = vector.shape_cast %128 : vector<2x1x1x32xf32> to vector<2x32xf32>
    %c0_80 = arith.constant 0 : index
    %c96 = arith.constant 96 : index
    %130 = vector.load %arg16[%c0_80, %c96] : memref<2x512xf32, #tpu.memory_space<vmem>>, vector<2x32xf32>
    tpu.vector_store %arg16[%c0_80, %c96], %129 {strides = array<i32>} : memref<2x512xf32, #tpu.memory_space<vmem>>, vector<2x32xf32>,
    %131 = vector.extract_strided_slice %94 {offsets = [0, 2, 0, 0], sizes = [2, 1, 1, 32], strides = [1, 1, 1, 1]} : vector<2x8x8x32xf32> to vector<2x1x1x32xf32>
    %132 = vector.extract_strided_slice %94 {offsets = [0, 2, 1, 0], sizes = [2, 1, 1, 32], strides = [1, 1, 1, 1]} : vector<2x8x8x32xf32> to vector<2x1x1x32xf32>
    %133 = vector.extract_strided_slice %94 {offsets = [0, 3, 0, 0], sizes = [2, 1, 1, 32], strides = [1, 1, 1, 1]} : vector<2x8x8x32xf32> to vector<2x1x1x32xf32>
    %134 = vector.extract_strided_slice %94 {offsets = [0, 3, 1, 0], sizes = [2, 1, 1, 32], strides = [1, 1, 1, 1]} : vector<2x8x8x32xf32> to vector<2x1x1x32xf32>
    %135 = arith.maximumf %131, %132 : vector<2x1x1x32xf32>
    %136 = arith.maximumf %133, %134 : vector<2x1x1x32xf32>
    %137 = arith.maximumf %135, %136 : vector<2x1x1x32xf32>
    %138 = vector.shape_cast %137 : vector<2x1x1x32xf32> to vector<2x32xf32>
    %c0_81 = arith.constant 0 : index
    %c128 = arith.constant 128 : index
    %139 = vector.load %arg16[%c0_81, %c128] : memref<2x512xf32, #tpu.memory_space<vmem>>, vector<2x32xf32>
    tpu.vector_store %arg16[%c0_81, %c128], %138 {strides = array<i32>} : memref<2x512xf32, #tpu.memory_space<vmem>>, vector<2x32xf32>,
    %140 = vector.extract_strided_slice %94 {offsets = [0, 2, 2, 0], sizes = [2, 1, 1, 32], strides = [1, 1, 1, 1]} : vector<2x8x8x32xf32> to vector<2x1x1x32xf32>
    %141 = vector.extract_strided_slice %94 {offsets = [0, 2, 3, 0], sizes = [2, 1, 1, 32], strides = [1, 1, 1, 1]} : vector<2x8x8x32xf32> to vector<2x1x1x32xf32>
    %142 = vector.extract_strided_slice %94 {offsets = [0, 3, 2, 0], sizes = [2, 1, 1, 32], strides = [1, 1, 1, 1]} : vector<2x8x8x32xf32> to vector<2x1x1x32xf32>
    %143 = vector.extract_strided_slice %94 {offsets = [0, 3, 3, 0], sizes = [2, 1, 1, 32], strides = [1, 1, 1, 1]} : vector<2x8x8x32xf32> to vector<2x1x1x32xf32>
    %144 = arith.maximumf %140, %141 : vector<2x1x1x32xf32>
    %145 = arith.maximumf %142, %143 : vector<2x1x1x32xf32>
    %146 = arith.maximumf %144, %145 : vector<2x1x1x32xf32>
    %147 = vector.shape_cast %146 : vector<2x1x1x32xf32> to vector<2x32xf32>
    %c0_82 = arith.constant 0 : index
    %c160 = arith.constant 160 : index
    %148 = vector.load %arg16[%c0_82, %c160] : memref<2x512xf32, #tpu.memory_space<vmem>>, vector<2x32xf32>
    tpu.vector_store %arg16[%c0_82, %c160], %147 {strides = array<i32>} : memref<2x512xf32, #tpu.memory_space<vmem>>, vector<2x32xf32>,
    %149 = vector.extract_strided_slice %94 {offsets = [0, 2, 4, 0], sizes = [2, 1, 1, 32], strides = [1, 1, 1, 1]} : vector<2x8x8x32xf32> to vector<2x1x1x32xf32>
    %150 = vector.extract_strided_slice %94 {offsets = [0, 2, 5, 0], sizes = [2, 1, 1, 32], strides = [1, 1, 1, 1]} : vector<2x8x8x32xf32> to vector<2x1x1x32xf32>
    %151 = vector.extract_strided_slice %94 {offsets = [0, 3, 4, 0], sizes = [2, 1, 1, 32], strides = [1, 1, 1, 1]} : vector<2x8x8x32xf32> to vector<2x1x1x32xf32>
    %152 = vector.extract_strided_slice %94 {offsets = [0, 3, 5, 0], sizes = [2, 1, 1, 32], strides = [1, 1, 1, 1]} : vector<2x8x8x32xf32> to vector<2x1x1x32xf32>
    %153 = arith.maximumf %149, %150 : vector<2x1x1x32xf32>
    %154 = arith.maximumf %151, %152 : vector<2x1x1x32xf32>
    %155 = arith.maximumf %153, %154 : vector<2x1x1x32xf32>
    %156 = vector.shape_cast %155 : vector<2x1x1x32xf32> to vector<2x32xf32>
    %c0_83 = arith.constant 0 : index
    %c192 = arith.constant 192 : index
    %157 = vector.load %arg16[%c0_83, %c192] : memref<2x512xf32, #tpu.memory_space<vmem>>, vector<2x32xf32>
    tpu.vector_store %arg16[%c0_83, %c192], %156 {strides = array<i32>} : memref<2x512xf32, #tpu.memory_space<vmem>>, vector<2x32xf32>,
    %158 = vector.extract_strided_slice %94 {offsets = [0, 2, 6, 0], sizes = [2, 1, 1, 32], strides = [1, 1, 1, 1]} : vector<2x8x8x32xf32> to vector<2x1x1x32xf32>
    %159 = vector.extract_strided_slice %94 {offsets = [0, 2, 7, 0], sizes = [2, 1, 1, 32], strides = [1, 1, 1, 1]} : vector<2x8x8x32xf32> to vector<2x1x1x32xf32>
    %160 = vector.extract_strided_slice %94 {offsets = [0, 3, 6, 0], sizes = [2, 1, 1, 32], strides = [1, 1, 1, 1]} : vector<2x8x8x32xf32> to vector<2x1x1x32xf32>
    %161 = vector.extract_strided_slice %94 {offsets = [0, 3, 7, 0], sizes = [2, 1, 1, 32], strides = [1, 1, 1, 1]} : vector<2x8x8x32xf32> to vector<2x1x1x32xf32>
    %162 = arith.maximumf %158, %159 : vector<2x1x1x32xf32>
    %163 = arith.maximumf %160, %161 : vector<2x1x1x32xf32>
    %164 = arith.maximumf %162, %163 : vector<2x1x1x32xf32>
    %165 = vector.shape_cast %164 : vector<2x1x1x32xf32> to vector<2x32xf32>
    %c0_84 = arith.constant 0 : index
    %c224 = arith.constant 224 : index
    %166 = vector.load %arg16[%c0_84, %c224] : memref<2x512xf32, #tpu.memory_space<vmem>>, vector<2x32xf32>
    tpu.vector_store %arg16[%c0_84, %c224], %165 {strides = array<i32>} : memref<2x512xf32, #tpu.memory_space<vmem>>, vector<2x32xf32>,
    %167 = vector.extract_strided_slice %94 {offsets = [0, 4, 0, 0], sizes = [2, 1, 1, 32], strides = [1, 1, 1, 1]} : vector<2x8x8x32xf32> to vector<2x1x1x32xf32>
    %168 = vector.extract_strided_slice %94 {offsets = [0, 4, 1, 0], sizes = [2, 1, 1, 32], strides = [1, 1, 1, 1]} : vector<2x8x8x32xf32> to vector<2x1x1x32xf32>
    %169 = vector.extract_strided_slice %94 {offsets = [0, 5, 0, 0], sizes = [2, 1, 1, 32], strides = [1, 1, 1, 1]} : vector<2x8x8x32xf32> to vector<2x1x1x32xf32>
    %170 = vector.extract_strided_slice %94 {offsets = [0, 5, 1, 0], sizes = [2, 1, 1, 32], strides = [1, 1, 1, 1]} : vector<2x8x8x32xf32> to vector<2x1x1x32xf32>
    %171 = arith.maximumf %167, %168 : vector<2x1x1x32xf32>
    %172 = arith.maximumf %169, %170 : vector<2x1x1x32xf32>
    %173 = arith.maximumf %171, %172 : vector<2x1x1x32xf32>
    %174 = vector.shape_cast %173 : vector<2x1x1x32xf32> to vector<2x32xf32>
    %c0_85 = arith.constant 0 : index
    %c256 = arith.constant 256 : index
    %175 = vector.load %arg16[%c0_85, %c256] : memref<2x512xf32, #tpu.memory_space<vmem>>, vector<2x32xf32>
    tpu.vector_store %arg16[%c0_85, %c256], %174 {strides = array<i32>} : memref<2x512xf32, #tpu.memory_space<vmem>>, vector<2x32xf32>,
    %176 = vector.extract_strided_slice %94 {offsets = [0, 4, 2, 0], sizes = [2, 1, 1, 32], strides = [1, 1, 1, 1]} : vector<2x8x8x32xf32> to vector<2x1x1x32xf32>
    %177 = vector.extract_strided_slice %94 {offsets = [0, 4, 3, 0], sizes = [2, 1, 1, 32], strides = [1, 1, 1, 1]} : vector<2x8x8x32xf32> to vector<2x1x1x32xf32>
    %178 = vector.extract_strided_slice %94 {offsets = [0, 5, 2, 0], sizes = [2, 1, 1, 32], strides = [1, 1, 1, 1]} : vector<2x8x8x32xf32> to vector<2x1x1x32xf32>
    %179 = vector.extract_strided_slice %94 {offsets = [0, 5, 3, 0], sizes = [2, 1, 1, 32], strides = [1, 1, 1, 1]} : vector<2x8x8x32xf32> to vector<2x1x1x32xf32>
    %180 = arith.maximumf %176, %177 : vector<2x1x1x32xf32>
    %181 = arith.maximumf %178, %179 : vector<2x1x1x32xf32>
    %182 = arith.maximumf %180, %181 : vector<2x1x1x32xf32>
    %183 = vector.shape_cast %182 : vector<2x1x1x32xf32> to vector<2x32xf32>
    %c0_86 = arith.constant 0 : index
    %c288 = arith.constant 288 : index
    %184 = vector.load %arg16[%c0_86, %c288] : memref<2x512xf32, #tpu.memory_space<vmem>>, vector<2x32xf32>
    tpu.vector_store %arg16[%c0_86, %c288], %183 {strides = array<i32>} : memref<2x512xf32, #tpu.memory_space<vmem>>, vector<2x32xf32>,
    %185 = vector.extract_strided_slice %94 {offsets = [0, 4, 4, 0], sizes = [2, 1, 1, 32], strides = [1, 1, 1, 1]} : vector<2x8x8x32xf32> to vector<2x1x1x32xf32>
    %186 = vector.extract_strided_slice %94 {offsets = [0, 4, 5, 0], sizes = [2, 1, 1, 32], strides = [1, 1, 1, 1]} : vector<2x8x8x32xf32> to vector<2x1x1x32xf32>
    %187 = vector.extract_strided_slice %94 {offsets = [0, 5, 4, 0], sizes = [2, 1, 1, 32], strides = [1, 1, 1, 1]} : vector<2x8x8x32xf32> to vector<2x1x1x32xf32>
    %188 = vector.extract_strided_slice %94 {offsets = [0, 5, 5, 0], sizes = [2, 1, 1, 32], strides = [1, 1, 1, 1]} : vector<2x8x8x32xf32> to vector<2x1x1x32xf32>
    %189 = arith.maximumf %185, %186 : vector<2x1x1x32xf32>
    %190 = arith.maximumf %187, %188 : vector<2x1x1x32xf32>
    %191 = arith.maximumf %189, %190 : vector<2x1x1x32xf32>
    %192 = vector.shape_cast %191 : vector<2x1x1x32xf32> to vector<2x32xf32>
    %c0_87 = arith.constant 0 : index
    %c320 = arith.constant 320 : index
    %193 = vector.load %arg16[%c0_87, %c320] : memref<2x512xf32, #tpu.memory_space<vmem>>, vector<2x32xf32>
    tpu.vector_store %arg16[%c0_87, %c320], %192 {strides = array<i32>} : memref<2x512xf32, #tpu.memory_space<vmem>>, vector<2x32xf32>,
    %194 = vector.extract_strided_slice %94 {offsets = [0, 4, 6, 0], sizes = [2, 1, 1, 32], strides = [1, 1, 1, 1]} : vector<2x8x8x32xf32> to vector<2x1x1x32xf32>
    %195 = vector.extract_strided_slice %94 {offsets = [0, 4, 7, 0], sizes = [2, 1, 1, 32], strides = [1, 1, 1, 1]} : vector<2x8x8x32xf32> to vector<2x1x1x32xf32>
    %196 = vector.extract_strided_slice %94 {offsets = [0, 5, 6, 0], sizes = [2, 1, 1, 32], strides = [1, 1, 1, 1]} : vector<2x8x8x32xf32> to vector<2x1x1x32xf32>
    %197 = vector.extract_strided_slice %94 {offsets = [0, 5, 7, 0], sizes = [2, 1, 1, 32], strides = [1, 1, 1, 1]} : vector<2x8x8x32xf32> to vector<2x1x1x32xf32>
    %198 = arith.maximumf %194, %195 : vector<2x1x1x32xf32>
    %199 = arith.maximumf %196, %197 : vector<2x1x1x32xf32>
    %200 = arith.maximumf %198, %199 : vector<2x1x1x32xf32>
    %201 = vector.shape_cast %200 : vector<2x1x1x32xf32> to vector<2x32xf32>
    %c0_88 = arith.constant 0 : index
    %c352 = arith.constant 352 : index
    %202 = vector.load %arg16[%c0_88, %c352] : memref<2x512xf32, #tpu.memory_space<vmem>>, vector<2x32xf32>
    tpu.vector_store %arg16[%c0_88, %c352], %201 {strides = array<i32>} : memref<2x512xf32, #tpu.memory_space<vmem>>, vector<2x32xf32>,
    %203 = vector.extract_strided_slice %94 {offsets = [0, 6, 0, 0], sizes = [2, 1, 1, 32], strides = [1, 1, 1, 1]} : vector<2x8x8x32xf32> to vector<2x1x1x32xf32>
    %204 = vector.extract_strided_slice %94 {offsets = [0, 6, 1, 0], sizes = [2, 1, 1, 32], strides = [1, 1, 1, 1]} : vector<2x8x8x32xf32> to vector<2x1x1x32xf32>
    %205 = vector.extract_strided_slice %94 {offsets = [0, 7, 0, 0], sizes = [2, 1, 1, 32], strides = [1, 1, 1, 1]} : vector<2x8x8x32xf32> to vector<2x1x1x32xf32>
    %206 = vector.extract_strided_slice %94 {offsets = [0, 7, 1, 0], sizes = [2, 1, 1, 32], strides = [1, 1, 1, 1]} : vector<2x8x8x32xf32> to vector<2x1x1x32xf32>
    %207 = arith.maximumf %203, %204 : vector<2x1x1x32xf32>
    %208 = arith.maximumf %205, %206 : vector<2x1x1x32xf32>
    %209 = arith.maximumf %207, %208 : vector<2x1x1x32xf32>
    %210 = vector.shape_cast %209 : vector<2x1x1x32xf32> to vector<2x32xf32>
    %c0_89 = arith.constant 0 : index
    %c384 = arith.constant 384 : index
    %211 = vector.load %arg16[%c0_89, %c384] : memref<2x512xf32, #tpu.memory_space<vmem>>, vector<2x32xf32>
    tpu.vector_store %arg16[%c0_89, %c384], %210 {strides = array<i32>} : memref<2x512xf32, #tpu.memory_space<vmem>>, vector<2x32xf32>,
    %212 = vector.extract_strided_slice %94 {offsets = [0, 6, 2, 0], sizes = [2, 1, 1, 32], strides = [1, 1, 1, 1]} : vector<2x8x8x32xf32> to vector<2x1x1x32xf32>
    %213 = vector.extract_strided_slice %94 {offsets = [0, 6, 3, 0], sizes = [2, 1, 1, 32], strides = [1, 1, 1, 1]} : vector<2x8x8x32xf32> to vector<2x1x1x32xf32>
    %214 = vector.extract_strided_slice %94 {offsets = [0, 7, 2, 0], sizes = [2, 1, 1, 32], strides = [1, 1, 1, 1]} : vector<2x8x8x32xf32> to vector<2x1x1x32xf32>
    %215 = vector.extract_strided_slice %94 {offsets = [0, 7, 3, 0], sizes = [2, 1, 1, 32], strides = [1, 1, 1, 1]} : vector<2x8x8x32xf32> to vector<2x1x1x32xf32>
    %216 = arith.maximumf %212, %213 : vector<2x1x1x32xf32>
    %217 = arith.maximumf %214, %215 : vector<2x1x1x32xf32>
    %218 = arith.maximumf %216, %217 : vector<2x1x1x32xf32>
    %219 = vector.shape_cast %218 : vector<2x1x1x32xf32> to vector<2x32xf32>
    %c0_90 = arith.constant 0 : index
    %c416 = arith.constant 416 : index
    %220 = vector.load %arg16[%c0_90, %c416] : memref<2x512xf32, #tpu.memory_space<vmem>>, vector<2x32xf32>
    tpu.vector_store %arg16[%c0_90, %c416], %219 {strides = array<i32>} : memref<2x512xf32, #tpu.memory_space<vmem>>, vector<2x32xf32>,
    %221 = vector.extract_strided_slice %94 {offsets = [0, 6, 4, 0], sizes = [2, 1, 1, 32], strides = [1, 1, 1, 1]} : vector<2x8x8x32xf32> to vector<2x1x1x32xf32>
    %222 = vector.extract_strided_slice %94 {offsets = [0, 6, 5, 0], sizes = [2, 1, 1, 32], strides = [1, 1, 1, 1]} : vector<2x8x8x32xf32> to vector<2x1x1x32xf32>
    %223 = vector.extract_strided_slice %94 {offsets = [0, 7, 4, 0], sizes = [2, 1, 1, 32], strides = [1, 1, 1, 1]} : vector<2x8x8x32xf32> to vector<2x1x1x32xf32>
    %224 = vector.extract_strided_slice %94 {offsets = [0, 7, 5, 0], sizes = [2, 1, 1, 32], strides = [1, 1, 1, 1]} : vector<2x8x8x32xf32> to vector<2x1x1x32xf32>
    %225 = arith.maximumf %221, %222 : vector<2x1x1x32xf32>
    %226 = arith.maximumf %223, %224 : vector<2x1x1x32xf32>
    %227 = arith.maximumf %225, %226 : vector<2x1x1x32xf32>
    %228 = vector.shape_cast %227 : vector<2x1x1x32xf32> to vector<2x32xf32>
    %c0_91 = arith.constant 0 : index
    %c448 = arith.constant 448 : index
    %229 = vector.load %arg16[%c0_91, %c448] : memref<2x512xf32, #tpu.memory_space<vmem>>, vector<2x32xf32>
    tpu.vector_store %arg16[%c0_91, %c448], %228 {strides = array<i32>} : memref<2x512xf32, #tpu.memory_space<vmem>>, vector<2x32xf32>,
    %230 = vector.extract_strided_slice %94 {offsets = [0, 6, 6, 0], sizes = [2, 1, 1, 32], strides = [1, 1, 1, 1]} : vector<2x8x8x32xf32> to vector<2x1x1x32xf32>
    %231 = vector.extract_strided_slice %94 {offsets = [0, 6, 7, 0], sizes = [2, 1, 1, 32], strides = [1, 1, 1, 1]} : vector<2x8x8x32xf32> to vector<2x1x1x32xf32>
    %232 = vector.extract_strided_slice %94 {offsets = [0, 7, 6, 0], sizes = [2, 1, 1, 32], strides = [1, 1, 1, 1]} : vector<2x8x8x32xf32> to vector<2x1x1x32xf32>
    %233 = vector.extract_strided_slice %94 {offsets = [0, 7, 7, 0], sizes = [2, 1, 1, 32], strides = [1, 1, 1, 1]} : vector<2x8x8x32xf32> to vector<2x1x1x32xf32>
    %234 = arith.maximumf %230, %231 : vector<2x1x1x32xf32>
    %235 = arith.maximumf %232, %233 : vector<2x1x1x32xf32>
    %236 = arith.maximumf %234, %235 : vector<2x1x1x32xf32>
    %237 = vector.shape_cast %236 : vector<2x1x1x32xf32> to vector<2x32xf32>
    %c0_92 = arith.constant 0 : index
    %c480 = arith.constant 480 : index
    %238 = vector.load %arg16[%c0_92, %c480] : memref<2x512xf32, #tpu.memory_space<vmem>>, vector<2x32xf32>
    tpu.vector_store %arg16[%c0_92, %c480], %237 {strides = array<i32>} : memref<2x512xf32, #tpu.memory_space<vmem>>, vector<2x32xf32>,
    %c0_93 = arith.constant 0 : index
    %c0_94 = arith.constant 0 : index
    %239 = vector.load %arg16[%c0_93, %c0_94] : memref<2x512xf32, #tpu.memory_space<vmem>>, vector<2x512xf32>
    %c0_95 = arith.constant 0 : index
    %c0_96 = arith.constant 0 : index
    %240 = vector.load %arg6[%c0_95, %c0_96] : memref<512x40xf32, #tpu.memory_space<vmem>>, vector<512x40xf32>
    %cst_97 = arith.constant dense<0.000000e+00> : vector<2x40xf32>
    %241 = tpu.matmul %239, %240, %cst_97 {dimension_numbers = #tpu.dot_dimension_numbers<[1], [0], [0], [1], [0, 0, 1, 1], [], []>} : vector<2x512xf32>, vector<512x40xf32>, vector<2x40xf32> -> vector<2x40xf32>
    %c0_98 = arith.constant 0 : index
    %c0_99 = arith.constant 0 : index
    %242 = vector.load %arg7[%c0_98, %c0_99] : memref<1x40xf32, #tpu.memory_space<vmem>>, vector<1x40xf32>
    %243 = vector.broadcast %242 : vector<1x40xf32> to vector<2x40xf32>
    %244 = arith.addf %241, %243 : vector<2x40xf32>
    %cst_100 = arith.constant 0.000000e+00 : f32
    %245 = vector.broadcast %cst_100 : f32 to vector<2x40xf32>
    %246 = arith.maximumf %244, %245 : vector<2x40xf32>
    %c0_101 = arith.constant 0 : index
    %c0_102 = arith.constant 0 : index
    %247 = vector.load %arg8[%c0_101, %c0_102] : memref<40x10xf32, #tpu.memory_space<vmem>>, vector<40x10xf32>
    %cst_103 = arith.constant dense<0.000000e+00> : vector<2x10xf32>
    %248 = tpu.matmul %246, %247, %cst_103 {dimension_numbers = #tpu.dot_dimension_numbers<[1], [0], [0], [1], [0, 0, 1, 1], [], []>} : vector<2x40xf32>, vector<40x10xf32>, vector<2x10xf32> -> vector<2x10xf32>
    %c0_104 = arith.constant 0 : index
    %c0_105 = arith.constant 0 : index
    %249 = vector.load %arg9[%c0_104, %c0_105] : memref<1x10xf32, #tpu.memory_space<vmem>>, vector<1x10xf32>
    %250 = vector.broadcast %249 : vector<1x10xf32> to vector<2x10xf32>
    %251 = arith.addf %248, %250 : vector<2x10xf32>
    %cst_106 = arith.constant dense<0xFF800000> : vector<2xf32>
    %252 = vector.multi_reduction <maximumf>, %251, %cst_106 [1] : vector<2x10xf32> to vector<2xf32>
    %253 = vector.shape_cast %252 : vector<2xf32> to vector<2x1xf32>
    %254 = vector.broadcast %253 : vector<2x1xf32> to vector<2x10xf32>
    %255 = arith.subf %251, %254 : vector<2x10xf32>
    %256 = math.exp %255 : vector<2x10xf32>
    %cst_107 = arith.constant dense<0.000000e+00> : vector<2xf32>
    %257 = vector.multi_reduction <add>, %256, %cst_107 [1] : vector<2x10xf32> to vector<2xf32>
    %258 = vector.shape_cast %257 : vector<2xf32> to vector<2x1xf32>
    %259 = vector.broadcast %258 : vector<2x1xf32> to vector<2x10xf32>
    %260 = arith.divf %256, %259 : vector<2x10xf32>
    %c0_108 = arith.constant 0 : index
    %c0_109 = arith.constant 0 : index
    %261 = vector.load %arg10[%c0_108, %c0_109] : memref<2x10xf32, #tpu.memory_space<vmem>>, vector<2x10xf32>
    tpu.vector_store %arg10[%c0_108, %c0_109], %260 {strides = array<i32>} : memref<2x10xf32, #tpu.memory_space<vmem>>, vector<2x10xf32>,
    return
  }
}

</mosaic_0001>

<bundles_post_ra>
// kernel: resnet_forward.1
= control target key start
LH: loop header
LB: loop body
LE: loop exit
PB: predicated region body
PF: predicated region fallthrough
CT: control target
= control target key end

     0   :  { %vm36_vm0 = vcmask 23552   ;;  %s10258_s0 = inlined_call_operand.vmem [shape: f32[2,16,16,3], index: 0, kind: input, shape index: {}]   ;;  %s10259_s1 = inlined_call_operand.vmem [shape: f32[27,32], index: 1, kind: input, shape index: {}]   ;;  %s10260_s2 = inlined_call_operand.vmem [shape: f32[1,32], index: 2, kind: input, shape index: {}]   ;;  %s10261_s3 = inlined_call_operand.vmem [shape: f32[288,32], index: 3, kind: input, shape index: {}]   ;;  %s10262_s4 = inlined_call_operand.vmem [shape: f32[1,32], index: 4, kind: input, shape index: {}]   ;;  %s10263_s5 = inlined_call_operand.vmem [shape: f32[1,32], index: 5, kind: input, shape index: {}]   ;;  %s10264_s6 = inlined_call_operand.vmem [shape: f32[512,40], index: 6, kind: input, shape index: {}]   ;;  %s10265_s7 = inlined_call_operand.vmem [shape: f32[1,40], index: 7, kind: input, shape index: {}]   ;;  %s10266_s8 = inlined_call_operand.vmem [shape: f32[40,10], index: 8, kind: input, shape index: {}]   ;;  %s10267_s9 = inlined_call_operand.vmem [shape: f32[1,10], index: 9, kind: input, shape index: {}]   ;;  %s10268_s10 = inlined_call_operand.hbm [shape: f32[2,10], index: 10, kind: output, shape index: {}]  }
   0x1   :  { %15 = vsyncpa [#allocation9], 0  ;;  %v10269_v0 = vmov 0.0   ;;  %s6687_s13 = smov 3   ;;  %v146_v2 = vld [vmem:[%s10258_s0] sm:$0xff]  ;;  %vm39_vm1 = vcmask 17408  }
   0x2   :  { %37 = vst.msk [vmem:[#allocation2] sm:$0xff] %vm36_vm0, %v10269_v0  ;;  %v147_v5 = vld [vmem:[%s10258_s0 + $0x8] sm:$0xff]  ;;  %v150_v6 = vld [vmem:[%s10258_s0 + $0x20] sm:$0xff]  ;;  %v148_v7 = vld [vmem:[%s10258_s0 + $0x10] sm:$0xff]  ;;  %vm723_vm2 = vcmask 48152   ;;  %s6688_s20 = smov 6  }
   0x3   :  { %38 = vst.msk [vmem:[#allocation2 + $0x8] sm:$0xff] %vm36_vm0, %v10269_v0  ;;  %v151_v8 = vld [vmem:[%s10258_s0 + $0x28] sm:$0xff]  ;;  %v153_v9 = vld [vmem:[%s10258_s0 + $0x38] sm:$0xff]  ;;  %v154_v11 = vld [vmem:[%s10258_s0 + $0x40] sm:$0xff]  ;;  %vm1108_vm3 = vcmask 72752   ;;  %vm1493_vm4 = vcmask 97352  }
   0x4   :  { %41 = vst.msk [vmem:[#allocation2 + $0x18] sm:$0xff] %vm36_vm0, %v10269_v0  ;;  %v149_v10 = vld [vmem:[%s10258_s0 + $0x18] sm:$0xff]  ;;  %v156_v12 = vld [vmem:[%s10258_s0 + $0x50] sm:$0xff]  ;;  %v159_v16 = vld [vmem:[%s10258_s0 + $0x68] sm:$0xff]  ;;  %vm1878_vm5 = vcmask 121952   ;;  %s6691_s29 = smov 15  }
   0x5   :  { %42 = vst.msk [vmem:[#allocation2 + $0x20] sm:$0xff] %vm36_vm0, %v10269_v0  ;;  %v152_v13 = vld [vmem:[%s10258_s0 + $0x30] sm:$0xff]  ;;  %v157_v14 = vld [vmem:[%s10258_s0 + $0x58] sm:$0xff]  ;;  %v155_v18 = vld [vmem:[%s10258_s0 + $0x48] sm:$0xff]  ;;  %vm2263_vm6 = vcmask 146552   ;;  %s6692_s30 = smov 18  }
   0x6   :  { %44 = vst.msk [vmem:[#allocation2 + $0x30] sm:$0xff] %vm36_vm0, %v10269_v0  ;;  %v160_v20 = vld [vmem:[%s10258_s0 + $0x70] sm:$0xff]  ;;  %v162_v21 = vld [vmem:[%s10258_s0 + $0x80] sm:$0xff]  ;;  %v163_v23 = vld [vmem:[%s10258_s0 + $0x88] sm:$0xff]  ;;  %vm2649_vm7 = vcmask 171152   ;;  %s6693_s11 = smov 21  }
   0x7   :  { %45 = vst.msk [vmem:[#allocation2 + $0x38] sm:$0xff] %vm36_vm0, %v10269_v0  ;;  %v158_v22 = vld [vmem:[%s10258_s0 + $0x60] sm:$0xff]  ;;  %v165_v26 = vld [vmem:[%s10258_s0 + $0x98] sm:$0xff]  ;;  %v168_v32 = vld [vmem:[%s10258_s0 + $0xb0] sm:$0xff]  ;;  %s6694_s12 = smov 24   ;;  %vm3034_vm8 = vcmask 195752  }
   0x8   :  { %47 = vst.msk [vmem:[#allocation2 + $0x48] sm:$0xff] %vm36_vm0, %v10269_v0  ;;  %v161_v28 = vld [vmem:[%s10258_s0 + $0x78] sm:$0xff]  ;;  %v166_v29 = vld [vmem:[%s10258_s0 + $0xa0] sm:$0xff]  ;;  %v164_v34 = vld [vmem:[%s10258_s0 + $0x90] sm:$0xff]  ;;  %vm3749_vm9 = vcmask 1042432   ;;  %vm3419_vm10 = vcmask 220352  }
   0x9   :  { %48 = vst.msk [vmem:[#allocation2 + $0x50] sm:$0xff] %vm36_vm0, %v10269_v0  ;;  %v169_v35 = vld [vmem:[%s10258_s0 + $0xb8] sm:$0xff]  ;;  %v171_v38 = vld [vmem:[%s10258_s0 + $0xc8] sm:$0xff]  ;;  %v172_v41 = vld [vmem:[%s10258_s0 + $0xd0] sm:$0xff]  ;;  %vm3556_vm11 = vcmask 220160   ;;  %vm4560_vm12 = vcmask 261120  }
   0xa   :  { %v403_v1 = vld [vmem:[#allocation2 + $0x1] sm:$0xff]  ;;  %50 = vst.msk [vmem:[#allocation2 + $0x60] sm:$0xff] %vm36_vm0, %v10269_v0  ;;  %v174_v44 = vld [vmem:[%s10258_s0 + $0xe0] sm:$0xff]  ;;  %v173_v51 = vld [vmem:[%s10258_s0 + $0xd8] sm:$0xff]  ;;  %vm4442_vm13 = vcmask 1040384   ;;  %vm4459_vm14 = vcmask 1041408  }
   0xb   :  { %531 = vrot.lane.b32.xlu0 %v403_v1, %s6687_s13  ;;  %51 = vst.msk [vmem:[#allocation2 + $0x68] sm:$0xff] %vm36_vm0, %v10269_v0  ;;  %v167_v40 = vld [vmem:[%s10258_s0 + $0xa8] sm:$0xff]  ;;  %v170_v46 = vld [vmem:[%s10258_s0 + $0xc0] sm:$0xff]  ;;  %v180_v55 = vld [vmem:[%s10258_s0 + $0x110] sm:$0xff]  ;;  %vm4492_vm15 = vcmask 1043456  }
   0xc   :  { %53 = vst.msk [vmem:[#allocation2 + $0x78] sm:$0xff] %vm36_vm0, %v10269_v0  ;;  %v175_v47 = vld [vmem:[%s10258_s0 + $0xe8] sm:$0xff]  ;;  %v178_v52 = vld [vmem:[%s10258_s0 + $0x100] sm:$0xff]  ;;  %v181_v57 = vld [vmem:[%s10258_s0 + $0x118] sm:$0xff] }
   0xd   :  { %54 = vst.msk [vmem:[#allocation2 + $0x80] sm:$0xff] %vm36_vm0, %v10269_v0  ;;  %v183_v60 = vld [vmem:[%s10258_s0 + $0x128] sm:$0xff]  ;;  %v184_v63 = vld [vmem:[%s10258_s0 + $0x130] sm:$0xff] }
   0xe   :  { %56 = vst.msk [vmem:[#allocation2 + $0x90] sm:$0xff] %vm36_vm0, %v10269_v0  ;;  %v179_v62 = vld [vmem:[%s10258_s0 + $0x108] sm:$0xff] }
   0xf   :  { %57 = vst.msk [vmem:[#allocation2 + $0x98] sm:$0xff] %vm36_vm0, %v10269_v0 }
  0x10   :  { %59 = vst.msk [vmem:[#allocation2 + $0xa8] sm:$0xff] %vm36_vm0, %v10269_v0 }
  0x11   :  { %60 = vst.msk [vmem:[#allocation2 + $0xb0] sm:$0xff] %vm36_vm0, %v10269_v0 }
  0x12   :  { %62 = vst.msk [vmem:[#allocation2 + $0xc0] sm:$0xff] %vm36_vm0, %v10269_v0 }
  0x13   :  { %63 = vst.msk [vmem:[#allocation2 + $0xc8] sm:$0xff] %vm36_vm0, %v10269_v0 }
  0x14   :  { %65 = vst.msk [vmem:[#allocation2 + $0xd8] sm:$0xff] %vm36_vm0, %v10269_v0 }
  0x15   :  { %66 = vst.msk [vmem:[#allocation2 + $0xe0] sm:$0xff] %vm36_vm0, %v10269_v0 }
  0x16   :  { %68 = vst.msk [vmem:[#allocation2 + $0xf0] sm:$0xff] %vm36_vm0, %v10269_v0 }
  0x17   :  { %69 = vst.msk [vmem:[#allocation2 + $0xf8] sm:$0xff] %vm36_vm0, %v10269_v0 }
  0x18   :  { %71 = vst.msk [vmem:[#allocation2 + $0x108] sm:$0xff] %vm36_vm0, %v10269_v0 }
  0x19   :  { %72 = vst.msk [vmem:[#allocation2 + $0x110] sm:$0xff] %vm36_vm0, %v10269_v0 }
  0x1a   :  { %74 = vst.msk [vmem:[#allocation2 + $0x120] sm:$0xff] %vm36_vm0, %v10269_v0 }
  0x1b   :  { %75 = vst.msk [vmem:[#allocation2 + $0x128] sm:$0xff] %vm36_vm0, %v10269_v0 }
  0x1c   :  { %77 = vst.msk [vmem:[#allocation2 + $0x138] sm:$0xff] %vm36_vm0, %v10269_v0 }
  0x1d   :  { %78 = vst.msk [vmem:[#allocation2 + $0x140] sm:$0xff] %vm36_vm0, %v10269_v0 }
  0x1e   :  { %80 = vst.msk [vmem:[#allocation2 + $0x150] sm:$0xff] %vm36_vm0, %v10269_v0 }
  0x1f   :  { %81 = vst.msk [vmem:[#allocation2 + $0x158] sm:$0xff] %vm36_vm0, %v10269_v0 }
  0x20   :  { %83 = vst.msk [vmem:[#allocation2 + $0x168] sm:$0xff] %vm36_vm0, %v10269_v0 }
  0x21   :  { %84 = vst.msk [vmem:[#allocation2 + $0x170] sm:$0xff] %vm36_vm0, %v10269_v0 }
  0x22   :  { %86 = vst.msk [vmem:[#allocation2 + $0x180] sm:$0xff] %vm36_vm0, %v10269_v0 }
  0x23   :  { %87 = vst.msk [vmem:[#allocation2 + $0x188] sm:$0xff] %vm36_vm0, %v10269_v0 }
  0x24   :  { %89 = vst.msk [vmem:[#allocation2 + $0x198] sm:$0xff] %vm36_vm0, %v10269_v0 }
  0x25   :  { %90 = vst.msk [vmem:[#allocation2 + $0x1a0] sm:$0xff] %vm36_vm0, %v10269_v0 }
  0x26   :  { %92 = vst.msk [vmem:[#allocation2 + $0x1b0] sm:$0xff] %vm36_vm0, %v10269_v0 }
  0x27   :  { %93 = vst.msk [vmem:[#allocation2 + $0x1b8] sm:$0xff] %vm36_vm0, %v10269_v0 }
  0x28   :  { %95 = vst.msk [vmem:[#allocation2 + $0x1c8] sm:$0xff] %vm36_vm0, %v10269_v0 }
  0x29   :  { %96 = vst.msk [vmem:[#allocation2 + $0x1d0] sm:$0xff] %vm36_vm0, %v10269_v0 }
  0x2a   :  { %98 = vst.msk [vmem:[#allocation2 + $0x1e0] sm:$0xff] %vm36_vm0, %v10269_v0 }
  0x2b   :  { %99 = vst.msk [vmem:[#allocation2 + $0x1e8] sm:$0xff] %vm36_vm0, %v10269_v0 }
  0x2c   :  { %101 = vst.msk [vmem:[#allocation2 + $0x1f8] sm:$0xff] %vm36_vm0, %v10269_v0 }
  0x2d   :  { %102 = vst.msk [vmem:[#allocation2 + $0x200] sm:$0xff] %vm36_vm0, %v10269_v0 }
  0x2e   :  { %104 = vst.msk [vmem:[#allocation2 + $0x210] sm:$0xff] %vm36_vm0, %v10269_v0 }
  0x2f   :  { %105 = vst.msk [vmem:[#allocation2 + $0x218] sm:$0xff] %vm36_vm0, %v10269_v0 }
  0x30   :  { %107 = vst.msk [vmem:[#allocation2 + $0x228] sm:$0xff] %vm36_vm0, %v10269_v0 }
  0x31   :  { %108 = vst.msk [vmem:[#allocation2 + $0x230] sm:$0xff] %vm36_vm0, %v10269_v0 }
  0x32   :  { %110 = vst.msk [vmem:[#allocation2 + $0x240] sm:$0xff] %vm36_vm0, %v10269_v0 }
  0x33   :  { %111 = vst.msk [vmem:[#allocation2 + $0x248] sm:$0xff] %vm36_vm0, %v10269_v0 }
  0x34   :  { %113 = vst.msk [vmem:[#allocation2 + $0x258] sm:$0xff] %vm36_vm0, %v10269_v0 }
  0x35   :  { %114 = vst.msk [vmem:[#allocation2 + $0x260] sm:$0xff] %vm36_vm0, %v10269_v0 }
  0x36   :  { %116 = vst.msk [vmem:[#allocation2 + $0x270] sm:$0xff] %vm36_vm0, %v10269_v0 }
  0x37   :  { %117 = vst.msk [vmem:[#allocation2 + $0x278] sm:$0xff] %vm36_vm0, %v10269_v0 }
  0x38   :  { %119 = vst.msk [vmem:[#allocation2 + $0x288] sm:$0xff] %vm36_vm0, %v10269_v0 }
  0x39   :  { %120 = vst.msk [vmem:[#allocation2 + $0x290] sm:$0xff] %vm36_vm0, %v10269_v0 }
  0x3a   :  { %122 = vst.msk [vmem:[#allocation2 + $0x2a0] sm:$0xff] %vm36_vm0, %v10269_v0 }
  0x3b   :  { %123 = vst.msk [vmem:[#allocation2 + $0x2a8] sm:$0xff] %vm36_vm0, %v10269_v0 }
  0x3c   :  { %125 = vst.msk [vmem:[#allocation2 + $0x2b8] sm:$0xff] %vm36_vm0, %v10269_v0 }
  0x3d   :  { %126 = vst.msk [vmem:[#allocation2 + $0x2c0] sm:$0xff] %vm36_vm0, %v10269_v0 }
  0x3e   :  { %128 = vst.msk [vmem:[#allocation2 + $0x2d0] sm:$0xff] %vm36_vm0, %v10269_v0 }
  0x3f   :  { %129 = vst.msk [vmem:[#allocation2 + $0x2d8] sm:$0xff] %vm36_vm0, %v10269_v0 }
  0x40   :  { %131 = vst.msk [vmem:[#allocation2 + $0x2e8] sm:$0xff] %vm36_vm0, %v10269_v0 }
  0x41   :  { %132 = vst.msk [vmem:[#allocation2 + $0x2f0] sm:$0xff] %vm36_vm0, %v10269_v0 }
  0x42   :  { %134 = vst.msk [vmem:[#allocation2 + $0x300] sm:$0xff] %vm36_vm0, %v10269_v0 }
  0x43   :  { %135 = vst.msk [vmem:[#allocation2 + $0x308] sm:$0xff] %vm36_vm0, %v10269_v0 }
  0x44   :  { %137 = vst.msk [vmem:[#allocation2 + $0x318] sm:$0xff] %vm36_vm0, %v10269_v0 }
  0x45   :  { %138 = vst.msk [vmem:[#allocation2 + $0x320] sm:$0xff] %vm36_vm0, %v10269_v0 }
  0x46   :  { %140 = vst.msk [vmem:[#allocation2 + $0x330] sm:$0xff] %vm36_vm0, %v10269_v0 }
  0x47   :  { %141 = vst.msk [vmem:[#allocation2 + $0x338] sm:$0xff] %vm36_vm0, %v10269_v0 }
  0x48   :  { %143 = vst.msk [vmem:[#allocation2 + $0x348] sm:$0xff] %vm36_vm0, %v10269_v0 }
  0x49   :  { %144 = vst.msk [vmem:[#allocation2 + $0x350] sm:$0xff] %vm36_vm0, %v10269_v0 }
  0x4a   :  { %211 = vst.msk [vmem:[#allocation2 + $0x19] sm:$0xff] %vm36_vm0, %v146_v2 }
  0x4b   :  { %40 = vst.msk [vmem:[#allocation2 + $0x10] sm:$0x3] %vm39_vm1, %v10269_v0 }
  0x4c   :  { %43 = vst.msk [vmem:[#allocation2 + $0x28] sm:$0x3] %vm39_vm1, %v10269_v0 }
  0x4d   :  { %46 = vst.msk [vmem:[#allocation2 + $0x40] sm:$0x3] %vm39_vm1, %v10269_v0 }
  0x4e   :  { %49 = vst.msk [vmem:[#allocation2 + $0x58] sm:$0x3] %vm39_vm1, %v10269_v0 }
  0x4f   :  { %52 = vst.msk [vmem:[#allocation2 + $0x70] sm:$0x3] %vm39_vm1, %v10269_v0 }
  0x50   :  { %55 = vst.msk [vmem:[#allocation2 + $0x88] sm:$0x3] %vm39_vm1, %v10269_v0 }
  0x51   :  { %v405_v3 = vld [vmem:[#allocation2 + $0x19] sm:$0xff]  ;;  %58 = vst.msk [vmem:[#allocation2 + $0xa0] sm:$0x3] %vm39_vm1, %v10269_v0 }
  0x52   :  { %535 = vrot.lane.b32.xlu1 %v405_v3, %s6687_s13  ;;  %v404_v4 = vld [vmem:[#allocation2 + $0x9] sm:$0xff]  ;;  %61 = vst.msk [vmem:[#allocation2 + $0xb8] sm:$0x3] %vm39_vm1, %v10269_v0  ;;  %v186_v3 = vld [vmem:[%s10258_s0 + $0x140] sm:$0xff] }
  0x53   :  { %533 = vrot.lane.b32.xlu0 %v404_v4, %s6687_s13  ;;  %64 = vst.msk [vmem:[#allocation2 + $0xd0] sm:$0x3] %vm39_vm1, %v10269_v0 }
  0x54   :  { %67 = vst.msk [vmem:[#allocation2 + $0xe8] sm:$0x3] %vm39_vm1, %v10269_v0 }
  0x55   :  { %70 = vst.msk [vmem:[#allocation2 + $0x100] sm:$0x3] %vm39_vm1, %v10269_v0 }
  0x56   :  { %73 = vst.msk [vmem:[#allocation2 + $0x118] sm:$0x3] %vm39_vm1, %v10269_v0 }
  0x57   :  { %76 = vst.msk [vmem:[#allocation2 + $0x130] sm:$0x3] %vm39_vm1, %v10269_v0 }
  0x58   :  { %79 = vst.msk [vmem:[#allocation2 + $0x148] sm:$0x3] %vm39_vm1, %v10269_v0 }
  0x59   :  { %82 = vst.msk [vmem:[#allocation2 + $0x160] sm:$0x3] %vm39_vm1, %v10269_v0 }
  0x5a   :  { %85 = vst.msk [vmem:[#allocation2 + $0x178] sm:$0x3] %vm39_vm1, %v10269_v0 }
  0x5b   :  { %88 = vst.msk [vmem:[#allocation2 + $0x190] sm:$0x3] %vm39_vm1, %v10269_v0 }
  0x5c   :  { %91 = vst.msk [vmem:[#allocation2 + $0x1a8] sm:$0x3] %vm39_vm1, %v10269_v0 }
  0x5d   :  { %94 = vst.msk [vmem:[#allocation2 + $0x1c0] sm:$0x3] %vm39_vm1, %v10269_v0 }
  0x5e   :  { %97 = vst.msk [vmem:[#allocation2 + $0x1d8] sm:$0x3] %vm39_vm1, %v10269_v0 }
  0x5f   :  { %100 = vst.msk [vmem:[#allocation2 + $0x1f0] sm:$0x3] %vm39_vm1, %v10269_v0 }
  0x60   :  { %103 = vst.msk [vmem:[#allocation2 + $0x208] sm:$0x3] %vm39_vm1, %v10269_v0 }
  0x61   :  { %106 = vst.msk [vmem:[#allocation2 + $0x220] sm:$0x3] %vm39_vm1, %v10269_v0 }
  0x62   :  { %109 = vst.msk [vmem:[#allocation2 + $0x238] sm:$0x3] %vm39_vm1, %v10269_v0 }
  0x63   :  { %112 = vst.msk [vmem:[#allocation2 + $0x250] sm:$0x3] %vm39_vm1, %v10269_v0 }
  0x64   :  { %115 = vst.msk [vmem:[#allocation2 + $0x268] sm:$0x3] %vm39_vm1, %v10269_v0 }
  0x65   :  { %118 = vst.msk [vmem:[#allocation2 + $0x280] sm:$0x3] %vm39_vm1, %v10269_v0 }
  0x66   :  { %121 = vst.msk [vmem:[#allocation2 + $0x298] sm:$0x3] %vm39_vm1, %v10269_v0 }
  0x67   :  { %124 = vst.msk [vmem:[#allocation2 + $0x2b0] sm:$0x3] %vm39_vm1, %v10269_v0 }
  0x68   :  { %127 = vst.msk [vmem:[#allocation2 + $0x2c8] sm:$0x3] %vm39_vm1, %v10269_v0 }
  0x69   :  { %130 = vst.msk [vmem:[#allocation2 + $0x2e0] sm:$0x3] %vm39_vm1, %v10269_v0 }
  0x6a   :  { %133 = vst.msk [vmem:[#allocation2 + $0x2f8] sm:$0x3] %vm39_vm1, %v10269_v0 }
  0x6b   :  { %136 = vst.msk [vmem:[#allocation2 + $0x310] sm:$0x3] %vm39_vm1, %v10269_v0 }
  0x6c   :  { %139 = vst.msk [vmem:[#allocation2 + $0x328] sm:$0x3] %vm39_vm1, %v10269_v0 }
  0x6d   :  { %142 = vst.msk [vmem:[#allocation2 + $0x340] sm:$0x3] %vm39_vm1, %v10269_v0 }
  0x6e   :  { %145 = vst.msk [vmem:[#allocation2 + $0x358] sm:$0x3] %vm39_vm1, %v10269_v0  ;;  %vm4526_vm1 = vcmask 1045504  }
  0x6f   :  { %212 = vst.msk [vmem:[#allocation2 + $0x21] sm:$0xff] %vm36_vm0, %v147_v5  ;;  %v182_v5 = vld [vmem:[%s10258_s0 + $0x120] sm:$0xff] }
  0x70   :  { %215 = vst.msk [vmem:[#allocation2 + $0x49] sm:$0xff] %vm36_vm0, %v150_v6  ;;  %v187_v6 = vld [vmem:[%s10258_s0 + $0x148] sm:$0xff] }
  0x71   :  { %213 = vst.msk [vmem:[#allocation2 + $0x31] sm:$0xff] %vm36_vm0, %v148_v7 }
  0x72   :  { %216 = vst.msk [vmem:[#allocation2 + $0x51] sm:$0xff] %vm36_vm0, %v151_v8 }
  0x73   :  { %218 = vst.msk [vmem:[#allocation2 + $0x69] sm:$0xff] %vm36_vm0, %v153_v9  ;;  %v436_v9 = vld [vmem:[#allocation2 + $0x1b9] sm:$0xff] }
  0x74   :  { %214 = vst.msk [vmem:[#allocation2 + $0x39] sm:$0xff] %vm36_vm0, %v149_v10  ;;  %v189_v10 = vld [vmem:[%s10258_s0 + $0x158] sm:$0xff] }
  0x75   :  { %219 = vst.msk [vmem:[#allocation2 + $0x79] sm:$0xff] %vm36_vm0, %v154_v11 }
  0x76   :  { %v406_v15 = vld [vmem:[#allocation2 + $0x21] sm:$0xff]  ;;  %221 = vst.msk [vmem:[#allocation2 + $0x91] sm:$0xff] %vm36_vm0, %v156_v12  ;;  %v185_v12 = vld [vmem:[%s10258_s0 + $0x138] sm:$0xff] }
  0x77   :  { %537 = vrot.lane.b32.xlu1 %v406_v15, %s6687_s13  ;;  %v409_v17 = vld [vmem:[#allocation2 + $0x49] sm:$0xff]  ;;  %217 = vst.msk [vmem:[#allocation2 + $0x61] sm:$0xff] %vm36_vm0, %v152_v13 }
  0x78   :  { %543 = vrot.lane.b32.xlu0 %v409_v17, %s6687_s13  ;;  %v407_v19 = vld [vmem:[#allocation2 + $0x31] sm:$0xff]  ;;  %222 = vst.msk [vmem:[#allocation2 + $0x99] sm:$0xff] %vm36_vm0, %v157_v14  ;;  %v275_v14 = vld [vmem:[#allocation2] sm:$0xff] }
  0x79   :  { %539 = vrot.lane.b32.xlu2 %v407_v19, %s6687_s13  ;;  %224 = vst.msk [vmem:[#allocation2 + $0xb1] sm:$0xff] %vm36_vm0, %v159_v16  ;;  %v410_v24 = vld [vmem:[#allocation2 + $0x51] sm:$0xff] }
  0x7a   :  { %220 = vst.msk [vmem:[#allocation2 + $0x81] sm:$0xff] %vm36_vm0, %v155_v18  ;;  %v412_v25 = vld [vmem:[#allocation2 + $0x69] sm:$0xff]  ;;  %v277_v16 = vld [vmem:[#allocation2 + $0x18] sm:$0xff] }
  0x7b   :  { %225 = vst.msk [vmem:[#allocation2 + $0xc1] sm:$0xff] %vm36_vm0, %v160_v20  ;;  %v408_v27 = vld [vmem:[#allocation2 + $0x39] sm:$0xff]  ;;  %v279_v7 = vld [vmem:[#allocation2 + $0x30] sm:$0xff] }
  0x7c   :  { %227 = vst.msk [vmem:[#allocation2 + $0xd9] sm:$0xff] %vm36_vm0, %v162_v21  ;;  %v413_v30 = vld [vmem:[#allocation2 + $0x79] sm:$0xff]  ;;  %v192_v21 = vld [vmem:[%s10258_s0 + $0x170] sm:$0xff] }
  0x7d   :  { %223 = vst.msk [vmem:[#allocation2 + $0xa9] sm:$0xff] %vm36_vm0, %v158_v22  ;;  %v415_v31 = vld [vmem:[#allocation2 + $0x91] sm:$0xff]  ;;  %v532_v13 = vpop.permute.xlu0 %531 }
  0x7e   :  { %228 = vst.msk [vmem:[#allocation2 + $0xe1] sm:$0xff] %vm36_vm0, %v163_v23  ;;  %v411_v33 = vld [vmem:[#allocation2 + $0x61] sm:$0xff]  ;;  %v280_v15 = vld [vmem:[#allocation2 + $0x38] sm:$0xff] }
  0x7f   :  { %545 = vrot.lane.b32.xlu1 %v410_v24, %s6687_s13  ;;  %230 = vst.msk [vmem:[#allocation2 + $0xf9] sm:$0xff] %vm36_vm0, %v165_v26  ;;  %v416_v36 = vld [vmem:[#allocation2 + $0x99] sm:$0xff]  ;;  %v435_v22 = vld [vmem:[#allocation2 + $0x1b1] sm:$0xff]  ;;  %v188_v23 = vld [vmem:[%s10258_s0 + $0x150] sm:$0xff] }
  0x80   :  { %549 = vrot.lane.b32.xlu0 %v412_v25, %s6687_s13  ;;  %226 = vst.msk [vmem:[#allocation2 + $0xc9] sm:$0xff] %vm36_vm0, %v161_v28  ;;  %v418_v37 = vld [vmem:[#allocation2 + $0xb1] sm:$0xff]  ;;  %v276_v24 = vld [vmem:[#allocation2 + $0x8] sm:$0xff]  ;;  %v283_v26 = vld [vmem:[#allocation2 + $0x60] sm:$0xff] }
  0x81   :  { %541 = vrot.lane.b32.xlu2 %v408_v27, %s6687_s13  ;;  %231 = vst.msk [vmem:[#allocation2 + $0x109] sm:$0xff] %vm36_vm0, %v166_v29  ;;  %v414_v39 = vld [vmem:[#allocation2 + $0x81] sm:$0xff]  ;;  %v190_v17 = vld [vmem:[%s10258_s0 + $0x160] sm:$0xff]  ;;  %v193_v28 = vld [vmem:[%s10258_s0 + $0x178] sm:$0xff] }
  0x82   :  { %233 = vst.msk [vmem:[#allocation2 + $0x121] sm:$0xff] %vm36_vm0, %v168_v32  ;;  %v419_v42 = vld [vmem:[#allocation2 + $0xc1] sm:$0xff] }
  0x83   :  { %229 = vst.msk [vmem:[#allocation2 + $0xf1] sm:$0xff] %vm36_vm0, %v164_v34  ;;  %v421_v43 = vld [vmem:[#allocation2 + $0xd9] sm:$0xff]  ;;  %v7210_v34 = vld [vmem:[#allocation2 + $0x48] sm:$0xff] }
  0x84   :  { %234 = vst.msk [vmem:[#allocation2 + $0x129] sm:$0xff] %vm36_vm0, %v169_v35  ;;  %v417_v45 = vld [vmem:[#allocation2 + $0xa9] sm:$0xff]  ;;  %v7191_v27 = vld [vmem:[#allocation2 + $0x20] sm:$0xff] }
  0x85   :  { %236 = vst.msk [vmem:[#allocation2 + $0x141] sm:$0xff] %vm36_vm0, %v171_v38  ;;  %v422_v48 = vld [vmem:[#allocation2 + $0xe1] sm:$0xff] }
  0x86   :  { %232 = vst.msk [vmem:[#allocation2 + $0x111] sm:$0xff] %vm36_vm0, %v167_v40  ;;  %v424_v49 = vld [vmem:[#allocation2 + $0xf9] sm:$0xff] }
  0x87   :  { %551 = vrot.lane.b32.xlu1 %v413_v30, %s6687_s13  ;;  %237 = vst.msk [vmem:[#allocation2 + $0x151] sm:$0xff] %vm36_vm0, %v172_v41  ;;  %v420_v50 = vld [vmem:[#allocation2 + $0xc9] sm:$0xff]  ;;  %v7212_v35 = vld [vmem:[#allocation2 + $0x80] sm:$0xff]  ;;  %v198_v41 = vld [vmem:[%s10258_s0 + $0x1a0] sm:$0xff] }
  0x88   :  { %555 = vrot.lane.b32.xlu0 %v415_v31, %s6687_s13  ;;  %239 = vst.msk [vmem:[#allocation2 + $0x169] sm:$0xff] %vm36_vm0, %v174_v44  ;;  %v425_v53 = vld [vmem:[#allocation2 + $0x109] sm:$0xff]  ;;  %v195_v31 = vld [vmem:[%s10258_s0 + $0x188] sm:$0xff] }
  0x89   :  { %547 = vrot.lane.b32.xlu2 %v411_v33, %s6687_s13  ;;  %235 = vst.msk [vmem:[#allocation2 + $0x139] sm:$0xff] %vm36_vm0, %v170_v46  ;;  %v427_v54 = vld [vmem:[#allocation2 + $0x121] sm:$0xff]  ;;  %v7242_v46 = vld [vmem:[#allocation2 + $0x78] sm:$0xff] }
  0x8a   :  { %240 = vst.msk [vmem:[#allocation2 + $0x171] sm:$0xff] %vm36_vm0, %v175_v47  ;;  %v423_v56 = vld [vmem:[#allocation2 + $0xf1] sm:$0xff]  ;;  %v191_v33 = vld [vmem:[%s10258_s0 + $0x168] sm:$0xff]  ;;  %v7238_v44 = vld [vmem:[#allocation2 + $0x68] sm:$0xff] }
  0x8b   :  { %238 = vst.msk [vmem:[#allocation2 + $0x159] sm:$0xff] %vm36_vm0, %v173_v51  ;;  %v428_v58 = vld [vmem:[#allocation2 + $0x129] sm:$0xff]  ;;  %v199_v47 = vld [vmem:[%s10258_s0 + $0x1a8] sm:$0xff] }
  0x8c   :  { %243 = vst.msk [vmem:[#allocation2 + $0x1c9] sm:$0xff] %vm36_vm0, %v178_v52  ;;  %v430_v59 = vld [vmem:[#allocation2 + $0x141] sm:$0xff]  ;;  %v201_v51 = vld [vmem:[%s10258_s0 + $0x1b8] sm:$0xff] }
  0x8d   :  { %245 = vst.msk [vmem:[#allocation2 + $0x1e1] sm:$0xff] %vm36_vm0, %v180_v55  ;;  %v426_v61 = vld [vmem:[#allocation2 + $0x111] sm:$0xff]  ;;  %v7268_v55 = vld [vmem:[#allocation2 + $0xc8] sm:$0xff] }
  0x8e   :  { %246 = vst.msk [vmem:[#allocation2 + $0x1e9] sm:$0xff] %vm36_vm0, %v181_v57  ;;  %v431_v1 = vld [vmem:[#allocation2 + $0x151] sm:$0xff] }
  0x8f   :  { %557 = vrot.lane.b32.xlu1 %v416_v36, %s6687_s13  ;;  %248 = vst.msk [vmem:[#allocation2 + $0x201] sm:$0xff] %vm36_vm0, %v183_v60  ;;  %v433_v2 = vld [vmem:[#allocation2 + $0x169] sm:$0xff]  ;;  %v202_v57 = vld [vmem:[%s10258_s0 + $0x1c0] sm:$0xff] }
  0x90   :  { %561 = vrot.lane.b32.xlu0 %v418_v37, %s6687_s13  ;;  %244 = vst.msk [vmem:[#allocation2 + $0x1d1] sm:$0xff] %vm36_vm0, %v179_v62  ;;  %v429_v4 = vld [vmem:[#allocation2 + $0x139] sm:$0xff]  ;;  %v7214_v36 = vld [vmem:[#allocation2 + $0x50] sm:$0xff]  ;;  %v196_v37 = vld [vmem:[%s10258_s0 + $0x190] sm:$0xff] }
  0x91   :  { %553 = vrot.lane.b32.xlu2 %v414_v39, %s6687_s13  ;;  %249 = vst.msk [vmem:[#allocation2 + $0x211] sm:$0xff] %vm36_vm0, %v184_v63  ;;  %v434_v8 = vld [vmem:[#allocation2 + $0x171] sm:$0xff]  ;;  %v200_v63 = vld [vmem:[%s10258_s0 + $0x1b0] sm:$0xff] }
  0x92   :  { %251 = vst.msk [vmem:[#allocation2 + $0x229] sm:$0xff] %vm36_vm0, %v186_v3  ;;  %v432_v11 = vld [vmem:[#allocation2 + $0x159] sm:$0xff] }
  0x93   :  { %247 = vst.msk [vmem:[#allocation2 + $0x1f9] sm:$0xff] %vm36_vm0, %v182_v5  ;;  %v437_v18 = vld [vmem:[#allocation2 + $0x1c9] sm:$0xff]  ;;  %v7306_v5 = vld [vmem:[#allocation2 + $0xc0] sm:$0xff]  ;;  %v819_v0 = vld [vmem:[#allocation2 + $0x172] sm:$0xff] }
  0x94   :  { %343 = vst.msk [vmem:[#allocation3 + $0x20] sm:$0xff] %vm36_vm0, %v279_v7  ;;  %v439_v20 = vld [vmem:[#allocation2 + $0x1e1] sm:$0xff]  ;;  %v205_v7 = vld [vmem:[%s10258_s0 + $0x1d8] sm:$0xff] }
  0x95   :  { %252 = vst.msk [vmem:[#allocation2 + $0x231] sm:$0xff] %vm36_vm0, %v187_v6  ;;  %v440_v29 = vld [vmem:[#allocation2 + $0x1e9] sm:$0xff] }
  0x96   :  { %254 = vst.msk [vmem:[#allocation2 + $0x249] sm:$0xff] %vm36_vm0, %v189_v10  ;;  %v442_v30 = vld [vmem:[#allocation2 + $0x201] sm:$0xff] }
  0x97   :  { %563 = vrot.lane.b32.xlu1 %v419_v42, %s6687_s13  ;;  %250 = vst.msk [vmem:[#allocation2 + $0x219] sm:$0xff] %vm36_vm0, %v185_v12  ;;  %v438_v32 = vld [vmem:[#allocation2 + $0x1d1] sm:$0xff]  ;;  %v207_v10 = vld [vmem:[%s10258_s0 + $0x1e8] sm:$0xff] }
  0x98   :  { %567 = vrot.lane.b32.xlu0 %v421_v43, %s6687_s13  ;;  %339 = vst.msk [vmem:[#allocation3] sm:$0xff] %vm36_vm0, %v275_v14  ;;  %v443_v39 = vld [vmem:[#allocation2 + $0x211] sm:$0xff] }
  0x99   :  { %559 = vrot.lane.b32.xlu2 %v417_v45, %s6687_s13  ;;  %724 = vst.msk [vmem:[#allocation3] sm:$0xff] %vm723_vm2, %v532_v13  ;;  %v445_v40 = vld [vmem:[#allocation2 + $0x229] sm:$0xff]  ;;  %v194_v43 = vld [vmem:[%s10258_s0 + $0x180] sm:$0xff] }
  0x9a   :  { %344 = vst.msk [vmem:[#allocation3 + $0x28] sm:$0xff] %vm36_vm0, %v280_v15  ;;  %v441_v42 = vld [vmem:[#allocation2 + $0x1f9] sm:$0xff]  ;;  %v7240_v45 = vld [vmem:[#allocation2 + $0xa8] sm:$0xff]  ;;  %v7322_v13 = vld [vmem:[#allocation2 + $0x110] sm:$0xff] }
  0x9b   :  { %341 = vst.msk [vmem:[#allocation3 + $0x10] sm:$0xff] %vm36_vm0, %v277_v16  ;;  %v7320_v12 = vld [vmem:[#allocation2 + $0xd8] sm:$0xff]  ;;  %v7332_v16 = vld [vmem:[#allocation2 + $0xe0] sm:$0xff] }
  0x9c   :  { %255 = vst.msk [vmem:[#allocation2 + $0x259] sm:$0xff] %vm36_vm0, %v190_v17 }
  0x9d   :  { %257 = vst.msk [vmem:[#allocation2 + $0x271] sm:$0xff] %vm36_vm0, %v192_v21 }
  0x9e   :  { %253 = vst.msk [vmem:[#allocation2 + $0x241] sm:$0xff] %vm36_vm0, %v188_v23  ;;  %v444_v52 = vld [vmem:[#allocation2 + $0x219] sm:$0xff] }
  0x9f   :  { %569 = vrot.lane.b32.xlu1 %v422_v48, %s6687_s13  ;;  %340 = vst.msk [vmem:[#allocation3 + $0x8] sm:$0xff] %vm36_vm0, %v276_v24  ;;  %v7346_v23 = vld [vmem:[#allocation2 + $0xf8] sm:$0xff] }
  0xa0   :  { %573 = vrot.lane.b32.xlu0 %v424_v49, %s6687_s13  ;;  %347 = vst.msk [vmem:[#allocation3 + $0x40] sm:$0xff] %vm36_vm0, %v283_v26  ;;  %v446_v49 = vld [vmem:[#allocation2 + $0x231] sm:$0xff] }
  0xa1   :  { %565 = vrot.lane.b32.xlu2 %v420_v50, %s6687_s13  ;;  %342 = vst.msk [vmem:[#allocation3 + $0x18] sm:$0xff] %vm36_vm0, %v7191_v27  ;;  %v448_v50 = vld [vmem:[#allocation2 + $0x249] sm:$0xff]  ;;  %v7348_v24 = vld [vmem:[#allocation2 + $0x138] sm:$0xff] }
  0xa2   :  { %258 = vst.msk [vmem:[#allocation2 + $0x279] sm:$0xff] %vm36_vm0, %v193_v28  ;;  %v7358_v28 = vld [vmem:[#allocation2 + $0x108] sm:$0xff] }
  0xa3   :  { %260 = vst.msk [vmem:[#allocation2 + $0x291] sm:$0xff] %vm36_vm0, %v195_v31 }
  0xa4   :  { %256 = vst.msk [vmem:[#allocation2 + $0x261] sm:$0xff] %vm36_vm0, %v191_v33  ;;  %v451_v60 = vld [vmem:[#allocation2 + $0x271] sm:$0xff]  ;;  %v7365_v33 = vld [vmem:[#allocation2 + $0x120] sm:$0xff] }
  0xa5   :  { %345 = vst.msk [vmem:[#allocation3 + $0x30] sm:$0xff] %vm36_vm0, %v7210_v34  ;;  %v447_v62 = vld [vmem:[#allocation2 + $0x241] sm:$0xff] }
  0xa6   :  { %350 = vst.msk [vmem:[#allocation3 + $0x58] sm:$0xff] %vm36_vm0, %v7212_v35 }
  0xa7   :  { %575 = vrot.lane.b32.xlu1 %v425_v53, %s6687_s13  ;;  %346 = vst.msk [vmem:[#allocation3 + $0x38] sm:$0xff] %vm36_vm0, %v7214_v36  ;;  %v197_v53 = vld [vmem:[%s10258_s0 + $0x198] sm:$0xff] }
  0xa8   :  { %579 = vrot.lane.b32.xlu0 %v427_v54, %s6687_s13  ;;  %261 = vst.msk [vmem:[#allocation2 + $0x2a1] sm:$0xff] %vm36_vm0, %v196_v37  ;;  %v7266_v54 = vld [vmem:[#allocation2 + $0x90] sm:$0xff]  ;;  %v7367_v37 = vld [vmem:[#allocation2 + $0x158] sm:$0xff] }
  0xa9   :  { %571 = vrot.lane.b32.xlu2 %v423_v56, %s6687_s13  ;;  %263 = vst.msk [vmem:[#allocation2 + $0x2b9] sm:$0xff] %vm36_vm0, %v198_v41  ;;  %v7270_v56 = vld [vmem:[#allocation2 + $0x98] sm:$0xff] }
  0xaa   :  { %259 = vst.msk [vmem:[#allocation2 + $0x289] sm:$0xff] %vm36_vm0, %v194_v43 }
  0xab   :  { %348 = vst.msk [vmem:[#allocation3 + $0x48] sm:$0xff] %vm36_vm0, %v7238_v44 }
  0xac   :  { %353 = vst.msk [vmem:[#allocation3 + $0x70] sm:$0xff] %vm36_vm0, %v7240_v45 }
  0xad   :  { %349 = vst.msk [vmem:[#allocation3 + $0x50] sm:$0xff] %vm36_vm0, %v7242_v46 }
  0xae   :  { %264 = vst.msk [vmem:[#allocation2 + $0x2c1] sm:$0xff] %vm36_vm0, %v199_v47 }
  0xaf   :  { %581 = vrot.lane.b32.xlu1 %v428_v58, %s6687_s13  ;;  %266 = vst.msk [vmem:[#allocation2 + $0x2d9] sm:$0xff] %vm36_vm0, %v201_v51 }
  0xb0   :  { %585 = vrot.lane.b32.xlu0 %v430_v59, %s6687_s13  ;;  %262 = vst.msk [vmem:[#allocation2 + $0x2a9] sm:$0xff] %vm36_vm0, %v197_v53  ;;  %v449_v59 = vld [vmem:[#allocation2 + $0x259] sm:$0xff] }
  0xb1   :  { %577 = vrot.lane.b32.xlu2 %v426_v61, %s6687_s13  ;;  %351 = vst.msk [vmem:[#allocation3 + $0x60] sm:$0xff] %vm36_vm0, %v7266_v54  ;;  %v204_v61 = vld [vmem:[%s10258_s0 + $0x1d0] sm:$0xff] }
  0xb2   :  { %356 = vst.msk [vmem:[#allocation3 + $0x88] sm:$0xff] %vm36_vm0, %v7268_v55  ;;  %v453_v21 = vld [vmem:[#allocation2 + $0x289] sm:$0xff] }
  0xb3   :  { %352 = vst.msk [vmem:[#allocation3 + $0x68] sm:$0xff] %vm36_vm0, %v7270_v56 }
  0xb4   :  { %267 = vst.msk [vmem:[#allocation2 + $0x2e9] sm:$0xff] %vm36_vm0, %v202_v57 }
  0xb5   :  { %269 = vst.msk [vmem:[#allocation2 + $0x301] sm:$0xff] %vm36_vm0, %v204_v61  ;;  %v7400_v61 = vld [vmem:[#allocation2 + $0x1d0] sm:$0xff] }
  0xb6   :  { %265 = vst.msk [vmem:[#allocation2 + $0x2d1] sm:$0xff] %vm36_vm0, %v200_v63  ;;  %v460_v31 = vld [vmem:[#allocation2 + $0x2d9] sm:$0xff] }
  0xb7   :  { %587 = vrot.lane.b32.xlu1 %v431_v1, %s6687_s13  ;;  %v7294_v1 = vld [vmem:[#allocation2 + $0xb0] sm:$0xff]  ;;  %355 = vst.msk [vmem:[#allocation3 + $0x80] sm:$0xff] %vm36_vm0, %v7306_v5 }
  0xb8   :  { %591 = vrot.lane.b32.xlu0 %v433_v2, %s6687_s13  ;;  %v7296_v2 = vld [vmem:[#allocation2 + $0xf0] sm:$0xff]  ;;  %354 = vst.msk [vmem:[#allocation3 + $0x78] sm:$0xff] %vm36_vm0, %v7294_v1 }
  0xb9   :  { %583 = vrot.lane.b32.xlu2 %v429_v4, %s6687_s13  ;;  %359 = vst.msk [vmem:[#allocation3 + $0xa0] sm:$0xff] %vm36_vm0, %v7296_v2 }
  0xba   :  { %270 = vst.msk [vmem:[#allocation2 + $0x309] sm:$0xff] %vm36_vm0, %v205_v7  ;;  %v790_v7 = vld [vmem:[#allocation2 + $0x1a] sm:$0xff] }
  0xbb   :  { %272 = vst.msk [vmem:[#allocation2 + $0x321] sm:$0xff] %vm36_vm0, %v207_v10  ;;  %v7416_v10 = vld [vmem:[#allocation2 + $0x1f8] sm:$0xff] }
  0xbc   :  { %357 = vst.msk [vmem:[#allocation3 + $0x90] sm:$0xff] %vm36_vm0, %v7320_v12  ;;  %v463_v43 = vld [vmem:[#allocation2 + $0x301] sm:$0xff] }
  0xbd   :  { %362 = vst.msk [vmem:[#allocation3 + $0xb8] sm:$0xff] %vm36_vm0, %v7322_v13  ;;  %v459_v47 = vld [vmem:[#allocation2 + $0x2d1] sm:$0xff] }
  0xbe   :  { %358 = vst.msk [vmem:[#allocation3 + $0x98] sm:$0xff] %vm36_vm0, %v7332_v16 }
  0xbf   :  { %593 = vrot.lane.b32.xlu1 %v434_v8, %s6687_s13  ;;  %v452_v8 = vld [vmem:[#allocation2 + $0x279] sm:$0xff]  ;;  %360 = vst.msk [vmem:[#allocation3 + $0xa8] sm:$0xff] %vm36_vm0, %v7346_v23 }
  0xc0   :  { %597 = vrot.lane.b32.xlu0 %v436_v9, %s6687_s13  ;;  %v454_v9 = vld [vmem:[#allocation2 + $0x291] sm:$0xff]  ;;  %365 = vst.msk [vmem:[#allocation3 + $0xd0] sm:$0xff] %vm36_vm0, %v7348_v24 }
  0xc1   :  { %589 = vrot.lane.b32.xlu2 %v432_v11, %s6687_s13  ;;  %v450_v11 = vld [vmem:[#allocation2 + $0x261] sm:$0xff]  ;;  %361 = vst.msk [vmem:[#allocation3 + $0xb0] sm:$0xff] %vm36_vm0, %v7358_v28  ;;  %v464_v57 = vld [vmem:[#allocation2 + $0x309] sm:$0xff] }
  0xc2   :  { %363 = vst.msk [vmem:[#allocation3 + $0xc0] sm:$0xff] %vm36_vm0, %v7365_v33 }
  0xc3   :  { %368 = vst.msk [vmem:[#allocation3 + $0xe8] sm:$0xff] %vm36_vm0, %v7367_v37 }
  0xc4   :  { %v536_v19 = vpop.permute.xlu1 %535  ;;  %374 = vst.msk [vmem:[#allocation3 + $0x118] sm:$0xff] %vm36_vm0, %v7400_v61 }
  0xc5   :  { %726 = vst.msk [vmem:[#allocation3 + $0x10] sm:$0xff] %vm723_vm2, %v536_v19  ;;  %v534_v25 = vpop.permute.xlu0 %533  ;;  %v455_v19 = vld [vmem:[#allocation2 + $0x2a1] sm:$0xff] }
  0xc6   :  { %725 = vst.msk [vmem:[#allocation3 + $0x8] sm:$0xff] %vm723_vm2, %v534_v25 }
  0xc7   :  { %599 = vrot.lane.b32.xlu1 %v437_v18, %s6687_s13  ;;  %v203_v18 = vld [vmem:[%s10258_s0 + $0x1c8] sm:$0xff]  ;;  %377 = vst.msk [vmem:[#allocation3 + $0x130] sm:$0xff] %vm36_vm0, %v7416_v10 }
  0xc8   :  { %603 = vrot.lane.b32.xlu0 %v439_v20, %s6687_s13  ;;  %v457_v20 = vld [vmem:[#allocation2 + $0x2b9] sm:$0xff]  ;;  %268 = vst.msk [vmem:[#allocation2 + $0x2f1] sm:$0xff] %vm36_vm0, %v203_v18  ;;  %v791_v18 = vld [vmem:[#allocation2 + $0x22] sm:$0xff] }
  0xc9   :  { %595 = vrot.lane.b32.xlu2 %v435_v22, %s6687_s13  ;;  %v206_v22 = vld [vmem:[%s10258_s0 + $0x1e0] sm:$0xff] }
  0xca   :  { %271 = vst.msk [vmem:[#allocation2 + $0x319] sm:$0xff] %vm36_vm0, %v206_v22  ;;  %v7433_v22 = vld [vmem:[#allocation2 + $0x218] sm:$0xff] }
  0xcb   :  { %380 = vst.msk [vmem:[#allocation3 + $0x148] sm:$0xff] %vm36_vm0, %v7433_v22 }
  0xcf   :  { %605 = vrot.lane.b32.xlu1 %v440_v29, %s6687_s13 }
  0xd0   :  { %609 = vrot.lane.b32.xlu0 %v442_v30, %s6687_s13  ;;  %v458_v30 = vld [vmem:[#allocation2 + $0x2c1] sm:$0xff] }
  0xd1   :  { %601 = vrot.lane.b32.xlu2 %v438_v32, %s6687_s13  ;;  %v456_v32 = vld [vmem:[#allocation2 + $0x2a9] sm:$0xff] }
  0xd3   :  { %v540_v38 = vpop.permute.xlu2 %539 }
  0xd4   :  { %728 = vst.msk [vmem:[#allocation3 + $0x20] sm:$0xff] %vm723_vm2, %v540_v38 }
  0xd7   :  { %611 = vrot.lane.b32.xlu1 %v443_v39, %s6687_s13 }
  0xd8   :  { %615 = vrot.lane.b32.xlu0 %v445_v40, %s6687_s13  ;;  %v7376_v40 = vld [vmem:[#allocation2 + $0x128] sm:$0xff] }
  0xd9   :  { %607 = vrot.lane.b32.xlu2 %v441_v42, %s6687_s13  ;;  %v461_v42 = vld [vmem:[#allocation2 + $0x2e9] sm:$0xff]  ;;  %364 = vst.msk [vmem:[#allocation3 + $0xc8] sm:$0xff] %vm36_vm0, %v7376_v40 }
  0xdb   :  { %v542_v48 = vpop.permute.xlu2 %541 }
  0xdc   :  { %729 = vst.msk [vmem:[#allocation3 + $0x28] sm:$0xff] %vm723_vm2, %v542_v48  ;;  %v7383_v48 = vld [vmem:[#allocation2 + $0x140] sm:$0xff] }
  0xdd   :  { %366 = vst.msk [vmem:[#allocation3 + $0xd8] sm:$0xff] %vm36_vm0, %v7383_v48 }
  0xdf   :  { %617 = vrot.lane.b32.xlu1 %v446_v49, %s6687_s13  ;;  %v307_v49 = vld [vmem:[#allocation2 + $0x1b0] sm:$0xff] }
  0xe0   :  { %621 = vrot.lane.b32.xlu0 %v448_v50, %s6687_s13  ;;  %371 = vst.msk [vmem:[#allocation3 + $0x100] sm:$0xff] %vm36_vm0, %v307_v49 }
  0xe1   :  { %613 = vrot.lane.b32.xlu2 %v444_v52, %s6687_s13  ;;  %v7391_v52 = vld [vmem:[#allocation2 + $0x150] sm:$0xff] }
  0xe2   :  { %367 = vst.msk [vmem:[#allocation3 + $0xe0] sm:$0xff] %vm36_vm0, %v7391_v52 }
  0xe3   :  { %v548_v58 = vpop.permute.xlu2 %547 }
  0xe4   :  { %732 = vst.msk [vmem:[#allocation3 + $0x40] sm:$0xff] %vm723_vm2, %v548_v58  ;;  %v466_v58 = vld [vmem:[#allocation2 + $0x321] sm:$0xff] }
  0xe7   :  { %623 = vrot.lane.b32.xlu1 %v449_v59, %s6687_s13  ;;  %v462_v59 = vld [vmem:[#allocation2 + $0x2f1] sm:$0xff] }
  0xe8   :  { %627 = vrot.lane.b32.xlu0 %v451_v60, %s6687_s13  ;;  %v7398_v60 = vld [vmem:[#allocation2 + $0x168] sm:$0xff] }
  0xe9   :  { %v538_v3 = vpop.permute.xlu1 %537  ;;  %619 = vrot.lane.b32.xlu2 %v447_v62, %s6687_s13  ;;  %369 = vst.msk [vmem:[#allocation3 + $0xf0] sm:$0xff] %vm36_vm0, %v7398_v60 }
  0xea   :  { %727 = vst.msk [vmem:[#allocation3 + $0x18] sm:$0xff] %vm723_vm2, %v538_v3  ;;  %v544_v4 = vpop.permute.xlu0 %543  ;;  %v7409_v3 = vld [vmem:[#allocation2 + $0x170] sm:$0xff] }
  0xeb   :  { %730 = vst.msk [vmem:[#allocation3 + $0x30] sm:$0xff] %vm723_vm2, %v544_v4  ;;  %v554_v6 = vpop.permute.xlu2 %553 }
  0xec   :  { %735 = vst.msk [vmem:[#allocation3 + $0x58] sm:$0xff] %vm723_vm2, %v554_v6  ;;  %v788_v6 = vld [vmem:[#allocation2 + $0x2] sm:$0xff] }
  0xed   :  { %370 = vst.msk [vmem:[#allocation3 + $0xf8] sm:$0xff] %vm36_vm0, %v7409_v3 }
  0xef   :  { %629 = vrot.lane.b32.xlu1 %v452_v8, %s6687_s13  ;;  %v465_v8 = vld [vmem:[#allocation2 + $0x319] sm:$0xff] }
  0xf0   :  { %633 = vrot.lane.b32.xlu0 %v454_v9, %s6687_s13  ;;  %v308_v9 = vld [vmem:[#allocation2 + $0x1b8] sm:$0xff] }
  0xf1   :  { %v546_v14 = vpop.permute.xlu1 %545  ;;  %625 = vrot.lane.b32.xlu2 %v450_v11, %s6687_s13  ;;  %372 = vst.msk [vmem:[#allocation3 + $0x108] sm:$0xff] %vm36_vm0, %v308_v9  ;;  %v7485_v9 = vld [vmem:[#allocation2 + $0x248] sm:$0xff] }
  0xf2   :  { %731 = vst.msk [vmem:[#allocation3 + $0x38] sm:$0xff] %vm723_vm2, %v546_v14  ;;  %v550_v15 = vpop.permute.xlu0 %549 }
  0xf3   :  { %733 = vst.msk [vmem:[#allocation3 + $0x48] sm:$0xff] %vm723_vm2, %v550_v15  ;;  %v560_v17 = vpop.permute.xlu2 %559  ;;  %v7424_v15 = vld [vmem:[#allocation2 + $0x1c8] sm:$0xff] }
  0xf4   :  { %738 = vst.msk [vmem:[#allocation3 + $0x70] sm:$0xff] %vm723_vm2, %v560_v17 }
  0xf5   :  { %373 = vst.msk [vmem:[#allocation3 + $0x110] sm:$0xff] %vm36_vm0, %v7424_v15 }
  0xf6   :  { %384 = vst.msk [vmem:[#allocation3 + $0x168] sm:$0xff] %vm36_vm0, %v7485_v9 }
  0xf7   :  { %635 = vrot.lane.b32.xlu1 %v455_v19, %s6687_s13  ;;  %v793_v19 = vld [vmem:[#allocation2 + $0x3a] sm:$0xff] }
  0xf8   :  { %639 = vrot.lane.b32.xlu0 %v457_v20, %s6687_s13  ;;  %v789_v20 = vld [vmem:[#allocation2 + $0xa] sm:$0xff] }
  0xf9   :  { %v552_v25 = vpop.permute.xlu1 %551  ;;  %631 = vrot.lane.b32.xlu2 %v453_v21, %s6687_s13  ;;  %v7431_v21 = vld [vmem:[#allocation2 + $0x1e0] sm:$0xff] }
  0xfa   :  { %734 = vst.msk [vmem:[#allocation3 + $0x50] sm:$0xff] %vm723_vm2, %v552_v25  ;;  %v556_v26 = vpop.permute.xlu0 %555 }
  0xfb   :  { %736 = vst.msk [vmem:[#allocation3 + $0x60] sm:$0xff] %vm723_vm2, %v556_v26  ;;  %v566_v29 = vpop.permute.xlu2 %565 }
  0xfc   :  { %741 = vst.msk [vmem:[#allocation3 + $0x88] sm:$0xff] %vm723_vm2, %v566_v29  ;;  %v7442_v29 = vld [vmem:[#allocation2 + $0x1e8] sm:$0xff] }
  0xfd   :  { %375 = vst.msk [vmem:[#allocation3 + $0x120] sm:$0xff] %vm36_vm0, %v7431_v21 }
  0xfe   :  { %376 = vst.msk [vmem:[#allocation3 + $0x128] sm:$0xff] %vm36_vm0, %v7442_v29 }
  0xff   :  { %641 = vrot.lane.b32.xlu1 %v458_v30, %s6687_s13 }
 0x100   :  { %645 = vrot.lane.b32.xlu0 %v460_v31, %s6687_s13  ;;  %v794_v31 = vld [vmem:[#allocation2 + $0x4a] sm:$0xff] }
 0x101   :  { %v558_v38 = vpop.permute.xlu1 %557  ;;  %637 = vrot.lane.b32.xlu2 %v456_v32, %s6687_s13  ;;  %v796_v32 = vld [vmem:[#allocation2 + $0x62] sm:$0xff] }
 0x102   :  { %737 = vst.msk [vmem:[#allocation3 + $0x68] sm:$0xff] %vm723_vm2, %v558_v38  ;;  %v562_v39 = vpop.permute.xlu0 %561  ;;  %v792_v38 = vld [vmem:[#allocation2 + $0x32] sm:$0xff] }
 0x103   :  { %739 = vst.msk [vmem:[#allocation3 + $0x78] sm:$0xff] %vm723_vm2, %v562_v39  ;;  %v572_v41 = vpop.permute.xlu2 %571  ;;  %v7449_v39 = vld [vmem:[#allocation2 + $0x200] sm:$0xff] }
 0x104   :  { %744 = vst.msk [vmem:[#allocation3 + $0xa0] sm:$0xff] %vm723_vm2, %v572_v41  ;;  %v7451_v41 = vld [vmem:[#allocation2 + $0x240] sm:$0xff] }
 0x105   :  { %378 = vst.msk [vmem:[#allocation3 + $0x138] sm:$0xff] %vm36_vm0, %v7449_v39 }
 0x106   :  { %383 = vst.msk [vmem:[#allocation3 + $0x160] sm:$0xff] %vm36_vm0, %v7451_v41 }
 0x107   :  { %647 = vrot.lane.b32.xlu1 %v461_v42, %s6687_s13 }
 0x108   :  { %651 = vrot.lane.b32.xlu0 %v463_v43, %s6687_s13 }
 0x109   :  { %v564_v50 = vpop.permute.xlu1 %563  ;;  %643 = vrot.lane.b32.xlu2 %v459_v47, %s6687_s13  ;;  %v7460_v47 = vld [vmem:[#allocation2 + $0x210] sm:$0xff] }
 0x10a   :  { %740 = vst.msk [vmem:[#allocation3 + $0x80] sm:$0xff] %vm723_vm2, %v564_v50  ;;  %v568_v51 = vpop.permute.xlu0 %567  ;;  %v797_v50 = vld [vmem:[#allocation2 + $0x6a] sm:$0xff] }
 0x10b   :  { %742 = vst.msk [vmem:[#allocation3 + $0x90] sm:$0xff] %vm723_vm2, %v568_v51  ;;  %v578_v53 = vpop.permute.xlu2 %577  ;;  %v799_v51 = vld [vmem:[#allocation2 + $0x82] sm:$0xff] }
 0x10c   :  { %747 = vst.msk [vmem:[#allocation3 + $0xb8] sm:$0xff] %vm723_vm2, %v578_v53  ;;  %v795_v53 = vld [vmem:[#allocation2 + $0x52] sm:$0xff] }
 0x10d   :  { %379 = vst.msk [vmem:[#allocation3 + $0x140] sm:$0xff] %vm36_vm0, %v7460_v47 }
 0x10f   :  { %653 = vrot.lane.b32.xlu1 %v464_v57, %s6687_s13  ;;  %v7467_v57 = vld [vmem:[#allocation2 + $0x228] sm:$0xff] }
 0x110   :  { %657 = vrot.lane.b32.xlu0 %v466_v58, %s6687_s13  ;;  %v7469_v58 = vld [vmem:[#allocation2 + $0x260] sm:$0xff]  ;;  %381 = vst.msk [vmem:[#allocation3 + $0x150] sm:$0xff] %vm36_vm0, %v7467_v57 }
 0x111   :  { %v570_v62 = vpop.permute.xlu1 %569  ;;  %649 = vrot.lane.b32.xlu2 %v462_v59, %s6687_s13  ;;  %386 = vst.msk [vmem:[#allocation3 + $0x178] sm:$0xff] %vm36_vm0, %v7469_v58 }
 0x112   :  { %743 = vst.msk [vmem:[#allocation3 + $0x98] sm:$0xff] %vm723_vm2, %v570_v62  ;;  %v574_v63 = vpop.permute.xlu0 %573 }
 0x113   :  { %745 = vst.msk [vmem:[#allocation3 + $0xa8] sm:$0xff] %vm723_vm2, %v574_v63  ;;  %v584_v4 = vpop.permute.xlu2 %583  ;;  %v7478_v63 = vld [vmem:[#allocation2 + $0x230] sm:$0xff] }
 0x114   :  { %750 = vst.msk [vmem:[#allocation3 + $0xd0] sm:$0xff] %vm723_vm2, %v584_v4 }
 0x115   :  { %382 = vst.msk [vmem:[#allocation3 + $0x158] sm:$0xff] %vm36_vm0, %v7478_v63 }
 0x117   :  { %916 = vrot.lane.b32.xlu1 %v788_v6, %s6688_s20  ;;  %v800_v6 = vld [vmem:[#allocation2 + $0x92] sm:$0xff] }
 0x118   :  { %920 = vrot.lane.b32.xlu0 %v790_v7, %s6688_s20  ;;  %v802_v7 = vld [vmem:[#allocation2 + $0xaa] sm:$0xff] }
 0x119   :  { %v576_v11 = vpop.permute.xlu1 %575  ;;  %655 = vrot.lane.b32.xlu2 %v465_v8, %s6687_s13  ;;  %v798_v8 = vld [vmem:[#allocation2 + $0x7a] sm:$0xff]  ;;  %s6689_s13 = smov 9  }
 0x11a   :  { %746 = vst.msk [vmem:[#allocation3 + $0xb0] sm:$0xff] %vm723_vm2, %v576_v11  ;;  %v580_v14 = vpop.permute.xlu0 %579  ;;  %v7487_v11 = vld [vmem:[#allocation2 + $0x288] sm:$0xff] }
 0x11b   :  { %748 = vst.msk [vmem:[#allocation3 + $0xc0] sm:$0xff] %vm723_vm2, %v580_v14  ;;  %v590_v17 = vpop.permute.xlu2 %589 }
 0x11c   :  { %753 = vst.msk [vmem:[#allocation3 + $0xe8] sm:$0xff] %vm723_vm2, %v590_v17 }
 0x11d   :  { %389 = vst.msk [vmem:[#allocation3 + $0x190] sm:$0xff] %vm36_vm0, %v7487_v11 }
 0x11f   :  { %922 = vrot.lane.b32.xlu1 %v791_v18, %s6688_s20  ;;  %v7496_v18 = vld [vmem:[#allocation2 + $0x258] sm:$0xff] }
 0x120   :  { %926 = vrot.lane.b32.xlu0 %v793_v19, %s6688_s20  ;;  %385 = vst.msk [vmem:[#allocation3 + $0x170] sm:$0xff] %vm36_vm0, %v7496_v18 }
 0x121   :  { %v582_v25 = vpop.permute.xlu1 %581  ;;  %918 = vrot.lane.b32.xlu2 %v789_v20, %s6688_s20  ;;  %v803_v20 = vld [vmem:[#allocation2 + $0xb2] sm:$0xff] }
 0x122   :  { %749 = vst.msk [vmem:[#allocation3 + $0xc8] sm:$0xff] %vm723_vm2, %v582_v25  ;;  %v586_v26 = vpop.permute.xlu0 %585  ;;  %v805_v25 = vld [vmem:[#allocation2 + $0xca] sm:$0xff] }
 0x123   :  { %751 = vst.msk [vmem:[#allocation3 + $0xd8] sm:$0xff] %vm723_vm2, %v586_v26  ;;  %v596_v30 = vpop.permute.xlu2 %595  ;;  %v801_v26 = vld [vmem:[#allocation2 + $0x9a] sm:$0xff] }
 0x124   :  { %756 = vst.msk [vmem:[#allocation3 + $0x100] sm:$0xff] %vm723_vm2, %v596_v30  ;;  %v7503_v30 = vld [vmem:[#allocation2 + $0x270] sm:$0xff] }
 0x125   :  { %387 = vst.msk [vmem:[#allocation3 + $0x180] sm:$0xff] %vm36_vm0, %v7503_v30 }
 0x127   :  { %928 = vrot.lane.b32.xlu1 %v794_v31, %s6688_s20  ;;  %v7505_v31 = vld [vmem:[#allocation2 + $0x2a8] sm:$0xff] }
 0x128   :  { %932 = vrot.lane.b32.xlu0 %v796_v32, %s6688_s20  ;;  %392 = vst.msk [vmem:[#allocation3 + $0x1a8] sm:$0xff] %vm36_vm0, %v7505_v31 }
 0x129   :  { %v588_v42 = vpop.permute.xlu1 %587  ;;  %924 = vrot.lane.b32.xlu2 %v792_v38, %s6688_s20 }
 0x12a   :  { %752 = vst.msk [vmem:[#allocation3 + $0xe0] sm:$0xff] %vm723_vm2, %v588_v42  ;;  %v592_v43 = vpop.permute.xlu0 %591  ;;  %v7514_v42 = vld [vmem:[#allocation2 + $0x278] sm:$0xff] }
 0x12b   :  { %754 = vst.msk [vmem:[#allocation3 + $0xf0] sm:$0xff] %vm723_vm2, %v592_v43  ;;  %v602_v49 = vpop.permute.xlu2 %601 }
 0x12c   :  { %759 = vst.msk [vmem:[#allocation3 + $0x118] sm:$0xff] %vm723_vm2, %v602_v49  ;;  %v806_v49 = vld [vmem:[#allocation2 + $0xda] sm:$0xff] }
 0x12d   :  { %388 = vst.msk [vmem:[#allocation3 + $0x188] sm:$0xff] %vm36_vm0, %v7514_v42 }
 0x12f   :  { %934 = vrot.lane.b32.xlu1 %v797_v50, %s6688_s20  ;;  %v808_v50 = vld [vmem:[#allocation2 + $0xf2] sm:$0xff] }
 0x130   :  { %938 = vrot.lane.b32.xlu0 %v799_v51, %s6688_s20  ;;  %v804_v51 = vld [vmem:[#allocation2 + $0xc2] sm:$0xff] }
 0x131   :  { %v594_v59 = vpop.permute.xlu1 %593  ;;  %930 = vrot.lane.b32.xlu2 %v795_v53, %s6688_s20  ;;  %v7521_v53 = vld [vmem:[#allocation2 + $0x290] sm:$0xff] }
 0x132   :  { %755 = vst.msk [vmem:[#allocation3 + $0xf8] sm:$0xff] %vm723_vm2, %v594_v59  ;;  %v598_v62 = vpop.permute.xlu0 %597  ;;  %v7523_v59 = vld [vmem:[#allocation2 + $0x2d0] sm:$0xff] }
 0x133   :  { %757 = vst.msk [vmem:[#allocation3 + $0x108] sm:$0xff] %vm723_vm2, %v598_v62  ;;  %v608_v4 = vpop.permute.xlu2 %607 }
 0x134   :  { %762 = vst.msk [vmem:[#allocation3 + $0x130] sm:$0xff] %vm723_vm2, %v608_v4 }
 0x135   :  { %390 = vst.msk [vmem:[#allocation3 + $0x198] sm:$0xff] %vm36_vm0, %v7521_v53 }
 0x136   :  { %395 = vst.msk [vmem:[#allocation3 + $0x1c0] sm:$0xff] %vm36_vm0, %v7523_v59 }
 0x137   :  { %940 = vrot.lane.b32.xlu1 %v800_v6, %s6688_s20  ;;  %v7532_v6 = vld [vmem:[#allocation2 + $0x2a0] sm:$0xff] }
 0x138   :  { %944 = vrot.lane.b32.xlu0 %v802_v7, %s6688_s20  ;;  %391 = vst.msk [vmem:[#allocation3 + $0x1a0] sm:$0xff] %vm36_vm0, %v7532_v6 }
 0x139   :  { %v600_v14 = vpop.permute.xlu1 %599  ;;  %936 = vrot.lane.b32.xlu2 %v798_v8, %s6688_s20  ;;  %v809_v8 = vld [vmem:[#allocation2 + $0xfa] sm:$0xff] }
 0x13a   :  { %758 = vst.msk [vmem:[#allocation3 + $0x110] sm:$0xff] %vm723_vm2, %v600_v14  ;;  %v604_v17 = vpop.permute.xlu0 %603  ;;  %v811_v14 = vld [vmem:[#allocation2 + $0x112] sm:$0xff] }
 0x13b   :  { %760 = vst.msk [vmem:[#allocation3 + $0x120] sm:$0xff] %vm723_vm2, %v604_v17  ;;  %v614_v19 = vpop.permute.xlu2 %613  ;;  %v807_v17 = vld [vmem:[#allocation2 + $0xe2] sm:$0xff] }
 0x13c   :  { %765 = vst.msk [vmem:[#allocation3 + $0x148] sm:$0xff] %vm723_vm2, %v614_v19  ;;  %v7539_v19 = vld [vmem:[#allocation2 + $0x2b8] sm:$0xff] }
 0x13d   :  { %393 = vst.msk [vmem:[#allocation3 + $0x1b0] sm:$0xff] %vm36_vm0, %v7539_v19 }
 0x13f   :  { %946 = vrot.lane.b32.xlu1 %v803_v20, %s6688_s20  ;;  %v7541_v20 = vld [vmem:[#allocation2 + $0x2f0] sm:$0xff] }
 0x140   :  { %950 = vrot.lane.b32.xlu0 %v805_v25, %s6688_s20  ;;  %398 = vst.msk [vmem:[#allocation3 + $0x1d8] sm:$0xff] %vm36_vm0, %v7541_v20 }
 0x141   :  { %v606_v32 = vpop.permute.xlu1 %605  ;;  %942 = vrot.lane.b32.xlu2 %v801_v26, %s6688_s20 }
 0x142   :  { %761 = vst.msk [vmem:[#allocation3 + $0x128] sm:$0xff] %vm723_vm2, %v606_v32  ;;  %v610_v38 = vpop.permute.xlu0 %609  ;;  %v7550_v32 = vld [vmem:[#allocation2 + $0x2c0] sm:$0xff] }
 0x143   :  { %763 = vst.msk [vmem:[#allocation3 + $0x138] sm:$0xff] %vm723_vm2, %v610_v38  ;;  %v620_v43 = vpop.permute.xlu2 %619 }
 0x144   :  { %768 = vst.msk [vmem:[#allocation3 + $0x160] sm:$0xff] %vm723_vm2, %v620_v43  ;;  %v812_v43 = vld [vmem:[#allocation2 + $0x122] sm:$0xff] }
 0x145   :  { %394 = vst.msk [vmem:[#allocation3 + $0x1b8] sm:$0xff] %vm36_vm0, %v7550_v32 }
 0x147   :  { %952 = vrot.lane.b32.xlu1 %v806_v49, %s6688_s20  ;;  %v814_v49 = vld [vmem:[#allocation2 + $0x13a] sm:$0xff] }
 0x148   :  { %956 = vrot.lane.b32.xlu0 %v808_v50, %s6688_s20  ;;  %v810_v50 = vld [vmem:[#allocation2 + $0x10a] sm:$0xff] }
 0x149   :  { %v612_v62 = vpop.permute.xlu1 %611  ;;  %948 = vrot.lane.b32.xlu2 %v804_v51, %s6688_s20  ;;  %v7557_v51 = vld [vmem:[#allocation2 + $0x2d8] sm:$0xff] }
 0x14a   :  { %764 = vst.msk [vmem:[#allocation3 + $0x140] sm:$0xff] %vm723_vm2, %v612_v62  ;;  %v616_v4 = vpop.permute.xlu0 %615  ;;  %v7559_v62 = vld [vmem:[#allocation2 + $0x318] sm:$0xff] }
 0x14b   :  { %766 = vst.msk [vmem:[#allocation3 + $0x150] sm:$0xff] %vm723_vm2, %v616_v4  ;;  %v626_v7 = vpop.permute.xlu2 %625 }
 0x14c   :  { %771 = vst.msk [vmem:[#allocation3 + $0x178] sm:$0xff] %vm723_vm2, %v626_v7 }
 0x14d   :  { %10272 = vst [vmem:[#allocation11_spill] sm:$0xff] %v7559_v62 }
 0x14e   :  { %396 = vst.msk [vmem:[#allocation3 + $0x1c8] sm:$0xff] %vm36_vm0, %v7557_v51 }
 0x14f   :  { %958 = vrot.lane.b32.xlu1 %v809_v8, %s6688_s20  ;;  %401 = vst.msk [vmem:[#allocation3 + $0x1f0] sm:$0xff] %vm36_vm0, %v7559_v62  ;;  %v7568_v8 = vld [vmem:[#allocation2 + $0x2e8] sm:$0xff]  ;;  %v826_v62 = vld [vmem:[#allocation2 + $0x1fa] sm:$0xff] }
 0x150   :  { %962 = vrot.lane.b32.xlu0 %v811_v14, %s6688_s20  ;;  %397 = vst.msk [vmem:[#allocation3 + $0x1d0] sm:$0xff] %vm36_vm0, %v7568_v8 }
 0x151   :  { %v618_v25 = vpop.permute.xlu1 %617  ;;  %954 = vrot.lane.b32.xlu2 %v807_v17, %s6688_s20  ;;  %v815_v17 = vld [vmem:[#allocation2 + $0x142] sm:$0xff] }
 0x152   :  { %767 = vst.msk [vmem:[#allocation3 + $0x158] sm:$0xff] %vm723_vm2, %v618_v25  ;;  %v622_v26 = vpop.permute.xlu0 %621  ;;  %v817_v25 = vld [vmem:[#allocation2 + $0x15a] sm:$0xff] }
 0x153   :  { %769 = vst.msk [vmem:[#allocation3 + $0x168] sm:$0xff] %vm723_vm2, %v622_v26  ;;  %v632_v38 = vpop.permute.xlu2 %631  ;;  %v813_v26 = vld [vmem:[#allocation2 + $0x12a] sm:$0xff] }
 0x154   :  { %774 = vst.msk [vmem:[#allocation3 + $0x190] sm:$0xff] %vm723_vm2, %v632_v38  ;;  %v7575_v38 = vld [vmem:[#allocation2 + $0x300] sm:$0xff] }
 0x155   :  { %399 = vst.msk [vmem:[#allocation3 + $0x1e0] sm:$0xff] %vm36_vm0, %v7575_v38 }
 0x157   :  { %964 = vrot.lane.b32.xlu1 %v812_v43, %s6688_s20  ;;  %v7577_v43 = vld [vmem:[#allocation2 + $0x308] sm:$0xff] }
 0x158   :  { %968 = vrot.lane.b32.xlu0 %v814_v49, %s6688_s20  ;;  %400 = vst.msk [vmem:[#allocation3 + $0x1e8] sm:$0xff] %vm36_vm0, %v7577_v43 }
 0x159   :  { %v624_v4 = vpop.permute.xlu1 %623  ;;  %960 = vrot.lane.b32.xlu2 %v810_v50, %s6688_s20 }
 0x15a   :  { %770 = vst.msk [vmem:[#allocation3 + $0x170] sm:$0xff] %vm723_vm2, %v624_v4  ;;  %v628_v7 = vpop.permute.xlu0 %627 }
 0x15b   :  { %772 = vst.msk [vmem:[#allocation3 + $0x180] sm:$0xff] %vm723_vm2, %v628_v7  ;;  %v638_v14 = vpop.permute.xlu2 %637  ;;  %v818_v7 = vld [vmem:[#allocation2 + $0x16a] sm:$0xff] }
 0x15c   :  { %777 = vst.msk [vmem:[#allocation3 + $0x1a8] sm:$0xff] %vm723_vm2, %v638_v14  ;;  %v820_v14 = vld [vmem:[#allocation2 + $0x1b2] sm:$0xff] }
 0x15f   :  { %970 = vrot.lane.b32.xlu1 %v815_v17, %s6688_s20  ;;  %v816_v17 = vld [vmem:[#allocation2 + $0x152] sm:$0xff] }
 0x160   :  { %974 = vrot.lane.b32.xlu0 %v817_v25, %s6688_s20  ;;  %v7589_v25 = vld [vmem:[#allocation2 + $0x320] sm:$0xff] }
 0x161   :  { %v630_v49 = vpop.permute.xlu1 %629  ;;  %966 = vrot.lane.b32.xlu2 %v813_v26, %s6688_s20  ;;  %402 = vst.msk [vmem:[#allocation3 + $0x1f8] sm:$0xff] %vm36_vm0, %v7589_v25 }
 0x162   :  { %773 = vst.msk [vmem:[#allocation3 + $0x188] sm:$0xff] %vm723_vm2, %v630_v49  ;;  %v634_v50 = vpop.permute.xlu0 %633 }
 0x163   :  { %775 = vst.msk [vmem:[#allocation3 + $0x198] sm:$0xff] %vm723_vm2, %v634_v50  ;;  %v644_v4 = vpop.permute.xlu2 %643 }
 0x164   :  { %780 = vst.msk [vmem:[#allocation3 + $0x1c0] sm:$0xff] %vm723_vm2, %v644_v4  ;;  %v821_v4 = vld [vmem:[#allocation2 + $0x1ba] sm:$0xff] }
 0x167   :  { %976 = vrot.lane.b32.xlu1 %v818_v7, %s6688_s20  ;;  %v823_v7 = vld [vmem:[#allocation2 + $0x1d2] sm:$0xff] }
 0x168   :  { %980 = vrot.lane.b32.xlu0 %v820_v14, %s6688_s20 }
 0x169   :  { %v636_v26 = vpop.permute.xlu1 %635  ;;  %972 = vrot.lane.b32.xlu2 %v816_v17, %s6688_s20 }
 0x16a   :  { %776 = vst.msk [vmem:[#allocation3 + $0x1a0] sm:$0xff] %vm723_vm2, %v636_v26  ;;  %v640_v49 = vpop.permute.xlu0 %639 }
 0x16b   :  { %778 = vst.msk [vmem:[#allocation3 + $0x1b0] sm:$0xff] %vm723_vm2, %v640_v49  ;;  %v650_v50 = vpop.permute.xlu2 %649  ;;  %v824_v49 = vld [vmem:[#allocation2 + $0x1e2] sm:$0xff] }
 0x16c   :  { %783 = vst.msk [vmem:[#allocation3 + $0x1d8] sm:$0xff] %vm723_vm2, %v650_v50  ;;  %v822_v50 = vld [vmem:[#allocation2 + $0x1ca] sm:$0xff] }
 0x16f   :  { %982 = vrot.lane.b32.xlu1 %v821_v4, %s6688_s20 }
 0x170   :  { %986 = vrot.lane.b32.xlu0 %v823_v7, %s6688_s20 }
 0x171   :  { %v642_v14 = vpop.permute.xlu1 %641  ;;  %978 = vrot.lane.b32.xlu2 %v819_v0, %s6688_s20 }
 0x172   :  { %779 = vst.msk [vmem:[#allocation3 + $0x1b8] sm:$0xff] %vm723_vm2, %v642_v14  ;;  %v646_v17 = vpop.permute.xlu0 %645  ;;  %v827_v14 = vld [vmem:[#allocation2 + $0x202] sm:$0xff] }
 0x173   :  { %781 = vst.msk [vmem:[#allocation3 + $0x1c8] sm:$0xff] %vm723_vm2, %v646_v17  ;;  %v656_v26 = vpop.permute.xlu2 %655  ;;  %v829_v17 = vld [vmem:[#allocation2 + $0x21a] sm:$0xff] }
 0x174   :  { %786 = vst.msk [vmem:[#allocation3 + $0x1f0] sm:$0xff] %vm723_vm2, %v656_v26  ;;  %v825_v26 = vld [vmem:[#allocation2 + $0x1ea] sm:$0xff] }
 0x177   :  { %988 = vrot.lane.b32.xlu1 %v824_v49, %s6688_s20 }
 0x178   :  { %992 = vrot.lane.b32.xlu0 %v826_v62, %s6688_s20 }
 0x179   :  { %v648_v4 = vpop.permute.xlu1 %647  ;;  %984 = vrot.lane.b32.xlu2 %v822_v50, %s6688_s20 }
 0x17a   :  { %782 = vst.msk [vmem:[#allocation3 + $0x1d0] sm:$0xff] %vm723_vm2, %v648_v4  ;;  %v652_v0 = vpop.permute.xlu0 %651  ;;  %v830_v4 = vld [vmem:[#allocation2 + $0x22a] sm:$0xff] }
 0x17b   :  { %784 = vst.msk [vmem:[#allocation3 + $0x1e0] sm:$0xff] %vm723_vm2, %v652_v0  ;;  %v919_v7 = vpop.permute.xlu2 %918  ;;  %v832_v0 = vld [vmem:[#allocation2 + $0x242] sm:$0xff] }
 0x17c   :  { %1110 = vst.msk [vmem:[#allocation3 + $0x8] sm:$0xff] %vm1108_vm3, %v919_v7  ;;  %v828_v7 = vld [vmem:[#allocation2 + $0x212] sm:$0xff] }
 0x17f   :  { %994 = vrot.lane.b32.xlu1 %v827_v14, %s6688_s20 }
 0x180   :  { %998 = vrot.lane.b32.xlu0 %v829_v17, %s6688_s20 }
 0x181   :  { %v654_v62 = vpop.permute.xlu1 %653  ;;  %990 = vrot.lane.b32.xlu2 %v825_v26, %s6688_s20 }
 0x182   :  { %785 = vst.msk [vmem:[#allocation3 + $0x1e8] sm:$0xff] %vm723_vm2, %v654_v62  ;;  %v658_v49 = vpop.permute.xlu0 %657  ;;  %v833_v62 = vld [vmem:[#allocation2 + $0x24a] sm:$0xff] }
 0x183   :  { %787 = vst.msk [vmem:[#allocation3 + $0x1f8] sm:$0xff] %vm723_vm2, %v658_v49  ;;  %v925_v50 = vpop.permute.xlu2 %924  ;;  %v835_v49 = vld [vmem:[#allocation2 + $0x262] sm:$0xff]  ;;  %vm4543_vm2 = vcmask 1046528  }
 0x184   :  { %1113 = vst.msk [vmem:[#allocation3 + $0x20] sm:$0xff] %vm1108_vm3, %v925_v50  ;;  %v831_v50 = vld [vmem:[#allocation2 + $0x232] sm:$0xff] }
 0x187   :  { %1000 = vrot.lane.b32.xlu1 %v830_v4, %s6688_s20 }
 0x188   :  { %1004 = vrot.lane.b32.xlu0 %v832_v0, %s6688_s20 }
 0x189   :  { %v917_v14 = vpop.permute.xlu1 %916  ;;  %996 = vrot.lane.b32.xlu2 %v828_v7, %s6688_s20 }
 0x18a   :  { %1109 = vst.msk [vmem:[#allocation3] sm:$0xff] %vm1108_vm3, %v917_v14  ;;  %v921_v17 = vpop.permute.xlu0 %920  ;;  %v836_v14 = vld [vmem:[#allocation2 + $0x272] sm:$0xff] }
 0x18b   :  { %1111 = vst.msk [vmem:[#allocation3 + $0x10] sm:$0xff] %vm1108_vm3, %v921_v17  ;;  %v931_v26 = vpop.permute.xlu2 %930  ;;  %v838_v17 = vld [vmem:[#allocation2 + $0x28a] sm:$0xff] }
 0x18c   :  { %1116 = vst.msk [vmem:[#allocation3 + $0x38] sm:$0xff] %vm1108_vm3, %v931_v26  ;;  %v834_v26 = vld [vmem:[#allocation2 + $0x25a] sm:$0xff] }
 0x18f   :  { %1006 = vrot.lane.b32.xlu1 %v833_v62, %s6688_s20 }
 0x190   :  { %1010 = vrot.lane.b32.xlu0 %v835_v49, %s6688_s20 }
 0x191   :  { %v923_v4 = vpop.permute.xlu1 %922  ;;  %1002 = vrot.lane.b32.xlu2 %v831_v50, %s6688_s20 }
 0x192   :  { %1112 = vst.msk [vmem:[#allocation3 + $0x18] sm:$0xff] %vm1108_vm3, %v923_v4  ;;  %v927_v0 = vpop.permute.xlu0 %926  ;;  %v839_v4 = vld [vmem:[#allocation2 + $0x292] sm:$0xff] }
 0x193   :  { %1114 = vst.msk [vmem:[#allocation3 + $0x28] sm:$0xff] %vm1108_vm3, %v927_v0  ;;  %v937_v7 = vpop.permute.xlu2 %936  ;;  %v841_v0 = vld [vmem:[#allocation2 + $0x2aa] sm:$0xff] }
 0x194   :  { %1119 = vst.msk [vmem:[#allocation3 + $0x50] sm:$0xff] %vm1108_vm3, %v937_v7  ;;  %v837_v7 = vld [vmem:[#allocation2 + $0x27a] sm:$0xff] }
 0x197   :  { %1012 = vrot.lane.b32.xlu1 %v836_v14, %s6688_s20 }
 0x198   :  { %1016 = vrot.lane.b32.xlu0 %v838_v17, %s6688_s20 }
 0x199   :  { %v929_v62 = vpop.permute.xlu1 %928  ;;  %1008 = vrot.lane.b32.xlu2 %v834_v26, %s6688_s20 }
 0x19a   :  { %1115 = vst.msk [vmem:[#allocation3 + $0x30] sm:$0xff] %vm1108_vm3, %v929_v62  ;;  %v933_v49 = vpop.permute.xlu0 %932  ;;  %v842_v62 = vld [vmem:[#allocation2 + $0x2ba] sm:$0xff] }
 0x19b   :  { %1117 = vst.msk [vmem:[#allocation3 + $0x40] sm:$0xff] %vm1108_vm3, %v933_v49  ;;  %v943_v50 = vpop.permute.xlu2 %942  ;;  %v844_v49 = vld [vmem:[#allocation2 + $0x2d2] sm:$0xff] }
 0x19c   :  { %1122 = vst.msk [vmem:[#allocation3 + $0x68] sm:$0xff] %vm1108_vm3, %v943_v50  ;;  %v840_v50 = vld [vmem:[#allocation2 + $0x2a2] sm:$0xff] }
 0x19f   :  { %1018 = vrot.lane.b32.xlu1 %v839_v4, %s6688_s20 }
 0x1a0   :  { %1022 = vrot.lane.b32.xlu0 %v841_v0, %s6688_s20 }
 0x1a1   :  { %v935_v14 = vpop.permute.xlu1 %934  ;;  %1014 = vrot.lane.b32.xlu2 %v837_v7, %s6688_s20 }
 0x1a2   :  { %1118 = vst.msk [vmem:[#allocation3 + $0x48] sm:$0xff] %vm1108_vm3, %v935_v14  ;;  %v939_v17 = vpop.permute.xlu0 %938  ;;  %v845_v14 = vld [vmem:[#allocation2 + $0x2da] sm:$0xff] }
 0x1a3   :  { %1120 = vst.msk [vmem:[#allocation3 + $0x58] sm:$0xff] %vm1108_vm3, %v939_v17  ;;  %v949_v26 = vpop.permute.xlu2 %948  ;;  %v847_v17 = vld [vmem:[#allocation2 + $0x2f2] sm:$0xff] }
 0x1a4   :  { %1125 = vst.msk [vmem:[#allocation3 + $0x80] sm:$0xff] %vm1108_vm3, %v949_v26  ;;  %v843_v26 = vld [vmem:[#allocation2 + $0x2c2] sm:$0xff] }
 0x1a7   :  { %1024 = vrot.lane.b32.xlu1 %v842_v62, %s6688_s20 }
 0x1a8   :  { %1028 = vrot.lane.b32.xlu0 %v844_v49, %s6688_s20 }
 0x1a9   :  { %v941_v4 = vpop.permute.xlu1 %940  ;;  %1020 = vrot.lane.b32.xlu2 %v840_v50, %s6688_s20 }
 0x1aa   :  { %1121 = vst.msk [vmem:[#allocation3 + $0x60] sm:$0xff] %vm1108_vm3, %v941_v4  ;;  %v945_v0 = vpop.permute.xlu0 %944  ;;  %v848_v4 = vld [vmem:[#allocation2 + $0x302] sm:$0xff] }
 0x1ab   :  { %1123 = vst.msk [vmem:[#allocation3 + $0x70] sm:$0xff] %vm1108_vm3, %v945_v0  ;;  %v955_v7 = vpop.permute.xlu2 %954  ;;  %v850_v0 = vld [vmem:[#allocation2 + $0x31a] sm:$0xff] }
 0x1ac   :  { %1128 = vst.msk [vmem:[#allocation3 + $0x98] sm:$0xff] %vm1108_vm3, %v955_v7  ;;  %v846_v7 = vld [vmem:[#allocation2 + $0x2ea] sm:$0xff] }
 0x1af   :  { %1030 = vrot.lane.b32.xlu1 %v845_v14, %s6688_s20 }
 0x1b0   :  { %1034 = vrot.lane.b32.xlu0 %v847_v17, %s6688_s20 }
 0x1b1   :  { %v947_v62 = vpop.permute.xlu1 %946  ;;  %1026 = vrot.lane.b32.xlu2 %v843_v26, %s6688_s20 }
 0x1b2   :  { %1124 = vst.msk [vmem:[#allocation3 + $0x78] sm:$0xff] %vm1108_vm3, %v947_v62  ;;  %v951_v49 = vpop.permute.xlu0 %950  ;;  %v851_v62 = vld [vmem:[#allocation2 + $0x322] sm:$0xff] }
 0x1b3   :  { %1126 = vst.msk [vmem:[#allocation3 + $0x88] sm:$0xff] %vm1108_vm3, %v951_v49  ;;  %v961_v50 = vpop.permute.xlu2 %960  ;;  %v849_v49 = vld [vmem:[#allocation2 + $0x30a] sm:$0xff] }
 0x1b4   :  { %1131 = vst.msk [vmem:[#allocation3 + $0xb0] sm:$0xff] %vm1108_vm3, %v961_v50 }
 0x1b7   :  { %1036 = vrot.lane.b32.xlu1 %v848_v4, %s6688_s20 }
 0x1b8   :  { %1040 = vrot.lane.b32.xlu0 %v850_v0, %s6688_s20 }
 0x1b9   :  { %v953_v14 = vpop.permute.xlu1 %952  ;;  %1032 = vrot.lane.b32.xlu2 %v846_v7, %s6688_s20  ;;  %v1175_v7 = vld [vmem:[#allocation2 + $0x30] sm:$0xff] }
 0x1ba   :  { %1127 = vst.msk [vmem:[#allocation3 + $0x90] sm:$0xff] %vm1108_vm3, %v953_v14  ;;  %v957_v17 = vpop.permute.xlu0 %956  ;;  %v1173_v14 = vld [vmem:[#allocation2 + $0x18] sm:$0xff] }
 0x1bb   :  { %1129 = vst.msk [vmem:[#allocation3 + $0xa0] sm:$0xff] %vm1108_vm3, %v957_v17  ;;  %v967_v26 = vpop.permute.xlu2 %966 }
 0x1bc   :  { %1134 = vst.msk [vmem:[#allocation3 + $0xc8] sm:$0xff] %vm1108_vm3, %v967_v26 }
 0x1bf   :  { %1042 = vrot.lane.b32.xlu1 %v851_v62, %s6688_s20  ;;  %v1176_v62 = vld [vmem:[#allocation2 + $0x38] sm:$0xff] }
 0x1c0   :  { %1303 = vrot.lane.b32.xlu0 %v7191_v27, %s6689_s13 }
 0x1c1   :  { %v959_v50 = vpop.permute.xlu1 %958  ;;  %1038 = vrot.lane.b32.xlu2 %v849_v49, %s6688_s20 }
 0x1c2   :  { %1130 = vst.msk [vmem:[#allocation3 + $0xa8] sm:$0xff] %vm1108_vm3, %v959_v50  ;;  %v963_v4 = vpop.permute.xlu0 %962 }
 0x1c3   :  { %1132 = vst.msk [vmem:[#allocation3 + $0xb8] sm:$0xff] %vm1108_vm3, %v963_v4  ;;  %v973_v0 = vpop.permute.xlu2 %972  ;;  %v1179_v4 = vld [vmem:[#allocation2 + $0x60] sm:$0xff] }
 0x1c4   :  { %1137 = vst.msk [vmem:[#allocation3 + $0xe0] sm:$0xff] %vm1108_vm3, %v973_v0 }
 0x1c7   :  { %1305 = vrot.lane.b32.xlu1 %v1175_v7, %s6689_s13 }
 0x1c8   :  { %1309 = vrot.lane.b32.xlu0 %v7210_v34, %s6689_s13 }
 0x1c9   :  { %v965_v17 = vpop.permute.xlu1 %964  ;;  %1301 = vrot.lane.b32.xlu2 %v1173_v14, %s6689_s13  ;;  %v176_v14 = vld [vmem:[%s10258_s0 + $0xf0] sm:$0xff] }
 0x1ca   :  { %1133 = vst.msk [vmem:[#allocation3 + $0xc0] sm:$0xff] %vm1108_vm3, %v965_v17  ;;  %v969_v27 = vpop.permute.xlu0 %968 }
 0x1cb   :  { %1135 = vst.msk [vmem:[#allocation3 + $0xd0] sm:$0xff] %vm1108_vm3, %v969_v27  ;;  %v979_v26 = vpop.permute.xlu2 %978 }
 0x1cc   :  { %1140 = vst.msk [vmem:[#allocation3 + $0xf8] sm:$0xff] %vm1108_vm3, %v979_v26 }
 0x1cd   :  { %241 = vst.msk [vmem:[#allocation2 + $0x181] sm:$0xff] %vm36_vm0, %v176_v14  ;;  %v1564_v14 = vld [vmem:[#allocation2 + $0x61] sm:$0xff] }
 0x1cf   :  { %1311 = vrot.lane.b32.xlu1 %v7214_v36, %s6689_s13 }
 0x1d0   :  { %1315 = vrot.lane.b32.xlu0 %v7238_v44, %s6689_s13 }
 0x1d1   :  { %v971_v49 = vpop.permute.xlu1 %970  ;;  %1307 = vrot.lane.b32.xlu2 %v1176_v62, %s6689_s13 }
 0x1d2   :  { %1136 = vst.msk [vmem:[#allocation3 + $0xd8] sm:$0xff] %vm1108_vm3, %v971_v49  ;;  %v975_v34 = vpop.permute.xlu0 %974 }
 0x1d3   :  { %1138 = vst.msk [vmem:[#allocation3 + $0xe8] sm:$0xff] %vm1108_vm3, %v975_v34  ;;  %v985_v50 = vpop.permute.xlu2 %984  ;;  %v208_v34 = vld [vmem:[%s10258_s0 + $0x1f0] sm:$0xff] }
 0x1d4   :  { %1143 = vst.msk [vmem:[#allocation3 + $0x110] sm:$0xff] %vm1108_vm3, %v985_v50  ;;  %v1203_v26 = vld [vmem:[#allocation2 + $0x180] sm:$0xff]  ;;  %v209_v50 = vld [vmem:[%s10258_s0 + $0x1f8] sm:$0xff] }
 0x1d5   :  { %273 = vst.msk [vmem:[#allocation2 + $0x331] sm:$0xff] %vm36_vm0, %v208_v34 }
 0x1d6   :  { %274 = vst.msk [vmem:[#allocation2 + $0x339] sm:$0xff] %vm36_vm0, %v209_v50  ;;  %v1583_v50 = vld [vmem:[#allocation2 + $0x141] sm:$0xff] }
 0x1d7   :  { %1317 = vrot.lane.b32.xlu1 %v7242_v46, %s6689_s13 }
 0x1d8   :  { %1321 = vrot.lane.b32.xlu0 %v7266_v54, %s6689_s13 }
 0x1d9   :  { %v977_v36 = vpop.permute.xlu1 %976  ;;  %1313 = vrot.lane.b32.xlu2 %v1179_v4, %s6689_s13 }
 0x1da   :  { %1139 = vst.msk [vmem:[#allocation3 + $0xf0] sm:$0xff] %vm1108_vm3, %v977_v36  ;;  %v981_v44 = vpop.permute.xlu0 %980  ;;  %v1558_v36 = vld [vmem:[#allocation2 + $0x19] sm:$0xff] }
 0x1db   :  { %1141 = vst.msk [vmem:[#allocation3 + $0x100] sm:$0xff] %vm1108_vm3, %v981_v44  ;;  %v991_v0 = vpop.permute.xlu2 %990 }
 0x1dc   :  { %1146 = vst.msk [vmem:[#allocation3 + $0x128] sm:$0xff] %vm1108_vm3, %v991_v0  ;;  %v1235_v4 = vld [vmem:[#allocation2 + $0x330] sm:$0xff]  ;;  %v1559_v0 = vld [vmem:[#allocation2 + $0x21] sm:$0xff] }
 0x1df   :  { %1323 = vrot.lane.b32.xlu1 %v7270_v56, %s6689_s13 }
 0x1e0   :  { %1327 = vrot.lane.b32.xlu0 %v7294_v1, %s6689_s13 }
 0x1e1   :  { %v983_v46 = vpop.permute.xlu1 %982  ;;  %1319 = vrot.lane.b32.xlu2 %v7212_v35, %s6689_s13 }
 0x1e2   :  { %1142 = vst.msk [vmem:[#allocation3 + $0x108] sm:$0xff] %vm1108_vm3, %v983_v46  ;;  %v987_v54 = vpop.permute.xlu0 %986  ;;  %v1561_v46 = vld [vmem:[#allocation2 + $0x39] sm:$0xff] }
 0x1e3   :  { %1144 = vst.msk [vmem:[#allocation3 + $0x118] sm:$0xff] %vm1108_vm3, %v987_v54  ;;  %v997_v7 = vpop.permute.xlu2 %996  ;;  %v1236_v54 = vld [vmem:[#allocation2 + $0x338] sm:$0xff] }
 0x1e4   :  { %1149 = vst.msk [vmem:[#allocation3 + $0x140] sm:$0xff] %vm1108_vm3, %v997_v7 }
 0x1e7   :  { %1329 = vrot.lane.b32.xlu1 %v7306_v5, %s6689_s13  ;;  %v177_v5 = vld [vmem:[%s10258_s0 + $0xf8] sm:$0xff]  ;;  %s6690_s0 = smov 12  }
 0x1e8   :  { %1333 = vrot.lane.b32.xlu0 %v7320_v12, %s6689_s13  ;;  %242 = vst.msk [vmem:[#allocation2 + $0x189] sm:$0xff] %vm36_vm0, %v177_v5  ;;  %v1560_v5 = vld [vmem:[#allocation2 + $0x31] sm:$0xff]  ;;  %vm4509_vm0 = vcmask 1044480  }
 0x1e9   :  { %v989_v56 = vpop.permute.xlu1 %988  ;;  %1325 = vrot.lane.b32.xlu2 %v7240_v45, %s6689_s13 }
 0x1ea   :  { %1145 = vst.msk [vmem:[#allocation3 + $0x120] sm:$0xff] %vm1108_vm3, %v989_v56  ;;  %v993_v35 = vpop.permute.xlu0 %992 }
 0x1eb   :  { %1147 = vst.msk [vmem:[#allocation3 + $0x130] sm:$0xff] %vm1108_vm3, %v993_v35  ;;  %v1003_v1 = vpop.permute.xlu2 %1002 }
 0x1ec   :  { %1152 = vst.msk [vmem:[#allocation3 + $0x158] sm:$0xff] %vm1108_vm3, %v1003_v1  ;;  %v1562_v1 = vld [vmem:[#allocation2 + $0x49] sm:$0xff] }
 0x1ef   :  { %1335 = vrot.lane.b32.xlu1 %v7332_v16, %s6689_s13  ;;  %v1204_v27 = vld [vmem:[#allocation2 + $0x188] sm:$0xff] }
 0x1f0   :  { %1339 = vrot.lane.b32.xlu0 %v7346_v23, %s6689_s13 }
 0x1f1   :  { %v995_v45 = vpop.permute.xlu1 %994  ;;  %1331 = vrot.lane.b32.xlu2 %v7268_v55, %s6689_s13 }
 0x1f2   :  { %1148 = vst.msk [vmem:[#allocation3 + $0x138] sm:$0xff] %vm1108_vm3, %v995_v45  ;;  %v999_v12 = vpop.permute.xlu0 %998 }
 0x1f3   :  { %1150 = vst.msk [vmem:[#allocation3 + $0x148] sm:$0xff] %vm1108_vm3, %v999_v12  ;;  %v1009_v17 = vpop.permute.xlu2 %1008 }
 0x1f4   :  { %1155 = vst.msk [vmem:[#allocation3 + $0x170] sm:$0xff] %vm1108_vm3, %v1009_v17 }
 0x1f7   :  { %1341 = vrot.lane.b32.xlu1 %v7358_v28, %s6689_s13 }
 0x1f8   :  { %1345 = vrot.lane.b32.xlu0 %v7365_v33, %s6689_s13 }
 0x1f9   :  { %v1001_v16 = vpop.permute.xlu1 %1000  ;;  %1337 = vrot.lane.b32.xlu2 %v7296_v2, %s6689_s13 }
 0x1fa   :  { %1151 = vst.msk [vmem:[#allocation3 + $0x150] sm:$0xff] %vm1108_vm3, %v1001_v16  ;;  %v1005_v55 = vpop.permute.xlu0 %1004  ;;  %v1565_v16 = vld [vmem:[#allocation2 + $0x69] sm:$0xff] }
 0x1fb   :  { %1153 = vst.msk [vmem:[#allocation3 + $0x160] sm:$0xff] %vm1108_vm3, %v1005_v55  ;;  %v1015_v23 = vpop.permute.xlu2 %1014  ;;  %v1567_v55 = vld [vmem:[#allocation2 + $0x81] sm:$0xff] }
 0x1fc   :  { %1158 = vst.msk [vmem:[#allocation3 + $0x188] sm:$0xff] %vm1108_vm3, %v1015_v23  ;;  %v1563_v23 = vld [vmem:[#allocation2 + $0x51] sm:$0xff] }
 0x1ff   :  { %1347 = vrot.lane.b32.xlu1 %v7376_v40, %s6689_s13 }
 0x200   :  { %1351 = vrot.lane.b32.xlu0 %v7383_v48, %s6689_s13 }
 0x201   :  { %v1007_v28 = vpop.permute.xlu1 %1006  ;;  %1343 = vrot.lane.b32.xlu2 %v7322_v13, %s6689_s13 }
 0x202   :  { %1154 = vst.msk [vmem:[#allocation3 + $0x168] sm:$0xff] %vm1108_vm3, %v1007_v28  ;;  %v1011_v2 = vpop.permute.xlu0 %1010 }
 0x203   :  { %1156 = vst.msk [vmem:[#allocation3 + $0x178] sm:$0xff] %vm1108_vm3, %v1011_v2  ;;  %v1021_v33 = vpop.permute.xlu2 %1020 }
 0x204   :  { %1161 = vst.msk [vmem:[#allocation3 + $0x1a0] sm:$0xff] %vm1108_vm3, %v1021_v33 }
 0x207   :  { %1353 = vrot.lane.b32.xlu1 %v7391_v52, %s6689_s13 }
 0x208   :  { %1357 = vrot.lane.b32.xlu0 %v7398_v60, %s6689_s13 }
 0x209   :  { %v1013_v40 = vpop.permute.xlu1 %1012  ;;  %1349 = vrot.lane.b32.xlu2 %v7348_v24, %s6689_s13 }
 0x20a   :  { %1157 = vst.msk [vmem:[#allocation3 + $0x180] sm:$0xff] %vm1108_vm3, %v1013_v40  ;;  %v1017_v13 = vpop.permute.xlu0 %1016  ;;  %v1568_v40 = vld [vmem:[#allocation2 + $0x91] sm:$0xff] }
 0x20b   :  { %1159 = vst.msk [vmem:[#allocation3 + $0x190] sm:$0xff] %vm1108_vm3, %v1017_v13  ;;  %v1027_v48 = vpop.permute.xlu2 %1026  ;;  %v1570_v13 = vld [vmem:[#allocation2 + $0xa9] sm:$0xff] }
 0x20c   :  { %1164 = vst.msk [vmem:[#allocation3 + $0x1b8] sm:$0xff] %vm1108_vm3, %v1027_v48  ;;  %v1566_v48 = vld [vmem:[#allocation2 + $0x79] sm:$0xff] }
 0x20f   :  { %1359 = vrot.lane.b32.xlu1 %v7409_v3, %s6689_s13 }
 0x210   :  { %1363 = vrot.lane.b32.xlu0 %v1204_v27, %s6689_s13 }
 0x211   :  { %v1019_v52 = vpop.permute.xlu1 %1018  ;;  %1355 = vrot.lane.b32.xlu2 %v7367_v37, %s6689_s13 }
 0x212   :  { %1160 = vst.msk [vmem:[#allocation3 + $0x198] sm:$0xff] %vm1108_vm3, %v1019_v52  ;;  %v1023_v24 = vpop.permute.xlu0 %1022 }
 0x213   :  { %1162 = vst.msk [vmem:[#allocation3 + $0x1a8] sm:$0xff] %vm1108_vm3, %v1023_v24  ;;  %v1033_v60 = vpop.permute.xlu2 %1032 }
 0x214   :  { %1167 = vst.msk [vmem:[#allocation3 + $0x1d0] sm:$0xff] %vm1108_vm3, %v1033_v60  ;;  %v1571_v60 = vld [vmem:[#allocation2 + $0xb1] sm:$0xff] }
 0x217   :  { %1365 = vrot.lane.b32.xlu1 %v7424_v15, %s6689_s13 }
 0x218   :  { %1369 = vrot.lane.b32.xlu0 %v7431_v21, %s6689_s13 }
 0x219   :  { %v1025_v3 = vpop.permute.xlu1 %1024  ;;  %1361 = vrot.lane.b32.xlu2 %v1203_v26, %s6689_s13  ;;  %v1573_v26 = vld [vmem:[#allocation2 + $0xc9] sm:$0xff] }
 0x21a   :  { %1163 = vst.msk [vmem:[#allocation3 + $0x1b0] sm:$0xff] %vm1108_vm3, %v1025_v3  ;;  %v1029_v37 = vpop.permute.xlu0 %1028  ;;  %v1569_v3 = vld [vmem:[#allocation2 + $0x99] sm:$0xff] }
 0x21b   :  { %1165 = vst.msk [vmem:[#allocation3 + $0x1c0] sm:$0xff] %vm1108_vm3, %v1029_v37  ;;  %v1039_v62 = vpop.permute.xlu2 %1038 }
 0x21c   :  { %1170 = vst.msk [vmem:[#allocation3 + $0x1e8] sm:$0xff] %vm1108_vm3, %v1039_v62 }
 0x21f   :  { %1371 = vrot.lane.b32.xlu1 %v7442_v29, %s6689_s13 }
 0x220   :  { %1375 = vrot.lane.b32.xlu0 %v7449_v39, %s6689_s13 }
 0x221   :  { %v1031_v15 = vpop.permute.xlu1 %1030  ;;  %1367 = vrot.lane.b32.xlu2 %v7400_v61, %s6689_s13 }
 0x222   :  { %1166 = vst.msk [vmem:[#allocation3 + $0x1c8] sm:$0xff] %vm1108_vm3, %v1031_v15  ;;  %v1035_v21 = vpop.permute.xlu0 %1034 }
 0x223   :  { %1168 = vst.msk [vmem:[#allocation3 + $0x1d8] sm:$0xff] %vm1108_vm3, %v1035_v21  ;;  %v1302_v49 = vpop.permute.xlu2 %1301  ;;  %v1574_v21 = vld [vmem:[#allocation2 + $0xd9] sm:$0xff] }
 0x224   :  { %1494 = vst.msk [vmem:[#allocation3] sm:$0xff] %vm1493_vm4, %v1302_v49  ;;  %v1576_v49 = vld [vmem:[#allocation2 + $0xf1] sm:$0xff] }
 0x227   :  { %1377 = vrot.lane.b32.xlu1 %v7460_v47, %s6689_s13 }
 0x228   :  { %1381 = vrot.lane.b32.xlu0 %v7467_v57, %s6689_s13 }
 0x229   :  { %v1037_v29 = vpop.permute.xlu1 %1036  ;;  %1373 = vrot.lane.b32.xlu2 %v7416_v10, %s6689_s13 }
 0x22a   :  { %1169 = vst.msk [vmem:[#allocation3 + $0x1e0] sm:$0xff] %vm1108_vm3, %v1037_v29  ;;  %v1041_v61 = vpop.permute.xlu0 %1040  ;;  %v1572_v29 = vld [vmem:[#allocation2 + $0xc1] sm:$0xff] }
 0x22b   :  { %1171 = vst.msk [vmem:[#allocation3 + $0x1f0] sm:$0xff] %vm1108_vm3, %v1041_v61  ;;  %v1308_v39 = vpop.permute.xlu2 %1307 }
 0x22c   :  { %1497 = vst.msk [vmem:[#allocation3 + $0x18] sm:$0xff] %vm1493_vm4, %v1308_v39 }
 0x22f   :  { %1383 = vrot.lane.b32.xlu1 %v7478_v63, %s6689_s13 }
 0x230   :  { %1387 = vrot.lane.b32.xlu0 %v7485_v9, %s6689_s13 }
 0x231   :  { %v1043_v47 = vpop.permute.xlu1 %1042  ;;  %1379 = vrot.lane.b32.xlu2 %v7433_v22, %s6689_s13 }
 0x232   :  { %1172 = vst.msk [vmem:[#allocation3 + $0x1f8] sm:$0xff] %vm1108_vm3, %v1043_v47  ;;  %v1304_v10 = vpop.permute.xlu0 %1303  ;;  %vm4578_vm3 = vcmask 254976  }
 0x233   :  { %1495 = vst.msk [vmem:[#allocation3 + $0x8] sm:$0xff] %vm1493_vm4, %v1304_v10  ;;  %v1314_v57 = vpop.permute.xlu2 %1313  ;;  %v1577_v10 = vld [vmem:[#allocation2 + $0xf9] sm:$0xff] }
 0x234   :  { %1500 = vst.msk [vmem:[#allocation3 + $0x30] sm:$0xff] %vm1493_vm4, %v1314_v57  ;;  %v1579_v57 = vld [vmem:[#allocation2 + $0x111] sm:$0xff] }
 0x237   :  { %1389 = vrot.lane.b32.xlu1 %v7496_v18, %s6689_s13 }
 0x238   :  { %1393 = vrot.lane.b32.xlu0 %v7503_v30, %s6689_s13 }
 0x239   :  { %v1306_v63 = vpop.permute.xlu1 %1305  ;;  %1385 = vrot.lane.b32.xlu2 %v7451_v41, %s6689_s13 }
 0x23a   :  { %1496 = vst.msk [vmem:[#allocation3 + $0x10] sm:$0xff] %vm1493_vm4, %v1306_v63  ;;  %v1310_v22 = vpop.permute.xlu0 %1309  ;;  %v1575_v63 = vld [vmem:[#allocation2 + $0xe1] sm:$0xff] }
 0x23b   :  { %1498 = vst.msk [vmem:[#allocation3 + $0x20] sm:$0xff] %vm1493_vm4, %v1310_v22  ;;  %v1320_v9 = vpop.permute.xlu2 %1319 }
 0x23c   :  { %1503 = vst.msk [vmem:[#allocation3 + $0x48] sm:$0xff] %vm1493_vm4, %v1320_v9 }
 0x23f   :  { %1395 = vrot.lane.b32.xlu1 %v7514_v42, %s6689_s13 }
 0x240   :  { %1399 = vrot.lane.b32.xlu0 %v7521_v53, %s6689_s13 }
 0x241   :  { %v1312_v41 = vpop.permute.xlu1 %1311  ;;  %1391 = vrot.lane.b32.xlu2 %v7469_v58, %s6689_s13 }
 0x242   :  { %1499 = vst.msk [vmem:[#allocation3 + $0x28] sm:$0xff] %vm1493_vm4, %v1312_v41  ;;  %v1316_v18 = vpop.permute.xlu0 %1315  ;;  %v1580_v41 = vld [vmem:[#allocation2 + $0x121] sm:$0xff] }
 0x243   :  { %1501 = vst.msk [vmem:[#allocation3 + $0x38] sm:$0xff] %vm1493_vm4, %v1316_v18  ;;  %v1326_v30 = vpop.permute.xlu2 %1325  ;;  %v1582_v18 = vld [vmem:[#allocation2 + $0x139] sm:$0xff] }
 0x244   :  { %1506 = vst.msk [vmem:[#allocation3 + $0x60] sm:$0xff] %vm1493_vm4, %v1326_v30  ;;  %v1578_v30 = vld [vmem:[#allocation2 + $0x109] sm:$0xff] }
 0x247   :  { %1401 = vrot.lane.b32.xlu1 %v7532_v6, %s6689_s13 }
 0x248   :  { %1405 = vrot.lane.b32.xlu0 %v7539_v19, %s6689_s13 }
 0x249   :  { %v1318_v42 = vpop.permute.xlu1 %1317  ;;  %1397 = vrot.lane.b32.xlu2 %v7487_v11, %s6689_s13 }
 0x24a   :  { %1502 = vst.msk [vmem:[#allocation3 + $0x40] sm:$0xff] %vm1493_vm4, %v1318_v42  ;;  %v1322_v58 = vpop.permute.xlu0 %1321 }
 0x24b   :  { %1504 = vst.msk [vmem:[#allocation3 + $0x50] sm:$0xff] %vm1493_vm4, %v1322_v58  ;;  %v1332_v53 = vpop.permute.xlu2 %1331 }
 0x24c   :  { %1509 = vst.msk [vmem:[#allocation3 + $0x78] sm:$0xff] %vm1493_vm4, %v1332_v53 }
 0x24f   :  { %1407 = vrot.lane.b32.xlu1 %v7550_v32, %s6689_s13 }
 0x250   :  { %1411 = vrot.lane.b32.xlu0 %v7557_v51, %s6689_s13 }
 0x251   :  { %v1324_v11 = vpop.permute.xlu1 %1323  ;;  %1403 = vrot.lane.b32.xlu2 %v7505_v31, %s6689_s13 }
 0x252   :  { %1505 = vst.msk [vmem:[#allocation3 + $0x58] sm:$0xff] %vm1493_vm4, %v1324_v11  ;;  %v1328_v6 = vpop.permute.xlu0 %1327  ;;  %v1585_v11 = vld [vmem:[#allocation2 + $0x159] sm:$0xff] }
 0x253   :  { %1507 = vst.msk [vmem:[#allocation3 + $0x68] sm:$0xff] %vm1493_vm4, %v1328_v6  ;;  %v1338_v19 = vpop.permute.xlu2 %1337  ;;  %v1581_v6 = vld [vmem:[#allocation2 + $0x129] sm:$0xff] }
 0x254   :  { %1512 = vst.msk [vmem:[#allocation3 + $0x90] sm:$0xff] %vm1493_vm4, %v1338_v19 }
 0x257   :  { %1413 = vrot.lane.b32.xlu1 %v7568_v8, %s6689_s13 }
 0x258   :  { %1417 = vrot.lane.b32.xlu0 %v7575_v38, %s6689_s13 }
 0x259   :  { %v1330_v32 = vpop.permute.xlu1 %1329  ;;  %1409 = vrot.lane.b32.xlu2 %v7523_v59, %s6689_s13 }
 0x25a   :  { %1508 = vst.msk [vmem:[#allocation3 + $0x70] sm:$0xff] %vm1493_vm4, %v1330_v32  ;;  %v1334_v31 = vpop.permute.xlu0 %1333 }
 0x25b   :  { %1510 = vst.msk [vmem:[#allocation3 + $0x80] sm:$0xff] %vm1493_vm4, %v1334_v31  ;;  %v1344_v51 = vpop.permute.xlu2 %1343 }
 0x25c   :  { %1515 = vst.msk [vmem:[#allocation3 + $0xa8] sm:$0xff] %vm1493_vm4, %v1344_v51  ;;  %v1586_v51 = vld [vmem:[#allocation2 + $0x169] sm:$0xff] }
 0x25f   :  { %1419 = vrot.lane.b32.xlu1 %v7577_v43, %s6689_s13 }
 0x260   :  { %1423 = vrot.lane.b32.xlu0 %v7589_v25, %s6689_s13  ;;  %v10273_v25 = vld [vmem:[#allocation11_spill] sm:$0xff] }
 0x261   :  { %v1336_v8 = vpop.permute.xlu1 %1335  ;;  %1415 = vrot.lane.b32.xlu2 %v7541_v20, %s6689_s13 }
 0x262   :  { %1511 = vst.msk [vmem:[#allocation3 + $0x88] sm:$0xff] %vm1493_vm4, %v1336_v8  ;;  %v1340_v59 = vpop.permute.xlu0 %1339  ;;  %v1588_v8 = vld [vmem:[#allocation2 + $0x181] sm:$0xff] }
 0x263   :  { %1513 = vst.msk [vmem:[#allocation3 + $0x98] sm:$0xff] %vm1493_vm4, %v1340_v59  ;;  %v1350_v38 = vpop.permute.xlu2 %1349  ;;  %v1584_v59 = vld [vmem:[#allocation2 + $0x151] sm:$0xff] }
 0x264   :  { %1518 = vst.msk [vmem:[#allocation3 + $0xc0] sm:$0xff] %vm1493_vm4, %v1350_v38 }
 0x267   :  { %1425 = vrot.lane.b32.xlu1 %v1235_v4, %s6689_s13 }
 0x268   :  { %1686 = vrot.lane.b32.xlu0 %v1558_v36, %s6690_s0 }
 0x269   :  { %v1342_v43 = vpop.permute.xlu1 %1341  ;;  %1421 = vrot.lane.b32.xlu2 %v10273_v25, %s6689_s13  ;;  %v1591_v25 = vld [vmem:[#allocation2 + $0x1d1] sm:$0xff] }
 0x26a   :  { %1514 = vst.msk [vmem:[#allocation3 + $0xa0] sm:$0xff] %vm1493_vm4, %v1342_v43  ;;  %v1346_v20 = vpop.permute.xlu0 %1345  ;;  %v1589_v43 = vld [vmem:[#allocation2 + $0x189] sm:$0xff] }
 0x26b   :  { %1516 = vst.msk [vmem:[#allocation3 + $0xb0] sm:$0xff] %vm1493_vm4, %v1346_v20  ;;  %v1356_v44 = vpop.permute.xlu2 %1355  ;;  %v1587_v20 = vld [vmem:[#allocation2 + $0x171] sm:$0xff] }
 0x26c   :  { %1521 = vst.msk [vmem:[#allocation3 + $0xd8] sm:$0xff] %vm1493_vm4, %v1356_v44 }
 0x26f   :  { %1688 = vrot.lane.b32.xlu1 %v1559_v0, %s6690_s0 }
 0x270   :  { %1692 = vrot.lane.b32.xlu0 %v1561_v46, %s6690_s0 }
 0x271   :  { %v1348_v7 = vpop.permute.xlu1 %1347  ;;  %1427 = vrot.lane.b32.xlu2 %v1236_v54, %s6689_s13  ;;  %v1592_v54 = vld [vmem:[#allocation2 + $0x1e1] sm:$0xff] }
 0x272   :  { %1517 = vst.msk [vmem:[#allocation3 + $0xb8] sm:$0xff] %vm1493_vm4, %v1348_v7  ;;  %v1352_v56 = vpop.permute.xlu0 %1351  ;;  %v1594_v7 = vld [vmem:[#allocation2 + $0x1f9] sm:$0xff] }
 0x273   :  { %1519 = vst.msk [vmem:[#allocation3 + $0xc8] sm:$0xff] %vm1493_vm4, %v1352_v56  ;;  %v1362_v35 = vpop.permute.xlu2 %1361  ;;  %v1590_v56 = vld [vmem:[#allocation2 + $0x1c9] sm:$0xff] }
 0x274   :  { %1524 = vst.msk [vmem:[#allocation3 + $0xf0] sm:$0xff] %vm1493_vm4, %v1362_v35 }
 0x277   :  { %1694 = vrot.lane.b32.xlu1 %v1562_v1, %s6690_s0 }
 0x278   :  { %1698 = vrot.lane.b32.xlu0 %v1564_v14, %s6690_s0 }
 0x279   :  { %v1354_v45 = vpop.permute.xlu1 %1353  ;;  %1690 = vrot.lane.b32.xlu2 %v1560_v5, %s6690_s0  ;;  %v1595_v5 = vld [vmem:[#allocation2 + $0x201] sm:$0xff] }
 0x27a   :  { %1520 = vst.msk [vmem:[#allocation3 + $0xd0] sm:$0xff] %vm1493_vm4, %v1354_v45  ;;  %v1358_v12 = vpop.permute.xlu0 %1357  ;;  %v1597_v45 = vld [vmem:[#allocation2 + $0x219] sm:$0xff] }
 0x27b   :  { %1522 = vst.msk [vmem:[#allocation3 + $0xe0] sm:$0xff] %vm1493_vm4, %v1358_v12  ;;  %v1368_v17 = vpop.permute.xlu2 %1367  ;;  %v1593_v12 = vld [vmem:[#allocation2 + $0x1e9] sm:$0xff] }
 0x27c   :  { %1527 = vst.msk [vmem:[#allocation3 + $0x108] sm:$0xff] %vm1493_vm4, %v1368_v17 }
 0x27f   :  { %1700 = vrot.lane.b32.xlu1 %v1565_v16, %s6690_s0 }
 0x280   :  { %1704 = vrot.lane.b32.xlu0 %v1567_v55, %s6690_s0 }
 0x281   :  { %v1360_v28 = vpop.permute.xlu1 %1359  ;;  %1696 = vrot.lane.b32.xlu2 %v1563_v23, %s6690_s0  ;;  %v1598_v23 = vld [vmem:[#allocation2 + $0x229] sm:$0xff] }
 0x282   :  { %1523 = vst.msk [vmem:[#allocation3 + $0xe8] sm:$0xff] %vm1493_vm4, %v1360_v28  ;;  %v1364_v2 = vpop.permute.xlu0 %1363  ;;  %v1600_v28 = vld [vmem:[#allocation2 + $0x241] sm:$0xff] }
 0x283   :  { %1525 = vst.msk [vmem:[#allocation3 + $0xf8] sm:$0xff] %vm1493_vm4, %v1364_v2  ;;  %v1374_v33 = vpop.permute.xlu2 %1373  ;;  %v1596_v2 = vld [vmem:[#allocation2 + $0x211] sm:$0xff] }
 0x284   :  { %1530 = vst.msk [vmem:[#allocation3 + $0x120] sm:$0xff] %vm1493_vm4, %v1374_v33 }
 0x287   :  { %1706 = vrot.lane.b32.xlu1 %v1568_v40, %s6690_s0 }
 0x288   :  { %1710 = vrot.lane.b32.xlu0 %v1570_v13, %s6690_s0 }
 0x289   :  { %v1366_v27 = vpop.permute.xlu1 %1365  ;;  %1702 = vrot.lane.b32.xlu2 %v1566_v48, %s6690_s0  ;;  %v1601_v48 = vld [vmem:[#allocation2 + $0x249] sm:$0xff] }
 0x28a   :  { %1526 = vst.msk [vmem:[#allocation3 + $0x100] sm:$0xff] %vm1493_vm4, %v1366_v27  ;;  %v1370_v52 = vpop.permute.xlu0 %1369  ;;  %v1603_v27 = vld [vmem:[#allocation2 + $0x261] sm:$0xff] }
 0x28b   :  { %1528 = vst.msk [vmem:[#allocation3 + $0x110] sm:$0xff] %vm1493_vm4, %v1370_v52  ;;  %v1380_v24 = vpop.permute.xlu2 %1379  ;;  %v1599_v52 = vld [vmem:[#allocation2 + $0x231] sm:$0xff] }
 0x28c   :  { %1533 = vst.msk [vmem:[#allocation3 + $0x138] sm:$0xff] %vm1493_vm4, %v1380_v24 }
 0x28f   :  { %1712 = vrot.lane.b32.xlu1 %v1571_v60, %s6690_s0 }
 0x290   :  { %1716 = vrot.lane.b32.xlu0 %v1573_v26, %s6690_s0 }
 0x291   :  { %v1372_v37 = vpop.permute.xlu1 %1371  ;;  %1708 = vrot.lane.b32.xlu2 %v1569_v3, %s6690_s0  ;;  %v1604_v3 = vld [vmem:[#allocation2 + $0x271] sm:$0xff] }
 0x292   :  { %1529 = vst.msk [vmem:[#allocation3 + $0x118] sm:$0xff] %vm1493_vm4, %v1372_v37  ;;  %v1376_v62 = vpop.permute.xlu0 %1375  ;;  %v1606_v37 = vld [vmem:[#allocation2 + $0x289] sm:$0xff] }
 0x293   :  { %1531 = vst.msk [vmem:[#allocation3 + $0x128] sm:$0xff] %vm1493_vm4, %v1376_v62  ;;  %v1386_v15 = vpop.permute.xlu2 %1385  ;;  %v1602_v62 = vld [vmem:[#allocation2 + $0x259] sm:$0xff] }
 0x294   :  { %1536 = vst.msk [vmem:[#allocation3 + $0x150] sm:$0xff] %vm1493_vm4, %v1386_v15 }
 0x297   :  { %1718 = vrot.lane.b32.xlu1 %v1574_v21, %s6690_s0 }
 0x298   :  { %1722 = vrot.lane.b32.xlu0 %v1576_v49, %s6690_s0 }
 0x299   :  { %v1378_v61 = vpop.permute.xlu1 %1377  ;;  %1714 = vrot.lane.b32.xlu2 %v1572_v29, %s6690_s0  ;;  %v1607_v29 = vld [vmem:[#allocation2 + $0x291] sm:$0xff] }
 0x29a   :  { %1532 = vst.msk [vmem:[#allocation3 + $0x130] sm:$0xff] %vm1493_vm4, %v1378_v61  ;;  %v1382_v39 = vpop.permute.xlu0 %1381  ;;  %v1609_v61 = vld [vmem:[#allocation2 + $0x2a9] sm:$0xff] }
 0x29b   :  { %1534 = vst.msk [vmem:[#allocation3 + $0x140] sm:$0xff] %vm1493_vm4, %v1382_v39  ;;  %v1392_v47 = vpop.permute.xlu2 %1391  ;;  %v1605_v39 = vld [vmem:[#allocation2 + $0x279] sm:$0xff] }
 0x29c   :  { %1539 = vst.msk [vmem:[#allocation3 + $0x168] sm:$0xff] %vm1493_vm4, %v1392_v47 }
 0x29f   :  { %1724 = vrot.lane.b32.xlu1 %v1577_v10, %s6690_s0 }
 0x2a0   :  { %1728 = vrot.lane.b32.xlu0 %v1579_v57, %s6690_s0 }
 0x2a1   :  { %v1384_v22 = vpop.permute.xlu1 %1383  ;;  %1720 = vrot.lane.b32.xlu2 %v1575_v63, %s6690_s0  ;;  %v1610_v63 = vld [vmem:[#allocation2 + $0x2b9] sm:$0xff] }
 0x2a2   :  { %1535 = vst.msk [vmem:[#allocation3 + $0x148] sm:$0xff] %vm1493_vm4, %v1384_v22  ;;  %v1388_v9 = vpop.permute.xlu0 %1387  ;;  %v1612_v22 = vld [vmem:[#allocation2 + $0x2d1] sm:$0xff] }
 0x2a3   :  { %1537 = vst.msk [vmem:[#allocation3 + $0x158] sm:$0xff] %vm1493_vm4, %v1388_v9  ;;  %v1398_v34 = vpop.permute.xlu2 %1397  ;;  %v1608_v9 = vld [vmem:[#allocation2 + $0x2a1] sm:$0xff] }
 0x2a4   :  { %1542 = vst.msk [vmem:[#allocation3 + $0x180] sm:$0xff] %vm1493_vm4, %v1398_v34 }
 0x2a7   :  { %1730 = vrot.lane.b32.xlu1 %v1580_v41, %s6690_s0 }
 0x2a8   :  { %1734 = vrot.lane.b32.xlu0 %v1582_v18, %s6690_s0 }
 0x2a9   :  { %v1390_v42 = vpop.permute.xlu1 %1389  ;;  %1726 = vrot.lane.b32.xlu2 %v1578_v30, %s6690_s0  ;;  %v1613_v30 = vld [vmem:[#allocation2 + $0x2d9] sm:$0xff] }
 0x2aa   :  { %1538 = vst.msk [vmem:[#allocation3 + $0x160] sm:$0xff] %vm1493_vm4, %v1390_v42  ;;  %v1394_v58 = vpop.permute.xlu0 %1393  ;;  %v1615_v42 = vld [vmem:[#allocation2 + $0x2f1] sm:$0xff] }
 0x2ab   :  { %1540 = vst.msk [vmem:[#allocation3 + $0x170] sm:$0xff] %vm1493_vm4, %v1394_v58  ;;  %v1404_v53 = vpop.permute.xlu2 %1403  ;;  %v1611_v58 = vld [vmem:[#allocation2 + $0x2c1] sm:$0xff] }
 0x2ac   :  { %1545 = vst.msk [vmem:[#allocation3 + $0x198] sm:$0xff] %vm1493_vm4, %v1404_v53 }
 0x2af   :  { %1736 = vrot.lane.b32.xlu1 %v1583_v50, %s6690_s0 }
 0x2b0   :  { %1740 = vrot.lane.b32.xlu0 %v1585_v11, %s6690_s0 }
 0x2b1   :  { %v1396_v19 = vpop.permute.xlu1 %1395  ;;  %1732 = vrot.lane.b32.xlu2 %v1581_v6, %s6690_s0  ;;  %v1616_v6 = vld [vmem:[#allocation2 + $0x301] sm:$0xff] }
 0x2b2   :  { %1541 = vst.msk [vmem:[#allocation3 + $0x178] sm:$0xff] %vm1493_vm4, %v1396_v19  ;;  %v1400_v32 = vpop.permute.xlu0 %1399  ;;  %v1618_v19 = vld [vmem:[#allocation2 + $0x319] sm:$0xff] }
 0x2b3   :  { %1543 = vst.msk [vmem:[#allocation3 + $0x188] sm:$0xff] %vm1493_vm4, %v1400_v32  ;;  %v1410_v31 = vpop.permute.xlu2 %1409  ;;  %v1614_v32 = vld [vmem:[#allocation2 + $0x2e9] sm:$0xff] }
 0x2b4   :  { %1548 = vst.msk [vmem:[#allocation3 + $0x1b0] sm:$0xff] %vm1493_vm4, %v1410_v31 }
 0x2b7   :  { %1742 = vrot.lane.b32.xlu1 %v1586_v51, %s6690_s0 }
 0x2b8   :  { %1746 = vrot.lane.b32.xlu0 %v1588_v8, %s6690_s0 }
 0x2b9   :  { %v1402_v38 = vpop.permute.xlu1 %1401  ;;  %1738 = vrot.lane.b32.xlu2 %v1584_v59, %s6690_s0  ;;  %v1619_v59 = vld [vmem:[#allocation2 + $0x321] sm:$0xff] }
 0x2ba   :  { %1544 = vst.msk [vmem:[#allocation3 + $0x190] sm:$0xff] %vm1493_vm4, %v1402_v38  ;;  %v1406_v4 = vpop.permute.xlu0 %1405  ;;  %v1621_v38 = vld [vmem:[#allocation2 + $0x339] sm:$0xff] }
 0x2bb   :  { %1546 = vst.msk [vmem:[#allocation3 + $0x1a0] sm:$0xff] %vm1493_vm4, %v1406_v4  ;;  %v1416_v36 = vpop.permute.xlu2 %1415  ;;  %v1617_v4 = vld [vmem:[#allocation2 + $0x309] sm:$0xff] }
 0x2bc   :  { %1551 = vst.msk [vmem:[#allocation3 + $0x1c8] sm:$0xff] %vm1493_vm4, %v1416_v36 }
 0x2bf   :  { %1748 = vrot.lane.b32.xlu1 %v1589_v43, %s6690_s0 }
 0x2c0   :  { %1752 = vrot.lane.b32.xlu0 %v1591_v25, %s6690_s0 }
 0x2c1   :  { %v1408_v44 = vpop.permute.xlu1 %1407  ;;  %1744 = vrot.lane.b32.xlu2 %v1587_v20, %s6690_s0  ;;  %v1943_v20 = vld [vmem:[#allocation2 + $0x1a] sm:$0xff] }
 0x2c2   :  { %1547 = vst.msk [vmem:[#allocation3 + $0x1a8] sm:$0xff] %vm1493_vm4, %v1408_v44  ;;  %v1412_v0 = vpop.permute.xlu0 %1411  ;;  %v1945_v44 = vld [vmem:[#allocation2 + $0x32] sm:$0xff] }
 0x2c3   :  { %1549 = vst.msk [vmem:[#allocation3 + $0x1b8] sm:$0xff] %vm1493_vm4, %v1412_v0  ;;  %v1422_v46 = vpop.permute.xlu2 %1421  ;;  %v1620_v0 = vld [vmem:[#allocation2 + $0x331] sm:$0xff] }
 0x2c4   :  { %1554 = vst.msk [vmem:[#allocation3 + $0x1e0] sm:$0xff] %vm1493_vm4, %v1422_v46 }
 0x2c7   :  { %1754 = vrot.lane.b32.xlu1 %v1592_v54, %s6690_s0 }
 0x2c8   :  { %1758 = vrot.lane.b32.xlu0 %v1594_v7, %s6690_s0 }
 0x2c9   :  { %v1414_v35 = vpop.permute.xlu1 %1413  ;;  %1750 = vrot.lane.b32.xlu2 %v1590_v56, %s6690_s0  ;;  %v1946_v56 = vld [vmem:[#allocation2 + $0x3a] sm:$0xff] }
 0x2ca   :  { %1550 = vst.msk [vmem:[#allocation3 + $0x1c0] sm:$0xff] %vm1493_vm4, %v1414_v35  ;;  %v1418_v1 = vpop.permute.xlu0 %1417  ;;  %v1948_v35 = vld [vmem:[#allocation2 + $0x52] sm:$0xff] }
 0x2cb   :  { %1552 = vst.msk [vmem:[#allocation3 + $0x1d0] sm:$0xff] %vm1493_vm4, %v1418_v1  ;;  %v1428_v14 = vpop.permute.xlu2 %1427  ;;  %v1944_v1 = vld [vmem:[#allocation2 + $0x22] sm:$0xff] }
 0x2cc   :  { %1557 = vst.msk [vmem:[#allocation3 + $0x1f8] sm:$0xff] %vm1493_vm4, %v1428_v14 }
 0x2cf   :  { %1760 = vrot.lane.b32.xlu1 %v1595_v5, %s6690_s0 }
 0x2d0   :  { %1764 = vrot.lane.b32.xlu0 %v1597_v45, %s6690_s0 }
 0x2d1   :  { %v1420_v17 = vpop.permute.xlu1 %1419  ;;  %1756 = vrot.lane.b32.xlu2 %v1593_v12, %s6690_s0  ;;  %v1949_v12 = vld [vmem:[#allocation2 + $0x62] sm:$0xff] }
 0x2d2   :  { %1553 = vst.msk [vmem:[#allocation3 + $0x1d8] sm:$0xff] %vm1493_vm4, %v1420_v17  ;;  %v1424_v16 = vpop.permute.xlu0 %1423  ;;  %v1951_v17 = vld [vmem:[#allocation2 + $0x7a] sm:$0xff] }
 0x2d3   :  { %1555 = vst.msk [vmem:[#allocation3 + $0x1e8] sm:$0xff] %vm1493_vm4, %v1424_v16  ;;  %v1691_v55 = vpop.permute.xlu2 %1690  ;;  %v1947_v16 = vld [vmem:[#allocation2 + $0x4a] sm:$0xff] }
 0x2d4   :  { %1881 = vst.msk [vmem:[#allocation3 + $0x10] sm:$0xff] %vm1878_vm5, %v1691_v55 }
 0x2d7   :  { %1766 = vrot.lane.b32.xlu1 %v1598_v23, %s6690_s0 }
 0x2d8   :  { %1770 = vrot.lane.b32.xlu0 %v1600_v28, %s6690_s0 }
 0x2d9   :  { %v1426_v33 = vpop.permute.xlu1 %1425  ;;  %1762 = vrot.lane.b32.xlu2 %v1596_v2, %s6690_s0  ;;  %v1952_v2 = vld [vmem:[#allocation2 + $0x82] sm:$0xff] }
 0x2da   :  { %1556 = vst.msk [vmem:[#allocation3 + $0x1f0] sm:$0xff] %vm1493_vm4, %v1426_v33  ;;  %v1687_v40 = vpop.permute.xlu0 %1686  ;;  %v1954_v33 = vld [vmem:[#allocation2 + $0x9a] sm:$0xff] }
 0x2db   :  { %1879 = vst.msk [vmem:[#allocation3] sm:$0xff] %vm1878_vm5, %v1687_v40  ;;  %v1697_v13 = vpop.permute.xlu2 %1696  ;;  %v1950_v40 = vld [vmem:[#allocation2 + $0x6a] sm:$0xff] }
 0x2dc   :  { %1884 = vst.msk [vmem:[#allocation3 + $0x28] sm:$0xff] %vm1878_vm5, %v1697_v13 }
 0x2df   :  { %1772 = vrot.lane.b32.xlu1 %v1601_v48, %s6690_s0 }
 0x2e0   :  { %1776 = vrot.lane.b32.xlu0 %v1603_v27, %s6690_s0 }
 0x2e1   :  { %v1689_v24 = vpop.permute.xlu1 %1688  ;;  %1768 = vrot.lane.b32.xlu2 %v1599_v52, %s6690_s0  ;;  %v1955_v52 = vld [vmem:[#allocation2 + $0xaa] sm:$0xff] }
 0x2e2   :  { %1880 = vst.msk [vmem:[#allocation3 + $0x8] sm:$0xff] %vm1878_vm5, %v1689_v24  ;;  %v1693_v60 = vpop.permute.xlu0 %1692  ;;  %v1957_v24 = vld [vmem:[#allocation2 + $0xc2] sm:$0xff] }
 0x2e3   :  { %1882 = vst.msk [vmem:[#allocation3 + $0x18] sm:$0xff] %vm1878_vm5, %v1693_v60  ;;  %v1703_v26 = vpop.permute.xlu2 %1702  ;;  %v1953_v60 = vld [vmem:[#allocation2 + $0x92] sm:$0xff] }
 0x2e4   :  { %1887 = vst.msk [vmem:[#allocation3 + $0x40] sm:$0xff] %vm1878_vm5, %v1703_v26 }
 0x2e7   :  { %1778 = vrot.lane.b32.xlu1 %v1604_v3, %s6690_s0 }
 0x2e8   :  { %1782 = vrot.lane.b32.xlu0 %v1606_v37, %s6690_s0 }
 0x2e9   :  { %v1695_v15 = vpop.permute.xlu1 %1694  ;;  %1774 = vrot.lane.b32.xlu2 %v1602_v62, %s6690_s0  ;;  %v1958_v62 = vld [vmem:[#allocation2 + $0xca] sm:$0xff] }
 0x2ea   :  { %1883 = vst.msk [vmem:[#allocation3 + $0x20] sm:$0xff] %vm1878_vm5, %v1695_v15  ;;  %v1699_v21 = vpop.permute.xlu0 %1698  ;;  %v1960_v15 = vld [vmem:[#allocation2 + $0xe2] sm:$0xff] }
 0x2eb   :  { %1885 = vst.msk [vmem:[#allocation3 + $0x30] sm:$0xff] %vm1878_vm5, %v1699_v21  ;;  %v1709_v49 = vpop.permute.xlu2 %1708  ;;  %v1956_v21 = vld [vmem:[#allocation2 + $0xb2] sm:$0xff] }
 0x2ec   :  { %1890 = vst.msk [vmem:[#allocation3 + $0x58] sm:$0xff] %vm1878_vm5, %v1709_v49 }
 0x2ef   :  { %1784 = vrot.lane.b32.xlu1 %v1607_v29, %s6690_s0 }
 0x2f0   :  { %1788 = vrot.lane.b32.xlu0 %v1609_v61, %s6690_s0 }
 0x2f1   :  { %v1701_v47 = vpop.permute.xlu1 %1700  ;;  %1780 = vrot.lane.b32.xlu2 %v1605_v39, %s6690_s0  ;;  %v1961_v39 = vld [vmem:[#allocation2 + $0xf2] sm:$0xff] }
 0x2f2   :  { %1886 = vst.msk [vmem:[#allocation3 + $0x38] sm:$0xff] %vm1878_vm5, %v1701_v47  ;;  %v1705_v10 = vpop.permute.xlu0 %1704  ;;  %v1963_v47 = vld [vmem:[#allocation2 + $0x10a] sm:$0xff] }
 0x2f3   :  { %1888 = vst.msk [vmem:[#allocation3 + $0x48] sm:$0xff] %vm1878_vm5, %v1705_v10  ;;  %v1715_v57 = vpop.permute.xlu2 %1714  ;;  %v1959_v10 = vld [vmem:[#allocation2 + $0xda] sm:$0xff] }
 0x2f4   :  { %1893 = vst.msk [vmem:[#allocation3 + $0x70] sm:$0xff] %vm1878_vm5, %v1715_v57 }
 0x2f7   :  { %1790 = vrot.lane.b32.xlu1 %v1610_v63, %s6690_s0 }
 0x2f8   :  { %1794 = vrot.lane.b32.xlu0 %v1612_v22, %s6690_s0 }
 0x2f9   :  { %v1707_v34 = vpop.permute.xlu1 %1706  ;;  %1786 = vrot.lane.b32.xlu2 %v1608_v9, %s6690_s0  ;;  %v1964_v9 = vld [vmem:[#allocation2 + $0x112] sm:$0xff] }
 0x2fa   :  { %1889 = vst.msk [vmem:[#allocation3 + $0x50] sm:$0xff] %vm1878_vm5, %v1707_v34  ;;  %v1711_v41 = vpop.permute.xlu0 %1710  ;;  %v1966_v34 = vld [vmem:[#allocation2 + $0x12a] sm:$0xff] }
 0x2fb   :  { %1891 = vst.msk [vmem:[#allocation3 + $0x60] sm:$0xff] %vm1878_vm5, %v1711_v41  ;;  %v1721_v18 = vpop.permute.xlu2 %1720  ;;  %v1962_v41 = vld [vmem:[#allocation2 + $0xfa] sm:$0xff] }
 0x2fc   :  { %1896 = vst.msk [vmem:[#allocation3 + $0x88] sm:$0xff] %vm1878_vm5, %v1721_v18 }
 0x2ff   :  { %1796 = vrot.lane.b32.xlu1 %v1613_v30, %s6690_s0 }
 0x300   :  { %1800 = vrot.lane.b32.xlu0 %v1615_v42, %s6690_s0 }
 0x301   :  { %v1713_v53 = vpop.permute.xlu1 %1712  ;;  %1792 = vrot.lane.b32.xlu2 %v1611_v58, %s6690_s0  ;;  %v1967_v58 = vld [vmem:[#allocation2 + $0x13a] sm:$0xff] }
 0x302   :  { %1892 = vst.msk [vmem:[#allocation3 + $0x68] sm:$0xff] %vm1878_vm5, %v1713_v53  ;;  %v1717_v50 = vpop.permute.xlu0 %1716  ;;  %v1969_v53 = vld [vmem:[#allocation2 + $0x152] sm:$0xff] }
 0x303   :  { %1894 = vst.msk [vmem:[#allocation3 + $0x78] sm:$0xff] %vm1878_vm5, %v1717_v50  ;;  %v1727_v11 = vpop.permute.xlu2 %1726  ;;  %v1965_v50 = vld [vmem:[#allocation2 + $0x122] sm:$0xff] }
 0x304   :  { %1899 = vst.msk [vmem:[#allocation3 + $0xa0] sm:$0xff] %vm1878_vm5, %v1727_v11 }
 0x307   :  { %1802 = vrot.lane.b32.xlu1 %v1616_v6, %s6690_s0 }
 0x308   :  { %1806 = vrot.lane.b32.xlu0 %v1618_v19, %s6690_s0 }
 0x309   :  { %v1719_v31 = vpop.permute.xlu1 %1718  ;;  %1798 = vrot.lane.b32.xlu2 %v1614_v32, %s6690_s0  ;;  %v1970_v32 = vld [vmem:[#allocation2 + $0x15a] sm:$0xff] }
 0x30a   :  { %1895 = vst.msk [vmem:[#allocation3 + $0x80] sm:$0xff] %vm1878_vm5, %v1719_v31  ;;  %v1723_v51 = vpop.permute.xlu0 %1722  ;;  %v1972_v31 = vld [vmem:[#allocation2 + $0x172] sm:$0xff] }
 0x30b   :  { %1897 = vst.msk [vmem:[#allocation3 + $0x90] sm:$0xff] %vm1878_vm5, %v1723_v51  ;;  %v1733_v8 = vpop.permute.xlu2 %1732  ;;  %v1968_v51 = vld [vmem:[#allocation2 + $0x142] sm:$0xff] }
 0x30c   :  { %1902 = vst.msk [vmem:[#allocation3 + $0xb8] sm:$0xff] %vm1878_vm5, %v1733_v8 }
 0x30f   :  { %1808 = vrot.lane.b32.xlu1 %v1619_v59, %s6690_s0 }
 0x310   :  { %1812 = vrot.lane.b32.xlu0 %v1621_v38, %s6690_s0 }
 0x311   :  { %v1725_v36 = vpop.permute.xlu1 %1724  ;;  %1804 = vrot.lane.b32.xlu2 %v1617_v4, %s6690_s0  ;;  %v1973_v4 = vld [vmem:[#allocation2 + $0x182] sm:$0xff] }
 0x312   :  { %1898 = vst.msk [vmem:[#allocation3 + $0x98] sm:$0xff] %vm1878_vm5, %v1725_v36  ;;  %v1729_v43 = vpop.permute.xlu0 %1728  ;;  %v1975_v36 = vld [vmem:[#allocation2 + $0x1ca] sm:$0xff] }
 0x313   :  { %1900 = vst.msk [vmem:[#allocation3 + $0xa8] sm:$0xff] %vm1878_vm5, %v1729_v43  ;;  %v1739_v25 = vpop.permute.xlu2 %1738  ;;  %v1971_v43 = vld [vmem:[#allocation2 + $0x16a] sm:$0xff] }
 0x314   :  { %1905 = vst.msk [vmem:[#allocation3 + $0xd0] sm:$0xff] %vm1878_vm5, %v1739_v25 }
 0x317   :  { %2071 = vrot.lane.b32.xlu1 %v1943_v20, %s6691_s29 }
 0x318   :  { %2075 = vrot.lane.b32.xlu0 %v1945_v44, %s6691_s29 }
 0x319   :  { %v1731_v46 = vpop.permute.xlu1 %1730  ;;  %1810 = vrot.lane.b32.xlu2 %v1620_v0, %s6690_s0  ;;  %v1976_v0 = vld [vmem:[#allocation2 + $0x1d2] sm:$0xff] }
 0x31a   :  { %1901 = vst.msk [vmem:[#allocation3 + $0xb0] sm:$0xff] %vm1878_vm5, %v1731_v46  ;;  %v1735_v54 = vpop.permute.xlu0 %1734  ;;  %v8054_v46 = vld [vmem:[#allocation2 + $0x1ea] sm:$0xff] }
 0x31b   :  { %1903 = vst.msk [vmem:[#allocation3 + $0xc0] sm:$0xff] %vm1878_vm5, %v1735_v54  ;;  %v1745_v7 = vpop.permute.xlu2 %1744  ;;  %v1974_v54 = vld [vmem:[#allocation2 + $0x18a] sm:$0xff] }
 0x31c   :  { %1908 = vst.msk [vmem:[#allocation3 + $0xe8] sm:$0xff] %vm1878_vm5, %v1745_v7 }
 0x31f   :  { %2077 = vrot.lane.b32.xlu1 %v1946_v56, %s6691_s29 }
 0x320   :  { %2081 = vrot.lane.b32.xlu0 %v1948_v35, %s6691_s29 }
 0x321   :  { %v1737_v14 = vpop.permute.xlu1 %1736  ;;  %2073 = vrot.lane.b32.xlu2 %v1944_v1, %s6691_s29  ;;  %v1979_v1 = vld [vmem:[#allocation2 + $0x1fa] sm:$0xff] }
 0x322   :  { %1904 = vst.msk [vmem:[#allocation3 + $0xc8] sm:$0xff] %vm1878_vm5, %v1737_v14  ;;  %v1741_v5 = vpop.permute.xlu0 %1740  ;;  %v1981_v14 = vld [vmem:[#allocation2 + $0x212] sm:$0xff] }
 0x323   :  { %1906 = vst.msk [vmem:[#allocation3 + $0xd8] sm:$0xff] %vm1878_vm5, %v1741_v5  ;;  %v1751_v45 = vpop.permute.xlu2 %1750  ;;  %v8063_v5 = vld [vmem:[#allocation2 + $0x1e2] sm:$0xff] }
 0x324   :  { %1911 = vst.msk [vmem:[#allocation3 + $0x100] sm:$0xff] %vm1878_vm5, %v1751_v45 }
 0x327   :  { %2083 = vrot.lane.b32.xlu1 %v1949_v12, %s6691_s29 }
 0x328   :  { %2087 = vrot.lane.b32.xlu0 %v1951_v17, %s6691_s29 }
 0x329   :  { %v1743_v55 = vpop.permute.xlu1 %1742  ;;  %2079 = vrot.lane.b32.xlu2 %v1947_v16, %s6691_s29  ;;  %v1982_v16 = vld [vmem:[#allocation2 + $0x21a] sm:$0xff] }
 0x32a   :  { %1907 = vst.msk [vmem:[#allocation3 + $0xe0] sm:$0xff] %vm1878_vm5, %v1743_v55  ;;  %v1747_v23 = vpop.permute.xlu0 %1746  ;;  %v1984_v55 = vld [vmem:[#allocation2 + $0x232] sm:$0xff] }
 0x32b   :  { %1909 = vst.msk [vmem:[#allocation3 + $0xf0] sm:$0xff] %vm1878_vm5, %v1747_v23  ;;  %v1757_v28 = vpop.permute.xlu2 %1756  ;;  %v1980_v23 = vld [vmem:[#allocation2 + $0x202] sm:$0xff] }
 0x32c   :  { %1914 = vst.msk [vmem:[#allocation3 + $0x118] sm:$0xff] %vm1878_vm5, %v1757_v28 }
 0x32f   :  { %2089 = vrot.lane.b32.xlu1 %v1952_v2, %s6691_s29 }
 0x330   :  { %2093 = vrot.lane.b32.xlu0 %v1954_v33, %s6691_s29 }
 0x331   :  { %v1749_v13 = vpop.permute.xlu1 %1748  ;;  %2085 = vrot.lane.b32.xlu2 %v1950_v40, %s6691_s29  ;;  %v1985_v40 = vld [vmem:[#allocation2 + $0x242] sm:$0xff] }
 0x332   :  { %1910 = vst.msk [vmem:[#allocation3 + $0xf8] sm:$0xff] %vm1878_vm5, %v1749_v13  ;;  %v1753_v48 = vpop.permute.xlu0 %1752  ;;  %v1987_v13 = vld [vmem:[#allocation2 + $0x25a] sm:$0xff] }
 0x333   :  { %1912 = vst.msk [vmem:[#allocation3 + $0x108] sm:$0xff] %vm1878_vm5, %v1753_v48  ;;  %v1763_v27 = vpop.permute.xlu2 %1762  ;;  %v1983_v48 = vld [vmem:[#allocation2 + $0x22a] sm:$0xff] }
 0x334   :  { %1917 = vst.msk [vmem:[#allocation3 + $0x130] sm:$0xff] %vm1878_vm5, %v1763_v27 }
 0x337   :  { %2095 = vrot.lane.b32.xlu1 %v1955_v52, %s6691_s29 }
 0x338   :  { %2099 = vrot.lane.b32.xlu0 %v1957_v24, %s6691_s29 }
 0x339   :  { %v1755_v26 = vpop.permute.xlu1 %1754  ;;  %2091 = vrot.lane.b32.xlu2 %v1953_v60, %s6691_s29  ;;  %v1988_v60 = vld [vmem:[#allocation2 + $0x262] sm:$0xff] }
 0x33a   :  { %1913 = vst.msk [vmem:[#allocation3 + $0x110] sm:$0xff] %vm1878_vm5, %v1755_v26  ;;  %v1759_v3 = vpop.permute.xlu0 %1758  ;;  %v1990_v26 = vld [vmem:[#allocation2 + $0x27a] sm:$0xff] }
 0x33b   :  { %1915 = vst.msk [vmem:[#allocation3 + $0x120] sm:$0xff] %vm1878_vm5, %v1759_v3  ;;  %v1769_v37 = vpop.permute.xlu2 %1768  ;;  %v1986_v3 = vld [vmem:[#allocation2 + $0x24a] sm:$0xff] }
 0x33c   :  { %1920 = vst.msk [vmem:[#allocation3 + $0x148] sm:$0xff] %vm1878_vm5, %v1769_v37 }
 0x33f   :  { %2101 = vrot.lane.b32.xlu1 %v1958_v62, %s6691_s29 }
 0x340   :  { %2105 = vrot.lane.b32.xlu0 %v1960_v15, %s6691_s29 }
 0x341   :  { %v1761_v49 = vpop.permute.xlu1 %1760  ;;  %2097 = vrot.lane.b32.xlu2 %v1956_v21, %s6691_s29  ;;  %v1991_v21 = vld [vmem:[#allocation2 + $0x28a] sm:$0xff] }
 0x342   :  { %1916 = vst.msk [vmem:[#allocation3 + $0x128] sm:$0xff] %vm1878_vm5, %v1761_v49  ;;  %v1765_v29 = vpop.permute.xlu0 %1764  ;;  %v8090_v49 = vld [vmem:[#allocation2 + $0x2a2] sm:$0xff] }
 0x343   :  { %1918 = vst.msk [vmem:[#allocation3 + $0x138] sm:$0xff] %vm1878_vm5, %v1765_v29  ;;  %v1775_v61 = vpop.permute.xlu2 %1774  ;;  %v1989_v29 = vld [vmem:[#allocation2 + $0x272] sm:$0xff] }
 0x344   :  { %1923 = vst.msk [vmem:[#allocation3 + $0x160] sm:$0xff] %vm1878_vm5, %v1775_v61 }
 0x347   :  { %2107 = vrot.lane.b32.xlu1 %v1961_v39, %s6691_s29 }
 0x348   :  { %2111 = vrot.lane.b32.xlu0 %v1963_v47, %s6691_s29 }
 0x349   :  { %v1767_v57 = vpop.permute.xlu1 %1766  ;;  %2103 = vrot.lane.b32.xlu2 %v1959_v10, %s6691_s29  ;;  %v8098_v10 = vld [vmem:[#allocation2 + $0x2aa] sm:$0xff] }
 0x34a   :  { %1919 = vst.msk [vmem:[#allocation3 + $0x140] sm:$0xff] %vm1878_vm5, %v1767_v57  ;;  %v1771_v63 = vpop.permute.xlu0 %1770  ;;  %v8101_v57 = vld [vmem:[#allocation2 + $0x2c2] sm:$0xff] }
 0x34b   :  { %1921 = vst.msk [vmem:[#allocation3 + $0x150] sm:$0xff] %vm1878_vm5, %v1771_v63  ;;  %v1781_v22 = vpop.permute.xlu2 %1780  ;;  %v1992_v63 = vld [vmem:[#allocation2 + $0x292] sm:$0xff] }
 0x34c   :  { %1926 = vst.msk [vmem:[#allocation3 + $0x178] sm:$0xff] %vm1878_vm5, %v1781_v22 }
 0x34f   :  { %2113 = vrot.lane.b32.xlu1 %v1964_v9, %s6691_s29 }
 0x350   :  { %2117 = vrot.lane.b32.xlu0 %v1966_v34, %s6691_s29 }
 0x351   :  { %v1773_v18 = vpop.permute.xlu1 %1772  ;;  %2109 = vrot.lane.b32.xlu2 %v1962_v41, %s6691_s29  ;;  %v1997_v41 = vld [vmem:[#allocation2 + $0x2d2] sm:$0xff] }
 0x352   :  { %1922 = vst.msk [vmem:[#allocation3 + $0x158] sm:$0xff] %vm1878_vm5, %v1773_v18  ;;  %v1777_v30 = vpop.permute.xlu0 %1776  ;;  %v1999_v18 = vld [vmem:[#allocation2 + $0x2ea] sm:$0xff] }
 0x353   :  { %1924 = vst.msk [vmem:[#allocation3 + $0x168] sm:$0xff] %vm1878_vm5, %v1777_v30  ;;  %v1787_v42 = vpop.permute.xlu2 %1786  ;;  %v8111_v30 = vld [vmem:[#allocation2 + $0x2ba] sm:$0xff] }
 0x354   :  { %1929 = vst.msk [vmem:[#allocation3 + $0x190] sm:$0xff] %vm1878_vm5, %v1787_v42 }
 0x357   :  { %2119 = vrot.lane.b32.xlu1 %v1967_v58, %s6691_s29 }
 0x358   :  { %2123 = vrot.lane.b32.xlu0 %v1969_v53, %s6691_s29 }
 0x359   :  { %v1779_v11 = vpop.permute.xlu1 %1778  ;;  %2115 = vrot.lane.b32.xlu2 %v1965_v50, %s6691_s29  ;;  %v2000_v50 = vld [vmem:[#allocation2 + $0x2f2] sm:$0xff] }
 0x35a   :  { %1925 = vst.msk [vmem:[#allocation3 + $0x170] sm:$0xff] %vm1878_vm5, %v1779_v11  ;;  %v1783_v6 = vpop.permute.xlu0 %1782  ;;  %v2002_v11 = vld [vmem:[#allocation2 + $0x30a] sm:$0xff] }
 0x35b   :  { %1927 = vst.msk [vmem:[#allocation3 + $0x180] sm:$0xff] %vm1878_vm5, %v1783_v6  ;;  %v1793_v19 = vpop.permute.xlu2 %1792  ;;  %v1998_v6 = vld [vmem:[#allocation2 + $0x2da] sm:$0xff] }
 0x35c   :  { %1932 = vst.msk [vmem:[#allocation3 + $0x1a8] sm:$0xff] %vm1878_vm5, %v1793_v19 }
 0x35f   :  { %2125 = vrot.lane.b32.xlu1 %v1970_v32, %s6691_s29 }
 0x360   :  { %2129 = vrot.lane.b32.xlu0 %v1972_v31, %s6691_s29 }
 0x361   :  { %v1785_v8 = vpop.permute.xlu1 %1784  ;;  %2121 = vrot.lane.b32.xlu2 %v1968_v51, %s6691_s29  ;;  %v2003_v51 = vld [vmem:[#allocation2 + $0x31a] sm:$0xff] }
 0x362   :  { %1928 = vst.msk [vmem:[#allocation3 + $0x188] sm:$0xff] %vm1878_vm5, %v1785_v8  ;;  %v1789_v59 = vpop.permute.xlu0 %1788  ;;  %v2005_v8 = vld [vmem:[#allocation2 + $0x332] sm:$0xff] }
 0x363   :  { %1930 = vst.msk [vmem:[#allocation3 + $0x198] sm:$0xff] %vm1878_vm5, %v1789_v59  ;;  %v1799_v38 = vpop.permute.xlu2 %1798  ;;  %v2001_v59 = vld [vmem:[#allocation2 + $0x302] sm:$0xff] }
 0x364   :  { %1935 = vst.msk [vmem:[#allocation3 + $0x1c0] sm:$0xff] %vm1878_vm5, %v1799_v38 }
 0x367   :  { %2131 = vrot.lane.b32.xlu1 %v1973_v4, %s6691_s29 }
 0x368   :  { %2135 = vrot.lane.b32.xlu0 %v1975_v36, %s6691_s29 }
 0x369   :  { %v1791_v25 = vpop.permute.xlu1 %1790  ;;  %2127 = vrot.lane.b32.xlu2 %v1971_v43, %s6691_s29  ;;  %v2006_v43 = vld [vmem:[#allocation2 + $0x33a] sm:$0xff] }
 0x36a   :  { %1931 = vst.msk [vmem:[#allocation3 + $0x1a0] sm:$0xff] %vm1878_vm5, %v1791_v25  ;;  %v1795_v20 = vpop.permute.xlu0 %1794  ;;  %v2330_v25 = vld [vmem:[#allocation2 + $0x38] sm:$0xff] }
 0x36b   :  { %1933 = vst.msk [vmem:[#allocation3 + $0x1b0] sm:$0xff] %vm1878_vm5, %v1795_v20  ;;  %v1805_v44 = vpop.permute.xlu2 %1804  ;;  %v2004_v20 = vld [vmem:[#allocation2 + $0x322] sm:$0xff] }
 0x36c   :  { %1938 = vst.msk [vmem:[#allocation3 + $0x1d8] sm:$0xff] %vm1878_vm5, %v1805_v44 }
 0x36f   :  { %2137 = vrot.lane.b32.xlu1 %v1976_v0, %s6691_s29 }
 0x370   :  { %2141 = vrot.lane.b32.xlu0 %v8054_v46, %s6691_s29 }
 0x371   :  { %v1797_v7 = vpop.permute.xlu1 %1796  ;;  %2133 = vrot.lane.b32.xlu2 %v1974_v54, %s6691_s29 }
 0x372   :  { %1934 = vst.msk [vmem:[#allocation3 + $0x1b8] sm:$0xff] %vm1878_vm5, %v1797_v7  ;;  %v1801_v56 = vpop.permute.xlu0 %1800  ;;  %v2331_v7 = vld [vmem:[#allocation2 + $0x48] sm:$0xff] }
 0x373   :  { %1936 = vst.msk [vmem:[#allocation3 + $0x1c8] sm:$0xff] %vm1878_vm5, %v1801_v56  ;;  %v1811_v35 = vpop.permute.xlu2 %1810  ;;  %v2333_v56 = vld [vmem:[#allocation2 + $0x60] sm:$0xff] }
 0x374   :  { %1941 = vst.msk [vmem:[#allocation3 + $0x1f0] sm:$0xff] %vm1878_vm5, %v1811_v35  ;;  %v2329_v35 = vld [vmem:[#allocation2 + $0x30] sm:$0xff] }
 0x377   :  { %2143 = vrot.lane.b32.xlu1 %v1979_v1, %s6691_s29 }
 0x378   :  { %2147 = vrot.lane.b32.xlu0 %v1981_v14, %s6691_s29 }
 0x379   :  { %v1803_v45 = vpop.permute.xlu1 %1802  ;;  %2139 = vrot.lane.b32.xlu2 %v8063_v5, %s6691_s29 }
 0x37a   :  { %1937 = vst.msk [vmem:[#allocation3 + $0x1d0] sm:$0xff] %vm1878_vm5, %v1803_v45  ;;  %v1807_v12 = vpop.permute.xlu0 %1806 }
 0x37b   :  { %1939 = vst.msk [vmem:[#allocation3 + $0x1e0] sm:$0xff] %vm1878_vm5, %v1807_v12  ;;  %v2074_v17 = vpop.permute.xlu2 %2073  ;;  %v2334_v12 = vld [vmem:[#allocation2 + $0x68] sm:$0xff] }
 0x37c   :  { %2265 = vst.msk [vmem:[#allocation3 + $0x8] sm:$0xff] %vm2263_vm6, %v2074_v17  ;;  %v2336_v17 = vld [vmem:[#allocation2 + $0x80] sm:$0xff] }
 0x37f   :  { %2149 = vrot.lane.b32.xlu1 %v1982_v16, %s6691_s29  ;;  %v2332_v16 = vld [vmem:[#allocation2 + $0x50] sm:$0xff] }
 0x380   :  { %2153 = vrot.lane.b32.xlu0 %v1984_v55, %s6691_s29 }
 0x381   :  { %v1809_v28 = vpop.permute.xlu1 %1808  ;;  %2145 = vrot.lane.b32.xlu2 %v1980_v23, %s6691_s29 }
 0x382   :  { %1940 = vst.msk [vmem:[#allocation3 + $0x1e8] sm:$0xff] %vm1878_vm5, %v1809_v28  ;;  %v1813_v2 = vpop.permute.xlu0 %1812 }
 0x383   :  { %1942 = vst.msk [vmem:[#allocation3 + $0x1f8] sm:$0xff] %vm1878_vm5, %v1813_v2  ;;  %v2080_v33 = vpop.permute.xlu2 %2079  ;;  %v2337_v2 = vld [vmem:[#allocation2 + $0x90] sm:$0xff] }
 0x384   :  { %2268 = vst.msk [vmem:[#allocation3 + $0x20] sm:$0xff] %vm2263_vm6, %v2080_v33  ;;  %v2339_v33 = vld [vmem:[#allocation2 + $0xa8] sm:$0xff] }
 0x387   :  { %2155 = vrot.lane.b32.xlu1 %v1985_v40, %s6691_s29  ;;  %v2335_v40 = vld [vmem:[#allocation2 + $0x78] sm:$0xff] }
 0x388   :  { %2159 = vrot.lane.b32.xlu0 %v1987_v13, %s6691_s29 }
 0x389   :  { %v2072_v27 = vpop.permute.xlu1 %2071  ;;  %2151 = vrot.lane.b32.xlu2 %v1983_v48, %s6691_s29 }
 0x38a   :  { %2264 = vst.msk [vmem:[#allocation3] sm:$0xff] %vm2263_vm6, %v2072_v27  ;;  %v2076_v52 = vpop.permute.xlu0 %2075 }
 0x38b   :  { %2266 = vst.msk [vmem:[#allocation3 + $0x10] sm:$0xff] %vm2263_vm6, %v2076_v52  ;;  %v2086_v24 = vpop.permute.xlu2 %2085  ;;  %v2340_v52 = vld [vmem:[#allocation2 + $0xb0] sm:$0xff] }
 0x38c   :  { %2271 = vst.msk [vmem:[#allocation3 + $0x38] sm:$0xff] %vm2263_vm6, %v2086_v24  ;;  %v2342_v24 = vld [vmem:[#allocation2 + $0xc8] sm:$0xff] }
 0x38f   :  { %2161 = vrot.lane.b32.xlu1 %v1988_v60, %s6691_s29  ;;  %v2338_v60 = vld [vmem:[#allocation2 + $0x98] sm:$0xff] }
 0x390   :  { %2165 = vrot.lane.b32.xlu0 %v1990_v26, %s6691_s29 }
 0x391   :  { %v2078_v37 = vpop.permute.xlu1 %2077  ;;  %2157 = vrot.lane.b32.xlu2 %v1986_v3, %s6691_s29 }
 0x392   :  { %2267 = vst.msk [vmem:[#allocation3 + $0x18] sm:$0xff] %vm2263_vm6, %v2078_v37  ;;  %v2082_v62 = vpop.permute.xlu0 %2081 }
 0x393   :  { %2269 = vst.msk [vmem:[#allocation3 + $0x28] sm:$0xff] %vm2263_vm6, %v2082_v62  ;;  %v2092_v15 = vpop.permute.xlu2 %2091  ;;  %v2343_v62 = vld [vmem:[#allocation2 + $0xd8] sm:$0xff] }
 0x394   :  { %2274 = vst.msk [vmem:[#allocation3 + $0x50] sm:$0xff] %vm2263_vm6, %v2092_v15  ;;  %v2345_v15 = vld [vmem:[#allocation2 + $0xf0] sm:$0xff] }
 0x397   :  { %2167 = vrot.lane.b32.xlu1 %v1991_v21, %s6691_s29  ;;  %v2341_v21 = vld [vmem:[#allocation2 + $0xc0] sm:$0xff] }
 0x398   :  { %2171 = vrot.lane.b32.xlu0 %v8090_v49, %s6691_s29 }
 0x399   :  { %v2084_v61 = vpop.permute.xlu1 %2083  ;;  %2163 = vrot.lane.b32.xlu2 %v1989_v29, %s6691_s29 }
 0x39a   :  { %2270 = vst.msk [vmem:[#allocation3 + $0x30] sm:$0xff] %vm2263_vm6, %v2084_v61  ;;  %v2088_v39 = vpop.permute.xlu0 %2087 }
 0x39b   :  { %2272 = vst.msk [vmem:[#allocation3 + $0x40] sm:$0xff] %vm2263_vm6, %v2088_v39  ;;  %v2098_v47 = vpop.permute.xlu2 %2097 }
 0x39c   :  { %2277 = vst.msk [vmem:[#allocation3 + $0x68] sm:$0xff] %vm2263_vm6, %v2098_v47  ;;  %v2346_v47 = vld [vmem:[#allocation2 + $0xf8] sm:$0xff] }
 0x39f   :  { %2173 = vrot.lane.b32.xlu1 %v8098_v10, %s6691_s29 }
 0x3a0   :  { %2177 = vrot.lane.b32.xlu0 %v8101_v57, %s6691_s29 }
 0x3a1   :  { %v2090_v22 = vpop.permute.xlu1 %2089  ;;  %2169 = vrot.lane.b32.xlu2 %v1992_v63, %s6691_s29  ;;  %v2348_v63 = vld [vmem:[#allocation2 + $0x110] sm:$0xff] }
 0x3a2   :  { %2273 = vst.msk [vmem:[#allocation3 + $0x48] sm:$0xff] %vm2263_vm6, %v2090_v22  ;;  %v2094_v9 = vpop.permute.xlu0 %2093  ;;  %v2344_v22 = vld [vmem:[#allocation2 + $0xe0] sm:$0xff] }
 0x3a3   :  { %2275 = vst.msk [vmem:[#allocation3 + $0x58] sm:$0xff] %vm2263_vm6, %v2094_v9  ;;  %v2104_v34 = vpop.permute.xlu2 %2103 }
 0x3a4   :  { %2280 = vst.msk [vmem:[#allocation3 + $0x80] sm:$0xff] %vm2263_vm6, %v2104_v34 }
 0x3a7   :  { %2179 = vrot.lane.b32.xlu1 %v1997_v41, %s6691_s29 }
 0x3a8   :  { %2183 = vrot.lane.b32.xlu0 %v1999_v18, %s6691_s29  ;;  %v2349_v18 = vld [vmem:[#allocation2 + $0x120] sm:$0xff] }
 0x3a9   :  { %v2096_v42 = vpop.permute.xlu1 %2095  ;;  %2175 = vrot.lane.b32.xlu2 %v8111_v30, %s6691_s29 }
 0x3aa   :  { %2276 = vst.msk [vmem:[#allocation3 + $0x60] sm:$0xff] %vm2263_vm6, %v2096_v42  ;;  %v2100_v58 = vpop.permute.xlu0 %2099  ;;  %v2351_v42 = vld [vmem:[#allocation2 + $0x138] sm:$0xff] }
 0x3ab   :  { %2278 = vst.msk [vmem:[#allocation3 + $0x70] sm:$0xff] %vm2263_vm6, %v2100_v58  ;;  %v2110_v53 = vpop.permute.xlu2 %2109  ;;  %v2347_v58 = vld [vmem:[#allocation2 + $0x108] sm:$0xff] }
 0x3ac   :  { %2283 = vst.msk [vmem:[#allocation3 + $0x98] sm:$0xff] %vm2263_vm6, %v2110_v53 }
 0x3af   :  { %2185 = vrot.lane.b32.xlu1 %v2000_v50, %s6691_s29 }
 0x3b0   :  { %2189 = vrot.lane.b32.xlu0 %v2002_v11, %s6691_s29 }
 0x3b1   :  { %v2102_v19 = vpop.permute.xlu1 %2101  ;;  %2181 = vrot.lane.b32.xlu2 %v1998_v6, %s6691_s29  ;;  %v2352_v6 = vld [vmem:[#allocation2 + $0x140] sm:$0xff] }
 0x3b2   :  { %2279 = vst.msk [vmem:[#allocation3 + $0x78] sm:$0xff] %vm2263_vm6, %v2102_v19  ;;  %v2106_v32 = vpop.permute.xlu0 %2105  ;;  %v2354_v19 = vld [vmem:[#allocation2 + $0x158] sm:$0xff] }
 0x3b3   :  { %2281 = vst.msk [vmem:[#allocation3 + $0x88] sm:$0xff] %vm2263_vm6, %v2106_v32  ;;  %v2116_v31 = vpop.permute.xlu2 %2115  ;;  %v2350_v32 = vld [vmem:[#allocation2 + $0x128] sm:$0xff] }
 0x3b4   :  { %2286 = vst.msk [vmem:[#allocation3 + $0xb0] sm:$0xff] %vm2263_vm6, %v2116_v31 }
 0x3b7   :  { %2191 = vrot.lane.b32.xlu1 %v2003_v51, %s6691_s29 }
 0x3b8   :  { %2195 = vrot.lane.b32.xlu0 %v2005_v8, %s6691_s29 }
 0x3b9   :  { %v2108_v38 = vpop.permute.xlu1 %2107  ;;  %2187 = vrot.lane.b32.xlu2 %v2001_v59, %s6691_s29  ;;  %v2355_v59 = vld [vmem:[#allocation2 + $0x168] sm:$0xff] }
 0x3ba   :  { %2282 = vst.msk [vmem:[#allocation3 + $0x90] sm:$0xff] %vm2263_vm6, %v2108_v38  ;;  %v2112_v4 = vpop.permute.xlu0 %2111  ;;  %v2357_v38 = vld [vmem:[#allocation2 + $0x180] sm:$0xff] }
 0x3bb   :  { %2284 = vst.msk [vmem:[#allocation3 + $0xa0] sm:$0xff] %vm2263_vm6, %v2112_v4  ;;  %v2122_v36 = vpop.permute.xlu2 %2121  ;;  %v2353_v4 = vld [vmem:[#allocation2 + $0x150] sm:$0xff] }
 0x3bc   :  { %2289 = vst.msk [vmem:[#allocation3 + $0xc8] sm:$0xff] %vm2263_vm6, %v2122_v36 }
 0x3bf   :  { %2197 = vrot.lane.b32.xlu1 %v2006_v43, %s6691_s29 }
 0x3c0   :  { %2459 = vrot.lane.b32.xlu0 %v2330_v25, %s6692_s30 }
 0x3c1   :  { %v2114_v44 = vpop.permute.xlu1 %2113  ;;  %2193 = vrot.lane.b32.xlu2 %v2004_v20, %s6691_s29  ;;  %v2358_v20 = vld [vmem:[#allocation2 + $0x188] sm:$0xff] }
 0x3c2   :  { %2285 = vst.msk [vmem:[#allocation3 + $0xa8] sm:$0xff] %vm2263_vm6, %v2114_v44  ;;  %v2118_v0 = vpop.permute.xlu0 %2117  ;;  %v2360_v44 = vld [vmem:[#allocation2 + $0x1a0] sm:$0xff] }
 0x3c3   :  { %2287 = vst.msk [vmem:[#allocation3 + $0xb8] sm:$0xff] %vm2263_vm6, %v2118_v0  ;;  %v2128_v54 = vpop.permute.xlu2 %2127  ;;  %v2356_v0 = vld [vmem:[#allocation2 + $0x170] sm:$0xff] }
 0x3c4   :  { %2292 = vst.msk [vmem:[#allocation3 + $0xe0] sm:$0xff] %vm2263_vm6, %v2128_v54 }
 0x3c7   :  { %2461 = vrot.lane.b32.xlu1 %v2331_v7, %s6692_s30 }
 0x3c8   :  { %2465 = vrot.lane.b32.xlu0 %v2333_v56, %s6692_s30 }
 0x3c9   :  { %v2120_v1 = vpop.permute.xlu1 %2119  ;;  %2457 = vrot.lane.b32.xlu2 %v2329_v35, %s6692_s30  ;;  %v2361_v35 = vld [vmem:[#allocation2 + $0x1e0] sm:$0xff] }
 0x3ca   :  { %2288 = vst.msk [vmem:[#allocation3 + $0xc0] sm:$0xff] %vm2263_vm6, %v2120_v1  ;;  %v2124_v14 = vpop.permute.xlu0 %2123  ;;  %v2363_v1 = vld [vmem:[#allocation2 + $0x1f8] sm:$0xff] }
 0x3cb   :  { %2290 = vst.msk [vmem:[#allocation3 + $0xd0] sm:$0xff] %vm2263_vm6, %v2124_v14  ;;  %v2134_v45 = vpop.permute.xlu2 %2133  ;;  %v2359_v14 = vld [vmem:[#allocation2 + $0x198] sm:$0xff] }
 0x3cc   :  { %2295 = vst.msk [vmem:[#allocation3 + $0xf8] sm:$0xff] %vm2263_vm6, %v2134_v45 }
 0x3cf   :  { %2467 = vrot.lane.b32.xlu1 %v2334_v12, %s6692_s30 }
 0x3d0   :  { %2471 = vrot.lane.b32.xlu0 %v2336_v17, %s6692_s30 }
 0x3d1   :  { %v2126_v55 = vpop.permute.xlu1 %2125  ;;  %2463 = vrot.lane.b32.xlu2 %v2332_v16, %s6692_s30  ;;  %v2364_v16 = vld [vmem:[#allocation2 + $0x200] sm:$0xff] }
 0x3d2   :  { %2291 = vst.msk [vmem:[#allocation3 + $0xd8] sm:$0xff] %vm2263_vm6, %v2126_v55  ;;  %v2130_v23 = vpop.permute.xlu0 %2129  ;;  %v2366_v55 = vld [vmem:[#allocation2 + $0x218] sm:$0xff] }
 0x3d3   :  { %2293 = vst.msk [vmem:[#allocation3 + $0xe8] sm:$0xff] %vm2263_vm6, %v2130_v23  ;;  %v2140_v28 = vpop.permute.xlu2 %2139  ;;  %v2362_v23 = vld [vmem:[#allocation2 + $0x1e8] sm:$0xff] }
 0x3d4   :  { %2298 = vst.msk [vmem:[#allocation3 + $0x110] sm:$0xff] %vm2263_vm6, %v2140_v28 }
 0x3d7   :  { %2473 = vrot.lane.b32.xlu1 %v2337_v2, %s6692_s30 }
 0x3d8   :  { %2477 = vrot.lane.b32.xlu0 %v2339_v33, %s6692_s30 }
 0x3d9   :  { %v2132_v13 = vpop.permute.xlu1 %2131  ;;  %2469 = vrot.lane.b32.xlu2 %v2335_v40, %s6692_s30  ;;  %v2367_v40 = vld [vmem:[#allocation2 + $0x228] sm:$0xff] }
 0x3da   :  { %2294 = vst.msk [vmem:[#allocation3 + $0xf0] sm:$0xff] %vm2263_vm6, %v2132_v13  ;;  %v2136_v48 = vpop.permute.xlu0 %2135  ;;  %v2369_v13 = vld [vmem:[#allocation2 + $0x240] sm:$0xff] }
 0x3db   :  { %2296 = vst.msk [vmem:[#allocation3 + $0x100] sm:$0xff] %vm2263_vm6, %v2136_v48  ;;  %v2146_v27 = vpop.permute.xlu2 %2145  ;;  %v2365_v48 = vld [vmem:[#allocation2 + $0x210] sm:$0xff] }
 0x3dc   :  { %2301 = vst.msk [vmem:[#allocation3 + $0x128] sm:$0xff] %vm2263_vm6, %v2146_v27 }
 0x3df   :  { %2479 = vrot.lane.b32.xlu1 %v2340_v52, %s6692_s30 }
 0x3e0   :  { %2483 = vrot.lane.b32.xlu0 %v2342_v24, %s6692_s30 }
 0x3e1   :  { %v2138_v26 = vpop.permute.xlu1 %2137  ;;  %2475 = vrot.lane.b32.xlu2 %v2338_v60, %s6692_s30  ;;  %v2370_v60 = vld [vmem:[#allocation2 + $0x248] sm:$0xff] }
 0x3e2   :  { %2297 = vst.msk [vmem:[#allocation3 + $0x108] sm:$0xff] %vm2263_vm6, %v2138_v26  ;;  %v2142_v3 = vpop.permute.xlu0 %2141  ;;  %v2372_v26 = vld [vmem:[#allocation2 + $0x260] sm:$0xff] }
 0x3e3   :  { %2299 = vst.msk [vmem:[#allocation3 + $0x118] sm:$0xff] %vm2263_vm6, %v2142_v3  ;;  %v2152_v37 = vpop.permute.xlu2 %2151  ;;  %v2368_v3 = vld [vmem:[#allocation2 + $0x230] sm:$0xff] }
 0x3e4   :  { %2304 = vst.msk [vmem:[#allocation3 + $0x140] sm:$0xff] %vm2263_vm6, %v2152_v37 }
 0x3e7   :  { %2485 = vrot.lane.b32.xlu1 %v2343_v62, %s6692_s30 }
 0x3e8   :  { %2489 = vrot.lane.b32.xlu0 %v2345_v15, %s6692_s30 }
 0x3e9   :  { %v2144_v29 = vpop.permute.xlu1 %2143  ;;  %2481 = vrot.lane.b32.xlu2 %v2341_v21, %s6692_s30  ;;  %v2373_v21 = vld [vmem:[#allocation2 + $0x270] sm:$0xff] }
 0x3ea   :  { %2300 = vst.msk [vmem:[#allocation3 + $0x120] sm:$0xff] %vm2263_vm6, %v2144_v29  ;;  %v2148_v61 = vpop.permute.xlu0 %2147  ;;  %v2375_v29 = vld [vmem:[#allocation2 + $0x288] sm:$0xff] }
 0x3eb   :  { %2302 = vst.msk [vmem:[#allocation3 + $0x130] sm:$0xff] %vm2263_vm6, %v2148_v61  ;;  %v2158_v39 = vpop.permute.xlu2 %2157  ;;  %v2371_v61 = vld [vmem:[#allocation2 + $0x258] sm:$0xff] }
 0x3ec   :  { %2307 = vst.msk [vmem:[#allocation3 + $0x158] sm:$0xff] %vm2263_vm6, %v2158_v39 }
 0x3ef   :  { %2491 = vrot.lane.b32.xlu1 %v2346_v47, %s6692_s30 }
 0x3f0   :  { %2495 = vrot.lane.b32.xlu0 %v2348_v63, %s6692_s30 }
 0x3f1   :  { %v2150_v9 = vpop.permute.xlu1 %2149  ;;  %2487 = vrot.lane.b32.xlu2 %v2344_v22, %s6692_s30  ;;  %v2376_v22 = vld [vmem:[#allocation2 + $0x290] sm:$0xff] }
 0x3f2   :  { %2303 = vst.msk [vmem:[#allocation3 + $0x138] sm:$0xff] %vm2263_vm6, %v2150_v9  ;;  %v2154_v34 = vpop.permute.xlu0 %2153  ;;  %v2378_v9 = vld [vmem:[#allocation2 + $0x2a8] sm:$0xff] }
 0x3f3   :  { %2305 = vst.msk [vmem:[#allocation3 + $0x148] sm:$0xff] %vm2263_vm6, %v2154_v34  ;;  %v2164_v41 = vpop.permute.xlu2 %2163  ;;  %v2374_v34 = vld [vmem:[#allocation2 + $0x278] sm:$0xff] }
 0x3f4   :  { %2310 = vst.msk [vmem:[#allocation3 + $0x170] sm:$0xff] %vm2263_vm6, %v2164_v41 }
 0x3f7   :  { %2497 = vrot.lane.b32.xlu1 %v2349_v18, %s6692_s30 }
 0x3f8   :  { %2501 = vrot.lane.b32.xlu0 %v2351_v42, %s6692_s30 }
 0x3f9   :  { %v2156_v53 = vpop.permute.xlu1 %2155  ;;  %2493 = vrot.lane.b32.xlu2 %v2347_v58, %s6692_s30  ;;  %v2379_v58 = vld [vmem:[#allocation2 + $0x2b8] sm:$0xff] }
 0x3fa   :  { %2306 = vst.msk [vmem:[#allocation3 + $0x150] sm:$0xff] %vm2263_vm6, %v2156_v53  ;;  %v2160_v50 = vpop.permute.xlu0 %2159  ;;  %v2381_v53 = vld [vmem:[#allocation2 + $0x2d0] sm:$0xff] }
 0x3fb   :  { %2308 = vst.msk [vmem:[#allocation3 + $0x160] sm:$0xff] %vm2263_vm6, %v2160_v50  ;;  %v2170_v11 = vpop.permute.xlu2 %2169  ;;  %v2377_v50 = vld [vmem:[#allocation2 + $0x2a0] sm:$0xff] }
 0x3fc   :  { %2313 = vst.msk [vmem:[#allocation3 + $0x188] sm:$0xff] %vm2263_vm6, %v2170_v11 }
 0x3ff   :  { %2503 = vrot.lane.b32.xlu1 %v2352_v6, %s6692_s30 }
 0x400   :  { %2507 = vrot.lane.b32.xlu0 %v2354_v19, %s6692_s30 }
 0x401   :  { %v2162_v31 = vpop.permute.xlu1 %2161  ;;  %2499 = vrot.lane.b32.xlu2 %v2350_v32, %s6692_s30  ;;  %v2382_v32 = vld [vmem:[#allocation2 + $0x2d8] sm:$0xff] }
 0x402   :  { %2309 = vst.msk [vmem:[#allocation3 + $0x168] sm:$0xff] %vm2263_vm6, %v2162_v31  ;;  %v2166_v51 = vpop.permute.xlu0 %2165  ;;  %v2384_v31 = vld [vmem:[#allocation2 + $0x2f0] sm:$0xff] }
 0x403   :  { %2311 = vst.msk [vmem:[#allocation3 + $0x178] sm:$0xff] %vm2263_vm6, %v2166_v51  ;;  %v2176_v8 = vpop.permute.xlu2 %2175  ;;  %v2380_v51 = vld [vmem:[#allocation2 + $0x2c0] sm:$0xff] }
 0x404   :  { %2316 = vst.msk [vmem:[#allocation3 + $0x1a0] sm:$0xff] %vm2263_vm6, %v2176_v8 }
 0x407   :  { %2509 = vrot.lane.b32.xlu1 %v2355_v59, %s6692_s30 }
 0x408   :  { %2513 = vrot.lane.b32.xlu0 %v2357_v38, %s6692_s30 }
 0x409   :  { %v2168_v36 = vpop.permute.xlu1 %2167  ;;  %2505 = vrot.lane.b32.xlu2 %v2353_v4, %s6692_s30  ;;  %v2385_v4 = vld [vmem:[#allocation2 + $0x300] sm:$0xff] }
 0x40a   :  { %2312 = vst.msk [vmem:[#allocation3 + $0x180] sm:$0xff] %vm2263_vm6, %v2168_v36  ;;  %v2172_v43 = vpop.permute.xlu0 %2171  ;;  %v2387_v36 = vld [vmem:[#allocation2 + $0x318] sm:$0xff] }
 0x40b   :  { %2314 = vst.msk [vmem:[#allocation3 + $0x190] sm:$0xff] %vm2263_vm6, %v2172_v43  ;;  %v2182_v25 = vpop.permute.xlu2 %2181  ;;  %v2383_v43 = vld [vmem:[#allocation2 + $0x2e8] sm:$0xff] }
 0x40c   :  { %2319 = vst.msk [vmem:[#allocation3 + $0x1b8] sm:$0xff] %vm2263_vm6, %v2182_v25 }
 0x40f   :  { %2515 = vrot.lane.b32.xlu1 %v2358_v20, %s6692_s30 }
 0x410   :  { %2519 = vrot.lane.b32.xlu0 %v2360_v44, %s6692_s30 }
 0x411   :  { %v2174_v54 = vpop.permute.xlu1 %2173  ;;  %2511 = vrot.lane.b32.xlu2 %v2356_v0, %s6692_s30  ;;  %v2388_v0 = vld [vmem:[#allocation2 + $0x320] sm:$0xff] }
 0x412   :  { %2315 = vst.msk [vmem:[#allocation3 + $0x198] sm:$0xff] %vm2263_vm6, %v2174_v54  ;;  %v2178_v7 = vpop.permute.xlu0 %2177  ;;  %v2390_v54 = vld [vmem:[#allocation2 + $0x338] sm:$0xff] }
 0x413   :  { %2317 = vst.msk [vmem:[#allocation3 + $0x1a8] sm:$0xff] %vm2263_vm6, %v2178_v7  ;;  %v2188_v56 = vpop.permute.xlu2 %2187  ;;  %v2386_v7 = vld [vmem:[#allocation2 + $0x308] sm:$0xff] }
 0x414   :  { %2322 = vst.msk [vmem:[#allocation3 + $0x1d0] sm:$0xff] %vm2263_vm6, %v2188_v56 }
 0x417   :  { %2521 = vrot.lane.b32.xlu1 %v2361_v35, %s6692_s30 }
 0x418   :  { %2525 = vrot.lane.b32.xlu0 %v2363_v1, %s6692_s30 }
 0x419   :  { %v2180_v45 = vpop.permute.xlu1 %2179  ;;  %2517 = vrot.lane.b32.xlu2 %v2359_v14, %s6692_s30  ;;  %v2391_v14 = vld [vmem:[#allocation2 + $0x348] sm:$0xff] }
 0x41a   :  { %2318 = vst.msk [vmem:[#allocation3 + $0x1b0] sm:$0xff] %vm2263_vm6, %v2180_v45  ;;  %v2184_v12 = vpop.permute.xlu0 %2183  ;;  %v2714_v45 = vld [vmem:[#allocation2 + $0x31] sm:$0xff] }
 0x41b   :  { %2320 = vst.msk [vmem:[#allocation3 + $0x1c0] sm:$0xff] %vm2263_vm6, %v2184_v12  ;;  %v2194_v17 = vpop.permute.xlu2 %2193  ;;  %v2389_v12 = vld [vmem:[#allocation2 + $0x330] sm:$0xff] }
 0x41c   :  { %2325 = vst.msk [vmem:[#allocation3 + $0x1e8] sm:$0xff] %vm2263_vm6, %v2194_v17 }
 0x41f   :  { %2527 = vrot.lane.b32.xlu1 %v2364_v16, %s6692_s30 }
 0x420   :  { %2531 = vrot.lane.b32.xlu0 %v2366_v55, %s6692_s30 }
 0x421   :  { %v2186_v28 = vpop.permute.xlu1 %2185  ;;  %2523 = vrot.lane.b32.xlu2 %v2362_v23, %s6692_s30  ;;  %v2715_v23 = vld [vmem:[#allocation2 + $0x39] sm:$0xff] }
 0x422   :  { %2321 = vst.msk [vmem:[#allocation3 + $0x1c8] sm:$0xff] %vm2263_vm6, %v2186_v28  ;;  %v2190_v2 = vpop.permute.xlu0 %2189  ;;  %v2717_v28 = vld [vmem:[#allocation2 + $0x51] sm:$0xff] }
 0x423   :  { %2323 = vst.msk [vmem:[#allocation3 + $0x1d8] sm:$0xff] %vm2263_vm6, %v2190_v2  ;;  %v2458_v33 = vpop.permute.xlu2 %2457  ;;  %v2392_v2 = vld [vmem:[#allocation2 + $0x350] sm:$0xff] }
 0x424   :  { %2650 = vst.msk [vmem:[#allocation3] sm:$0xff] %vm2649_vm7, %v2458_v33 }
 0x427   :  { %2533 = vrot.lane.b32.xlu1 %v2367_v40, %s6692_s30 }
 0x428   :  { %2537 = vrot.lane.b32.xlu0 %v2369_v13, %s6692_s30 }
 0x429   :  { %v2192_v27 = vpop.permute.xlu1 %2191  ;;  %2529 = vrot.lane.b32.xlu2 %v2365_v48, %s6692_s30  ;;  %v2718_v48 = vld [vmem:[#allocation2 + $0x61] sm:$0xff] }
 0x42a   :  { %2324 = vst.msk [vmem:[#allocation3 + $0x1e0] sm:$0xff] %vm2263_vm6, %v2192_v27  ;;  %v2196_v52 = vpop.permute.xlu0 %2195  ;;  %v2720_v27 = vld [vmem:[#allocation2 + $0x79] sm:$0xff] }
 0x42b   :  { %2326 = vst.msk [vmem:[#allocation3 + $0x1f0] sm:$0xff] %vm2263_vm6, %v2196_v52  ;;  %v2464_v24 = vpop.permute.xlu2 %2463  ;;  %v2716_v52 = vld [vmem:[#allocation2 + $0x49] sm:$0xff] }
 0x42c   :  { %2653 = vst.msk [vmem:[#allocation3 + $0x18] sm:$0xff] %vm2649_vm7, %v2464_v24 }
 0x42f   :  { %2539 = vrot.lane.b32.xlu1 %v2370_v60, %s6692_s30 }
 0x430   :  { %2543 = vrot.lane.b32.xlu0 %v2372_v26, %s6692_s30 }
 0x431   :  { %v2198_v37 = vpop.permute.xlu1 %2197  ;;  %2535 = vrot.lane.b32.xlu2 %v2368_v3, %s6692_s30  ;;  %v2721_v3 = vld [vmem:[#allocation2 + $0x81] sm:$0xff] }
 0x432   :  { %2327 = vst.msk [vmem:[#allocation3 + $0x1f8] sm:$0xff] %vm2263_vm6, %v2198_v37  ;;  %v2460_v62 = vpop.permute.xlu0 %2459  ;;  %v2723_v37 = vld [vmem:[#allocation2 + $0x99] sm:$0xff] }
 0x433   :  { %2651 = vst.msk [vmem:[#allocation3 + $0x8] sm:$0xff] %vm2649_vm7, %v2460_v62  ;;  %v2470_v15 = vpop.permute.xlu2 %2469  ;;  %v2719_v62 = vld [vmem:[#allocation2 + $0x69] sm:$0xff] }
 0x434   :  { %2656 = vst.msk [vmem:[#allocation3 + $0x30] sm:$0xff] %vm2649_vm7, %v2470_v15 }
 0x437   :  { %2545 = vrot.lane.b32.xlu1 %v2373_v21, %s6692_s30 }
 0x438   :  { %2549 = vrot.lane.b32.xlu0 %v2375_v29, %s6692_s30 }
 0x439   :  { %v2462_v39 = vpop.permute.xlu1 %2461  ;;  %2541 = vrot.lane.b32.xlu2 %v2371_v61, %s6692_s30  ;;  %v2724_v61 = vld [vmem:[#allocation2 + $0xa9] sm:$0xff] }
 0x43a   :  { %2652 = vst.msk [vmem:[#allocation3 + $0x10] sm:$0xff] %vm2649_vm7, %v2462_v39  ;;  %v2466_v47 = vpop.permute.xlu0 %2465  ;;  %v2726_v39 = vld [vmem:[#allocation2 + $0xc1] sm:$0xff] }
 0x43b   :  { %2654 = vst.msk [vmem:[#allocation3 + $0x20] sm:$0xff] %vm2649_vm7, %v2466_v47  ;;  %v2476_v63 = vpop.permute.xlu2 %2475  ;;  %v2722_v47 = vld [vmem:[#allocation2 + $0x91] sm:$0xff] }
 0x43c   :  { %2659 = vst.msk [vmem:[#allocation3 + $0x48] sm:$0xff] %vm2649_vm7, %v2476_v63 }
 0x43f   :  { %2551 = vrot.lane.b32.xlu1 %v2376_v22, %s6692_s30 }
 0x440   :  { %2555 = vrot.lane.b32.xlu0 %v2378_v9, %s6692_s30 }
 0x441   :  { %v2468_v41 = vpop.permute.xlu1 %2467  ;;  %2547 = vrot.lane.b32.xlu2 %v2374_v34, %s6692_s30  ;;  %v2727_v34 = vld [vmem:[#allocation2 + $0xc9] sm:$0xff] }
 0x442   :  { %2655 = vst.msk [vmem:[#allocation3 + $0x28] sm:$0xff] %vm2649_vm7, %v2468_v41  ;;  %v2472_v18 = vpop.permute.xlu0 %2471  ;;  %v2729_v41 = vld [vmem:[#allocation2 + $0xe1] sm:$0xff] }
 0x443   :  { %2657 = vst.msk [vmem:[#allocation3 + $0x38] sm:$0xff] %vm2649_vm7, %v2472_v18  ;;  %v2482_v42 = vpop.permute.xlu2 %2481  ;;  %v2725_v18 = vld [vmem:[#allocation2 + $0xb1] sm:$0xff] }
 0x444   :  { %2662 = vst.msk [vmem:[#allocation3 + $0x60] sm:$0xff] %vm2649_vm7, %v2482_v42 }
 0x447   :  { %2557 = vrot.lane.b32.xlu1 %v2379_v58, %s6692_s30 }
 0x448   :  { %2561 = vrot.lane.b32.xlu0 %v2381_v53, %s6692_s30 }
 0x449   :  { %v2474_v11 = vpop.permute.xlu1 %2473  ;;  %2553 = vrot.lane.b32.xlu2 %v2377_v50, %s6692_s30  ;;  %v2730_v50 = vld [vmem:[#allocation2 + $0xf1] sm:$0xff] }
 0x44a   :  { %2658 = vst.msk [vmem:[#allocation3 + $0x40] sm:$0xff] %vm2649_vm7, %v2474_v11  ;;  %v2478_v6 = vpop.permute.xlu0 %2477  ;;  %v2732_v11 = vld [vmem:[#allocation2 + $0x109] sm:$0xff] }
 0x44b   :  { %2660 = vst.msk [vmem:[#allocation3 + $0x50] sm:$0xff] %vm2649_vm7, %v2478_v6  ;;  %v2488_v19 = vpop.permute.xlu2 %2487  ;;  %v2728_v6 = vld [vmem:[#allocation2 + $0xd9] sm:$0xff] }
 0x44c   :  { %2665 = vst.msk [vmem:[#allocation3 + $0x78] sm:$0xff] %vm2649_vm7, %v2488_v19 }
 0x44f   :  { %2563 = vrot.lane.b32.xlu1 %v2382_v32, %s6692_s30 }
 0x450   :  { %2567 = vrot.lane.b32.xlu0 %v2384_v31, %s6692_s30 }
 0x451   :  { %v2480_v8 = vpop.permute.xlu1 %2479  ;;  %2559 = vrot.lane.b32.xlu2 %v2380_v51, %s6692_s30  ;;  %v2733_v51 = vld [vmem:[#allocation2 + $0x111] sm:$0xff] }
 0x452   :  { %2661 = vst.msk [vmem:[#allocation3 + $0x58] sm:$0xff] %vm2649_vm7, %v2480_v8  ;;  %v2484_v59 = vpop.permute.xlu0 %2483  ;;  %v2735_v8 = vld [vmem:[#allocation2 + $0x129] sm:$0xff] }
 0x453   :  { %2663 = vst.msk [vmem:[#allocation3 + $0x68] sm:$0xff] %vm2649_vm7, %v2484_v59  ;;  %v2494_v38 = vpop.permute.xlu2 %2493  ;;  %v2731_v59 = vld [vmem:[#allocation2 + $0xf9] sm:$0xff] }
 0x454   :  { %2668 = vst.msk [vmem:[#allocation3 + $0x90] sm:$0xff] %vm2649_vm7, %v2494_v38 }
 0x457   :  { %2569 = vrot.lane.b32.xlu1 %v2385_v4, %s6692_s30 }
 0x458   :  { %2573 = vrot.lane.b32.xlu0 %v2387_v36, %s6692_s30 }
 0x459   :  { %v2486_v25 = vpop.permute.xlu1 %2485  ;;  %2565 = vrot.lane.b32.xlu2 %v2383_v43, %s6692_s30  ;;  %v2736_v43 = vld [vmem:[#allocation2 + $0x139] sm:$0xff] }
 0x45a   :  { %2664 = vst.msk [vmem:[#allocation3 + $0x70] sm:$0xff] %vm2649_vm7, %v2486_v25  ;;  %v2490_v20 = vpop.permute.xlu0 %2489  ;;  %v2762_v25 = vld [vmem:[#allocation2 + $0x2a1] sm:$0xff] }
 0x45b   :  { %2666 = vst.msk [vmem:[#allocation3 + $0x80] sm:$0xff] %vm2649_vm7, %v2490_v20  ;;  %v2500_v44 = vpop.permute.xlu2 %2499  ;;  %v2734_v20 = vld [vmem:[#allocation2 + $0x121] sm:$0xff] }
 0x45c   :  { %2671 = vst.msk [vmem:[#allocation3 + $0xa8] sm:$0xff] %vm2649_vm7, %v2500_v44 }
 0x45f   :  { %2575 = vrot.lane.b32.xlu1 %v2388_v0, %s6692_s30 }
 0x460   :  { %2579 = vrot.lane.b32.xlu0 %v2390_v54, %s6692_s30 }
 0x461   :  { %v2492_v56 = vpop.permute.xlu1 %2491  ;;  %2571 = vrot.lane.b32.xlu2 %v2386_v7, %s6692_s30  ;;  %v3099_v7 = vld [vmem:[#allocation2 + $0x32] sm:$0xff] }
 0x462   :  { %2667 = vst.msk [vmem:[#allocation3 + $0x88] sm:$0xff] %vm2649_vm7, %v2492_v56  ;;  %v2496_v35 = vpop.permute.xlu0 %2495  ;;  %v2746_v56 = vld [vmem:[#allocation2 + $0x1e1] sm:$0xff] }
 0x463   :  { %2669 = vst.msk [vmem:[#allocation3 + $0x98] sm:$0xff] %vm2649_vm7, %v2496_v35  ;;  %v2506_v1 = vpop.permute.xlu2 %2505 }
 0x464   :  { %2674 = vst.msk [vmem:[#allocation3 + $0xc0] sm:$0xff] %vm2649_vm7, %v2506_v1 }
 0x467   :  { %2581 = vrot.lane.b32.xlu1 %v2391_v14, %s6692_s30 }
 0x468   :  { %2842 = vrot.lane.b32.xlu0 %v2714_v45, %s6693_s11  ;;  %v3115_v45 = vld [vmem:[#allocation2 + $0xf2] sm:$0xff] }
 0x469   :  { %v2498_v17 = vpop.permute.xlu1 %2497  ;;  %2577 = vrot.lane.b32.xlu2 %v2389_v12, %s6692_s30  ;;  %v2763_v12 = vld [vmem:[#allocation2 + $0x2a9] sm:$0xff] }
 0x46a   :  { %2670 = vst.msk [vmem:[#allocation3 + $0xa0] sm:$0xff] %vm2649_vm7, %v2498_v17  ;;  %v2502_v16 = vpop.permute.xlu0 %2501 }
 0x46b   :  { %2672 = vst.msk [vmem:[#allocation3 + $0xb0] sm:$0xff] %vm2649_vm7, %v2502_v16  ;;  %v2512_v55 = vpop.permute.xlu2 %2511 }
 0x46c   :  { %2677 = vst.msk [vmem:[#allocation3 + $0xd8] sm:$0xff] %vm2649_vm7, %v2512_v55  ;;  %v3100_v55 = vld [vmem:[#allocation2 + $0x3a] sm:$0xff] }
 0x46f   :  { %2844 = vrot.lane.b32.xlu1 %v2715_v23, %s6693_s11  ;;  %v2747_v23 = vld [vmem:[#allocation2 + $0x1e9] sm:$0xff] }
 0x470   :  { %2848 = vrot.lane.b32.xlu0 %v2717_v28, %s6693_s11 }
 0x471   :  { %v2504_v33 = vpop.permute.xlu1 %2503  ;;  %2583 = vrot.lane.b32.xlu2 %v2392_v2, %s6692_s30 }
 0x472   :  { %2673 = vst.msk [vmem:[#allocation3 + $0xb8] sm:$0xff] %vm2649_vm7, %v2504_v33  ;;  %v2508_v40 = vpop.permute.xlu0 %2507  ;;  %v3116_v33 = vld [vmem:[#allocation2 + $0xfa] sm:$0xff] }
 0x473   :  { %2675 = vst.msk [vmem:[#allocation3 + $0xc8] sm:$0xff] %vm2649_vm7, %v2508_v40  ;;  %v2518_v13 = vpop.permute.xlu2 %2517  ;;  %v2764_v40 = vld [vmem:[#allocation2 + $0x2b9] sm:$0xff] }
 0x474   :  { %2680 = vst.msk [vmem:[#allocation3 + $0xf0] sm:$0xff] %vm2649_vm7, %v2518_v13 }
 0x477   :  { %2850 = vrot.lane.b32.xlu1 %v2718_v48, %s6693_s11 }
 0x478   :  { %2854 = vrot.lane.b32.xlu0 %v2720_v27, %s6693_s11  ;;  %v3133_v27 = vld [vmem:[#allocation2 + $0x1fa] sm:$0xff] }
 0x479   :  { %v2510_v24 = vpop.permute.xlu1 %2509  ;;  %2846 = vrot.lane.b32.xlu2 %v2716_v52, %s6693_s11  ;;  %v3101_v52 = vld [vmem:[#allocation2 + $0x4a] sm:$0xff] }
 0x47a   :  { %2676 = vst.msk [vmem:[#allocation3 + $0xd0] sm:$0xff] %vm2649_vm7, %v2510_v24  ;;  %v2514_v60 = vpop.permute.xlu0 %2513  ;;  %v2748_v24 = vld [vmem:[#allocation2 + $0x1f9] sm:$0xff] }
 0x47b   :  { %2678 = vst.msk [vmem:[#allocation3 + $0xe0] sm:$0xff] %vm2649_vm7, %v2514_v60  ;;  %v2524_v26 = vpop.permute.xlu2 %2523 }
 0x47c   :  { %2683 = vst.msk [vmem:[#allocation3 + $0x108] sm:$0xff] %vm2649_vm7, %v2524_v26 }
 0x47f   :  { %2856 = vrot.lane.b32.xlu1 %v2721_v3, %s6693_s11  ;;  %v3117_v3 = vld [vmem:[#allocation2 + $0x10a] sm:$0xff] }
 0x480   :  { %2860 = vrot.lane.b32.xlu0 %v2723_v37, %s6693_s11  ;;  %v2765_v37 = vld [vmem:[#allocation2 + $0x2c1] sm:$0xff] }
 0x481   :  { %v2516_v15 = vpop.permute.xlu1 %2515  ;;  %2852 = vrot.lane.b32.xlu2 %v2719_v62, %s6693_s11 }
 0x482   :  { %2679 = vst.msk [vmem:[#allocation3 + $0xe8] sm:$0xff] %vm2649_vm7, %v2516_v15  ;;  %v2520_v21 = vpop.permute.xlu0 %2519 }
 0x483   :  { %2681 = vst.msk [vmem:[#allocation3 + $0xf8] sm:$0xff] %vm2649_vm7, %v2520_v21  ;;  %v2530_v29 = vpop.permute.xlu2 %2529 }
 0x484   :  { %2686 = vst.msk [vmem:[#allocation3 + $0x120] sm:$0xff] %vm2649_vm7, %v2530_v29  ;;  %v3134_v29 = vld [vmem:[#allocation2 + $0x202] sm:$0xff] }
 0x487   :  { %2862 = vrot.lane.b32.xlu1 %v2724_v61, %s6693_s11  ;;  %v3102_v61 = vld [vmem:[#allocation2 + $0x52] sm:$0xff] }
 0x488   :  { %2866 = vrot.lane.b32.xlu0 %v2726_v39, %s6693_s11  ;;  %v2749_v39 = vld [vmem:[#allocation2 + $0x201] sm:$0xff] }
 0x489   :  { %v2522_v63 = vpop.permute.xlu1 %2521  ;;  %2858 = vrot.lane.b32.xlu2 %v2722_v47, %s6693_s11 }
 0x48a   :  { %2682 = vst.msk [vmem:[#allocation3 + $0x100] sm:$0xff] %vm2649_vm7, %v2522_v63  ;;  %v2526_v22 = vpop.permute.xlu0 %2525 }
 0x48b   :  { %2684 = vst.msk [vmem:[#allocation3 + $0x110] sm:$0xff] %vm2649_vm7, %v2526_v22  ;;  %v2536_v9 = vpop.permute.xlu2 %2535  ;;  %v3118_v22 = vld [vmem:[#allocation2 + $0x112] sm:$0xff] }
 0x48c   :  { %2689 = vst.msk [vmem:[#allocation3 + $0x138] sm:$0xff] %vm2649_vm7, %v2536_v9  ;;  %v2766_v9 = vld [vmem:[#allocation2 + $0x2d1] sm:$0xff] }
 0x48f   :  { %2868 = vrot.lane.b32.xlu1 %v2727_v34, %s6693_s11 }
 0x490   :  { %2872 = vrot.lane.b32.xlu0 %v2729_v41, %s6693_s11 }
 0x491   :  { %v2528_v42 = vpop.permute.xlu1 %2527  ;;  %2864 = vrot.lane.b32.xlu2 %v2725_v18, %s6693_s11 }
 0x492   :  { %2685 = vst.msk [vmem:[#allocation3 + $0x118] sm:$0xff] %vm2649_vm7, %v2528_v42  ;;  %v2532_v58 = vpop.permute.xlu0 %2531  ;;  %v3135_v42 = vld [vmem:[#allocation2 + $0x212] sm:$0xff] }
 0x493   :  { %2687 = vst.msk [vmem:[#allocation3 + $0x128] sm:$0xff] %vm2649_vm7, %v2532_v58  ;;  %v2542_v53 = vpop.permute.xlu2 %2541  ;;  %v3103_v58 = vld [vmem:[#allocation2 + $0x62] sm:$0xff] }
 0x494   :  { %2692 = vst.msk [vmem:[#allocation3 + $0x150] sm:$0xff] %vm2649_vm7, %v2542_v53  ;;  %v2750_v53 = vld [vmem:[#allocation2 + $0x211] sm:$0xff] }
 0x497   :  { %2874 = vrot.lane.b32.xlu1 %v2730_v50, %s6693_s11 }
 0x498   :  { %2878 = vrot.lane.b32.xlu0 %v2732_v11, %s6693_s11 }
 0x499   :  { %v2534_v19 = vpop.permute.xlu1 %2533  ;;  %2870 = vrot.lane.b32.xlu2 %v2728_v6, %s6693_s11  ;;  %v3119_v6 = vld [vmem:[#allocation2 + $0x122] sm:$0xff] }
 0x49a   :  { %2688 = vst.msk [vmem:[#allocation3 + $0x130] sm:$0xff] %vm2649_vm7, %v2534_v19  ;;  %v2538_v32 = vpop.permute.xlu0 %2537  ;;  %v2767_v19 = vld [vmem:[#allocation2 + $0x2d9] sm:$0xff] }
 0x49b   :  { %2690 = vst.msk [vmem:[#allocation3 + $0x140] sm:$0xff] %vm2649_vm7, %v2538_v32  ;;  %v2548_v31 = vpop.permute.xlu2 %2547  ;;  %v3151_v32 = vld [vmem:[#allocation2 + $0x2d2] sm:$0xff] }
 0x49c   :  { %2695 = vst.msk [vmem:[#allocation3 + $0x168] sm:$0xff] %vm2649_vm7, %v2548_v31 }
 0x49f   :  { %2880 = vrot.lane.b32.xlu1 %v2733_v51, %s6693_s11 }
 0x4a0   :  { %2884 = vrot.lane.b32.xlu0 %v2735_v8, %s6693_s11 }
 0x4a1   :  { %v2540_v38 = vpop.permute.xlu1 %2539  ;;  %2876 = vrot.lane.b32.xlu2 %v2731_v59, %s6693_s11  ;;  %v3136_v59 = vld [vmem:[#allocation2 + $0x21a] sm:$0xff] }
 0x4a2   :  { %2691 = vst.msk [vmem:[#allocation3 + $0x148] sm:$0xff] %vm2649_vm7, %v2540_v38  ;;  %v2544_v4 = vpop.permute.xlu0 %2543  ;;  %v3104_v38 = vld [vmem:[#allocation2 + $0x6a] sm:$0xff] }
 0x4a3   :  { %2693 = vst.msk [vmem:[#allocation3 + $0x158] sm:$0xff] %vm2649_vm7, %v2544_v4  ;;  %v2554_v36 = vpop.permute.xlu2 %2553  ;;  %v2751_v4 = vld [vmem:[#allocation2 + $0x219] sm:$0xff] }
 0x4a4   :  { %2698 = vst.msk [vmem:[#allocation3 + $0x180] sm:$0xff] %vm2649_vm7, %v2554_v36 }
 0x4a7   :  { %2886 = vrot.lane.b32.xlu1 %v2736_v43, %s6693_s11 }
 0x4a8   :  { %2938 = vrot.lane.b32.xlu0 %v2762_v25, %s6693_s11  ;;  %v3551_v25 = vld [vmem:[%s10259_s1 + $0x18] sm:$0x7] }
 0x4a9   :  { %v2546_v44 = vpop.permute.xlu1 %2545  ;;  %2882 = vrot.lane.b32.xlu2 %v2734_v20, %s6693_s11  ;;  %v3550_v20 = vld [vmem:[%s10259_s1 + $0x10] sm:$0xff]  ;;  %6569 = vmatpush.msk.msra.mxu2 %vm3749_vm9, %v3551_v25 }
 0x4aa   :  { %2694 = vst.msk [vmem:[#allocation3 + $0x160] sm:$0xff] %vm2649_vm7, %v2546_v44  ;;  %v2550_v0 = vpop.permute.xlu0 %2549  ;;  %6570 = vmatpush.msk.msra.mxu3 %vm3749_vm9, %v3551_v25  ;;  %6486 = vmatpush.msk.msra.mxu0 %vm3749_vm9, %v3551_v25 }
 0x4ab   :  { %2696 = vst.msk [vmem:[#allocation3 + $0x170] sm:$0xff] %vm2649_vm7, %v2550_v0  ;;  %v2560_v54 = vpop.permute.xlu2 %2559  ;;  %v3120_v0 = vld [vmem:[#allocation2 + $0x12a] sm:$0xff]  ;;  %6568 = vmatpush.msk.msra.mxu1 %vm3749_vm9, %v3551_v25  ;;  %6572 = vmatpush.msra.mxu2 %v3550_v20 }
 0x4ac   :  { %2701 = vst.msk [vmem:[#allocation3 + $0x198] sm:$0xff] %vm2649_vm7, %v2560_v54  ;;  %v3549_v54 = vld [vmem:[%s10259_s1 + $0x8] sm:$0xff]  ;;  %6573 = vmatpush.msra.mxu3 %v3550_v20  ;;  %3766 = vmatpush.msra.mxu0 %v3550_v20  ;;  %v2771_v25 = vld [vmem:[#allocation2 + $0x309] sm:$0xff] }
 0x4ad   :  { %6571 = vmatpush.msra.mxu1 %v3550_v20  ;;  %6575 = vmatpush.msra.mxu2 %v3549_v54 }
 0x4ae   :  { %6576 = vmatpush.msra.mxu3 %v3549_v54  ;;  %3767 = vmatpush.msra.mxu0 %v3549_v54 }
 0x4af   :  { %3291 = vrot.lane.b32.xlu1 %v8063_v5, %s6694_s12  ;;  %6574 = vmatpush.msra.mxu1 %v3549_v54 }
 0x4b0   :  { %3227 = vrot.lane.b32.xlu0 %v3099_v7, %s6694_s12  ;;  %v2768_v7 = vld [vmem:[#allocation2 + $0x2e9] sm:$0xff] }
 0x4b1   :  { %v2552_v35 = vpop.permute.xlu1 %2551  ;;  %2906 = vrot.lane.b32.xlu2 %v2746_v56, %s6693_s11  ;;  %v3152_v56 = vld [vmem:[#allocation2 + $0x2da] sm:$0xff] }
 0x4b2   :  { %2697 = vst.msk [vmem:[#allocation3 + $0x178] sm:$0xff] %vm2649_vm7, %v2552_v35  ;;  %v2556_v1 = vpop.permute.xlu0 %2555  ;;  %v3548_v35 = vld [vmem:[%s10259_s1] sm:$0xff] }
 0x4b3   :  { %2699 = vst.msk [vmem:[#allocation3 + $0x188] sm:$0xff] %vm2649_vm7, %v2556_v1  ;;  %v2566_v14 = vpop.permute.xlu2 %2565  ;;  %6578 = vmatpush.msra.mxu2 %v3548_v35  ;;  %6579 = vmatpush.msra.mxu3 %v3548_v35 }
 0x4b4   :  { %2704 = vst.msk [vmem:[#allocation3 + $0x1b0] sm:$0xff] %vm2649_vm7, %v2566_v14  ;;  %3768 = vmatpush.msra.mxu0 %v3548_v35  ;;  %6577 = vmatpush.msra.mxu1 %v3548_v35  ;;  %v2772_v35 = vld [vmem:[#allocation2 + $0x319] sm:$0xff] }
 0x4b7   :  { %3259 = vrot.lane.b32.xlu1 %v3115_v45, %s6694_s12 }
 0x4b8   :  { %2940 = vrot.lane.b32.xlu0 %v2763_v12, %s6693_s11  ;;  %v3137_v12 = vld [vmem:[#allocation2 + $0x22a] sm:$0xff] }
 0x4b9   :  { %v2558_v5 = vpop.permute.xlu1 %2557  ;;  %3323 = vrot.lane.b32.xlu2 %v8090_v49, %s6694_s12 }
 0x4ba   :  { %2700 = vst.msk [vmem:[#allocation3 + $0x190] sm:$0xff] %vm2649_vm7, %v2558_v5  ;;  %v2562_v17 = vpop.permute.xlu0 %2561  ;;  %v3105_v5 = vld [vmem:[#allocation2 + $0x7a] sm:$0xff] }
 0x4bb   :  { %2702 = vst.msk [vmem:[#allocation3 + $0x1a0] sm:$0xff] %vm2649_vm7, %v2562_v17  ;;  %v2572_v16 = vpop.permute.xlu2 %2571  ;;  %v2752_v17 = vld [vmem:[#allocation2 + $0x229] sm:$0xff] }
 0x4bc   :  { %2707 = vst.msk [vmem:[#allocation3 + $0x1c8] sm:$0xff] %vm2649_vm7, %v2572_v16 }
 0x4bf   :  { %3293 = vrot.lane.b32.xlu1 %v8054_v46, %s6694_s12 }
 0x4c0   :  { %3229 = vrot.lane.b32.xlu0 %v3100_v55, %s6694_s12 }
 0x4c1   :  { %v2564_v28 = vpop.permute.xlu1 %2563  ;;  %2908 = vrot.lane.b32.xlu2 %v2747_v23, %s6693_s11 }
 0x4c2   :  { %2703 = vst.msk [vmem:[#allocation3 + $0x1a8] sm:$0xff] %vm2649_vm7, %v2564_v28  ;;  %v2568_v49 = vpop.permute.xlu0 %2567  ;;  %v3121_v28 = vld [vmem:[#allocation2 + $0x13a] sm:$0xff] }
 0x4c3   :  { %2705 = vst.msk [vmem:[#allocation3 + $0x1b8] sm:$0xff] %vm2649_vm7, %v2568_v49  ;;  %v2578_v2 = vpop.permute.xlu2 %2577  ;;  %v2769_v49 = vld [vmem:[#allocation2 + $0x2f1] sm:$0xff] }
 0x4c4   :  { %2710 = vst.msk [vmem:[#allocation3 + $0x1e0] sm:$0xff] %vm2649_vm7, %v2578_v2  ;;  %v3153_v2 = vld [vmem:[#allocation2 + $0x2ea] sm:$0xff] }
 0x4c7   :  { %3261 = vrot.lane.b32.xlu1 %v3116_v33, %s6694_s12 }
 0x4c8   :  { %2942 = vrot.lane.b32.xlu0 %v2764_v40, %s6693_s11 }
 0x4c9   :  { %v2570_v46 = vpop.permute.xlu1 %2569  ;;  %3325 = vrot.lane.b32.xlu2 %v8098_v10, %s6694_s12 }
 0x4ca   :  { %2706 = vst.msk [vmem:[#allocation3 + $0x1c0] sm:$0xff] %vm2649_vm7, %v2570_v46  ;;  %v2574_v13 = vpop.permute.xlu0 %2573 }
 0x4cb   :  { %2708 = vst.msk [vmem:[#allocation3 + $0x1d0] sm:$0xff] %vm2649_vm7, %v2574_v13  ;;  %v2584_v48 = vpop.permute.xlu2 %2583  ;;  %v3138_v13 = vld [vmem:[#allocation2 + $0x232] sm:$0xff] }
 0x4cc   :  { %2713 = vst.msk [vmem:[#allocation3 + $0x1f8] sm:$0xff] %vm2649_vm7, %v2584_v48  ;;  %v2737_v48 = vld [vmem:[#allocation2 + $0x141] sm:$0xff] }
 0x4cf   :  { %3295 = vrot.lane.b32.xlu1 %v3133_v27, %s6694_s12  ;;  %v2753_v27 = vld [vmem:[#allocation2 + $0x231] sm:$0xff] }
 0x4d0   :  { %3231 = vrot.lane.b32.xlu0 %v3101_v52, %s6694_s12 }
 0x4d1   :  { %v2576_v60 = vpop.permute.xlu1 %2575  ;;  %2910 = vrot.lane.b32.xlu2 %v2748_v24, %s6693_s11 }
 0x4d2   :  { %2709 = vst.msk [vmem:[#allocation3 + $0x1d8] sm:$0xff] %vm2649_vm7, %v2576_v60  ;;  %v2580_v10 = vpop.permute.xlu0 %2579 }
 0x4d3   :  { %2711 = vst.msk [vmem:[#allocation3 + $0x1e8] sm:$0xff] %vm2649_vm7, %v2580_v10  ;;  %v2847_v26 = vpop.permute.xlu2 %2846 }
 0x4d4   :  { %3037 = vst.msk [vmem:[#allocation3 + $0x10] sm:$0xff] %vm3034_vm8, %v2847_v26  ;;  %v3106_v26 = vld [vmem:[#allocation2 + $0x82] sm:$0xff] }
 0x4d7   :  { %3263 = vrot.lane.b32.xlu1 %v3117_v3, %s6694_s12  ;;  %v2754_v3 = vld [vmem:[#allocation2 + $0x241] sm:$0xff] }
 0x4d8   :  { %2944 = vrot.lane.b32.xlu0 %v2765_v37, %s6693_s11  ;;  %v3154_v37 = vld [vmem:[#allocation2 + $0x2f2] sm:$0xff] }
 0x4d9   :  { %v2582_v62 = vpop.permute.xlu1 %2581  ;;  %3327 = vrot.lane.b32.xlu2 %v8111_v30, %s6694_s12 }
 0x4da   :  { %2712 = vst.msk [vmem:[#allocation3 + $0x1f0] sm:$0xff] %vm2649_vm7, %v2582_v62  ;;  %v2843_v15 = vpop.permute.xlu0 %2842 }
 0x4db   :  { %3035 = vst.msk [vmem:[#allocation3] sm:$0xff] %vm3034_vm8, %v2843_v15  ;;  %v2853_v21 = vpop.permute.xlu2 %2852 }
 0x4dc   :  { %3040 = vst.msk [vmem:[#allocation3 + $0x28] sm:$0xff] %vm3034_vm8, %v2853_v21 }
 0x4df   :  { %3297 = vrot.lane.b32.xlu1 %v3134_v29, %s6694_s12 }
 0x4e0   :  { %3233 = vrot.lane.b32.xlu0 %v3102_v61, %s6694_s12 }
 0x4e1   :  { %v2845_v47 = vpop.permute.xlu1 %2844  ;;  %2912 = vrot.lane.b32.xlu2 %v2749_v39, %s6693_s11  ;;  %v2770_v39 = vld [vmem:[#allocation2 + $0x301] sm:$0xff] }
 0x4e2   :  { %3036 = vst.msk [vmem:[#allocation3 + $0x8] sm:$0xff] %vm3034_vm8, %v2845_v47  ;;  %v2849_v30 = vpop.permute.xlu0 %2848  ;;  %v3155_v47 = vld [vmem:[#allocation2 + $0x302] sm:$0xff] }
 0x4e3   :  { %3038 = vst.msk [vmem:[#allocation3 + $0x18] sm:$0xff] %vm3034_vm8, %v2849_v30  ;;  %v2859_v63 = vpop.permute.xlu2 %2858  ;;  %v3122_v30 = vld [vmem:[#allocation2 + $0x142] sm:$0xff] }
 0x4e4   :  { %3043 = vst.msk [vmem:[#allocation3 + $0x40] sm:$0xff] %vm3034_vm8, %v2859_v63 }
 0x4e7   :  { %3265 = vrot.lane.b32.xlu1 %v3118_v22, %s6694_s12 }
 0x4e8   :  { %2946 = vrot.lane.b32.xlu0 %v2766_v9, %s6693_s11 }
 0x4e9   :  { %v2851_v34 = vpop.permute.xlu1 %2850  ;;  %3329 = vrot.lane.b32.xlu2 %v8101_v57, %s6694_s12 }
 0x4ea   :  { %3039 = vst.msk [vmem:[#allocation3 + $0x20] sm:$0xff] %vm3034_vm8, %v2851_v34  ;;  %v2855_v41 = vpop.permute.xlu0 %2854 }
 0x4eb   :  { %3041 = vst.msk [vmem:[#allocation3 + $0x30] sm:$0xff] %vm3034_vm8, %v2855_v41  ;;  %v2865_v18 = vpop.permute.xlu2 %2864 }
 0x4ec   :  { %3046 = vst.msk [vmem:[#allocation3 + $0x58] sm:$0xff] %vm3034_vm8, %v2865_v18  ;;  %v2738_v18 = vld [vmem:[#allocation2 + $0x151] sm:$0xff] }
 0x4ef   :  { %3299 = vrot.lane.b32.xlu1 %v3135_v42, %s6694_s12  ;;  %v3123_v42 = vld [vmem:[#allocation2 + $0x152] sm:$0xff] }
 0x4f0   :  { %3235 = vrot.lane.b32.xlu0 %v3103_v58, %s6694_s12  ;;  %v3139_v58 = vld [vmem:[#allocation2 + $0x242] sm:$0xff] }
 0x4f1   :  { %v2857_v50 = vpop.permute.xlu1 %2856  ;;  %2914 = vrot.lane.b32.xlu2 %v2750_v53, %s6693_s11 }
 0x4f2   :  { %3042 = vst.msk [vmem:[#allocation3 + $0x38] sm:$0xff] %vm3034_vm8, %v2857_v50  ;;  %v2861_v57 = vpop.permute.xlu0 %2860 }
 0x4f3   :  { %3044 = vst.msk [vmem:[#allocation3 + $0x48] sm:$0xff] %vm3034_vm8, %v2861_v57  ;;  %v2871_v11 = vpop.permute.xlu2 %2870 }
 0x4f4   :  { %3049 = vst.msk [vmem:[#allocation3 + $0x70] sm:$0xff] %vm3034_vm8, %v2871_v11 }
 0x4f7   :  { %3267 = vrot.lane.b32.xlu1 %v3119_v6, %s6694_s12 }
 0x4f8   :  { %2948 = vrot.lane.b32.xlu0 %v2767_v19, %s6693_s11  ;;  %v2755_v19 = vld [vmem:[#allocation2 + $0x249] sm:$0xff] }
 0x4f9   :  { %v2863_v31 = vpop.permute.xlu1 %2862  ;;  %3331 = vrot.lane.b32.xlu2 %v3151_v32, %s6694_s12  ;;  %v3140_v32 = vld [vmem:[#allocation2 + $0x24a] sm:$0xff] }
 0x4fa   :  { %3045 = vst.msk [vmem:[#allocation3 + $0x50] sm:$0xff] %vm3034_vm8, %v2863_v31  ;;  %v2867_v51 = vpop.permute.xlu0 %2866  ;;  %v3107_v31 = vld [vmem:[#allocation2 + $0x92] sm:$0xff] }
 0x4fb   :  { %3047 = vst.msk [vmem:[#allocation3 + $0x60] sm:$0xff] %vm3034_vm8, %v2867_v51  ;;  %v2877_v8 = vpop.permute.xlu2 %2876 }
 0x4fc   :  { %3052 = vst.msk [vmem:[#allocation3 + $0x88] sm:$0xff] %vm3034_vm8, %v2877_v8 }
 0x4ff   :  { %3301 = vrot.lane.b32.xlu1 %v3136_v59, %s6694_s12 }
 0x500   :  { %3237 = vrot.lane.b32.xlu0 %v3104_v38, %s6694_s12 }
 0x501   :  { %v2869_v36 = vpop.permute.xlu1 %2868  ;;  %2916 = vrot.lane.b32.xlu2 %v2751_v4, %s6693_s11 }
 0x502   :  { %3048 = vst.msk [vmem:[#allocation3 + $0x68] sm:$0xff] %vm3034_vm8, %v2869_v36  ;;  %v2873_v43 = vpop.permute.xlu0 %2872  ;;  %v3156_v36 = vld [vmem:[#allocation2 + $0x30a] sm:$0xff] }
 0x503   :  { %3050 = vst.msk [vmem:[#allocation3 + $0x78] sm:$0xff] %vm3034_vm8, %v2873_v43  ;;  %v2883_v44 = vpop.permute.xlu2 %2882  ;;  %v3108_v43 = vld [vmem:[#allocation2 + $0x9a] sm:$0xff] }
 0x504   :  { %3055 = vst.msk [vmem:[#allocation3 + $0xa0] sm:$0xff] %vm3034_vm8, %v2883_v44 }
 0x507   :  { %3269 = vrot.lane.b32.xlu1 %v3120_v0, %s6694_s12 }
 0x508   :  { %2950 = vrot.lane.b32.xlu0 %v2768_v7, %s6693_s11 }
 0x509   :  { %v2875_v1 = vpop.permute.xlu1 %2874  ;;  %3333 = vrot.lane.b32.xlu2 %v3152_v56, %s6694_s12  ;;  %v3124_v56 = vld [vmem:[#allocation2 + $0x15a] sm:$0xff] }
 0x50a   :  { %3051 = vst.msk [vmem:[#allocation3 + $0x80] sm:$0xff] %vm3034_vm8, %v2875_v1  ;;  %v2879_v14 = vpop.permute.xlu0 %2878  ;;  %v2739_v1 = vld [vmem:[#allocation2 + $0x159] sm:$0xff] }
 0x50b   :  { %3053 = vst.msk [vmem:[#allocation3 + $0x90] sm:$0xff] %vm3034_vm8, %v2879_v14  ;;  %v2907_v45 = vpop.permute.xlu2 %2906 }
 0x50c   :  { %3067 = vst.msk [vmem:[#allocation3 + $0x100] sm:$0xff] %vm3034_vm8, %v2907_v45 }
 0x50f   :  { %3303 = vrot.lane.b32.xlu1 %v3137_v12, %s6694_s12 }
 0x510   :  { %3239 = vrot.lane.b32.xlu0 %v3105_v5, %s6694_s12 }
 0x511   :  { %v2881_v16 = vpop.permute.xlu1 %2880  ;;  %2918 = vrot.lane.b32.xlu2 %v2752_v17, %s6693_s11 }
 0x512   :  { %3054 = vst.msk [vmem:[#allocation3 + $0x98] sm:$0xff] %vm3034_vm8, %v2881_v16  ;;  %v2885_v55 = vpop.permute.xlu0 %2884  ;;  %v3141_v16 = vld [vmem:[#allocation2 + $0x25a] sm:$0xff] }
 0x513   :  { %3056 = vst.msk [vmem:[#allocation3 + $0xa8] sm:$0xff] %vm3034_vm8, %v2885_v55  ;;  %v3324_v23 = vpop.permute.xlu2 %3323  ;;  %v2740_v55 = vld [vmem:[#allocation2 + $0x169] sm:$0xff] }
 0x517   :  { %3271 = vrot.lane.b32.xlu1 %v3121_v28, %s6694_s12 }
 0x518   :  { %2952 = vrot.lane.b32.xlu0 %v2769_v49, %s6693_s11 }
 0x519   :  { %v2887_v33 = vpop.permute.xlu1 %2886  ;;  %3335 = vrot.lane.b32.xlu2 %v3153_v2, %s6694_s12 }
 0x51a   :  { %3057 = vst.msk [vmem:[#allocation3 + $0xb0] sm:$0xff] %vm3034_vm8, %v2887_v33  ;;  %v2939_v40 = vpop.permute.xlu0 %2938 }
 0x51b   :  { %3083 = vst.msk [vmem:[#allocation3 + $0x180] sm:$0xff] %vm3034_vm8, %v2939_v40  ;;  %v2909_v46 = vpop.permute.xlu2 %2908 }
 0x51c   :  { %3468 = vst.msk [vmem:[#allocation3 + $0x180] sm:$0xff] %vm3419_vm10, %v3324_v23  ;;  %v2756_v23 = vld [vmem:[#allocation2 + $0x259] sm:$0xff] }
 0x51d   :  { %3068 = vst.msk [vmem:[#allocation3 + $0x108] sm:$0xff] %vm3034_vm8, %v2909_v46  ;;  %v3109_v46 = vld [vmem:[#allocation2 + $0xaa] sm:$0xff] }
 0x51f   :  { %3305 = vrot.lane.b32.xlu1 %v3138_v13, %s6694_s12  ;;  %v2757_v13 = vld [vmem:[#allocation2 + $0x261] sm:$0xff] }
 0x520   :  { %2888 = vrot.lane.b32.xlu0 %v2737_v48, %s6693_s11  ;;  %v3157_v48 = vld [vmem:[#allocation2 + $0x31a] sm:$0xff] }
 0x521   :  { %v3292_v52 = vpop.permute.xlu1 %3291  ;;  %2920 = vrot.lane.b32.xlu2 %v2753_v27, %s6693_s11 }
 0x522   :  { %3452 = vst.msk [vmem:[#allocation3 + $0x100] sm:$0xff] %vm3419_vm10, %v3292_v52  ;;  %v3228_v24 = vpop.permute.xlu0 %3227 }
 0x523   :  { %3420 = vst.msk [vmem:[#allocation3] sm:$0xff] %vm3419_vm10, %v3228_v24  ;;  %v3326_v60 = vpop.permute.xlu2 %3325  ;;  %v3532_v10 = vld [vmem:[#allocation3 + $0x180] sm:$0xff] }
 0x524   :  { %6535 = vmatmul.msk.f32.vlgmr.msra.gmra.mxu3 %vm3556_vm11, %v3532_v10 }
 0x527   :  { %3241 = vrot.lane.b32.xlu1 %v3106_v26, %s6694_s12  ;;  %v2773_v26 = vld [vmem:[#allocation2 + $0x321] sm:$0xff] }
 0x528   :  { %2922 = vrot.lane.b32.xlu0 %v2754_v3, %s6693_s11  ;;  %v3158_v3 = vld [vmem:[#allocation2 + $0x322] sm:$0xff] }
 0x529   :  { %v3260_v62 = vpop.permute.xlu1 %3259  ;;  %v3516_v15 = vld [vmem:[#allocation3 + $0x100] sm:$0xff]  ;;  %3337 = vrot.lane.b32.xlu2 %v3154_v37, %s6694_s12  ;;  %v3125_v37 = vld [vmem:[#allocation2 + $0x16a] sm:$0xff] }
 0x52a   :  { %3436 = vst.msk [vmem:[#allocation3 + $0x80] sm:$0xff] %vm3419_vm10, %v3260_v62  ;;  %6519 = vmatmul.msk.f32.vlgmr.msra.gmra.mxu2 %vm3556_vm11, %v3516_v15  ;;  %v2941_v21 = vpop.permute.xlu0 %2940  ;;  %v3484_v29 = vld [vmem:[#allocation3] sm:$0xff] }
 0x52b   :  { %3084 = vst.msk [vmem:[#allocation3 + $0x188] sm:$0xff] %vm3034_vm8, %v2941_v21  ;;  %v2911_v61 = vpop.permute.xlu2 %2910  ;;  %6487 = vmatmul.msk.f32.vlgmr.msra.gmra.mxu0 %vm3556_vm11, %v3484_v29 }
 0x52c   :  { %3469 = vst.msk [vmem:[#allocation3 + $0x188] sm:$0xff] %vm3419_vm10, %v3326_v60 }
 0x52d   :  { %3069 = vst.msk [vmem:[#allocation3 + $0x110] sm:$0xff] %vm3034_vm8, %v2911_v61 }
 0x52f   :  { %2954 = vrot.lane.b32.xlu1 %v2770_v39, %s6693_s11  ;;  %v2741_v39 = vld [vmem:[#allocation2 + $0x171] sm:$0xff] }
 0x530   :  { %3339 = vrot.lane.b32.xlu0 %v3155_v47, %s6694_s12  ;;  %v3126_v47 = vld [vmem:[#allocation2 + $0x172] sm:$0xff] }
 0x531   :  { %v3294_v63 = vpop.permute.xlu1 %3293  ;;  %v3500_v22 = vld [vmem:[#allocation3 + $0x80] sm:$0xff]  ;;  %3273 = vrot.lane.b32.xlu2 %v3122_v30, %s6694_s12 }
 0x532   :  { %3453 = vst.msk [vmem:[#allocation3 + $0x108] sm:$0xff] %vm3419_vm10, %v3294_v63  ;;  %6503 = vmatmul.msk.f32.vlgmr.msra.gmra.mxu1 %vm3556_vm11, %v3500_v22  ;;  %v3230_v9 = vpop.permute.xlu0 %3229  ;;  %v3142_v30 = vld [vmem:[#allocation2 + $0x262] sm:$0xff] }
 0x533   :  { %3421 = vst.msk [vmem:[#allocation3 + $0x8] sm:$0xff] %vm3419_vm10, %v3230_v9  ;;  %v3328_v34 = vpop.permute.xlu2 %3327  ;;  %v3533_v41 = vld [vmem:[#allocation3 + $0x188] sm:$0xff] }
 0x534   :  { %6536 = vmatmul.msk.f32.gmra.mxu3 %vm3556_vm11, %v3533_v41 }
 0x537   :  { %2890 = vrot.lane.b32.xlu1 %v2738_v18, %s6693_s11  ;;  %v2758_v18 = vld [vmem:[#allocation2 + $0x271] sm:$0xff] }
 0x538   :  { %3275 = vrot.lane.b32.xlu0 %v3123_v42, %s6694_s12  ;;  %v3143_v42 = vld [vmem:[#allocation2 + $0x272] sm:$0xff] }
 0x539   :  { %v3262_v53 = vpop.permute.xlu1 %3261  ;;  %v3517_v50 = vld [vmem:[#allocation3 + $0x108] sm:$0xff]  ;;  %3307 = vrot.lane.b32.xlu2 %v3139_v58, %s6694_s12  ;;  %v3110_v58 = vld [vmem:[#allocation2 + $0xb2] sm:$0xff] }
 0x53a   :  { %3437 = vst.msk [vmem:[#allocation3 + $0x88] sm:$0xff] %vm3419_vm10, %v3262_v53  ;;  %6520 = vmatmul.msk.f32.gmra.mxu2 %vm3556_vm11, %v3517_v50  ;;  %v2943_v57 = vpop.permute.xlu0 %2942  ;;  %v3485_v11 = vld [vmem:[#allocation3 + $0x8] sm:$0xff] }
 0x53b   :  { %3085 = vst.msk [vmem:[#allocation3 + $0x190] sm:$0xff] %vm3034_vm8, %v2943_v57  ;;  %v2913_v6 = vpop.permute.xlu2 %2912  ;;  %6488 = vmatmul.msk.f32.gmra.mxu0 %vm3556_vm11, %v3485_v11 }
 0x53c   :  { %3470 = vst.msk [vmem:[#allocation3 + $0x190] sm:$0xff] %vm3419_vm10, %v3328_v34 }
 0x53d   :  { %3070 = vst.msk [vmem:[#allocation3 + $0x118] sm:$0xff] %vm3034_vm8, %v2913_v6 }
 0x53f   :  { %2924 = vrot.lane.b32.xlu1 %v2755_v19, %s6693_s11  ;;  %v3159_v19 = vld [vmem:[#allocation2 + $0x332] sm:$0xff] }
 0x540   :  { %3309 = vrot.lane.b32.xlu0 %v3140_v32, %s6694_s12  ;;  %v3111_v32 = vld [vmem:[#allocation2 + $0xc2] sm:$0xff] }
 0x541   :  { %v3296_v51 = vpop.permute.xlu1 %3295  ;;  %v3501_v8 = vld [vmem:[#allocation3 + $0x88] sm:$0xff]  ;;  %3243 = vrot.lane.b32.xlu2 %v3107_v31, %s6694_s12  ;;  %v2774_v31 = vld [vmem:[#allocation2 + $0x331] sm:$0xff] }
 0x542   :  { %3454 = vst.msk [vmem:[#allocation3 + $0x110] sm:$0xff] %vm3419_vm10, %v3296_v51  ;;  %6504 = vmatmul.msk.f32.gmra.mxu1 %vm3556_vm11, %v3501_v8  ;;  %v3232_v59 = vpop.permute.xlu0 %3231 }
 0x543   :  { %3422 = vst.msk [vmem:[#allocation3 + $0x10] sm:$0xff] %vm3419_vm10, %v3232_v59  ;;  %v3330_v38 = vpop.permute.xlu2 %3329  ;;  %v3534_v4 = vld [vmem:[#allocation3 + $0x190] sm:$0xff] }
 0x544   :  { %6537 = vmatmul.msk.f32.gmra.mxu3 %vm3556_vm11, %v3534_v4 }
 0x547   :  { %3341 = vrot.lane.b32.xlu1 %v3156_v36, %s6694_s12  ;;  %v3127_v36 = vld [vmem:[#allocation2 + $0x182] sm:$0xff] }
 0x548   :  { %3245 = vrot.lane.b32.xlu0 %v3108_v43, %s6694_s12  ;;  %v2775_v43 = vld [vmem:[#allocation2 + $0x339] sm:$0xff] }
 0x549   :  { %v3264_v20 = vpop.permute.xlu1 %3263  ;;  %v3518_v44 = vld [vmem:[#allocation3 + $0x110] sm:$0xff]  ;;  %2956 = vrot.lane.b32.xlu2 %v2771_v25, %s6693_s11  ;;  %v2742_v25 = vld [vmem:[#allocation2 + $0x181] sm:$0xff] }
 0x54a   :  { %3438 = vst.msk [vmem:[#allocation3 + $0x90] sm:$0xff] %vm3419_vm10, %v3264_v20  ;;  %6521 = vmatmul.msk.f32.gmra.mxu2 %vm3556_vm11, %v3518_v44  ;;  %v2945_v0 = vpop.permute.xlu0 %2944  ;;  %v3486_v54 = vld [vmem:[#allocation3 + $0x10] sm:$0xff] }
 0x54b   :  { %3086 = vst.msk [vmem:[#allocation3 + $0x198] sm:$0xff] %vm3034_vm8, %v2945_v0  ;;  %v2915_v7 = vpop.permute.xlu2 %2914  ;;  %6489 = vmatmul.msk.f32.gmra.mxu0 %vm3556_vm11, %v3486_v54 }
 0x54c   :  { %3471 = vst.msk [vmem:[#allocation3 + $0x198] sm:$0xff] %vm3419_vm10, %v3330_v38 }
 0x54d   :  { %3071 = vst.msk [vmem:[#allocation3 + $0x120] sm:$0xff] %vm3034_vm8, %v2915_v7 }
 0x54f   :  { %3277 = vrot.lane.b32.xlu1 %v3124_v56, %s6694_s12  ;;  %v3144_v56 = vld [vmem:[#allocation2 + $0x27a] sm:$0xff] }
 0x550   :  { %2958 = vrot.lane.b32.xlu0 %v2772_v35, %s6693_s11  ;;  %v2743_v35 = vld [vmem:[#allocation2 + $0x189] sm:$0xff] }
 0x551   :  { %v3298_v14 = vpop.permute.xlu1 %3297  ;;  %v3502_v45 = vld [vmem:[#allocation3 + $0x90] sm:$0xff]  ;;  %2892 = vrot.lane.b32.xlu2 %v2739_v1, %s6693_s11  ;;  %v2759_v1 = vld [vmem:[#allocation2 + $0x279] sm:$0xff] }
 0x552   :  { %3455 = vst.msk [vmem:[#allocation3 + $0x118] sm:$0xff] %vm3419_vm10, %v3298_v14  ;;  %6505 = vmatmul.msk.f32.gmra.mxu1 %vm3556_vm11, %v3502_v45  ;;  %v3234_v12 = vpop.permute.xlu0 %3233 }
 0x553   :  { %3423 = vst.msk [vmem:[#allocation3 + $0x18] sm:$0xff] %vm3419_vm10, %v3234_v12  ;;  %v3332_v5 = vpop.permute.xlu2 %3331  ;;  %v3535_v17 = vld [vmem:[#allocation3 + $0x198] sm:$0xff] }
 0x554   :  { %6538 = vmatmul.msk.f32.gmra.mxu3 %vm3556_vm11, %v3535_v17 }
 0x557   :  { %3311 = vrot.lane.b32.xlu1 %v3141_v16, %s6694_s12  ;;  %v3112_v16 = vld [vmem:[#allocation2 + $0xca] sm:$0xff] }
 0x558   :  { %2894 = vrot.lane.b32.xlu0 %v2740_v55, %s6693_s11  ;;  %v2760_v55 = vld [vmem:[#allocation2 + $0x289] sm:$0xff] }
 0x559   :  { %v3266_v28 = vpop.permute.xlu1 %3265  ;;  %v3519_v49 = vld [vmem:[#allocation3 + $0x118] sm:$0xff]  ;;  %2926 = vrot.lane.b32.xlu2 %v2756_v23, %s6693_s11 }
 0x55a   :  { %3439 = vst.msk [vmem:[#allocation3 + $0x98] sm:$0xff] %vm3419_vm10, %v3266_v28  ;;  %6522 = vmatmul.msk.f32.gmra.mxu2 %vm3556_vm11, %v3519_v49  ;;  %v2947_v2 = vpop.permute.xlu0 %2946  ;;  %v3487_v33 = vld [vmem:[#allocation3 + $0x18] sm:$0xff] }
 0x55b   :  { %3087 = vst.msk [vmem:[#allocation3 + $0x1a0] sm:$0xff] %vm3034_vm8, %v2947_v2  ;;  %v2917_v40 = vpop.permute.xlu2 %2916  ;;  %6490 = vmatmul.msk.f32.gmra.mxu0 %vm3556_vm11, %v3487_v33  ;;  %v3160_v23 = vld [vmem:[#allocation2 + $0x33a] sm:$0xff] }
 0x55c   :  { %3472 = vst.msk [vmem:[#allocation3 + $0x1a0] sm:$0xff] %vm3419_vm10, %v3332_v5 }
 0x55d   :  { %3072 = vst.msk [vmem:[#allocation3 + $0x128] sm:$0xff] %vm3034_vm8, %v2917_v40 }
 0x55f   :  { %3247 = vrot.lane.b32.xlu1 %v3109_v46, %s6694_s12  ;;  %v2776_v46 = vld [vmem:[#allocation2 + $0x349] sm:$0xff] }
 0x560   :  { %2928 = vrot.lane.b32.xlu0 %v2757_v13, %s6693_s11  ;;  %v3161_v13 = vld [vmem:[#allocation2 + $0x34a] sm:$0xff] }
 0x561   :  { %v3300_v27 = vpop.permute.xlu1 %3299  ;;  %v3503_v52 = vld [vmem:[#allocation3 + $0x98] sm:$0xff]  ;;  %3343 = vrot.lane.b32.xlu2 %v3157_v48, %s6694_s12  ;;  %v3128_v48 = vld [vmem:[#allocation2 + $0x18a] sm:$0xff] }
 0x562   :  { %3456 = vst.msk [vmem:[#allocation3 + $0x120] sm:$0xff] %vm3419_vm10, %v3300_v27  ;;  %6506 = vmatmul.msk.f32.gmra.mxu1 %vm3556_vm11, %v3503_v52  ;;  %v3236_v24 = vpop.permute.xlu0 %3235 }
 0x563   :  { %3424 = vst.msk [vmem:[#allocation3 + $0x20] sm:$0xff] %vm3419_vm10, %v3236_v24  ;;  %v3334_v60 = vpop.permute.xlu2 %3333  ;;  %v3536_v10 = vld [vmem:[#allocation3 + $0x1a0] sm:$0xff] }
 0x564   :  { %6539 = vmatmul.msk.f32.gmra.mxu3 %vm3556_vm11, %v3536_v10 }
 0x567   :  { %2960 = vrot.lane.b32.xlu1 %v2773_v26, %s6693_s11  ;;  %v2744_v26 = vld [vmem:[#allocation2 + $0x199] sm:$0xff] }
 0x568   :  { %3345 = vrot.lane.b32.xlu0 %v3158_v3, %s6694_s12  ;;  %v3129_v3 = vld [vmem:[#allocation2 + $0x19a] sm:$0xff] }
 0x569   :  { %v3268_v62 = vpop.permute.xlu1 %3267  ;;  %v3520_v15 = vld [vmem:[#allocation3 + $0x120] sm:$0xff]  ;;  %3279 = vrot.lane.b32.xlu2 %v3125_v37, %s6694_s12  ;;  %v3145_v37 = vld [vmem:[#allocation2 + $0x28a] sm:$0xff] }
 0x56a   :  { %3440 = vst.msk [vmem:[#allocation3 + $0xa0] sm:$0xff] %vm3419_vm10, %v3268_v62  ;;  %6523 = vmatmul.msk.f32.gmra.mxu2 %vm3556_vm11, %v3520_v15  ;;  %v2949_v21 = vpop.permute.xlu0 %2948  ;;  %v3488_v29 = vld [vmem:[#allocation3 + $0x20] sm:$0xff] }
 0x56b   :  { %3088 = vst.msk [vmem:[#allocation3 + $0x1a8] sm:$0xff] %vm3034_vm8, %v2949_v21  ;;  %v2919_v61 = vpop.permute.xlu2 %2918  ;;  %6491 = vmatmul.msk.f32.gmra.mxu0 %vm3556_vm11, %v3488_v29 }
 0x56c   :  { %3473 = vst.msk [vmem:[#allocation3 + $0x1a8] sm:$0xff] %vm3419_vm10, %v3334_v60 }
 0x56d   :  { %3073 = vst.msk [vmem:[#allocation3 + $0x130] sm:$0xff] %vm3034_vm8, %v2919_v61 }
 0x56f   :  { %2896 = vrot.lane.b32.xlu1 %v2741_v39, %s6693_s11  ;;  %v2761_v39 = vld [vmem:[#allocation2 + $0x291] sm:$0xff] }
 0x570   :  { %3281 = vrot.lane.b32.xlu0 %v3126_v47, %s6694_s12  ;;  %v3146_v47 = vld [vmem:[#allocation2 + $0x292] sm:$0xff] }
 0x571   :  { %v3302_v63 = vpop.permute.xlu1 %3301  ;;  %v3504_v22 = vld [vmem:[#allocation3 + $0xa0] sm:$0xff]  ;;  %3313 = vrot.lane.b32.xlu2 %v3142_v30, %s6694_s12 }
 0x572   :  { %3457 = vst.msk [vmem:[#allocation3 + $0x128] sm:$0xff] %vm3419_vm10, %v3302_v63  ;;  %6507 = vmatmul.msk.f32.gmra.mxu1 %vm3556_vm11, %v3504_v22  ;;  %v3238_v9 = vpop.permute.xlu0 %3237  ;;  %v3113_v30 = vld [vmem:[#allocation2 + $0xda] sm:$0xff] }
 0x573   :  { %3425 = vst.msk [vmem:[#allocation3 + $0x28] sm:$0xff] %vm3419_vm10, %v3238_v9  ;;  %v3336_v34 = vpop.permute.xlu2 %3335  ;;  %v3537_v41 = vld [vmem:[#allocation3 + $0x1a8] sm:$0xff] }
 0x574   :  { %6540 = vmatmul.msk.f32.gmra.mxu3 %vm3556_vm11, %v3537_v41  ;;  %v3162_v41 = vld [vmem:[#allocation2 + $0x352] sm:$0xff] }
 0x577   :  { %2930 = vrot.lane.b32.xlu1 %v2758_v18, %s6693_s11 }
 0x578   :  { %3315 = vrot.lane.b32.xlu0 %v3143_v42, %s6694_s12  ;;  %v3114_v42 = vld [vmem:[#allocation2 + $0xe2] sm:$0xff] }
 0x579   :  { %v3270_v53 = vpop.permute.xlu1 %3269  ;;  %v3521_v50 = vld [vmem:[#allocation3 + $0x128] sm:$0xff]  ;;  %3249 = vrot.lane.b32.xlu2 %v3110_v58, %s6694_s12  ;;  %v2777_v58 = vld [vmem:[#allocation2 + $0x351] sm:$0xff] }
 0x57a   :  { %3441 = vst.msk [vmem:[#allocation3 + $0xa8] sm:$0xff] %vm3419_vm10, %v3270_v53  ;;  %6524 = vmatmul.msk.f32.gmra.mxu2 %vm3556_vm11, %v3521_v50  ;;  %v2951_v57 = vpop.permute.xlu0 %2950  ;;  %v3489_v11 = vld [vmem:[#allocation3 + $0x28] sm:$0xff] }
 0x57b   :  { %3089 = vst.msk [vmem:[#allocation3 + $0x1b0] sm:$0xff] %vm3034_vm8, %v2951_v57  ;;  %v2921_v6 = vpop.permute.xlu2 %2920  ;;  %6492 = vmatmul.msk.f32.gmra.mxu0 %vm3556_vm11, %v3489_v11 }
 0x57c   :  { %3474 = vst.msk [vmem:[#allocation3 + $0x1b0] sm:$0xff] %vm3419_vm10, %v3336_v34 }
 0x57d   :  { %3074 = vst.msk [vmem:[#allocation3 + $0x138] sm:$0xff] %vm3034_vm8, %v2921_v6 }
 0x57f   :  { %3347 = vrot.lane.b32.xlu1 %v3159_v19, %s6694_s12  ;;  %v3130_v19 = vld [vmem:[#allocation2 + $0x1a2] sm:$0xff] }
 0x580   :  { %3251 = vrot.lane.b32.xlu0 %v3111_v32, %s6694_s12 }
 0x581   :  { %v3304_v51 = vpop.permute.xlu1 %3303  ;;  %v3505_v8 = vld [vmem:[#allocation3 + $0xa8] sm:$0xff]  ;;  %2962 = vrot.lane.b32.xlu2 %v2774_v31, %s6693_s11 }
 0x582   :  { %3458 = vst.msk [vmem:[#allocation3 + $0x130] sm:$0xff] %vm3419_vm10, %v3304_v51  ;;  %6508 = vmatmul.msk.f32.gmra.mxu1 %vm3556_vm11, %v3505_v8  ;;  %v3240_v59 = vpop.permute.xlu0 %3239  ;;  %v2745_v51 = vld [vmem:[#allocation2 + $0x1a1] sm:$0xff] }
 0x583   :  { %3426 = vst.msk [vmem:[#allocation3 + $0x30] sm:$0xff] %vm3419_vm10, %v3240_v59  ;;  %v3338_v38 = vpop.permute.xlu2 %3337  ;;  %v3538_v4 = vld [vmem:[#allocation3 + $0x1b0] sm:$0xff] }
 0x584   :  { %6541 = vmatmul.msk.f32.gmra.mxu3 %vm3556_vm11, %v3538_v4 }
 0x587   :  { %3283 = vrot.lane.b32.xlu1 %v3127_v36, %s6694_s12 }
 0x588   :  { %2964 = vrot.lane.b32.xlu0 %v2775_v43, %s6693_s11 }
 0x589   :  { %v3272_v20 = vpop.permute.xlu1 %3271  ;;  %v3522_v44 = vld [vmem:[#allocation3 + $0x130] sm:$0xff]  ;;  %2898 = vrot.lane.b32.xlu2 %v2742_v25, %s6693_s11 }
 0x58a   :  { %3442 = vst.msk [vmem:[#allocation3 + $0xb0] sm:$0xff] %vm3419_vm10, %v3272_v20  ;;  %6525 = vmatmul.msk.f32.gmra.mxu2 %vm3556_vm11, %v3522_v44  ;;  %v2953_v0 = vpop.permute.xlu0 %2952  ;;  %v3490_v54 = vld [vmem:[#allocation3 + $0x30] sm:$0xff]  ;;  %v8587_v20 = vld [vmem:[%s10260_s2] ss:$0 sm:$0xff] }
 0x58b   :  { %3090 = vst.msk [vmem:[#allocation3 + $0x1b8] sm:$0xff] %vm3034_vm8, %v2953_v0  ;;  %v3274_v7 = vpop.permute.xlu2 %3273  ;;  %6493 = vmatmul.msk.f32.gmra.mxu0 %vm3556_vm11, %v3490_v54 }
 0x58c   :  { %3475 = vst.msk [vmem:[#allocation3 + $0x1b8] sm:$0xff] %vm3419_vm10, %v3338_v38 }
 0x58f   :  { %3317 = vrot.lane.b32.xlu1 %v3144_v56, %s6694_s12 }
 0x590   :  { %2900 = vrot.lane.b32.xlu0 %v2743_v35, %s6693_s11 }
 0x591   :  { %v3306_v14 = vpop.permute.xlu1 %3305  ;;  %v3506_v45 = vld [vmem:[#allocation3 + $0xb0] sm:$0xff]  ;;  %2932 = vrot.lane.b32.xlu2 %v2759_v1, %s6693_s11 }
 0x592   :  { %3459 = vst.msk [vmem:[#allocation3 + $0x138] sm:$0xff] %vm3419_vm10, %v3306_v14  ;;  %6509 = vmatmul.msk.f32.gmra.mxu1 %vm3556_vm11, %v3506_v45  ;;  %v2889_v12 = vpop.permute.xlu0 %2888 }
 0x593   :  { %3058 = vst.msk [vmem:[#allocation3 + $0xb8] sm:$0xff] %vm3034_vm8, %v2889_v12  ;;  %v3308_v5 = vpop.permute.xlu2 %3307  ;;  %v3539_v17 = vld [vmem:[#allocation3 + $0x1b8] sm:$0xff] }
 0x594   :  { %3443 = vst.msk [vmem:[#allocation3 + $0xb8] sm:$0xff] %vm3419_vm10, %v3274_v7  ;;  %6542 = vmatmul.msk.f32.gmra.mxu3 %vm3556_vm11, %v3539_v17 }
 0x597   :  { %3253 = vrot.lane.b32.xlu1 %v3112_v16, %s6694_s12 }
 0x598   :  { %2934 = vrot.lane.b32.xlu0 %v2760_v55, %s6693_s11 }
 0x599   :  { %v3242_v28 = vpop.permute.xlu1 %3241  ;;  %v3523_v49 = vld [vmem:[#allocation3 + $0x138] sm:$0xff]  ;;  %3349 = vrot.lane.b32.xlu2 %v3160_v23, %s6694_s12 }
 0x59a   :  { %3427 = vst.msk [vmem:[#allocation3 + $0x38] sm:$0xff] %vm3419_vm10, %v3242_v28  ;;  %6526 = vmatmul.msk.f32.gmra.mxu2 %vm3556_vm11, %v3523_v49  ;;  %v2923_v2 = vpop.permute.xlu0 %2922 }
 0x59b   :  { %3075 = vst.msk [vmem:[#allocation3 + $0x140] sm:$0xff] %vm3034_vm8, %v2923_v2  ;;  %v3244_v33 = vpop.permute.xlu2 %3243  ;;  %v3507_v40 = vld [vmem:[#allocation3 + $0xb8] sm:$0xff] }
 0x59c   :  { %3460 = vst.msk [vmem:[#allocation3 + $0x140] sm:$0xff] %vm3419_vm10, %v3308_v5  ;;  %6510 = vmatmul.msk.f32.gmra.mxu1 %vm3556_vm11, %v3507_v40 }
 0x59d   :  { %3428 = vst.msk [vmem:[#allocation3 + $0x40] sm:$0xff] %vm3419_vm10, %v3244_v33 }
 0x59f   :  { %2966 = vrot.lane.b32.xlu1 %v2776_v46, %s6693_s11 }
 0x5a0   :  { %3351 = vrot.lane.b32.xlu0 %v3161_v13, %s6694_s12 }
 0x5a1   :  { %v2955_v27 = vpop.permute.xlu1 %2954  ;;  %v3491_v52 = vld [vmem:[#allocation3 + $0x38] sm:$0xff]  ;;  %3285 = vrot.lane.b32.xlu2 %v3128_v48, %s6694_s12  ;;  %v10274_v48 = vmov 0.0  }
 0x5a2   :  { %3091 = vst.msk [vmem:[#allocation3 + $0x1c0] sm:$0xff] %vm3034_vm8, %v2955_v27  ;;  %6494 = vmatmul.msk.f32.gmra.mxu0 %vm3556_vm11, %v3491_v52  ;;  %v3340_v24 = vpop.permute.xlu0 %3339 }
 0x5a3   :  { %3476 = vst.msk [vmem:[#allocation3 + $0x1c0] sm:$0xff] %vm3419_vm10, %v3340_v24  ;;  %v2957_v60 = vpop.permute.xlu2 %2956  ;;  %v3524_v10 = vld [vmem:[#allocation3 + $0x140] sm:$0xff] }
 0x5a4   :  { %3092 = vst.msk [vmem:[#allocation3 + $0x1c8] sm:$0xff] %vm3034_vm8, %v2957_v60  ;;  %6527 = vmatmul.msk.f32.gmra.mxu2 %vm3556_vm11, %v3524_v10  ;;  %v3492_v62 = vld [vmem:[#allocation3 + $0x40] sm:$0xff] }
 0x5a5   :  { %4577 = vst.msk [vmem:[#allocation5] sm:$0xff] %vm4560_vm12, %v10274_v48 }
 0x5a6   :  { %4580 = vst.msk [vmem:[#allocation5 + $0x10] sm:$0xff] %vm4560_vm12, %v10274_v48 }
 0x5a7   :  { %2902 = vrot.lane.b32.xlu1 %v2744_v26, %s6693_s11  ;;  %v3914_v18 = vpop.f32.mrf.mxu3  ;;  %4582 = vst.msk [vmem:[#allocation5 + $0x20] sm:$0xff] %vm4560_vm12, %v10274_v48 }
 0x5a8   :  { %3287 = vrot.lane.b32.xlu0 %v3129_v3, %s6694_s12  ;;  %v3770_v53 = vpop.f32.mrf.mxu0  ;;  %v3915_v0 = vadd.f32 %v8587_v20, %v3914_v18  ;;  %4584 = vst.msk [vmem:[#allocation5 + $0x30] sm:$0xff] %vm4560_vm12, %v10274_v48 }
 0x5a9   :  { %v2891_v15 = vpop.permute.xlu1 %2890  ;;  %3319 = vrot.lane.b32.xlu2 %v3145_v37, %s6694_s12  ;;  %v3771_v54 = vadd.f32 %v8587_v20, %v3770_v53  ;;  %4586 = vst.msk [vmem:[#allocation5 + $0x40] sm:$0xff] %vm4560_vm12, %v10274_v48 }
 0x5aa   :  { %3059 = vst.msk [vmem:[#allocation3 + $0xc0] sm:$0xff] %vm3034_vm8, %v2891_v15  ;;  %v3276_v21 = vpop.permute.xlu0 %3275  ;;  %v3540_v29 = vld [vmem:[#allocation3 + $0x1c0] sm:$0xff]  ;;  %6495 = vmatmul.msk.f32.gmra.mxu0 %vm3556_vm11, %v3492_v62  ;;  %v4010_v5 = vmax.f32 %v3915_v0, 0.0 }
 0x5ab   :  { %3444 = vst.msk [vmem:[#allocation3 + $0xc0] sm:$0xff] %vm3419_vm10, %v3276_v21  ;;  %v2893_v61 = vpop.permute.xlu2 %2892  ;;  %6543 = vmatmul.msk.f32.gmra.mxu3 %vm3556_vm11, %v3540_v29  ;;  %v3962_v23 = vmax.f32 %v3771_v54, 0.0 }
 0x5ac   :  { %3060 = vst.msk [vmem:[#allocation3 + $0xc8] sm:$0xff] %vm3034_vm8, %v2893_v61 }
 0x5ad   :  { %v3866_v32 = vpop.f32.mrf.mxu2  ;;  %4588 = vst.msk [vmem:[#allocation5 + $0x50] sm:$0xff] %vm4560_vm12, %v10274_v48 }
 0x5ae   :  { %v3867_v55 = vadd.f32 %v8587_v20, %v3866_v32  ;;  %4590 = vst.msk [vmem:[#allocation5 + $0x60] sm:$0xff] %vm4560_vm12, %v10274_v48 }
 0x5af   :  { %2936 = vrot.lane.b32.xlu1 %v2761_v39, %s6693_s11  ;;  %v3818_v8 = vpop.f32.mrf.mxu1  ;;  %4592 = vst.msk [vmem:[#allocation5 + $0x70] sm:$0xff] %vm4560_vm12, %v10274_v48 }
 0x5b0   :  { %3321 = vrot.lane.b32.xlu0 %v3146_v47, %s6694_s12  ;;  %v3994_v27 = vmax.f32 %v3867_v55, 0.0  ;;  %v3819_v3 = vadd.f32 %v8587_v20, %v3818_v8  ;;  %4594 = vst.msk [vmem:[#allocation5 + $0x80] sm:$0xff] %vm4560_vm12, %v10274_v48 }
 0x5b1   :  { %v2925_v63 = vpop.permute.xlu1 %2924  ;;  %3255 = vrot.lane.b32.xlu2 %v3113_v30, %s6694_s12  ;;  %4596 = vst.msk [vmem:[#allocation5 + $0x90] sm:$0xff] %vm4560_vm12, %v10274_v48 }
 0x5b2   :  { %3076 = vst.msk [vmem:[#allocation3 + $0x148] sm:$0xff] %vm3034_vm8, %v2925_v63  ;;  %v3310_v22 = vpop.permute.xlu0 %3309  ;;  %v3508_v9 = vld [vmem:[#allocation3 + $0xc0] sm:$0xff]  ;;  %v3978_v63 = vmax.f32 %v3819_v3, 0.0 }
 0x5b3   :  { %3461 = vst.msk [vmem:[#allocation3 + $0x148] sm:$0xff] %vm3419_vm10, %v3310_v22  ;;  %v2927_v34 = vpop.permute.xlu2 %2926  ;;  %6511 = vmatmul.msk.f32.gmra.mxu1 %vm3556_vm11, %v3508_v9 }
 0x5b4   :  { %3077 = vst.msk [vmem:[#allocation3 + $0x150] sm:$0xff] %vm3034_vm8, %v2927_v34 }
 0x5b5   :  { %4598 = vst.msk [vmem:[#allocation5 + $0xa0] sm:$0xff] %vm4560_vm12, %v10274_v48 }
 0x5b6   :  { %4600 = vst.msk [vmem:[#allocation5 + $0xb0] sm:$0xff] %vm4560_vm12, %v10274_v48 }
 0x5b7   :  { %3353 = vrot.lane.b32.xlu1 %v3162_v41, %s6694_s12  ;;  %v8574_v31 = vpop.f32.mrf.mxu3  ;;  %4602 = vst.msk [vmem:[#allocation5 + $0xc0] sm:$0xff] %vm4560_vm12, %v10274_v48 }
 0x5b8   :  { %3257 = vrot.lane.b32.xlu0 %v3114_v42, %s6694_s12  ;;  %v8577_v59 = vpop.f32.mrf.mxu0  ;;  %v3918_v34 = vadd.f32 %v8587_v20, %v8574_v31  ;;  %4604 = vst.msk [vmem:[#allocation5 + $0xd0] sm:$0xff] %vm4560_vm12, %v10274_v48 }
 0x5b9   :  { %v3342_v50 = vpop.permute.xlu1 %3341  ;;  %2968 = vrot.lane.b32.xlu2 %v2777_v58, %s6693_s11  ;;  %v3774_v9 = vadd.f32 %v8587_v20, %v8577_v59  ;;  %4606 = vst.msk [vmem:[#allocation5 + $0xe0] sm:$0xff] %vm4560_vm12, %v10274_v48 }
 0x5ba   :  { %3477 = vst.msk [vmem:[#allocation3 + $0x1c8] sm:$0xff] %vm3419_vm10, %v3342_v50  ;;  %v3246_v57 = vpop.permute.xlu0 %3245  ;;  %v3525_v11 = vld [vmem:[#allocation3 + $0x148] sm:$0xff]  ;;  %v4011_v8 = vmax.f32 %v3918_v34, 0.0 }
 0x5bb   :  { %3429 = vst.msk [vmem:[#allocation3 + $0x48] sm:$0xff] %vm3419_vm10, %v3246_v57  ;;  %v3344_v6 = vpop.permute.xlu2 %3343  ;;  %6528 = vmatmul.msk.f32.gmra.mxu2 %vm3556_vm11, %v3525_v11 }
 0x5bc   :  { %4608 = vst.msk [vmem:[#allocation5 + $0xf0] sm:$0xff] %vm4560_vm12, %v10274_v48 }
 0x5bd   :  { %v3869_v44 = vpop.f32.mrf.mxu2  ;;  %4610 = vst.msk [vmem:[#allocation5 + $0x100] sm:$0xff] %vm4560_vm12, %v10274_v48 }
 0x5be   :  { %v8630_v41 = vadd.f32 %v8587_v20, %v3869_v44  ;;  %4612 = vst.msk [vmem:[#allocation5 + $0x110] sm:$0xff] %vm4560_vm12, %v10274_v48 }
 0x5bf   :  { %3289 = vrot.lane.b32.xlu1 %v3130_v19, %s6694_s12  ;;  %v8592_v7 = vpop.f32.mrf.mxu1  ;;  %4614 = vst.msk [vmem:[#allocation5 + $0x120] sm:$0xff] %vm4560_vm12, %v10274_v48 }
 0x5c0   :  { %v8641_v11 = vadd.f32 %v8587_v20, %v8592_v7  ;;  %4616 = vst.msk [vmem:[#allocation5 + $0x130] sm:$0xff] %vm4560_vm12, %v10274_v48 }
 0x5c1   :  { %v3278_v38 = vpop.permute.xlu1 %3277  ;;  %v3541_v4 = vld [vmem:[#allocation3 + $0x1c8] sm:$0xff]  ;;  %2904 = vrot.lane.b32.xlu2 %v2745_v51, %s6693_s11  ;;  %v3963_v51 = vmax.f32 %v3774_v9, 0.0  ;;  %4579 = vst.msk [vmem:[#allocation5 + $0x8] sm:$0x3] %vm4578_vm3, %v10274_v48 }
 0x5c2   :  { %3445 = vst.msk [vmem:[#allocation3 + $0xc8] sm:$0xff] %vm3419_vm10, %v3278_v38  ;;  %6544 = vmatmul.msk.f32.gmra.mxu3 %vm3556_vm11, %v3541_v4  ;;  %v2959_v36 = vpop.permute.xlu0 %2958  ;;  %v3493_v43 = vld [vmem:[#allocation3 + $0x48] sm:$0xff]  ;;  %v3995_v4 = vmax.f32 %v8630_v41, 0.0 }
 0x5c3   :  { %3093 = vst.msk [vmem:[#allocation3 + $0x1d0] sm:$0xff] %vm3034_vm8, %v2959_v36  ;;  %v3280_v25 = vpop.permute.xlu2 %3279  ;;  %6496 = vmatmul.msk.f32.gmra.mxu0 %vm3556_vm11, %v3493_v43 }
 0x5c4   :  { %3478 = vst.msk [vmem:[#allocation3 + $0x1d0] sm:$0xff] %vm3419_vm10, %v3344_v6 }
 0x5c5   :  { %4581 = vst.msk [vmem:[#allocation5 + $0x18] sm:$0x3] %vm4578_vm3, %v10274_v48 }
 0x5c6   :  { %4583 = vst.msk [vmem:[#allocation5 + $0x28] sm:$0x3] %vm4578_vm3, %v10274_v48 }
 0x5c7   :  { %v3920_v56 = vpop.f32.mrf.mxu3  ;;  %4585 = vst.msk [vmem:[#allocation5 + $0x38] sm:$0x3] %vm4578_vm3, %v10274_v48 }
 0x5c8   :  { %v3921_v35 = vadd.f32 %v8587_v20, %v3920_v56  ;;  %v3776_v1 = vpop.f32.mrf.mxu0  ;;  %4587 = vst.msk [vmem:[#allocation5 + $0x48] sm:$0x3] %vm4578_vm3, %v10274_v48 }
 0x5c9   :  { %v3312_v14 = vpop.permute.xlu1 %3311  ;;  %v3509_v45 = vld [vmem:[#allocation3 + $0xc8] sm:$0xff]  ;;  %v3777_v12 = vadd.f32 %v8587_v20, %v3776_v1  ;;  %v3979_v1 = vmax.f32 %v8641_v11, 0.0  ;;  %4589 = vst.msk [vmem:[#allocation5 + $0x58] sm:$0x3] %vm4578_vm3, %v10274_v48 }
 0x5ca   :  { %3462 = vst.msk [vmem:[#allocation3 + $0x150] sm:$0xff] %vm3419_vm10, %v3312_v14  ;;  %6512 = vmatmul.msk.f32.gmra.mxu1 %vm3556_vm11, %v3509_v45  ;;  %v4012_v17 = vmax.f32 %v3921_v35, 0.0  ;;  %v2895_v16 = vpop.permute.xlu0 %2894 }
 0x5cb   :  { %v3964_v28 = vmax.f32 %v3777_v12, 0.0  ;;  %3061 = vst.msk [vmem:[#allocation3 + $0xd0] sm:$0xff] %vm3034_vm8, %v2895_v16  ;;  %v3314_v49 = vpop.permute.xlu2 %3313  ;;  %v3542_v2 = vld [vmem:[#allocation3 + $0x1d0] sm:$0xff] }
 0x5cc   :  { %v4044_v33 = vmax.f32 %v4010_v5, %v4012_v17  ;;  %3446 = vst.msk [vmem:[#allocation3 + $0xd0] sm:$0xff] %vm3419_vm10, %v3280_v25  ;;  %6545 = vmatmul.msk.f32.gmra.mxu3 %vm3556_vm11, %v3542_v2 }
 0x5cd   :  { %v3872_v40 = vpop.f32.mrf.mxu2  ;;  %v4026_v46 = vmax.f32 %v3962_v23, %v3964_v28  ;;  %4591 = vst.msk [vmem:[#allocation5 + $0x68] sm:$0x3] %vm4578_vm3, %v10274_v48 }
 0x5ce   :  { %v3873_v13 = vadd.f32 %v8587_v20, %v3872_v40  ;;  %v4086_v60 = vrot.slane %v4044_v33, 1  ;;  %4593 = vst.msk [vmem:[#allocation5 + $0x78] sm:$0x3] %vm4578_vm3, %v10274_v48 }
 0x5cf   :  { %v3824_v52 = vpop.f32.mrf.mxu1  ;;  %v4074_v10 = vrot.slane %v4026_v46, 1  ;;  %4595 = vst.msk [vmem:[#allocation5 + $0x88] sm:$0x3] %vm4578_vm3, %v10274_v48 }
 0x5d0   :  { %v3996_v24 = vmax.f32 %v3873_v13, 0.0  ;;  %v3825_v26 = vadd.f32 %v8587_v20, %v3824_v52  ;;  %v8616_v47 = vmax.f32 %v4044_v33, %v4086_v60  ;;  %4597 = vst.msk [vmem:[#allocation5 + $0x98] sm:$0x3] %vm4578_vm3, %v10274_v48 }
 0x5d1   :  { %v3248_v37 = vpop.permute.xlu1 %3247  ;;  %v3526_v62 = vld [vmem:[#allocation3 + $0x150] sm:$0xff]  ;;  %v8618_v30 = vmax.f32 %v4026_v46, %v4074_v10  ;;  %4599 = vst.msk [vmem:[#allocation5 + $0xa8] sm:$0x3] %vm4578_vm3, %v10274_v48 }
 0x5d2   :  { %v4028_v15 = vmax.f32 %v3994_v27, %v3996_v24  ;;  %3430 = vst.msk [vmem:[#allocation3 + $0x50] sm:$0xff] %vm3419_vm10, %v3248_v37  ;;  %6529 = vmatmul.msk.f32.gmra.mxu2 %vm3556_vm11, %v3526_v62  ;;  %v2929_v21 = vpop.permute.xlu0 %2928  ;;  %v3980_v29 = vmax.f32 %v3825_v26, 0.0  ;;  %v4214_v58 = vrot.slane %v8616_v47, 1  ;;  %v4246_v36 = vrot.slane %v8616_v47, 2 }
 0x5d3   :  { %3078 = vst.msk [vmem:[#allocation3 + $0x158] sm:$0xff] %vm3034_vm8, %v2929_v21  ;;  %v3250_v61 = vpop.permute.xlu2 %3249  ;;  %v3510_v39 = vld [vmem:[#allocation3 + $0xd0] sm:$0xff]  ;;  %v4202_v53 = vrot.slane %v8618_v30, 1  ;;  %v4234_v43 = vrot.slane %v8618_v30, 2  ;;  %v4278_v12 = vrot.slane %v8616_v47, 3  ;;  %v4266_v24 = vrot.slane %v8618_v30, 3 }
 0x5d4   :  { %3463 = vst.msk [vmem:[#allocation3 + $0x158] sm:$0xff] %vm3419_vm10, %v3314_v49  ;;  %6513 = vmatmul.msk.f32.gmra.mxu1 %vm3556_vm11, %v3510_v39  ;;  %v4082_v22 = vrot.slane %v4028_v15, 1  ;;  %v4042_v18 = vmax.f32 %v3978_v63, %v3980_v29  ;;  %v4455_v54 = vsel %vm4442_vm13, %v8616_v47, %v4214_v58 }
 0x5d5   :  { %3431 = vst.msk [vmem:[#allocation3 + $0x58] sm:$0xff] %vm3419_vm10, %v3250_v61  ;;  %v4443_v7 = vsel %vm4442_vm13, %v8618_v30, %v4202_v53  ;;  %v4472_v23 = vsel %vm4459_vm14, %v4455_v54, %v4246_v36 }
 0x5d6   :  { %v8643_v6 = vmax.f32 %v4028_v15, %v4082_v22  ;;  %v4078_v25 = vrot.slane %v4042_v18, 1  ;;  %v4460_v28 = vsel %vm4459_vm14, %v4443_v7, %v4234_v43  ;;  %v4488_v10 = vsel %vm3749_vm9, %v4472_v23, %v4278_v12  ;;  %4601 = vst.msk [vmem:[#allocation5 + $0xb8] sm:$0x3] %vm4578_vm3, %v10274_v48 }
 0x5d7   :  { %v3923_v42 = vpop.f32.mrf.mxu3  ;;  %v4476_v15 = vsel %vm3749_vm9, %v4460_v28, %v4266_v24  ;;  %4603 = vst.msk [vmem:[#allocation5 + $0xc8] sm:$0x3] %vm4578_vm3, %v10274_v48 }
 0x5d8   :  { %v3924_v50 = vadd.f32 %v8587_v20, %v3923_v42  ;;  %v3779_v57 = vpop.f32.mrf.mxu0  ;;  %v4210_v14 = vrot.slane %v8643_v6, 1  ;;  %v4242_v55 = vrot.slane %v8643_v6, 2  ;;  %v8677_v49 = vmax.f32 %v4042_v18, %v4078_v25  ;;  %4605 = vst.msk [vmem:[#allocation5 + $0xd8] sm:$0x3] %vm4578_vm3, %v10274_v48 }
 0x5d9   :  { %v2961_v19 = vpop.permute.xlu1 %2960  ;;  %v3494_v32 = vld [vmem:[#allocation3 + $0x50] sm:$0xff]  ;;  %v3780_v31 = vadd.f32 %v8587_v20, %v3779_v57  ;;  %v4274_v57 = vrot.slane %v8643_v6, 3  ;;  %4607 = vst.msk [vmem:[#allocation5 + $0xe8] sm:$0x3] %vm4578_vm3, %v10274_v48 }
 0x5da   :  { %3094 = vst.msk [vmem:[#allocation3 + $0x1d8] sm:$0xff] %vm3034_vm8, %v2961_v19  ;;  %6497 = vmatmul.msk.f32.gmra.mxu0 %vm3556_vm11, %v3494_v32  ;;  %v4013_v59 = vmax.f32 %v3924_v50, 0.0  ;;  %v8650_v38 = vpop.permute.xlu0 %3345  ;;  %v4451_v52 = vsel %vm4442_vm13, %v8643_v6, %v4210_v14  ;;  %v4206_v21 = vrot.slane %v8677_v49, 1  ;;  %v4238_v42 = vrot.slane %v8677_v49, 2 }
 0x5db   :  { %v8657_v44 = vpop.permute.xlu2 %2962  ;;  %v3527_v0 = vld [vmem:[#allocation3 + $0x158] sm:$0xff]  ;;  %v3965_v35 = vmax.f32 %v3780_v31, 0.0  ;;  %v4468_v47 = vsel %vm4459_vm14, %v4451_v52, %v4242_v55  ;;  %3479 = vst.msk [vmem:[#allocation3 + $0x1d8] sm:$0xff] %vm3419_vm10, %v8650_v38 }
 0x5dc   :  { %v4045_v56 = vmax.f32 %v4011_v8, %v4013_v59  ;;  %6530 = vmatmul.msk.f32.gmra.mxu2 %vm3556_vm11, %v3527_v0  ;;  %v3495_v33 = vld [vmem:[#allocation3 + $0x58] sm:$0xff]  ;;  %v4447_v11 = vsel %vm4442_vm13, %v8677_v49, %v4206_v21  ;;  %v4484_v59 = vsel %vm3749_vm9, %v4468_v47, %v4274_v57  ;;  %3095 = vst.msk [vmem:[#allocation3 + $0x1e0] sm:$0xff] %vm3034_vm8, %v8657_v44 }
 0x5dd   :  { %v3875_v45 = vpop.f32.mrf.mxu2  ;;  %v4027_v16 = vmax.f32 %v3963_v51, %v3965_v35  ;;  %v4464_v25 = vsel %vm4459_vm14, %v4447_v11, %v4238_v42  ;;  %4609 = vst.msk [vmem:[#allocation5 + $0xf8] sm:$0x3] %vm4578_vm3, %v10274_v48 }
 0x5de   :  { %v3876_v5 = vadd.f32 %v8587_v20, %v3875_v45  ;;  %v4150_v17 = vrot.slane %v4045_v56, 1  ;;  %v4270_v45 = vrot.slane %v8677_v49, 3  ;;  %4611 = vst.msk [vmem:[#allocation5 + $0x108] sm:$0x3] %vm4578_vm3, %v10274_v48 }
 0x5df   :  { %v3827_v2 = vpop.f32.mrf.mxu1  ;;  %v4138_v13 = vrot.slane %v4027_v16, 1  ;;  %4613 = vst.msk [vmem:[#allocation5 + $0x118] sm:$0x3] %vm4578_vm3, %v10274_v48 }
 0x5e0   :  { %v3997_v40 = vmax.f32 %v3876_v5, 0.0  ;;  %v4182_v46 = vmax.f32 %v4045_v56, %v4150_v17  ;;  %v3828_v27 = vadd.f32 %v8587_v20, %v3827_v2  ;;  %v4480_v55 = vsel %vm3749_vm9, %v4464_v25, %v4270_v45  ;;  %4615 = vst.msk [vmem:[#allocation5 + $0x128] sm:$0x3] %vm4578_vm3, %v10274_v48 }
 0x5e1   :  { %v2897_v60 = vpop.permute.xlu1 %2896  ;;  %v4170_v29 = vmax.f32 %v4027_v16, %v4138_v13  ;;  %4617 = vst.msk [vmem:[#allocation5 + $0x138] sm:$0x3] %vm4578_vm3, %v10274_v48 }
 0x5e2   :  { %v4029_v26 = vmax.f32 %v3995_v4, %v3997_v40  ;;  %v4326_v3 = vrot.slane %v4182_v46, 4  ;;  %v4358_v37 = vrot.slane %v4182_v46, 5  ;;  %6498 = vmatmul.msk.f32.gmra.mxu0 %vm3556_vm11, %v3495_v33  ;;  %v3282_v62 = vpop.permute.xlu0 %3281  ;;  %v3981_v61 = vmax.f32 %v3828_v27, 0.0  ;;  %3062 = vst.msk [vmem:[#allocation3 + $0xd8] sm:$0xff] %vm3034_vm8, %v2897_v60  ;;  %v3543_v23 = vld [vmem:[#allocation3 + $0x1d8] sm:$0xff] }
 0x5e3   :  { %v2899_v39 = vpop.permute.xlu2 %2898  ;;  %v4390_v63 = vrot.slane %v4182_v46, 6  ;;  %v4422_v9 = vrot.slane %v4182_v46, 7  ;;  %v4314_v41 = vrot.slane %v4170_v29, 4  ;;  %v4346_v18 = vrot.slane %v4170_v29, 5  ;;  %3447 = vst.msk [vmem:[#allocation3 + $0xd8] sm:$0xff] %vm3419_vm10, %v3282_v62  ;;  %6546 = vmatmul.msk.f32.gmra.mxu3 %vm3556_vm11, %v3543_v23 }
 0x5e4   :  { %v4146_v30 = vrot.slane %v4029_v26, 1  ;;  %v4505_v22 = vsel %vm4492_vm15, %v4488_v10, %v4326_v3  ;;  %v4043_v50 = vmax.f32 %v3979_v1, %v3981_v61  ;;  %v4378_v8 = vrot.slane %v4170_v29, 6  ;;  %3063 = vst.msk [vmem:[#allocation3 + $0xe0] sm:$0xff] %vm3034_vm8, %v2899_v39 }
 0x5e5   :  { %v4522_v34 = vsel %vm4509_vm0, %v4505_v22, %v4358_v37  ;;  %v4493_v32 = vsel %vm4492_vm15, %v4476_v15, %v4314_v41  ;;  %v4410_v4 = vrot.slane %v4170_v29, 7 }
 0x5e6   :  { %v4178_v58 = vmax.f32 %v4029_v26, %v4146_v30  ;;  %v4539_v53 = vsel %vm4526_vm1, %v4522_v34, %v4390_v63  ;;  %v4510_v6 = vsel %vm4509_vm0, %v4493_v32, %v4346_v18  ;;  %v4142_v36 = vrot.slane %v4043_v50, 1 }
 0x5e7   :  { %v4556_v19 = vsel %vm4543_vm2, %v4539_v53, %v4422_v9  ;;  %v4527_v54 = vsel %vm4526_vm1, %v4510_v6, %v4378_v8  ;;  %v3926_v60 = vpop.f32.mrf.mxu3 }
 0x5e8   :  { %v4322_v31 = vrot.slane %v4178_v58, 4  ;;  %v4354_v51 = vrot.slane %v4178_v58, 5  ;;  %4573 = vst.msk [vmem:[#allocation4 + $0x60] sm:$0xff] %vm4560_vm12, %v4556_v19  ;;  %v4386_v0 = vrot.slane %v4178_v58, 6  ;;  %v4418_v56 = vrot.slane %v4178_v58, 7  ;;  %v3782_v26 = vpop.f32.mrf.mxu0 }
 0x5e9   :  { %v2931_v43 = vpop.permute.xlu1 %2930  ;;  %v4544_v1 = vsel %vm4543_vm2, %v4527_v54, %v4410_v4  ;;  %v4174_v14 = vmax.f32 %v4043_v50, %v4142_v36  ;;  %v3927_v18 = vadd.f32 %v8587_v20, %v3926_v60  ;;  %v3783_v8 = vadd.f32 %v8587_v20, %v3782_v26 }
 0x5ea   :  { %v4501_v38 = vsel %vm4492_vm15, %v4484_v59, %v4322_v31  ;;  %v3316_v7 = vpop.permute.xlu0 %3315  ;;  %4561 = vst.msk [vmem:[#allocation4] sm:$0xff] %vm4560_vm12, %v4544_v1  ;;  %v3511_v27 = vld [vmem:[#allocation3 + $0xd8] sm:$0xff] }
 0x5eb   :  { %v4518_v35 = vsel %vm4509_vm0, %v4501_v38, %v4354_v51  ;;  %v2933_v44 = vpop.permute.xlu2 %2932  ;;  %v4318_v17 = vrot.slane %v4174_v14, 4  ;;  %v4350_v16 = vrot.slane %v4174_v14, 5  ;;  %v4382_v28 = vrot.slane %v4174_v14, 6  ;;  %3079 = vst.msk [vmem:[#allocation3 + $0x160] sm:$0xff] %vm3034_vm8, %v2931_v43  ;;  %6514 = vmatmul.msk.f32.gmra.mxu1 %vm3556_vm11, %v3511_v27 }
 0x5ec   :  { %v4535_v12 = vsel %vm4526_vm1, %v4518_v35, %v4386_v0  ;;  %v4414_v49 = vrot.slane %v4174_v14, 7  ;;  %3464 = vst.msk [vmem:[#allocation3 + $0x160] sm:$0xff] %vm3419_vm10, %v3316_v7  ;;  %v4014_v32 = vmax.f32 %v3927_v18, 0.0  ;;  %v3966_v54 = vmax.f32 %v3783_v8, 0.0 }
 0x5ed   :  { %v4552_v5 = vsel %vm4543_vm2, %v4535_v12, %v4418_v56  ;;  %v4497_v2 = vsel %vm4492_vm15, %v4480_v55, %v4318_v17  ;;  %3080 = vst.msk [vmem:[#allocation3 + $0x168] sm:$0xff] %vm3034_vm8, %v2933_v44  ;;  %v3878_v29 = vpop.f32.mrf.mxu2 }
 0x5ee   :  { %4569 = vst.msk [vmem:[#allocation4 + $0x40] sm:$0xff] %vm4560_vm12, %v4552_v5  ;;  %v4514_v33 = vsel %vm4509_vm0, %v4497_v2, %v4350_v16  ;;  %v3879_v6 = vadd.f32 %v8587_v20, %v3878_v29 }
 0x5ef   :  { %v4531_v40 = vsel %vm4526_vm1, %v4514_v33, %v4382_v28  ;;  %v3830_v39 = vpop.f32.mrf.mxu1 }
 0x5f0   :  { %v4548_v13 = vsel %vm4543_vm2, %v4531_v40, %v4414_v49  ;;  %v3831_v7 = vadd.f32 %v8587_v20, %v3830_v39  ;;  %v3998_v35 = vmax.f32 %v3879_v6, 0.0 }
 0x5f1   :  { %v3348_v46 = vpop.permute.xlu1 %3347  ;;  %4565 = vst.msk [vmem:[#allocation4 + $0x20] sm:$0xff] %vm4560_vm12, %v4548_v13 }
 0x5f2   :  { %3480 = vst.msk [vmem:[#allocation3 + $0x1e0] sm:$0xff] %vm3419_vm10, %v3348_v46  ;;  %v3252_v52 = vpop.permute.xlu0 %3251  ;;  %v3982_v55 = vmax.f32 %v3831_v7, 0.0 }
 0x5f3   :  { %v3350_v24 = vpop.permute.xlu2 %3349  ;;  %3432 = vst.msk [vmem:[#allocation3 + $0x60] sm:$0xff] %vm3419_vm10, %v3252_v52  ;;  %v3528_v10 = vld [vmem:[#allocation3 + $0x160] sm:$0xff] }
 0x5f4   :  { %6531 = vmatmul.msk.f32.gmra.mxu2 %vm3556_vm11, %v3528_v10 }
 0x5f7   :  { %v3929_v61 = vpop.f32.mrf.mxu3 }
 0x5f8   :  { %v8752_v47 = vpop.f32.mrf.mxu0  ;;  %v3930_v49 = vadd.f32 %v8587_v20, %v3929_v61 }
 0x5f9   :  { %v3284_v3 = vpop.permute.xlu1 %3283  ;;  %v3544_v37 = vld [vmem:[#allocation3 + $0x1e0] sm:$0xff]  ;;  %v8786_v60 = vadd.f32 %v8587_v20, %v8752_v47 }
 0x5fa   :  { %3448 = vst.msk [vmem:[#allocation3 + $0xe0] sm:$0xff] %vm3419_vm10, %v3284_v3  ;;  %6547 = vmatmul.msk.f32.gmra.mxu3 %vm3556_vm11, %v3544_v37  ;;  %v2965_v62 = vpop.permute.xlu0 %2964  ;;  %v3496_v21 = vld [vmem:[#allocation3 + $0x60] sm:$0xff]  ;;  %v4015_v3 = vmax.f32 %v3930_v49, 0.0 }
 0x5fb   :  { %3096 = vst.msk [vmem:[#allocation3 + $0x1e8] sm:$0xff] %vm3034_vm8, %v2965_v62  ;;  %v3286_v15 = vpop.permute.xlu2 %3285  ;;  %6499 = vmatmul.msk.f32.gmra.mxu0 %vm3556_vm11, %v3496_v21 }
 0x5fc   :  { %3481 = vst.msk [vmem:[#allocation3 + $0x1e8] sm:$0xff] %vm3419_vm10, %v3350_v24 }
 0x5fd   :  { %v8759_v41 = vpop.f32.mrf.mxu2 }
 0x5ff   :  { %v3833_v42 = vpop.f32.mrf.mxu1 }
 0x600   :  { %v3834_v10 = vadd.f32 %v8587_v20, %v3833_v42 }
 0x601   :  { %v3318_v30 = vpop.permute.xlu1 %3317  ;;  %v3512_v63 = vld [vmem:[#allocation3 + $0xe0] sm:$0xff] }
 0x602   :  { %3465 = vst.msk [vmem:[#allocation3 + $0x168] sm:$0xff] %vm3419_vm10, %v3318_v30  ;;  %6515 = vmatmul.msk.f32.gmra.mxu1 %vm3556_vm11, %v3512_v63  ;;  %v2901_v22 = vpop.permute.xlu0 %2900  ;;  %v3983_v42 = vmax.f32 %v3834_v10, 0.0 }
 0x603   :  { %3064 = vst.msk [vmem:[#allocation3 + $0xe8] sm:$0xff] %vm3034_vm8, %v2901_v22  ;;  %v3320_v9 = vpop.permute.xlu2 %3319  ;;  %v3545_v34 = vld [vmem:[#allocation3 + $0x1e8] sm:$0xff] }
 0x604   :  { %3449 = vst.msk [vmem:[#allocation3 + $0xe8] sm:$0xff] %vm3419_vm10, %v3286_v15  ;;  %6548 = vmatmul.msk.f32.gmra.mxu3 %vm3556_vm11, %v3545_v34 }
 0x607   :  { %v3932_v58 = vpop.f32.mrf.mxu3 }
 0x608   :  { %v3933_v53 = vadd.f32 %v8587_v20, %v3932_v58  ;;  %v3788_v50 = vpop.f32.mrf.mxu0 }
 0x609   :  { %v3254_v57 = vpop.permute.xlu1 %3253  ;;  %v3529_v11 = vld [vmem:[#allocation3 + $0x168] sm:$0xff]  ;;  %v3789_v19 = vadd.f32 %v8587_v20, %v3788_v50  ;;  %v3967_v50 = vmax.f32 %v8786_v60, 0.0 }
 0x60a   :  { %3433 = vst.msk [vmem:[#allocation3 + $0x68] sm:$0xff] %vm3419_vm10, %v3254_v57  ;;  %6532 = vmatmul.msk.f32.gmra.mxu2 %vm3556_vm11, %v3529_v11  ;;  %v4016_v31 = vmax.f32 %v3933_v53, 0.0  ;;  %v2935_v51 = vpop.permute.xlu0 %2934 }
 0x60b   :  { %3081 = vst.msk [vmem:[#allocation3 + $0x170] sm:$0xff] %vm3034_vm8, %v2935_v51  ;;  %v3256_v59 = vpop.permute.xlu2 %3255  ;;  %v3513_v4 = vld [vmem:[#allocation3 + $0xe8] sm:$0xff]  ;;  %v3968_v25 = vmax.f32 %v3789_v19, 0.0 }
 0x60c   :  { %v4048_v36 = vmax.f32 %v4014_v32, %v4016_v31  ;;  %3466 = vst.msk [vmem:[#allocation3 + $0x170] sm:$0xff] %vm3419_vm10, %v3320_v9  ;;  %6516 = vmatmul.msk.f32.gmra.mxu1 %vm3556_vm11, %v3513_v4  ;;  %v3882_v9 = vadd.f32 %v8587_v20, %v8759_v41 }
 0x60d   :  { %v3884_v43 = vpop.f32.mrf.mxu2  ;;  %3434 = vst.msk [vmem:[#allocation3 + $0x70] sm:$0xff] %vm3419_vm10, %v3256_v59  ;;  %v4030_v44 = vmax.f32 %v3966_v54, %v3968_v25 }
 0x60e   :  { %v3885_v0 = vadd.f32 %v8587_v20, %v3884_v43  ;;  %v4087_v38 = vrot.slane %v4048_v36, 1  ;;  %v3999_v8 = vmax.f32 %v3882_v9, 0.0 }
 0x60f   :  { %v3836_v56 = vpop.f32.mrf.mxu1  ;;  %v4075_v33 = vrot.slane %v4030_v44, 1 }
 0x610   :  { %v4000_v1 = vmax.f32 %v3885_v0, 0.0  ;;  %v3837_v14 = vadd.f32 %v8587_v20, %v3836_v56  ;;  %v8775_v17 = vmax.f32 %v4048_v36, %v4087_v38 }
 0x611   :  { %v2967_v45 = vpop.permute.xlu1 %2966  ;;  %v3497_v12 = vld [vmem:[#allocation3 + $0x68] sm:$0xff]  ;;  %v8791_v62 = vmax.f32 %v4030_v44, %v4075_v33 }
 0x612   :  { %v4032_v5 = vmax.f32 %v3998_v35, %v4000_v1  ;;  %3097 = vst.msk [vmem:[#allocation3 + $0x1f0] sm:$0xff] %vm3034_vm8, %v2967_v45  ;;  %6500 = vmatmul.msk.f32.gmra.mxu0 %vm3556_vm11, %v3497_v12  ;;  %v3352_v16 = vpop.permute.xlu0 %3351  ;;  %v3984_v23 = vmax.f32 %v3837_v14, 0.0  ;;  %v4215_v13 = vrot.slane %v8775_v17, 1  ;;  %v4247_v37 = vrot.slane %v8775_v17, 2 }
 0x613   :  { %3482 = vst.msk [vmem:[#allocation3 + $0x1f0] sm:$0xff] %vm3419_vm10, %v3352_v16  ;;  %v3530_v28 = vld [vmem:[#allocation3 + $0x170] sm:$0xff]  ;;  %v2969_v2 = vpop.permute.xlu2 %2968  ;;  %v4203_v11 = vrot.slane %v8791_v62, 1  ;;  %v4279_v59 = vrot.slane %v8775_v17, 3  ;;  %v4235_v56 = vrot.slane %v8791_v62, 2 }
 0x614   :  { %6533 = vmatmul.msk.f32.gmra.mxu2 %vm3556_vm11, %v3530_v28  ;;  %3098 = vst.msk [vmem:[#allocation3 + $0x1f8] sm:$0xff] %vm3034_vm8, %v2969_v2  ;;  %v4046_v40 = vmax.f32 %v3982_v55, %v3984_v23  ;;  %v4083_v46 = vrot.slane %v4032_v5, 1  ;;  %v3498_v52 = vld [vmem:[#allocation3 + $0x70] sm:$0xff]  ;;  %v4456_v39 = vsel %vm4442_vm13, %v8775_v17, %v4215_v13 }
 0x615   :  { %v4473_v57 = vsel %vm4459_vm14, %v4456_v39, %v4247_v37  ;;  %v4444_v35 = vsel %vm4442_vm13, %v8791_v62, %v4203_v11 }
 0x616   :  { %v4079_v27 = vrot.slane %v4046_v40, 1  ;;  %v8795_v61 = vmax.f32 %v4032_v5, %v4083_v46  ;;  %v4489_v7 = vsel %vm3749_vm9, %v4473_v57, %v4279_v59 }
 0x617   :  { %v3935_v24 = vpop.f32.mrf.mxu3 }
 0x618   :  { %v3936_v26 = vadd.f32 %v8587_v20, %v3935_v24  ;;  %v8793_v15 = vmax.f32 %v4046_v40, %v4079_v27  ;;  %v4211_v41 = vrot.slane %v8795_v61, 1  ;;  %v4243_v54 = vrot.slane %v8795_v61, 2 }
 0x619   :  { %v2903_v21 = vpop.permute.xlu1 %2902  ;;  %v3839_v29 = vpop.f32.mrf.mxu1 }
 0x61a   :  { %3065 = vst.msk [vmem:[#allocation3 + $0xf0] sm:$0xff] %vm3034_vm8, %v2903_v21  ;;  %6501 = vmatmul.msk.f32.gmra.mxu0 %vm3556_vm11, %v3498_v52  ;;  %v4017_v47 = vmax.f32 %v3936_v26, 0.0  ;;  %v3840_v30 = vadd.f32 %v8587_v20, %v3839_v29  ;;  %v3288_v63 = vpop.permute.xlu0 %3287  ;;  %v3546_v22 = vld [vmem:[#allocation3 + $0x1f0] sm:$0xff]  ;;  %v4207_v34 = vrot.slane %v8793_v15, 1  ;;  %v4239_v4 = vrot.slane %v8793_v15, 2 }
 0x61b   :  { %3450 = vst.msk [vmem:[#allocation3 + $0xf0] sm:$0xff] %vm3419_vm10, %v3288_v63  ;;  %6549 = vmatmul.msk.f32.gmra.mxu3 %vm3556_vm11, %v3546_v22  ;;  %v2905_v18 = vpop.permute.xlu2 %2904  ;;  %v4452_v14 = vsel %vm4442_vm13, %v8795_v61, %v4211_v41  ;;  %v4271_v16 = vrot.slane %v8793_v15, 3  ;;  %v4267_v29 = vrot.slane %v8791_v62, 3  ;;  %v4461_v22 = vsel %vm4459_vm14, %v4444_v35, %v4235_v56 }
 0x61c   :  { %v4049_v58 = vmax.f32 %v4015_v3, %v4017_v47  ;;  %v3985_v53 = vmax.f32 %v3840_v30, 0.0  ;;  %3066 = vst.msk [vmem:[#allocation3 + $0xf8] sm:$0xff] %vm3034_vm8, %v2905_v18  ;;  %v4448_v6 = vsel %vm4442_vm13, %v8793_v15, %v4207_v34  ;;  %v4469_v24 = vsel %vm4459_vm14, %v4452_v14, %v4243_v54 }
 0x61d   :  { %v3887_v19 = vpop.f32.mrf.mxu2  ;;  %v4465_v55 = vsel %vm4459_vm14, %v4448_v6, %v4239_v4  ;;  %v4275_v3 = vrot.slane %v8795_v61, 3 }
 0x61e   :  { %v3888_v32 = vadd.f32 %v8587_v20, %v3887_v19  ;;  %v4151_v31 = vrot.slane %v4049_v58, 1  ;;  %v4047_v51 = vmax.f32 %v3983_v42, %v3985_v53  ;;  %v4481_v60 = vsel %vm3749_vm9, %v4465_v55, %v4271_v16 }
 0x61f   :  { %v3791_v36 = vpop.f32.mrf.mxu0  ;;  %v4485_v63 = vsel %vm3749_vm9, %v4469_v24, %v4275_v3 }
 0x620   :  { %v4001_v43 = vmax.f32 %v3888_v32, 0.0  ;;  %v4183_v25 = vmax.f32 %v4049_v58, %v4151_v31  ;;  %v3792_v0 = vadd.f32 %v8587_v20, %v3791_v36  ;;  %v4143_v38 = vrot.slane %v4047_v51, 1 }
 0x621   :  { %v2937_v1 = vpop.permute.xlu1 %2936  ;;  %v4477_v32 = vsel %vm3749_vm9, %v4461_v22, %v4267_v29 }
 0x622   :  { %v4033_v44 = vmax.f32 %v3999_v8, %v4001_v43  ;;  %v4327_v45 = vrot.slane %v4183_v25, 4  ;;  %v4359_v12 = vrot.slane %v4183_v25, 5  ;;  %3082 = vst.msk [vmem:[#allocation3 + $0x178] sm:$0xff] %vm3034_vm8, %v2937_v1  ;;  %v3322_v5 = vpop.permute.xlu0 %3321  ;;  %v3514_v17 = vld [vmem:[#allocation3 + $0xf0] sm:$0xff]  ;;  %v3969_v23 = vmax.f32 %v3792_v0, 0.0 }
 0x623   :  { %v4175_v28 = vmax.f32 %v4047_v51, %v4143_v38  ;;  %3467 = vst.msk [vmem:[#allocation3 + $0x178] sm:$0xff] %vm3419_vm10, %v3322_v5  ;;  %6517 = vmatmul.msk.f32.gmra.mxu1 %vm3556_vm11, %v3514_v17  ;;  %v4391_v49 = vrot.slane %v4183_v25, 6  ;;  %v4423_v33 = vrot.slane %v4183_v25, 7 }
 0x624   :  { %v4147_v2 = vrot.slane %v4033_v44, 1  ;;  %v4506_v40 = vsel %vm4492_vm15, %v4489_v7, %v4327_v45  ;;  %v4031_v13 = vmax.f32 %v3967_v50, %v3969_v23 }
 0x625   :  { %v4523_v46 = vsel %vm4509_vm0, %v4506_v40, %v4359_v12  ;;  %v4319_v27 = vrot.slane %v4175_v28, 4  ;;  %v4351_v52 = vrot.slane %v4175_v28, 5  ;;  %v4383_v30 = vrot.slane %v4175_v28, 6 }
 0x626   :  { %v4179_v10 = vmax.f32 %v4033_v44, %v4147_v2  ;;  %v4540_v26 = vsel %vm4526_vm1, %v4523_v46, %v4391_v49  ;;  %v4139_v15 = vrot.slane %v4031_v13, 1  ;;  %v4415_v58 = vrot.slane %v4175_v28, 7 }
 0x627   :  { %v4557_v37 = vsel %vm4543_vm2, %v4540_v26, %v4423_v33  ;;  %v4498_v21 = vsel %vm4492_vm15, %v4481_v60, %v4319_v27  ;;  %v3890_v56 = vpop.f32.mrf.mxu2  ;;  %v3794_v35 = vpop.f32.mrf.mxu0 }
 0x628   :  { %v4323_v39 = vrot.slane %v4179_v10, 4  ;;  %v4355_v47 = vrot.slane %v4179_v10, 5  ;;  %4574 = vst.msk [vmem:[#allocation4 + $0x68] sm:$0xff] %vm4560_vm12, %v4557_v37  ;;  %v4171_v9 = vmax.f32 %v4031_v13, %v4139_v15  ;;  %v4515_v34 = vsel %vm4509_vm0, %v4498_v21, %v4351_v52 }
 0x629   :  { %v3354_v61 = vpop.permute.xlu1 %3353  ;;  %v4387_v18 = vrot.slane %v4179_v10, 6  ;;  %v4532_v53 = vsel %vm4526_vm1, %v4515_v34, %v4383_v30  ;;  %v4419_v57 = vrot.slane %v4179_v10, 7  ;;  %v3891_v17 = vadd.f32 %v8587_v20, %v3890_v56 }
 0x62a   :  { %v4502_v42 = vsel %vm4492_vm15, %v4485_v63, %v4323_v39  ;;  %3483 = vst.msk [vmem:[#allocation3 + $0x1f8] sm:$0xff] %vm3419_vm10, %v3354_v61  ;;  %v3258_v62 = vpop.permute.xlu0 %3257  ;;  %v3531_v50 = vld [vmem:[#allocation3 + $0x178] sm:$0xff]  ;;  %v4315_v19 = vrot.slane %v4171_v9, 4  ;;  %v4347_v41 = vrot.slane %v4171_v9, 5  ;;  %v4549_v51 = vsel %vm4543_vm2, %v4532_v53, %v4415_v58 }
 0x62b   :  { %v4519_v11 = vsel %vm4509_vm0, %v4502_v42, %v4355_v47  ;;  %3435 = vst.msk [vmem:[#allocation3 + $0x78] sm:$0xff] %vm3419_vm10, %v3258_v62  ;;  %6534 = vmatmul.msk.f32.gmra.mxu2 %vm3556_vm11, %v3531_v50  ;;  %v4379_v59 = vrot.slane %v4171_v9, 6  ;;  %v4411_v6 = vrot.slane %v4171_v9, 7  ;;  %v3795_v23 = vadd.f32 %v8587_v20, %v3794_v35 }
 0x62c   :  { %v4536_v31 = vsel %vm4526_vm1, %v4519_v11, %v4387_v18  ;;  %v4494_v4 = vsel %vm4492_vm15, %v4477_v32, %v4315_v19  ;;  %4566 = vst.msk [vmem:[#allocation4 + $0x28] sm:$0xff] %vm4560_vm12, %v4549_v51  ;;  %v4002_v2 = vmax.f32 %v3891_v17, 0.0 }
 0x62d   :  { %v4553_v8 = vsel %vm4543_vm2, %v4536_v31, %v4419_v57  ;;  %v4511_v36 = vsel %vm4509_vm0, %v4494_v4, %v4347_v41  ;;  %v3970_v13 = vmax.f32 %v3795_v23, 0.0 }
 0x62e   :  { %4570 = vst.msk [vmem:[#allocation4 + $0x48] sm:$0xff] %vm4560_vm12, %v4553_v8  ;;  %v4528_v43 = vsel %vm4526_vm1, %v4511_v36, %v4379_v59  ;;  %v3938_v1 = vpop.f32.mrf.mxu3 }
 0x62f   :  { %v4545_v25 = vsel %vm4543_vm2, %v4528_v43, %v4411_v6  ;;  %v3939_v3 = vadd.f32 %v8587_v20, %v3938_v1 }
 0x630   :  { %4562 = vst.msk [vmem:[#allocation4 + $0x8] sm:$0xff] %vm4560_vm12, %v4545_v25  ;;  %v3842_v14 = vpop.f32.mrf.mxu1 }
 0x631   :  { %v3290_v0 = vpop.permute.xlu1 %3289  ;;  %v3547_v38 = vld [vmem:[#allocation3 + $0x1f8] sm:$0xff]  ;;  %v3843_v37 = vadd.f32 %v8587_v20, %v3842_v14  ;;  %v4018_v18 = vmax.f32 %v3939_v3, 0.0 }
 0x632   :  { %3451 = vst.msk [vmem:[#allocation3 + $0xf8] sm:$0xff] %vm3419_vm10, %v3290_v0  ;;  %6550 = vmatmul.msk.f32.gmra.mxu3 %vm3556_vm11, %v3547_v38  ;;  %v3499_v54 = vld [vmem:[#allocation3 + $0x78] sm:$0xff] }
 0x633   :  { %6502 = vmatmul.msk.f32.gmra.mxu0 %vm3556_vm11, %v3499_v54  ;;  %v3986_v42 = vmax.f32 %v3843_v37, 0.0 }
 0x639   :  { %v3515_v7 = vld [vmem:[#allocation3 + $0xf8] sm:$0xff] }
 0x63a   :  { %6518 = vmatmul.msk.f32.gmra.mxu1 %vm3556_vm11, %v3515_v7 }
 0x63e   :  { %v3893_v44 = vpop.f32.mrf.mxu2 }
 0x63f   :  { %v3894_v15 = vadd.f32 %v8587_v20, %v3893_v44 }
 0x640   :  { %v3797_v45 = vpop.f32.mrf.mxu0 }
 0x641   :  { %v3798_v47 = vadd.f32 %v8587_v20, %v3797_v45  ;;  %v4003_v58 = vmax.f32 %v3894_v15, 0.0 }
 0x643   :  { %v3971_v62 = vmax.f32 %v3798_v47, 0.0 }
 0x645   :  { %v8864_v12 = vpop.f32.mrf.mxu3 }
 0x647   :  { %v3845_v5 = vpop.f32.mrf.mxu1 }
 0x648   :  { %v3846_v35 = vadd.f32 %v8587_v20, %v3845_v5 }
 0x64a   :  { %v3987_v37 = vmax.f32 %v3846_v35, 0.0 }
 0x64f   :  { %v3944_v46 = vpop.f32.mrf.mxu3 }
 0x650   :  { %v3945_v60 = vadd.f32 %v8587_v20, %v3944_v46 }
 0x651   :  { %v3848_v52 = vpop.f32.mrf.mxu1 }
 0x652   :  { %v3849_v26 = vadd.f32 %v8587_v20, %v3848_v52  ;;  %v4020_v63 = vmax.f32 %v3945_v60, 0.0  ;;  %v3942_v60 = vadd.f32 %v8587_v20, %v8864_v12 }
 0x654   :  { %v3988_v61 = vmax.f32 %v3849_v26, 0.0  ;;  %v4052_v19 = vmax.f32 %v4018_v18, %v4020_v63  ;;  %v4019_v12 = vmax.f32 %v3942_v60, 0.0 }
 0x655   :  { %v3896_v16 = vpop.f32.mrf.mxu2 }
 0x656   :  { %v3897_v55 = vadd.f32 %v8587_v20, %v3896_v16  ;;  %v4050_v32 = vmax.f32 %v3986_v42, %v3988_v61  ;;  %v4088_v43 = vrot.slane %v4052_v19, 1 }
 0x657   :  { %v3800_v28 = vpop.f32.mrf.mxu0 }
 0x658   :  { %v4004_v49 = vmax.f32 %v3897_v55, 0.0  ;;  %v3801_v33 = vadd.f32 %v8587_v20, %v3800_v28  ;;  %v4080_v0 = vrot.slane %v4050_v32, 1  ;;  %v4120_v45 = vmax.f32 %v4052_v19, %v4088_v43 }
 0x65a   :  { %v4036_v40 = vmax.f32 %v4002_v2, %v4004_v49  ;;  %v3972_v27 = vmax.f32 %v3801_v33, 0.0  ;;  %v4112_v28 = vmax.f32 %v4050_v32, %v4080_v0  ;;  %v4280_v32 = vrot.slane %v4120_v45, 3 }
 0x65c   :  { %v4084_v24 = vrot.slane %v4036_v40, 1  ;;  %v4034_v10 = vmax.f32 %v3970_v13, %v3972_v27 }
 0x65e   :  { %v4076_v21 = vrot.slane %v4034_v10, 1  ;;  %v4116_v30 = vmax.f32 %v4036_v40, %v4084_v24 }
 0x65f   :  { %v3803_v29 = vpop.f32.mrf.mxu0  ;;  %v3899_v39 = vpop.f32.mrf.mxu2 }
 0x660   :  { %v4108_v22 = vmax.f32 %v4034_v10, %v4076_v21  ;;  %v3804_v9 = vadd.f32 %v8587_v20, %v3803_v29  ;;  %v3900_v34 = vadd.f32 %v8587_v20, %v3899_v39  ;;  %v4212_v50 = vrot.slane %v4116_v30, 1 }
 0x661   :  { %v4244_v8 = vrot.slane %v4116_v30, 2  ;;  %v4276_v1 = vrot.slane %v4116_v30, 3  ;;  %v4216_v29 = vrot.slane %v4120_v45, 1  ;;  %v4208_v39 = vrot.slane %v4112_v28, 1 }
 0x662   :  { %v4204_v53 = vrot.slane %v4108_v22, 1  ;;  %v3973_v57 = vmax.f32 %v3804_v9, 0.0  ;;  %v4005_v11 = vmax.f32 %v3900_v34, 0.0  ;;  %v4236_v41 = vrot.slane %v4108_v22, 2 }
 0x663   :  { %v4453_v4 = vsel %vm4442_vm13, %v4116_v30, %v4212_v50  ;;  %v4268_v56 = vrot.slane %v4108_v22, 3  ;;  %v4248_v9 = vrot.slane %v4120_v45, 2  ;;  %v4240_v34 = vrot.slane %v4112_v28, 2 }
 0x664   :  { %v4035_v31 = vmax.f32 %v3971_v62, %v3973_v57  ;;  %v4037_v51 = vmax.f32 %v4003_v58, %v4005_v11  ;;  %v4445_v59 = vsel %vm4442_vm13, %v4108_v22, %v4204_v53  ;;  %v4470_v7 = vsel %vm4459_vm14, %v4453_v4, %v4244_v8 }
 0x665   :  { %v4462_v25 = vsel %vm4459_vm14, %v4445_v59, %v4236_v41  ;;  %v4486_v23 = vsel %vm3749_vm9, %v4470_v7, %v4276_v1  ;;  %v4457_v61 = vsel %vm4442_vm13, %v4120_v45, %v4216_v29  ;;  %v4449_v18 = vsel %vm4442_vm13, %v4112_v28, %v4208_v39 }
 0x666   :  { %v4140_v6 = vrot.slane %v4035_v31, 1  ;;  %v4148_v36 = vrot.slane %v4037_v51, 1  ;;  %v4478_v17 = vsel %vm3749_vm9, %v4462_v25, %v4268_v56  ;;  %v3947_v21 = vpop.f32.mrf.mxu3  ;;  %v4474_v50 = vsel %vm4459_vm14, %v4457_v61, %v4248_v9 }
 0x667   :  { %v3948_v47 = vadd.f32 %v8587_v20, %v3947_v21  ;;  %v4466_v57 = vsel %vm4459_vm14, %v4449_v18, %v4240_v34  ;;  %v4272_v11 = vrot.slane %v4112_v28, 3  ;;  %v4490_v59 = vsel %vm3749_vm9, %v4474_v50, %v4280_v32 }
 0x668   :  { %v4172_v38 = vmax.f32 %v4035_v31, %v4140_v6  ;;  %v4180_v54 = vmax.f32 %v4037_v51, %v4148_v36  ;;  %v3851_v24 = vpop.f32.mrf.mxu1 }
 0x669   :  { %v3852_v3 = vadd.f32 %v8587_v20, %v3851_v24  ;;  %v4021_v63 = vmax.f32 %v3948_v47, 0.0  ;;  %v4482_v31 = vsel %vm3749_vm9, %v4466_v57, %v4272_v11 }
 0x66a   :  { %v4316_v14 = vrot.slane %v4172_v38, 4  ;;  %v4348_v44 = vrot.slane %v4172_v38, 5  ;;  %v4324_v16 = vrot.slane %v4180_v54, 4  ;;  %v4356_v55 = vrot.slane %v4180_v54, 5 }
 0x66b   :  { %v4380_v2 = vrot.slane %v4172_v38, 6  ;;  %v4412_v33 = vrot.slane %v4172_v38, 7  ;;  %v4388_v46 = vrot.slane %v4180_v54, 6  ;;  %v4420_v27 = vrot.slane %v4180_v54, 7 }
 0x66c   :  { %v4495_v49 = vsel %vm4492_vm15, %v4478_v17, %v4316_v14  ;;  %v4503_v5 = vsel %vm4492_vm15, %v4486_v23, %v4324_v16  ;;  %v3989_v30 = vmax.f32 %v3852_v3, 0.0  ;;  %v4053_v42 = vmax.f32 %v4019_v12, %v4021_v63 }
 0x66d   :  { %v4512_v40 = vsel %vm4509_vm0, %v4495_v49, %v4348_v44  ;;  %v4520_v52 = vsel %vm4509_vm0, %v4503_v5, %v4356_v55  ;;  %v8918_v49 = vld [vmem:[%s10260_s2] ss:$0 sm:$0xff]  ;;  %s9026_s2 = smov 0  }
 0x66e   :  { %v4529_v13 = vsel %vm4526_vm1, %v4512_v40, %v4380_v2  ;;  %v4537_v26 = vsel %vm4526_vm1, %v4520_v52, %v4388_v46  ;;  %v4051_v22 = vmax.f32 %v3987_v37, %v3989_v30  ;;  %v4152_v53 = vrot.slane %v4053_v42, 1 }
 0x66f   :  { %v4546_v10 = vsel %vm4543_vm2, %v4529_v13, %v4412_v33  ;;  %v4554_v15 = vsel %vm4543_vm2, %v4537_v26, %v4420_v27 }
 0x670   :  { %4563 = vst.msk [vmem:[#allocation4 + $0x10] sm:$0xff] %vm4560_vm12, %v4546_v10  ;;  %v4144_v58 = vrot.slane %v4051_v22, 1  ;;  %v4184_v20 = vmax.f32 %v4053_v42, %v4152_v53 }
 0x671   :  { %4571 = vst.msk [vmem:[#allocation4 + $0x50] sm:$0xff] %vm4560_vm12, %v4554_v15 }
 0x672   :  { %v4176_v62 = vmax.f32 %v4051_v22, %v4144_v58  ;;  %v4328_v51 = vrot.slane %v4184_v20, 4  ;;  %v4360_v8 = vrot.slane %v4184_v20, 5  ;;  %v4392_v36 = vrot.slane %v4184_v20, 6 }
 0x673   :  { %v4424_v38 = vrot.slane %v4184_v20, 7 }
 0x674   :  { %v4320_v19 = vrot.slane %v4176_v62, 4  ;;  %v4352_v41 = vrot.slane %v4176_v62, 5  ;;  %v4384_v4 = vrot.slane %v4176_v62, 6  ;;  %v4507_v43 = vsel %vm4492_vm15, %v4490_v59, %v4328_v51 }
 0x675   :  { %v4416_v25 = vrot.slane %v4176_v62, 7  ;;  %v4524_v54 = vsel %vm4509_vm0, %v4507_v43, %v4360_v8 }
 0x676   :  { %v4499_v6 = vsel %vm4492_vm15, %v4482_v31, %v4320_v19  ;;  %v4541_v56 = vsel %vm4526_vm1, %v4524_v54, %v4392_v36 }
 0x677   :  { %v4516_v0 = vsel %vm4509_vm0, %v4499_v6, %v4352_v41  ;;  %v4558_v1 = vsel %vm4543_vm2, %v4541_v56, %v4424_v38  ;;  %v3902_v14 = vpop.f32.mrf.mxu2 }
 0x678   :  { %v4533_v7 = vsel %vm4526_vm1, %v4516_v0, %v4384_v4  ;;  %4575 = vst.msk [vmem:[#allocation4 + $0x70] sm:$0xff] %vm4560_vm12, %v4558_v1  ;;  %v3806_v44 = vpop.f32.mrf.mxu0  ;;  %v3903_v46 = vadd.f32 %v8918_v49, %v3902_v14 }
 0x679   :  { %v4550_v35 = vsel %vm4543_vm2, %v4533_v7, %v4416_v25  ;;  %v3807_v13 = vadd.f32 %v8918_v49, %v3806_v44 }
 0x67a   :  { %4567 = vst.msk [vmem:[#allocation4 + $0x30] sm:$0xff] %vm4560_vm12, %v4550_v35  ;;  %v4006_v24 = vmax.f32 %v3903_v46, 0.0 }
 0x67b   :  { %v3974_v26 = vmax.f32 %v3807_v13, 0.0 }
 0x67d   :  { %v3950_v45 = vpop.f32.mrf.mxu3 }
 0x67e   :  { %v3951_v37 = vadd.f32 %v8918_v49, %v3950_v45 }
 0x67f   :  { %v3854_v55 = vpop.f32.mrf.mxu1 }
 0x680   :  { %v4022_v30 = vmax.f32 %v3951_v37, 0.0  ;;  %v3855_v12 = vadd.f32 %v8918_v49, %v3854_v55 }
 0x682   :  { %v3990_v61 = vmax.f32 %v3855_v12, 0.0 }
 0x687   :  { %v3953_v23 = vpop.f32.mrf.mxu3 }
 0x688   :  { %v3954_v59 = vadd.f32 %v8918_v49, %v3953_v23 }
 0x689   :  { %v3857_v40 = vpop.f32.mrf.mxu1 }
 0x68a   :  { %v3858_v43 = vadd.f32 %v8918_v49, %v3857_v40  ;;  %v4023_v44 = vmax.f32 %v3954_v59, 0.0 }
 0x68c   :  { %v3991_v55 = vmax.f32 %v3858_v43, 0.0 }
 0x68d   :  { %v3905_v17 = vpop.f32.mrf.mxu2 }
 0x68e   :  { %v3906_v18 = vadd.f32 %v8918_v49, %v3905_v17 }
 0x68f   :  { %v3809_v16 = vpop.f32.mrf.mxu0 }
 0x690   :  { %v3810_v57 = vadd.f32 %v8918_v49, %v3809_v16  ;;  %v4007_v20 = vmax.f32 %v3906_v18, 0.0 }
 0x692   :  { %v3975_v36 = vmax.f32 %v3810_v57, 0.0 }
 0x697   :  { %v3908_v28 = vpop.f32.mrf.mxu2  ;;  %v3812_v2 = vpop.f32.mrf.mxu0 }
 0x698   :  { %v3909_v33 = vadd.f32 %v8918_v49, %v3908_v28  ;;  %v3813_v5 = vadd.f32 %v8918_v49, %v3812_v2 }
 0x69a   :  { %v4008_v27 = vmax.f32 %v3909_v33, 0.0  ;;  %v3976_v60 = vmax.f32 %v3813_v5, 0.0 }
 0x69c   :  { %v4040_v3 = vmax.f32 %v4006_v24, %v4008_v27  ;;  %v4038_v21 = vmax.f32 %v3974_v26, %v3976_v60 }
 0x69e   :  { %v3956_v52 = vpop.f32.mrf.mxu3  ;;  %v4085_v39 = vrot.slane %v4040_v3, 1  ;;  %v4077_v63 = vrot.slane %v4038_v21, 1 }
 0x69f   :  { %v3957_v10 = vadd.f32 %v8918_v49, %v3956_v52 }
 0x6a0   :  { %v3860_v15 = vpop.f32.mrf.mxu1  ;;  %v4117_v9 = vmax.f32 %v4040_v3, %v4085_v39  ;;  %v8931_v42 = vmax.f32 %v4038_v21, %v4077_v63 }
 0x6a1   :  { %v4024_v29 = vmax.f32 %v3957_v10, 0.0  ;;  %v3861_v47 = vadd.f32 %v8918_v49, %v3860_v15 }
 0x6a2   :  { %v4213_v53 = vrot.slane %v4117_v9, 1  ;;  %v4205_v19 = vrot.slane %v8931_v42, 1  ;;  %v4245_v32 = vrot.slane %v4117_v9, 2  ;;  %v4237_v38 = vrot.slane %v8931_v42, 2 }
 0x6a3   :  { %v4056_v22 = vmax.f32 %v4022_v30, %v4024_v29  ;;  %v3992_v34 = vmax.f32 %v3861_v47, 0.0  ;;  %v4277_v45 = vrot.slane %v4117_v9, 3  ;;  %v4269_v23 = vrot.slane %v8931_v42, 3 }
 0x6a4   :  { %v4454_v4 = vsel %vm4442_vm13, %v4117_v9, %v4213_v53  ;;  %v4446_v54 = vsel %vm4442_vm13, %v8931_v42, %v4205_v19 }
 0x6a5   :  { %v4089_v58 = vrot.slane %v4056_v22, 1  ;;  %v4054_v62 = vmax.f32 %v3990_v61, %v3992_v34  ;;  %v4471_v7 = vsel %vm4459_vm14, %v4454_v4, %v4245_v32  ;;  %v4463_v40 = vsel %vm4459_vm14, %v4446_v54, %v4237_v38 }
 0x6a6   :  { %v4487_v46 = vsel %vm3749_vm9, %v4471_v7, %v4277_v45 }
 0x6a7   :  { %v8946_v31 = vmax.f32 %v4056_v22, %v4089_v58  ;;  %v4081_v6 = vrot.slane %v4054_v62, 1 }
 0x6a9   :  { %v4217_v56 = vrot.slane %v8946_v31, 1  ;;  %v8967_v17 = vmax.f32 %v4054_v62, %v4081_v6  ;;  %v4249_v27 = vrot.slane %v8946_v31, 2  ;;  %v4281_v53 = vrot.slane %v8946_v31, 3 }
 0x6ab   :  { %v4458_v52 = vsel %vm4442_vm13, %v8946_v31, %v4217_v56  ;;  %v4209_v10 = vrot.slane %v8967_v17, 1  ;;  %v4241_v22 = vrot.slane %v8967_v17, 2  ;;  %v4273_v48 = vrot.slane %v8967_v17, 3 }
 0x6ac   :  { %v4475_v63 = vsel %vm4459_vm14, %v4458_v52, %v4249_v27 }
 0x6ad   :  { %v4450_v61 = vsel %vm4442_vm13, %v8967_v17, %v4209_v10 }
 0x6ae   :  { %v3911_v50 = vpop.f32.mrf.mxu2  ;;  %v4467_v32 = vsel %vm4459_vm14, %v4450_v61, %v4241_v22 }
 0x6af   :  { %v3912_v11 = vadd.f32 %v8918_v49, %v3911_v50 }
 0x6b0   :  { %v3815_v41 = vpop.f32.mrf.mxu0 }
 0x6b1   :  { %v4009_v51 = vmax.f32 %v3912_v11, 0.0  ;;  %v3816_v8 = vadd.f32 %v8918_v49, %v3815_v41  ;;  %v4491_v41 = vsel %vm3749_vm9, %v4475_v63, %v4281_v53 }
 0x6b3   :  { %v4041_v25 = vmax.f32 %v4007_v20, %v4009_v51  ;;  %v3977_v0 = vmax.f32 %v3816_v8, 0.0 }
 0x6b5   :  { %v4149_v35 = vrot.slane %v4041_v25, 1  ;;  %v3959_v1 = vpop.f32.mrf.mxu3  ;;  %v4039_v14 = vmax.f32 %v3975_v36, %v3977_v0  ;;  %v4483_v0 = vsel %vm3749_vm9, %v4467_v32, %v4273_v48 }
 0x6b6   :  { %v3960_v16 = vadd.f32 %v8918_v49, %v3959_v1 }
 0x6b7   :  { %v4181_v28 = vmax.f32 %v4041_v25, %v4149_v35  ;;  %v4141_v2 = vrot.slane %v4039_v14, 1  ;;  %v3863_v33 = vpop.f32.mrf.mxu1 }
 0x6b8   :  { %v4025_v5 = vmax.f32 %v3960_v16, 0.0  ;;  %v3864_v13 = vadd.f32 %v8918_v49, %v3863_v33  ;;  %v4479_v49 = vsel %vm3749_vm9, %v4463_v40, %v4269_v23 }
 0x6b9   :  { %v4325_v24 = vrot.slane %v4181_v28, 4  ;;  %v4357_v60 = vrot.slane %v4181_v28, 5  ;;  %v4173_v3 = vmax.f32 %v4039_v14, %v4141_v2  ;;  %v4389_v15 = vrot.slane %v4181_v28, 6 }
 0x6ba   :  { %v4057_v26 = vmax.f32 %v4023_v44, %v4025_v5  ;;  %v3993_v37 = vmax.f32 %v3864_v13, 0.0  ;;  %v4421_v21 = vrot.slane %v4181_v28, 7 }
 0x6bb   :  { %v4504_v29 = vsel %vm4492_vm15, %v4487_v46, %v4325_v24  ;;  %v4317_v30 = vrot.slane %v4173_v3, 4  ;;  %v4349_v12 = vrot.slane %v4173_v3, 5  ;;  %v4381_v62 = vrot.slane %v4173_v3, 6 }
 0x6bc   :  { %v4521_v39 = vsel %vm4509_vm0, %v4504_v29, %v4357_v60  ;;  %v4153_v47 = vrot.slane %v4057_v26, 1  ;;  %v4055_v34 = vmax.f32 %v3991_v55, %v3993_v37  ;;  %v4413_v19 = vrot.slane %v4173_v3, 7 }
 0x6bd   :  { %v4538_v9 = vsel %vm4526_vm1, %v4521_v39, %v4389_v15  ;;  %v4496_v58 = vsel %vm4492_vm15, %v4479_v49, %v4317_v30 }
 0x6be   :  { %v4555_v18 = vsel %vm4543_vm2, %v4538_v9, %v4421_v21  ;;  %v4185_v42 = vmax.f32 %v4057_v26, %v4153_v47  ;;  %v4513_v50 = vsel %vm4509_vm0, %v4496_v58, %v4349_v12  ;;  %v4145_v57 = vrot.slane %v4055_v34, 1 }
 0x6bf   :  { %4572 = vst.msk [vmem:[#allocation4 + $0x58] sm:$0xff] %vm4560_vm12, %v4555_v18  ;;  %v4530_v51 = vsel %vm4526_vm1, %v4513_v50, %v4381_v62 }
 0x6c0   :  { %v4329_v11 = vrot.slane %v4185_v42, 4  ;;  %v4361_v20 = vrot.slane %v4185_v42, 5  ;;  %v4177_v8 = vmax.f32 %v4055_v34, %v4145_v57  ;;  %v4393_v59 = vrot.slane %v4185_v42, 6 }
 0x6c1   :  { %v4547_v4 = vsel %vm4543_vm2, %v4530_v51, %v4413_v19  ;;  %v4425_v6 = vrot.slane %v4185_v42, 7 }
 0x6c2   :  { %v4508_v31 = vsel %vm4492_vm15, %v4491_v41, %v4329_v11  ;;  %4564 = vst.msk [vmem:[#allocation4 + $0x18] sm:$0xff] %vm4560_vm12, %v4547_v4  ;;  %v4321_v43 = vrot.slane %v4177_v8, 4  ;;  %v4353_v25 = vrot.slane %v4177_v8, 5  ;;  %v4385_v7 = vrot.slane %v4177_v8, 6 }
 0x6c3   :  { %v4525_v36 = vsel %vm4509_vm0, %v4508_v31, %v4361_v20  ;;  %v4417_v35 = vrot.slane %v4177_v8, 7 }
 0x6c4   :  { %v4542_v38 = vsel %vm4526_vm1, %v4525_v36, %v4393_v59  ;;  %v4500_v56 = vsel %vm4492_vm15, %v4483_v0, %v4321_v43 }
 0x6c5   :  { %v4559_v54 = vsel %vm4543_vm2, %v4542_v38, %v4425_v6  ;;  %v4517_v1 = vsel %vm4509_vm0, %v4500_v56, %v4353_v25 }
 0x6c6   :  { %4576 = vst.msk [vmem:[#allocation4 + $0x78] sm:$0xff] %vm4560_vm12, %v4559_v54  ;;  %v4534_v14 = vsel %vm4526_vm1, %v4517_v1, %v4385_v7 }
 0x6c7   :  { %v4551_v44 = vsel %vm4543_vm2, %v4534_v14, %v4417_v35 }
 0x6c8   :  { %4568 = vst.msk [vmem:[#allocation4 + $0x38] sm:$0xff] %vm4560_vm12, %v4551_v44 }
 0x6c9 LB: > { %v4689_v45 = vld [vmem:[#allocation5 + $0x1] sm:$0xff]  ;;  %s6695_s24 = smov 32   ;;  %s6696_s25 = smov 64   ;;  %v4626_v23 = vld [vmem:[#allocation4 + $0x10] sm:$0xff]  ;;  %v4627_v28 = vld [vmem:[#allocation4 + $0x18] sm:$0xff]  ;;  %vm4769_vm4 = vcmask 523520   ;;  %s6684_s2 = sphi %s9026_s2, %s4623_s2  }
 0x6ca   : > { %v4786_v17 = vld [vmem:[#allocation5 + $0x2] sm:$0xff]  ;;  %4721 = vrot.lane.b32.xlu0 %v4689_v45, %s6695_s24  ;;  %4643 = vst.msk [vmem:[#allocation5 + $0x31] sm:$0xff] %vm4560_vm12, %v4626_v23  ;;  %s6697_s26 = smov 96   ;;  %v4635_v3 = vld [vmem:[#allocation4 + $0x58] sm:$0xff]  ;;  %v5396_v22 = vld [vmem:[%s10261_s3 + $0x78] sm:$0xff]  ;;  %vm4866_vm5 = vcmask 785920  }
 0x6cb   : > { %v4624_v16 = vld [vmem:[#allocation4] sm:$0xff]  ;;  %4818 = vrot.lane.b32.xlu1 %v4786_v17, %s6696_s25  ;;  %v4625_v55 = vld [vmem:[#allocation4 + $0x8] sm:$0xff]  ;;  %4644 = vst.msk [vmem:[#allocation5 + $0x41] sm:$0xff] %vm4560_vm12, %v4627_v28  ;;  %5465 = vmatpush.msra.mxu0 %v5396_v22  ;;  %v4630_v61 = vld [vmem:[#allocation4 + $0x30] sm:$0xff]  ;;  %vm4963_vm6 = vcmask 1048320   ;;  %s4623_s2 = sadd.s32 1, %s6684_s2  }
 0x6cc   : > { %4641 = vst.msk [vmem:[#allocation5 + $0x11] sm:$0xff] %vm4560_vm12, %v4624_v16  ;;  %v4628_v60 = vld [vmem:[#allocation4 + $0x20] sm:$0xff]  ;;  %v4629_v21 = vld [vmem:[#allocation4 + $0x28] sm:$0xff]  ;;  %6580 = vmatpush.msra.mxu3 %v5396_v22  ;;  %v5393_v58 = vld [vmem:[%s10261_s3 + $0x60] sm:$0xff]  ;;  %p4620_p0 = scmp.ge.s32.totalorder %s4623_s2, 3  }
 0x6cd   : > { %4642 = vst.msk [vmem:[#allocation5 + $0x21] sm:$0xff] %vm4560_vm12, %v4625_v55  ;;  %v4636_v39 = vld [vmem:[#allocation4 + $0x60] sm:$0xff]  ;;  %v5395_v9 = vld [vmem:[%s10261_s3 + $0x70] sm:$0xff]  ;;  %v9134_v53 = vld [vmem:[%s10261_s3 + $0xf8] sm:$0xff]  ;;  %vm5942_vm10 = vcmask (%p4620_p0), 1041409   ;;  %vm5944_vm11 = vcmask (%p4620_p0), 1043459  }
 0x6ce   : > { %4645 = vst.msk [vmem:[#allocation5 + $0x51] sm:$0xff] %vm4560_vm12, %v4628_v60  ;;  %5466 = vmatpush.msra.mxu0 %v5395_v9  ;;  %6581 = vmatpush.msra.mxu3 %v5395_v9  ;;  %v5394_v42 = vld [vmem:[%s10261_s3 + $0x68] sm:$0xff]  ;;  %v9139_v62 = vld [vmem:[%s10261_s3 + $0xf0] sm:$0xff]  ;;  %v5392_v50 = vld [vmem:[%s10261_s3 + $0x58] sm:$0xff]  ;;  %vm5948_vm13 = vcmask (%p4620_p0), 1047559   ;;  %vm5968_vm14 = vcmask (%p4620_p0), 517376  }
 0x6cf   : > { %4652 = vst.msk [vmem:[#allocation5 + $0xe1] sm:$0xff] %vm4560_vm12, %v4635_v3  ;;  %5530 = vmatpush.msra.mxu1 %v9134_v53  ;;  %v5391_v57 = vld [vmem:[%s10261_s3 + $0x50] sm:$0xff]  ;;  %v5390_v41 = vld [vmem:[%s10261_s3 + $0x48] sm:$0xff]  ;;  %v5389_v51 = vld [vmem:[%s10261_s3 + $0x40] sm:$0xff]  ;;  %vm5986_vm15 = vcmask (%p4620_p0), 779776   ;;  %vm6004_vm0 = vcmask (%p4620_p0), 1042176  }
 0x6d0   : > { %4646 = vst.msk [vmem:[#allocation5 + $0x61] sm:$0xff] %vm4560_vm12, %v4629_v21  ;;  %5467 = vmatpush.msra.mxu0 %v5394_v42  ;;  %6582 = vmatpush.msra.mxu3 %v5394_v42  ;;  %v4637_v11 = vld [vmem:[#allocation4 + $0x68] sm:$0xff]  ;;  %v9165_v32 = vld [vmem:[%s10261_s3 + $0xe8] sm:$0xff]  ;;  %v9176_v8 = vld [vmem:[%s10261_s3 + $0xe0] sm:$0xff]  ;;  %vm6415_vm1 = vcmask (%p4620_p0), 326656   ;;  %vm6439_vm2 = vcmask (%p4620_p0), 74752  }
 0x6d1   : > { %v5014_v27 = vld [vmem:[#allocation5 + $0x32] sm:$0xff]  ;;  %4653 = vst.msk [vmem:[#allocation5 + $0xf1] sm:$0xff] %vm4560_vm12, %v4636_v39  ;;  %5531 = vmatpush.msra.mxu1 %v9139_v62  ;;  %v5387_v31 = vld [vmem:[%s10261_s3 + $0x30] sm:$0xff]  ;;  %v5386_v43 = vld [vmem:[%s10261_s3 + $0x28] sm:$0xff]  ;;  %s6472_s15 = sshll.u32 (%p4620_p0), %s10268_s10, 4  ;;  %s6473_s15 = int_to_ptr.hbm [resolvable:$true] %s6472_s15 }
 0x6d2   : > { %5318 = vst.msk [vmem:[#allocation6 + $0x28] sm:$0xff] %vm4560_vm12, %v5014_v27  ;;  %v4692_v52 = vld [vmem:[#allocation5 + $0x31] sm:$0xff]  ;;  %v9050_v10 = vld [vmem:[#allocation5 + $0x42] sm:$0xff]  ;;  %5468 = vmatpush.msra.mxu0 %v5393_v58  ;;  %6583 = vmatpush.msra.mxu3 %v5393_v58 }
 0x6d3   : > { %v5012_v2 = vld [vmem:[#allocation5 + $0x12] sm:$0xff]  ;;  %4998 = vst.msk [vmem:[#allocation6 + $0x38] sm:$0xff] %vm4560_vm12, %v4692_v52  ;;  %v5111_v26 = vld [vmem:[#allocation5 + $0x40] sm:$0xff]  ;;  %5532 = vmatpush.msra.mxu1 %v9165_v32  ;;  %v9196_v4 = vld [vmem:[%s10261_s3 + $0xd0] sm:$0xff] }
 0x6d4   : > { %v4690_v33 = vld [vmem:[#allocation5 + $0x11] sm:$0xff]  ;;  %5044 = vrot.lane.b32.xlu0 %v5012_v2, %s6695_s24  ;;  %v5109_v46 = vld [vmem:[#allocation5 + $0x20] sm:$0xff]  ;;  %5319 = vst.msk [vmem:[#allocation6 + $0x40] sm:$0xff] %vm4560_vm12, %v9050_v10  ;;  %5469 = vmatpush.msra.mxu0 %v5392_v50  ;;  %v5383_v14 = vld [vmem:[%s10261_s3 + $0x10] sm:$0xff] }
 0x6d5   : > { %v4883_v40 = vld [vmem:[#allocation5 + $0x10] sm:$0xff]  ;;  %v5013_v5 = vld [vmem:[#allocation5 + $0x22] sm:$0xff]  ;;  %4996 = vst.msk [vmem:[#allocation6 + $0x8] sm:$0xff] %vm4560_vm12, %v4690_v33  ;;  %5141 = vrot.lane.b32.xlu1 %v5109_v46, %s6696_s25  ;;  %6584 = vmatpush.msra.mxu3 %v5392_v50  ;;  %v5385_v54 = vld [vmem:[%s10261_s3 + $0x20] sm:$0xff] }
 0x6d6   : > { %4915 = vrot.lane.b32.xlu2 %v4883_v40, %s6697_s26  ;;  %5317 = vst.msk [vmem:[#allocation6 + $0x10] sm:$0xff] %vm4560_vm12, %v5013_v5  ;;  %v4691_v13 = vld [vmem:[#allocation5 + $0x21] sm:$0xff]  ;;  %v5110_v24 = vld [vmem:[#allocation5 + $0x30] sm:$0xff]  ;;  %5470 = vmatpush.msra.mxu0 %v5391_v57  ;;  %v9230_v7 = vld [vmem:[%s10261_s3 + $0xc0] sm:$0xff] }
 0x6d7   : > { %4674 = vst.msk [vmem:[#allocation6 + $0x18] sm:$0xff] %vm4560_vm12, %v4883_v40  ;;  %v9059_v37 = vld [vmem:[#allocation5 + $0x50] sm:$0xff]  ;;  %v5207_v49 = vld [vmem:[#allocation5 + $0x41] sm:$0xff]  ;;  %6585 = vmatpush.msra.mxu3 %v5391_v57  ;;  %5533 = vmatpush.msra.mxu1 %v9176_v8  ;;  %v4631_v44 = vld [vmem:[#allocation4 + $0x38] sm:$0xff] }
 0x6d8   : > { %4997 = vst.msk [vmem:[#allocation6 + $0x20] sm:$0xff] %vm4560_vm12, %v4691_v13  ;;  %v9068_v15 = vld [vmem:[#allocation5 + $0xe2] sm:$0xff]  ;;  %v9075_v29 = vld [vmem:[#allocation5 + $0x52] sm:$0xff]  ;;  %5471 = vmatpush.msra.mxu0 %v5390_v41 }
 0x6d9   : > { %4675 = vst.msk [vmem:[#allocation6 + $0x30] sm:$0xff] %vm4560_vm12, %v5109_v46  ;;  %v9083_v47 = vld [vmem:[#allocation5 + $0x51] sm:$0xff]  ;;  %v9088_v30 = vld [vmem:[#allocation5 + $0x60] sm:$0xff]  ;;  %6586 = vmatpush.msra.mxu3 %v5390_v41  ;;  %v9256_v45 = vld [vmem:[%s10261_s3 + $0xb0] sm:$0xff] }
 0x6da   : > { %4676 = vst.msk [vmem:[#allocation6 + $0x48] sm:$0xff] %vm4560_vm12, %v5110_v24  ;;  %v9094_v12 = vld [vmem:[#allocation5 + $0xf1] sm:$0xff]  ;;  %v9112_v34 = vld [vmem:[#allocation5 + $0xe1] sm:$0xff]  ;;  %5472 = vmatpush.msra.mxu0 %v5389_v51 }
 0x6db   : > { %4677 = vst.msk [vmem:[#allocation6 + $0x60] sm:$0xff] %vm4560_vm12, %v5111_v26  ;;  %v9099_v63 = vld [vmem:[#allocation5 + $0xf0] sm:$0xff]  ;;  %v9118_v18 = vld [vmem:[#allocation5 + $0x62] sm:$0xff]  ;;  %6587 = vmatpush.msra.mxu3 %v5389_v51  ;;  %v5381_v28 = vld [vmem:[%s10261_s3] sm:$0xff] }
 0x6dc   : > { %4723 = vrot.lane.b32.xlu0 %v4690_v33, %s6695_s24  ;;  %4678 = vst.msk [vmem:[#allocation6 + $0x78] sm:$0xff] %vm4560_vm12, %v9059_v37  ;;  %v9152_v20 = vld [vmem:[#allocation5 + $0x61] sm:$0xff]  ;;  %v9183_v48 = vld [vmem:[%s10261_s3 + $0xd8] sm:$0xff]  ;;  %v9292_v33 = vld [vmem:[%s10261_s3 + $0xa0] sm:$0xff] }
 0x6dd   : > { %5046 = vrot.lane.b32.xlu1 %v5013_v5, %s6695_s24  ;;  %4999 = vst.msk [vmem:[#allocation6 + $0x50] sm:$0xff] %vm4560_vm12, %v5207_v49  ;;  %v5388_v59 = vld [vmem:[%s10261_s3 + $0x38] sm:$0xff]  ;;  %5534 = vmatpush.msra.mxu1 %v9183_v48  ;;  %v9216_v25 = vld [vmem:[%s10261_s3 + $0xc8] sm:$0xff]  ;;  %v4639_v9 = vld [vmem:[#allocation4 + $0x78] sm:$0xff] }
 0x6de   : > { %5237 = vrot.lane.b32.xlu2 %v4691_v13, %s6697_s26  ;;  %5327 = vst.msk [vmem:[#allocation6 + $0x100] sm:$0xff] %vm4560_vm12, %v9068_v15  ;;  %5473 = vmatpush.msra.mxu0 %v5388_v59  ;;  %v4657_v0 = vld [vmem:[#allocation5] sm:$0xff]  ;;  %v5384_v56 = vld [vmem:[%s10261_s3 + $0x18] sm:$0xff] }
 0x6df   : > { %5320 = vst.msk [vmem:[#allocation6 + $0x58] sm:$0xff] %vm4560_vm12, %v9075_v29  ;;  %5535 = vmatpush.msra.mxu1 %v9196_v4  ;;  %6588 = vmatpush.msra.mxu3 %v5388_v59  ;;  %v9238_v35 = vld [vmem:[#allocation5 + $0xf2] sm:$0xff]  ;;  %v5382_v16 = vld [vmem:[%s10261_s3 + $0x8] sm:$0xff] }
 0x6e0   : > { %5000 = vst.msk [vmem:[#allocation6 + $0x68] sm:$0xff] %vm4560_vm12, %v9083_v47  ;;  %5474 = vmatpush.msra.mxu0 %v5387_v31  ;;  %v9244_v1 = vld [vmem:[%s10261_s3 + $0xb8] sm:$0xff]  ;;  %v9277_v23 = vld [vmem:[%s10261_s3 + $0xa8] sm:$0xff] }
 0x6e1   : > { %4679 = vst.msk [vmem:[#allocation6 + $0x90] sm:$0xff] %vm4560_vm12, %v9088_v30  ;;  %5536 = vmatpush.msra.mxu1 %v9216_v25  ;;  %6589 = vmatpush.msra.mxu3 %v5387_v31  ;;  %v9270_v55 = vld [vmem:[%s10261_s3 + $0x118] sm:$0xff]  ;;  %v9299_v40 = vld [vmem:[%s10261_s3 + $0x108] sm:$0xff] }
 0x6e2   : > { %5008 = vst.msk [vmem:[#allocation6 + $0x128] sm:$0xff] %vm4560_vm12, %v9094_v12  ;;  %5475 = vmatpush.msra.mxu0 %v5386_v43  ;;  %5607 = vmatpush.msra.mxu2 %v9270_v55  ;;  %v5341_v57 = vld [vmem:[#allocation6 + $0x40] sm:$0xff] }
 0x6e3   : > { %4686 = vst.msk [vmem:[#allocation6 + $0x138] sm:$0xff] %vm4560_vm12, %v9099_v63  ;;  %5537 = vmatpush.msra.mxu1 %v9230_v7  ;;  %6590 = vmatpush.msra.mxu3 %v5386_v43  ;;  %v9434_v43 = vld [vmem:[#allocation5 + $0xe0] sm:$0xff] }
 0x6e4   : > { %5143 = vrot.lane.b32.xlu0 %v5110_v24, %s6696_s25  ;;  %4647 = vst.msk [vmem:[#allocation5 + $0x71] sm:$0xff] %vm4560_vm12, %v4630_v61  ;;  %5476 = vmatpush.msra.mxu0 %v5385_v54 }
 0x6e5   : > { %4917 = vrot.lane.b32.xlu1 %v5109_v46, %s6697_s26  ;;  %5321 = vst.msk [vmem:[#allocation6 + $0x70] sm:$0xff] %vm4560_vm12, %v9118_v18  ;;  %5538 = vmatpush.msra.mxu1 %v9244_v1  ;;  %v9304_v46 = vld [vmem:[%s10261_s3 + $0x98] sm:$0xff] }
 0x6e6   : > { %4820 = vrot.lane.b32.xlu2 %v5012_v2, %s6696_s25  ;;  %4654 = vst.msk [vmem:[#allocation5 + $0x101] sm:$0xff] %vm4560_vm12, %v4637_v11  ;;  %5477 = vmatpush.msra.mxu0 %v5384_v56  ;;  %v9287_v2 = vld [vmem:[%s10261_s3 + $0x110] sm:$0xff]  ;;  %v4632_v11 = vld [vmem:[#allocation4 + $0x40] sm:$0xff]  ;;  %v5344_v31 = vld [vmem:[#allocation6 + $0x58] sm:$0xff] }
 0x6e7   : > { %5001 = vst.msk [vmem:[#allocation6 + $0x80] sm:$0xff] %vm4560_vm12, %v9152_v20  ;;  %5539 = vmatpush.msra.mxu1 %v9256_v45  ;;  %6591 = vmatpush.msra.mxu3 %v5385_v54 }
 0x6e8   : > { %4673 = vst.msk [vmem:[#allocation6] sm:$0xff] %vm4560_vm12, %v4657_v0  ;;  %5478 = vmatpush.msra.mxu0 %v5383_v14  ;;  %5608 = vmatpush.msra.mxu2 %v9287_v2 }
 0x6e9   : > { %4648 = vst.msk [vmem:[#allocation5 + $0x81] sm:$0xff] %vm4560_vm12, %v4631_v44  ;;  %5540 = vmatpush.msra.mxu1 %v9277_v23  ;;  %6592 = vmatpush.msra.mxu3 %v5384_v56 }
 0x6ea   : > { %5479 = vmatpush.msra.mxu0 %v5382_v16  ;;  %5609 = vmatpush.msra.mxu2 %v9299_v40  ;;  %4656 = vst.msk [vmem:[#allocation5 + $0x121] sm:$0xff] %vm4560_vm12, %v4639_v9 }
 0x6eb   : > { %v9157_v19 = vld [vmem:[#allocation5 + $0x70] sm:$0xff]  ;;  %5541 = vmatpush.msra.mxu1 %v9292_v33  ;;  %6593 = vmatpush.msra.mxu3 %v5383_v14  ;;  %4649 = vst.msk [vmem:[#allocation5 + $0xb1] sm:$0xff] %vm4560_vm12, %v4632_v11 }
 0x6ec   : > { %4725 = vrot.lane.b32.xlu0 %v4691_v13, %s6695_s24  ;;  %4680 = vst.msk [vmem:[#allocation6 + $0xa8] sm:$0xff] %vm4560_vm12, %v9157_v19  ;;  %v9258_v17 = vld [vmem:[#allocation5 + $0x72] sm:$0xff]  ;;  %5480 = vmatpush.msra.mxu0 %v5381_v28  ;;  %v9320_v13 = vld [vmem:[%s10261_s3 + $0x90] sm:$0xff] }
 0x6ed   : > { %5048 = vrot.lane.b32.xlu1 %v5014_v27, %s6695_s24  ;;  %v9198_v6 = vld [vmem:[#allocation5 + $0x101] sm:$0xff]  ;;  %5322 = vst.msk [vmem:[#allocation6 + $0x88] sm:$0xff] %vm4560_vm12, %v9258_v17  ;;  %5542 = vmatpush.msra.mxu1 %v9304_v46 }
 0x6ee   : > { %5239 = vrot.lane.b32.xlu2 %v4692_v52, %s6697_s26  ;;  %v9204_v36 = vld [vmem:[#allocation5 + $0x100] sm:$0xff]  ;;  %5009 = vst.msk [vmem:[#allocation6 + $0x140] sm:$0xff] %vm4560_vm12, %v9198_v6  ;;  %6594 = vmatpush.msra.mxu3 %v5382_v16 }
 0x6ef   : > { %4687 = vst.msk [vmem:[#allocation6 + $0x150] sm:$0xff] %vm4560_vm12, %v9204_v36  ;;  %v9221_v38 = vld [vmem:[#allocation5 + $0x102] sm:$0xff]  ;;  %5543 = vmatpush.msra.mxu1 %v9320_v13 }
 0x6f0   : > { %5329 = vst.msk [vmem:[#allocation6 + $0x130] sm:$0xff] %vm4560_vm12, %v9221_v38  ;;  %6595 = vmatpush.msra.mxu3 %v5381_v28  ;;  %v9374_v39 = vld [vmem:[#allocation5 + $0x82] sm:$0xff] }
 0x6f1   : > { %5323 = vst.msk [vmem:[#allocation6 + $0xa0] sm:$0xff] %vm4560_vm12, %v9374_v39  ;;  %v5211_v50 = vld [vmem:[#allocation5 + $0x81] sm:$0xff] }
 0x6f2   : > { %6596 = vmatpush.msrb.mxu3 %v9134_v53  ;;  %5003 = vst.msk [vmem:[#allocation6 + $0xb0] sm:$0xff] %vm4560_vm12, %v5211_v50  ;;  %v9423_v59 = vld [vmem:[#allocation5 + $0x120] sm:$0xff]  ;;  %v9454_v28 = vld [vmem:[#allocation5 + $0xb1] sm:$0xff] }
 0x6f3   : > { %4685 = vst.msk [vmem:[#allocation6 + $0x120] sm:$0xff] %vm4560_vm12, %v9434_v43 }
 0x6f4   : > { %5145 = vrot.lane.b32.xlu0 %v5111_v26, %s6696_s25  ;;  %6597 = vmatpush.msrb.mxu3 %v9139_v62  ;;  %v5115_v62 = vld [vmem:[#allocation5 + $0x80] sm:$0xff]  ;;  %5004 = vst.msk [vmem:[#allocation6 + $0xc8] sm:$0xff] %vm4560_vm12, %v9454_v28 }
 0x6f5   : > { %4919 = vrot.lane.b32.xlu1 %v5110_v24, %s6697_s26  ;;  %v9325_v24 = vld [vmem:[#allocation5 + $0x71] sm:$0xff] }
 0x6f6   : > { %4822 = vrot.lane.b32.xlu2 %v5013_v5, %s6696_s25  ;;  %v9311_v5 = vld [vmem:[%s10261_s3 + $0x100] sm:$0xff]  ;;  %5002 = vst.msk [vmem:[#allocation6 + $0x98] sm:$0xff] %vm4560_vm12, %v9325_v24  ;;  %6598 = vmatpush.msrb.mxu3 %v9165_v32 }
 0x6f7   : > { %5610 = vmatpush.msra.mxu2 %v9311_v5 }
 0x6f8   : > { %6599 = vmatpush.msrb.mxu3 %v9176_v8 }
 0x6fa   : > { %6600 = vmatpush.msrb.mxu3 %v9183_v48 }
 0x6fc   : > { %4727 = vrot.lane.b32.xlu0 %v4692_v52, %s6695_s24  ;;  %v4638_v52 = vld [vmem:[#allocation4 + $0x70] sm:$0xff]  ;;  %6601 = vmatpush.msrb.mxu3 %v9196_v4 }
 0x6fd   : > { %5050 = vrot.lane.b32.xlu1 %v9050_v10, %s6695_s24  ;;  %4655 = vst.msk [vmem:[#allocation5 + $0x111] sm:$0xff] %vm4560_vm12, %v4638_v52  ;;  %v9430_v4 = vld [vmem:[#allocation5 + $0xb0] sm:$0xff] }
 0x6fe   : > { %5241 = vrot.lane.b32.xlu2 %v5207_v49, %s6697_s26  ;;  %6602 = vmatpush.msrb.mxu3 %v9216_v25  ;;  %4682 = vst.msk [vmem:[#allocation6 + $0xd8] sm:$0xff] %vm4560_vm12, %v9430_v4 }
 0x700   : > { %6603 = vmatpush.msrb.mxu3 %v9230_v7 }
 0x702   : > { %6604 = vmatpush.msrb.mxu3 %v9244_v1  ;;  %v5116_v1 = vld [vmem:[#allocation5 + $0x90] sm:$0xff] }
 0x704   : > { %5147 = vrot.lane.b32.xlu0 %v9059_v37, %s6696_s25  ;;  %v9351_v3 = vld [vmem:[#allocation5 + $0x112] sm:$0xff]  ;;  %6605 = vmatpush.msrb.mxu3 %v9256_v45 }
 0x705   : > { %4921 = vrot.lane.b32.xlu1 %v5111_v26, %s6697_s26  ;;  %v9341_v26 = vld [vmem:[%s10261_s3 + $0x80] sm:$0xff]  ;;  %5330 = vst.msk [vmem:[#allocation6 + $0x148] sm:$0xff] %vm4560_vm12, %v9351_v3 }
 0x706   : > { %4824 = vrot.lane.b32.xlu2 %v5014_v27, %s6696_s25  ;;  %v5335_v27 = vld [vmem:[#allocation6 + $0x10] sm:$0xff]  ;;  %6606 = vmatpush.msrb.mxu3 %v9277_v23 }
 0x707   : > { %6551 = vmatmul.msk.f32.vlgmr.msra.gmra.mxu2 %vm4560_vm12, %v5335_v27  ;;  %v9360_v21 = vld [vmem:[#allocation5 + $0x111] sm:$0xff] }
 0x708   : > { %5010 = vst.msk [vmem:[#allocation6 + $0x158] sm:$0xff] %vm4560_vm12, %v9360_v21  ;;  %6607 = vmatpush.msrb.mxu3 %v9292_v33  ;;  %v5212_v23 = vld [vmem:[#allocation5 + $0x91] sm:$0xff] }
 0x70a   : > { %6608 = vmatpush.msrb.mxu3 %v9304_v46 }
 0x70c   : > { %4745 = vrot.lane.b32.xlu0 %v9112_v34, %s6695_s24  ;;  %6609 = vmatpush.msrb.mxu3 %v9320_v13 }
 0x70d   : > { %4842 = vrot.lane.b32.xlu1 %v9068_v15, %s6696_s25 }
 0x70e   : > { %5243 = vrot.lane.b32.xlu2 %v9083_v47, %s6697_s26 }
 0x714   : > { %4729 = vrot.lane.b32.xlu0 %v5207_v49, %s6695_s24 }
 0x715   : > { %5052 = vrot.lane.b32.xlu1 %v9075_v29, %s6695_s24 }
 0x716   : > { %4939 = vrot.lane.b32.xlu2 %v9099_v63, %s6697_s26 }
 0x71c   : > { %5149 = vrot.lane.b32.xlu0 %v9088_v30, %s6696_s25 }
 0x71d   : > { %4923 = vrot.lane.b32.xlu1 %v9059_v37, %s6697_s26  ;;  %v9355_v37 = vld [vmem:[#allocation5 + $0x110] sm:$0xff] }
 0x71e   : > { %4826 = vrot.lane.b32.xlu2 %v9050_v10, %s6696_s25  ;;  %v9332_v10 = vld [vmem:[%s10261_s3 + $0x88] sm:$0xff]  ;;  %4688 = vst.msk [vmem:[#allocation6 + $0x168] sm:$0xff] %vm4560_vm12, %v9355_v37  ;;  %s6698_s3 = smov (%p4620_p0), 32  }
 0x71f   : > { %5544 = vmatpush.msra.mxu1 %v9332_v10  ;;  %6610 = vmatpush.msrb.mxu3 %v9332_v10 }
 0x721   : > { %5545 = vmatpush.msra.mxu1 %v9341_v26  ;;  %6611 = vmatpush.msrb.mxu3 %v9341_v26 }
 0x724   : > { %4747 = vrot.lane.b32.xlu0 %v9094_v12, %s6695_s24 }
 0x725   : > { %4844 = vrot.lane.b32.xlu1 %v9238_v35, %s6696_s25 }
 0x726   : > { %5245 = vrot.lane.b32.xlu2 %v9152_v20, %s6697_s26 }
 0x72c   : > { %4731 = vrot.lane.b32.xlu0 %v9083_v47, %s6695_s24 }
 0x72d   : > { %5054 = vrot.lane.b32.xlu1 %v9118_v18, %s6695_s24 }
 0x72e   : > { %4941 = vrot.lane.b32.xlu2 %v9204_v36, %s6697_s26 }
 0x730   : > { %v4916_v60 = vpop.permute.xlu2 %4915 }
 0x734   : > { %5151 = vrot.lane.b32.xlu0 %v9157_v19, %s6696_s25 }
 0x735   : > { %4925 = vrot.lane.b32.xlu1 %v9088_v30, %s6697_s26 }
 0x736   : > { %4828 = vrot.lane.b32.xlu2 %v9075_v29, %s6696_s25  ;;  %v5338_v29 = vld [vmem:[#allocation6 + $0x28] sm:$0xff] }
 0x737   : > { %6552 = vmatmul.msk.f32.gmra.mxu2 %vm4560_vm12, %v5338_v29 }
 0x738   : > { %v5238_v49 = vpop.permute.xlu2 %5237 }
 0x73c   : > { %4749 = vrot.lane.b32.xlu0 %v9198_v6, %s6695_s24  ;;  %v4722_v47 = vpop.permute.xlu0 %4721 }
 0x73d   : > { %4846 = vrot.lane.b32.xlu1 %v9221_v38, %s6696_s25  ;;  %v4819_v30 = vpop.permute.xlu1 %4818  ;;  %4770 = vst.msk [vmem:[#allocation6] sm:$0xff] %vm4769_vm4, %v4722_v47 }
 0x73e   : > { %5247 = vrot.lane.b32.xlu2 %v9325_v24, %s6697_s26  ;;  %4867 = vst.msk [vmem:[#allocation6] sm:$0xff] %vm4866_vm5, %v4819_v30 }
 0x73f   : > { %4964 = vst.msk [vmem:[#allocation6] sm:$0xff] %vm4963_vm6, %v4916_v60  ;;  %6553 = vmatmul.msk.f32.gmra.mxu2 %vm4560_vm12, %v5341_v57  ;;  %v5020_v60 = vld [vmem:[#allocation5 + $0xb2] sm:$0xff] }
 0x740   : > { %v4821_v22 = vpop.permute.xlu2 %4820 }
 0x744   : > { %4733 = vrot.lane.b32.xlu0 %v9152_v20, %s6695_s24 }
 0x745   : > { %5056 = vrot.lane.b32.xlu1 %v9258_v17, %s6695_s24 }
 0x746   : > { %4943 = vrot.lane.b32.xlu2 %v9355_v37, %s6697_s26  ;;  %v5045_v61 = vpop.permute.xlu0 %5044  ;;  %v5333_v53 = vld [vmem:[#allocation6] sm:$0xff] }
 0x747   : > { %5092 = vst.msk [vmem:[#allocation6 + $0x8] sm:$0xff] %vm4769_vm4, %v5045_v61  ;;  %v5142_v42 = vpop.permute.xlu1 %5141  ;;  %5481 = vmatmul.f32.vlgmr.msra.gmra.mxu0 %v5333_v53  ;;  %6554 = vmatmul.msk.f32.gmra.mxu2 %vm4560_vm12, %v5344_v31 }
 0x748   : > { %v5240_v58 = vpop.permute.xlu2 %5239  ;;  %5189 = vst.msk [vmem:[#allocation6 + $0x8] sm:$0xff] %vm4866_vm5, %v5142_v42 }
 0x749   : > { %5285 = vst.msk [vmem:[#allocation6 + $0x8] sm:$0xff] %vm4963_vm6, %v5238_v49 }
 0x74c   : > { %5153 = vrot.lane.b32.xlu0 %v5115_v62, %s6696_s25 }
 0x74d   : > { %4927 = vrot.lane.b32.xlu1 %v9157_v19, %s6697_s26 }
 0x74e   : > { %4830 = vrot.lane.b32.xlu2 %v9118_v18, %s6696_s25  ;;  %v4724_v20 = vpop.permute.xlu0 %4723  ;;  %v4633_v18 = vld [vmem:[#allocation4 + $0x48] sm:$0xff] }
 0x74f   : > { %4771 = vst.msk [vmem:[#allocation6 + $0x18] sm:$0xff] %vm4769_vm4, %v4724_v20  ;;  %v5047_v41 = vpop.permute.xlu1 %5046 }
 0x750   : > { %v4823_v32 = vpop.permute.xlu2 %4822  ;;  %5093 = vst.msk [vmem:[#allocation6 + $0x20] sm:$0xff] %vm4769_vm4, %v5047_v41  ;;  %v5334_v51 = vld [vmem:[#allocation6 + $0x8] sm:$0xff] }
 0x751   : > { %4868 = vst.msk [vmem:[#allocation6 + $0x18] sm:$0xff] %vm4866_vm5, %v4821_v22  ;;  %5546 = vmatmul.f32.vlgmr.msra.gmra.mxu1 %v5334_v51  ;;  %v5353_v51 = vld [vmem:[#allocation6 + $0xa0] sm:$0xff] }
 0x752   : > { %4650 = vst.msk [vmem:[#allocation5 + $0xc1] sm:$0xff] %vm4560_vm12, %v4633_v18  ;;  %v5308_v18 = vld [vmem:[#allocation5 + $0x92] sm:$0xff] }
 0x753   : > { %5324 = vst.msk [vmem:[#allocation6 + $0xb8] sm:$0xff] %vm4560_vm12, %v5308_v18 }
 0x754   : > { %4751 = vrot.lane.b32.xlu0 %v9360_v21, %s6695_s24 }
 0x755   : > { %4848 = vrot.lane.b32.xlu1 %v9351_v3, %s6696_s25 }
 0x756   : > { %5249 = vrot.lane.b32.xlu2 %v5211_v50, %s6697_s26  ;;  %v5144_v19 = vpop.permute.xlu0 %5143 }
 0x757   : > { %5190 = vst.msk [vmem:[#allocation6 + $0x20] sm:$0xff] %vm4866_vm5, %v5144_v19  ;;  %v4918_v8 = vpop.permute.xlu1 %4917 }
 0x758   : > { %v5242_v48 = vpop.permute.xlu2 %5241  ;;  %4965 = vst.msk [vmem:[#allocation6 + $0x18] sm:$0xff] %vm4963_vm6, %v4918_v8 }
 0x759   : > { %5286 = vst.msk [vmem:[#allocation6 + $0x20] sm:$0xff] %vm4963_vm6, %v5240_v58  ;;  %v9443_v14 = vld [vmem:[#allocation5 + $0xc0] sm:$0xff] }
 0x75a   : > { %4683 = vst.msk [vmem:[#allocation6 + $0xf0] sm:$0xff] %vm4560_vm12, %v9443_v14  ;;  %v9463_v33 = vld [vmem:[#allocation5 + $0xc2] sm:$0xff] }
 0x75b   : > { %5325 = vst.msk [vmem:[#allocation6 + $0xd0] sm:$0xff] %vm4560_vm12, %v9463_v33  ;;  %v9478_v26 = vld [vmem:[#allocation5 + $0xc1] sm:$0xff] }
 0x75c   : > { %4735 = vrot.lane.b32.xlu0 %v9325_v24, %s6695_s24  ;;  %v5347_v24 = vld [vmem:[#allocation6 + $0x70] sm:$0xff]  ;;  %5005 = vst.msk [vmem:[#allocation6 + $0xe0] sm:$0xff] %vm4560_vm12, %v9478_v26 }
 0x75d   : > { %5058 = vrot.lane.b32.xlu1 %v9374_v39, %s6695_s24  ;;  %6555 = vmatmul.msk.f32.gmra.mxu2 %vm4560_vm12, %v5347_v24 }
 0x75e   : > { %4945 = vrot.lane.b32.xlu2 %v9423_v59, %s6697_s26  ;;  %v4726_v25 = vpop.permute.xlu0 %4725 }
 0x75f   : > { %4772 = vst.msk [vmem:[#allocation6 + $0x30] sm:$0xff] %vm4769_vm4, %v4726_v25  ;;  %v5049_v0 = vpop.permute.xlu1 %5048  ;;  %v5336_v54 = vld [vmem:[#allocation6 + $0x18] sm:$0xff] }
 0x760   : > { %v4825_v7 = vpop.permute.xlu2 %4824  ;;  %5094 = vst.msk [vmem:[#allocation6 + $0x38] sm:$0xff] %vm4769_vm4, %v5049_v0  ;;  %5484 = vmatmul.f32.gmra.mxu0 %v5336_v54  ;;  %v5337_v56 = vld [vmem:[#allocation6 + $0x20] sm:$0xff] }
 0x761   : > { %4869 = vst.msk [vmem:[#allocation6 + $0x30] sm:$0xff] %vm4866_vm5, %v4823_v32  ;;  %5549 = vmatmul.f32.gmra.mxu1 %v5337_v56 }
 0x762   : > { %v5359_v0 = vld [vmem:[#allocation6 + $0xd0] sm:$0xff] }
 0x764   : > { %5155 = vrot.lane.b32.xlu0 %v5116_v1, %s6696_s25 }
 0x765   : > { %4929 = vrot.lane.b32.xlu1 %v5115_v62, %s6697_s26 }
 0x766   : > { %4832 = vrot.lane.b32.xlu2 %v9258_v17, %s6696_s25  ;;  %v5146_v44 = vpop.permute.xlu0 %5145  ;;  %v4634_v17 = vld [vmem:[#allocation4 + $0x50] sm:$0xff] }
 0x767   : > { %5191 = vst.msk [vmem:[#allocation6 + $0x38] sm:$0xff] %vm4866_vm5, %v5146_v44  ;;  %v4920_v45 = vpop.permute.xlu1 %4919  ;;  %v5124_v44 = vld [vmem:[#allocation5 + $0x130] sm:$0xff] }
 0x768   : > { %v5244_v16 = vpop.permute.xlu2 %5243  ;;  %4966 = vst.msk [vmem:[#allocation6 + $0x30] sm:$0xff] %vm4963_vm6, %v4920_v45 }
 0x769   : > { %5287 = vst.msk [vmem:[#allocation6 + $0x38] sm:$0xff] %vm4963_vm6, %v5242_v48 }
 0x76a   : > { %4651 = vst.msk [vmem:[#allocation5 + $0xd1] sm:$0xff] %vm4560_vm12, %v4634_v17 }
 0x76c   : > { %5068 = vrot.lane.b32.xlu0 %v9238_v35, %s6695_s24 }
 0x76d   : > { %5165 = vrot.lane.b32.xlu1 %v9204_v36, %s6696_s25  ;;  %v4697_v36 = vld [vmem:[#allocation5 + $0xa1] sm:$0xff] }
 0x76e   : > { %5251 = vrot.lane.b32.xlu2 %v5212_v23, %s6697_s26  ;;  %v4728_v46 = vpop.permute.xlu0 %4727 }
 0x76f   : > { %4773 = vst.msk [vmem:[#allocation6 + $0x48] sm:$0xff] %vm4769_vm4, %v4728_v46  ;;  %v5051_v13 = vpop.permute.xlu1 %5050  ;;  %v5339_v27 = vld [vmem:[#allocation6 + $0x30] sm:$0xff]  ;;  %v5365_v46 = vld [vmem:[#allocation6 + $0x100] sm:$0xff] }
 0x770   : > { %v4940_v52 = vpop.permute.xlu2 %4939  ;;  %5095 = vst.msk [vmem:[#allocation6 + $0x50] sm:$0xff] %vm4769_vm4, %v5051_v13  ;;  %5487 = vmatmul.f32.gmra.mxu0 %v5339_v27  ;;  %v5340_v35 = vld [vmem:[#allocation6 + $0x38] sm:$0xff] }
 0x771   : > { %4870 = vst.msk [vmem:[#allocation6 + $0x48] sm:$0xff] %vm4866_vm5, %v4825_v7  ;;  %5552 = vmatmul.f32.gmra.mxu1 %v5340_v35  ;;  %v9475_v10 = vld [vmem:[#allocation5 + $0xd0] sm:$0xff] }
 0x772   : > { %4684 = vst.msk [vmem:[#allocation6 + $0x108] sm:$0xff] %vm4560_vm12, %v9475_v10  ;;  %v9499_v42 = vld [vmem:[#allocation5 + $0xd2] sm:$0xff] }
 0x773   : > { %5326 = vst.msk [vmem:[#allocation6 + $0xe8] sm:$0xff] %vm4560_vm12, %v9499_v42  ;;  %v5312_v13 = vld [vmem:[#allocation5 + $0xf2] sm:$0xff] }
 0x774   : > { %4737 = vrot.lane.b32.xlu0 %v4697_v36, %s6695_s24  ;;  %5328 = vst.msk [vmem:[#allocation6 + $0x118] sm:$0xff] %vm4560_vm12, %v5312_v13 }
 0x775   : > { %5060 = vrot.lane.b32.xlu1 %v5020_v60, %s6695_s24 }
 0x776   : > { %5261 = vrot.lane.b32.xlu2 %v9198_v6, %s6697_s26  ;;  %v5148_v49 = vpop.permute.xlu0 %5147  ;;  %v4794_v6 = vld [vmem:[#allocation5 + $0xa2] sm:$0xff] }
 0x777   : > { %5192 = vst.msk [vmem:[#allocation6 + $0x50] sm:$0xff] %vm4866_vm5, %v5148_v49  ;;  %v4922_v29 = vpop.permute.xlu1 %4921 }
 0x778   : > { %v4827_v39 = vpop.permute.xlu2 %4826  ;;  %4967 = vst.msk [vmem:[#allocation6 + $0x48] sm:$0xff] %vm4963_vm6, %v4922_v29 }
 0x779   : > { %5288 = vst.msk [vmem:[#allocation6 + $0x50] sm:$0xff] %vm4963_vm6, %v5244_v16 }
 0x77a   : > { %v5362_v45 = vld [vmem:[#allocation6 + $0xe8] sm:$0xff] }
 0x77b   : > { %v5368_v35 = vld [vmem:[#allocation6 + $0x118] sm:$0xff] }
 0x77c   : > { %5157 = vrot.lane.b32.xlu0 %v9443_v14, %s6696_s25 }
 0x77d   : > { %4931 = vrot.lane.b32.xlu1 %v9430_v4, %s6697_s26 }
 0x77e   : > { %4834 = vrot.lane.b32.xlu2 %v4794_v6, %s6696_s25  ;;  %v4746_v47 = vpop.permute.xlu0 %4745 }
 0x77f   : > { %4782 = vst.msk [vmem:[#allocation6 + $0x120] sm:$0xff] %vm4769_vm4, %v4746_v47  ;;  %v4843_v30 = vpop.permute.xlu1 %4842  ;;  %v5342_v22 = vld [vmem:[#allocation6 + $0x48] sm:$0xff] }
 0x780   : > { %v5246_v9 = vpop.permute.xlu2 %5245  ;;  %4879 = vst.msk [vmem:[#allocation6 + $0x120] sm:$0xff] %vm4866_vm5, %v4843_v30  ;;  %5490 = vmatmul.f32.gmra.mxu0 %v5342_v22  ;;  %v5343_v61 = vld [vmem:[#allocation6 + $0x50] sm:$0xff] }
 0x781   : > { %4976 = vst.msk [vmem:[#allocation6 + $0x120] sm:$0xff] %vm4963_vm6, %v4940_v52  ;;  %5555 = vmatmul.f32.gmra.mxu1 %v5343_v61 }
 0x784   : > { %5070 = vrot.lane.b32.xlu0 %v9221_v38, %s6695_s24  ;;  %v5350_v38 = vld [vmem:[#allocation6 + $0x88] sm:$0xff] }
 0x785   : > { %5167 = vrot.lane.b32.xlu1 %v9355_v37, %s6696_s25  ;;  %6556 = vmatmul.msk.f32.gmra.mxu2 %vm4560_vm12, %v5350_v38  ;;  %v9516_v37 = vld [vmem:[#allocation5 + $0xd1] sm:$0xff] }
 0x786   : > { %5253 = vrot.lane.b32.xlu2 %v9478_v26, %s6697_s26  ;;  %v4730_v58 = vpop.permute.xlu0 %4729  ;;  %5006 = vst.msk [vmem:[#allocation6 + $0xf8] sm:$0xff] %vm4560_vm12, %v9516_v37 }
 0x787   : > { %4774 = vst.msk [vmem:[#allocation6 + $0x60] sm:$0xff] %vm4769_vm4, %v4730_v58  ;;  %v5053_v53 = vpop.permute.xlu1 %5052 }
 0x788   : > { %v4942_v62 = vpop.permute.xlu2 %4941  ;;  %5096 = vst.msk [vmem:[#allocation6 + $0x68] sm:$0xff] %vm4769_vm4, %v5053_v53  ;;  %v5369_v50 = vld [vmem:[#allocation6 + $0x120] sm:$0xff] }
 0x789   : > { %4871 = vst.msk [vmem:[#allocation6 + $0x60] sm:$0xff] %vm4866_vm5, %v4827_v39  ;;  %5517 = vmatmul.f32.vlgmr.msra.gmra.mxu3 %v5369_v50 }
 0x78a   : > { %6612 = vmatpush.msra.mxu3 %v9270_v55  ;;  %v5612_v49 = vpop.f32.mrf.mxu2 }
 0x78c   : > { %4739 = vrot.lane.b32.xlu0 %v9454_v28, %s6695_s24  ;;  %6613 = vmatpush.msra.mxu3 %v9287_v2  ;;  %v5219_v2 = vld [vmem:[#allocation5 + $0x121] sm:$0xff] }
 0x78d   : > { %5062 = vrot.lane.b32.xlu1 %v9463_v33, %s6695_s24  ;;  %5011 = vst.msk [vmem:[#allocation6 + $0x170] sm:$0xff] %vm4560_vm12, %v5219_v2  ;;  %6557 = vmatmul.msk.f32.gmra.mxu2 %vm4560_vm12, %v5353_v51 }
 0x78e   : > { %5263 = vrot.lane.b32.xlu2 %v9360_v21, %s6697_s26  ;;  %v5150_v57 = vpop.permute.xlu0 %5149  ;;  %6614 = vmatpush.msra.mxu3 %v9299_v40  ;;  %v5027_v21 = vld [vmem:[#allocation5 + $0x122] sm:$0xff] }
 0x78f   : > { %5193 = vst.msk [vmem:[#allocation6 + $0x68] sm:$0xff] %vm4866_vm5, %v5150_v57  ;;  %v4924_v55 = vpop.permute.xlu1 %4923 }
 0x790   : > { %v4829_v11 = vpop.permute.xlu2 %4828  ;;  %4968 = vst.msk [vmem:[#allocation6 + $0x60] sm:$0xff] %vm4963_vm6, %v4924_v55  ;;  %6615 = vmatpush.msra.mxu3 %v9311_v5 }
 0x791   : > { %5289 = vst.msk [vmem:[#allocation6 + $0x68] sm:$0xff] %vm4963_vm6, %v5246_v9 }
 0x792   : > { %5331 = vst.msk [vmem:[#allocation6 + $0x160] sm:$0xff] %vm4560_vm12, %v5027_v21 }
 0x794   : > { %5159 = vrot.lane.b32.xlu0 %v9475_v10, %s6696_s25 }
 0x795   : > { %4933 = vrot.lane.b32.xlu1 %v9443_v14, %s6697_s26 }
 0x796   : > { %4836 = vrot.lane.b32.xlu2 %v5020_v60, %s6696_s25  ;;  %v4748_v20 = vpop.permute.xlu0 %4747 }
 0x797   : > { %4783 = vst.msk [vmem:[#allocation6 + $0x138] sm:$0xff] %vm4769_vm4, %v4748_v20  ;;  %v4845_v40 = vpop.permute.xlu1 %4844  ;;  %v5345_v41 = vld [vmem:[#allocation6 + $0x60] sm:$0xff] }
 0x798   : > { %v5248_v32 = vpop.permute.xlu2 %5247  ;;  %4880 = vst.msk [vmem:[#allocation6 + $0x138] sm:$0xff] %vm4866_vm5, %v4845_v40  ;;  %5493 = vmatmul.f32.gmra.mxu0 %v5345_v41  ;;  %v5346_v5 = vld [vmem:[#allocation6 + $0x68] sm:$0xff] }
 0x799   : > { %4977 = vst.msk [vmem:[#allocation6 + $0x138] sm:$0xff] %vm4963_vm6, %v4942_v62  ;;  %5558 = vmatmul.f32.gmra.mxu1 %v5346_v5 }
 0x79c   : > { %5072 = vrot.lane.b32.xlu0 %v9351_v3, %s6695_s24  ;;  %v5356_v3 = vld [vmem:[#allocation6 + $0xb8] sm:$0xff] }
 0x79d   : > { %5169 = vrot.lane.b32.xlu1 %v9423_v59, %s6696_s25  ;;  %6558 = vmatmul.msk.f32.gmra.mxu2 %vm4560_vm12, %v5356_v3 }
 0x79e   : > { %5255 = vrot.lane.b32.xlu2 %v9516_v37, %s6697_s26  ;;  %v4732_v19 = vpop.permute.xlu0 %4731 }
 0x79f   : > { %4775 = vst.msk [vmem:[#allocation6 + $0x78] sm:$0xff] %vm4769_vm4, %v4732_v19  ;;  %v5055_v8 = vpop.permute.xlu1 %5054  ;;  %v5377_v19 = vld [vmem:[#allocation6 + $0x160] sm:$0xff] }
 0x7a0   : > { %v4944_v48 = vpop.permute.xlu2 %4943  ;;  %5097 = vst.msk [vmem:[#allocation6 + $0x80] sm:$0xff] %vm4769_vm4, %v5055_v8  ;;  %v5372_v31 = vld [vmem:[#allocation6 + $0x138] sm:$0xff] }
 0x7a1   : > { %4872 = vst.msk [vmem:[#allocation6 + $0x78] sm:$0xff] %vm4866_vm5, %v4829_v11  ;;  %5520 = vmatmul.f32.gmra.mxu3 %v5372_v31 }
 0x7a4   : > { %4741 = vrot.lane.b32.xlu0 %v9478_v26, %s6695_s24 }
 0x7a5   : > { %5064 = vrot.lane.b32.xlu1 %v9499_v42, %s6695_s24  ;;  %6559 = vmatmul.msk.f32.gmra.mxu2 %vm4560_vm12, %v5359_v0 }
 0x7a6   : > { %5265 = vrot.lane.b32.xlu2 %v5219_v2, %s6697_s26  ;;  %v5152_v59 = vpop.permute.xlu0 %5151 }
 0x7a7   : > { %5194 = vst.msk [vmem:[#allocation6 + $0x80] sm:$0xff] %vm4866_vm5, %v5152_v59  ;;  %v4926_v4 = vpop.permute.xlu1 %4925 }
 0x7a8   : > { %v4831_v25 = vpop.permute.xlu2 %4830  ;;  %4969 = vst.msk [vmem:[#allocation6 + $0x78] sm:$0xff] %vm4963_vm6, %v4926_v4 }
 0x7a9   : > { %5290 = vst.msk [vmem:[#allocation6 + $0x80] sm:$0xff] %vm4963_vm6, %v5248_v32 }
 0x7ac   : > { %5161 = vrot.lane.b32.xlu0 %v9434_v43, %s6696_s25 }
 0x7ad   : > { %4935 = vrot.lane.b32.xlu1 %v9475_v10, %s6697_s26  ;;  %6560 = vmatmul.msk.f32.gmra.mxu2 %vm4560_vm12, %v5362_v45  ;;  %v4665_v10 = vld [vmem:[#allocation5 + $0xa0] sm:$0xff] }
 0x7ae   : > { %4838 = vrot.lane.b32.xlu2 %v9463_v33, %s6696_s25  ;;  %v4750_v54 = vpop.permute.xlu0 %4749  ;;  %v5220_v33 = vld [vmem:[#allocation5 + $0x131] sm:$0xff]  ;;  %4681 = vst.msk [vmem:[#allocation6 + $0xc0] sm:$0xff] %vm4560_vm12, %v4665_v10 }
 0x7af   : > { %4784 = vst.msk [vmem:[#allocation6 + $0x150] sm:$0xff] %vm4769_vm4, %v4750_v54  ;;  %v4847_v7 = vpop.permute.xlu1 %4846  ;;  %v5348_v56 = vld [vmem:[#allocation6 + $0x78] sm:$0xff] }
 0x7b0   : > { %v5250_v1 = vpop.permute.xlu2 %5249  ;;  %4881 = vst.msk [vmem:[#allocation6 + $0x150] sm:$0xff] %vm4866_vm5, %v4847_v7  ;;  %5496 = vmatmul.f32.gmra.mxu0 %v5348_v56  ;;  %v5349_v14 = vld [vmem:[#allocation6 + $0x80] sm:$0xff] }
 0x7b1   : > { %4978 = vst.msk [vmem:[#allocation6 + $0x150] sm:$0xff] %vm4963_vm6, %v4944_v48  ;;  %5561 = vmatmul.f32.gmra.mxu1 %v5349_v14  ;;  %v4991_v56 = vld [vmem:[#allocation5 + $0xe1] sm:$0xff]  ;;  %v5316_v14 = vld [vmem:[#allocation5 + $0x132] sm:$0xff] }
 0x7b2   : > { %5007 = vst.msk [vmem:[#allocation6 + $0x110] sm:$0xff] %vm4560_vm12, %v4991_v56 }
 0x7b3   : > { %5332 = vst.msk [vmem:[#allocation6 + $0x178] sm:$0xff] %vm4560_vm12, %v5316_v14 }
 0x7b4   : > { %5074 = vrot.lane.b32.xlu0 %v5027_v21, %s6695_s24 }
 0x7b5   : > { %5171 = vrot.lane.b32.xlu1 %v5124_v44, %s6696_s25  ;;  %6561 = vmatmul.msk.f32.gmra.mxu2 %vm4560_vm12, %v5365_v46 }
 0x7b6   : > { %5257 = vrot.lane.b32.xlu2 %v9112_v34, %s6697_s26  ;;  %v4734_v16 = vpop.permute.xlu0 %4733 }
 0x7b7   : > { %4776 = vst.msk [vmem:[#allocation6 + $0x90] sm:$0xff] %vm4769_vm4, %v4734_v16  ;;  %v5057_v23 = vpop.permute.xlu1 %5056 }
 0x7b8   : > { %v4946_v28 = vpop.permute.xlu2 %4945  ;;  %5098 = vst.msk [vmem:[#allocation6 + $0x98] sm:$0xff] %vm4769_vm4, %v5057_v23  ;;  %v5375_v17 = vld [vmem:[#allocation6 + $0x150] sm:$0xff] }
 0x7b9   : > { %4873 = vst.msk [vmem:[#allocation6 + $0x90] sm:$0xff] %vm4866_vm5, %v4831_v25  ;;  %5523 = vmatmul.f32.gmra.mxu3 %v5375_v17 }
 0x7ba   : > { %v5380_v10 = vld [vmem:[#allocation6 + $0x178] sm:$0xff] }
 0x7bc   : > { %4743 = vrot.lane.b32.xlu0 %v9516_v37, %s6695_s24  ;;  %v5374_v37 = vld [vmem:[#allocation6 + $0x148] sm:$0xff] }
 0x7bd   : > { %5066 = vrot.lane.b32.xlu1 %v9068_v15, %s6695_s24  ;;  %6562 = vmatmul.msk.f32.gmra.mxu2 %vm4560_vm12, %v5368_v35 }
 0x7be   : > { %5267 = vrot.lane.b32.xlu2 %v5220_v33, %s6697_s26  ;;  %v5154_v34 = vpop.permute.xlu0 %5153 }
 0x7bf   : > { %5195 = vst.msk [vmem:[#allocation6 + $0x98] sm:$0xff] %vm4866_vm5, %v5154_v34  ;;  %v4928_v27 = vpop.permute.xlu1 %4927 }
 0x7c0   : > { %v4833_v52 = vpop.permute.xlu2 %4832  ;;  %4970 = vst.msk [vmem:[#allocation6 + $0x90] sm:$0xff] %vm4963_vm6, %v4928_v27 }
 0x7c1   : > { %5291 = vst.msk [vmem:[#allocation6 + $0x98] sm:$0xff] %vm4963_vm6, %v5250_v1 }
 0x7c4   : > { %5163 = vrot.lane.b32.xlu0 %v9099_v63, %s6696_s25  ;;  %v5371_v63 = vld [vmem:[#allocation6 + $0x130] sm:$0xff] }
 0x7c5   : > { %4937 = vrot.lane.b32.xlu1 %v9434_v43, %s6697_s26  ;;  %v5482_v43 = vpop.f32.mrf.mxu0  ;;  %6563 = vmatmul.msk.f32.gmra.mxu2 %vm4560_vm12, %v5371_v63 }
 0x7c6   : > { %4840 = vrot.lane.b32.xlu2 %v9499_v42, %s6696_s25  ;;  %v4752_v15 = vpop.permute.xlu0 %4751 }
 0x7c7   : > { %4785 = vst.msk [vmem:[#allocation6 + $0x168] sm:$0xff] %vm4769_vm4, %v4752_v15  ;;  %v4849_v36 = vpop.permute.xlu1 %4848  ;;  %v5351_v24 = vld [vmem:[#allocation6 + $0x90] sm:$0xff] }
 0x7c8   : > { %v5252_v60 = vpop.permute.xlu2 %5251  ;;  %4882 = vst.msk [vmem:[#allocation6 + $0x168] sm:$0xff] %vm4866_vm5, %v4849_v36  ;;  %5499 = vmatmul.f32.gmra.mxu0 %v5351_v24  ;;  %v5352_v26 = vld [vmem:[#allocation6 + $0x98] sm:$0xff] }
 0x7c9   : > { %4979 = vst.msk [vmem:[#allocation6 + $0x168] sm:$0xff] %vm4963_vm6, %v4946_v28  ;;  %5564 = vmatmul.f32.gmra.mxu1 %v5352_v26 }
 0x7cd   : > { %6564 = vmatmul.msk.f32.gmra.mxu2 %vm4560_vm12, %v5374_v37 }
 0x7ce   : > { %5259 = vrot.lane.b32.xlu2 %v9094_v12, %s6697_s26  ;;  %v5547_v29 = vpop.f32.mrf.mxu1  ;;  %v4736_v39 = vpop.permute.xlu0 %4735 }
 0x7cf   : > { %v5548_v6 = vadd.f32 %v5547_v29, %v5482_v43  ;;  %4777 = vst.msk [vmem:[#allocation6 + $0xa8] sm:$0xff] %vm4769_vm4, %v4736_v39  ;;  %v5059_v47 = vpop.permute.xlu1 %5058 }
 0x7d0   : > { %v5262_v30 = vpop.permute.xlu2 %5261  ;;  %5099 = vst.msk [vmem:[#allocation6 + $0xb0] sm:$0xff] %vm4769_vm4, %v5059_v47  ;;  %v5378_v22 = vld [vmem:[#allocation6 + $0x168] sm:$0xff] }
 0x7d1   : > { %4874 = vst.msk [vmem:[#allocation6 + $0xa8] sm:$0xff] %vm4866_vm5, %v4833_v52  ;;  %v9601_v9 = vadd.f32 %v5612_v49, %v5548_v6  ;;  %5526 = vmatmul.f32.gmra.mxu3 %v5378_v22  ;;  %v5615_v49 = vpop.f32.mrf.mxu2 }
 0x7d5   : > { %6565 = vmatmul.msk.f32.gmra.mxu2 %vm4560_vm12, %v5377_v19 }
 0x7d6   : > { %v5156_v12 = vpop.permute.xlu0 %5155 }
 0x7d7   : > { %5196 = vst.msk [vmem:[#allocation6 + $0xb0] sm:$0xff] %vm4866_vm5, %v5156_v12  ;;  %v4930_v61 = vpop.permute.xlu1 %4929 }
 0x7d8   : > { %v4835_v42 = vpop.permute.xlu2 %4834  ;;  %4971 = vst.msk [vmem:[#allocation6 + $0xa8] sm:$0xff] %vm4963_vm6, %v4930_v61 }
 0x7d9   : > { %5292 = vst.msk [vmem:[#allocation6 + $0xb0] sm:$0xff] %vm4963_vm6, %v5252_v60  ;;  %v5618_v29 = vpop.f32.mrf.mxu2 }
 0x7dd   : > { %v5485_v47 = vpop.f32.mrf.mxu0 }
 0x7de   : > { %v5069_v58 = vpop.permute.xlu0 %5068 }
 0x7df   : > { %5104 = vst.msk [vmem:[#allocation6 + $0x128] sm:$0xff] %vm4769_vm4, %v5069_v58  ;;  %v5166_v53 = vpop.permute.xlu1 %5165  ;;  %v5354_v62 = vld [vmem:[#allocation6 + $0xa8] sm:$0xff] }
 0x7e0   : > { %v5254_v50 = vpop.permute.xlu2 %5253  ;;  %5201 = vst.msk [vmem:[#allocation6 + $0x128] sm:$0xff] %vm4866_vm5, %v5166_v53  ;;  %5502 = vmatmul.f32.gmra.mxu0 %v5354_v62  ;;  %v5355_v38 = vld [vmem:[#allocation6 + $0xb0] sm:$0xff] }
 0x7e1   : > { %5297 = vst.msk [vmem:[#allocation6 + $0x128] sm:$0xff] %vm4963_vm6, %v5262_v30  ;;  %5567 = vmatmul.f32.gmra.mxu1 %v5355_v38  ;;  %v5621_v39 = vpop.f32.mrf.mxu2  ;;  %v5550_v30 = vpop.f32.mrf.mxu1 }
 0x7e6   : > { %v4738_v57 = vpop.permute.xlu0 %4737 }
 0x7e7   : > { %4778 = vst.msk [vmem:[#allocation6 + $0xc0] sm:$0xff] %vm4769_vm4, %v4738_v57  ;;  %v5061_v55 = vpop.permute.xlu1 %5060 }
 0x7e8   : > { %v5264_v11 = vpop.permute.xlu2 %5263  ;;  %5100 = vst.msk [vmem:[#allocation6 + $0xc8] sm:$0xff] %vm4769_vm4, %v5061_v55  ;;  %v5370_v21 = vld [vmem:[#allocation6 + $0x128] sm:$0xff] }
 0x7e9   : > { %4875 = vst.msk [vmem:[#allocation6 + $0xc0] sm:$0xff] %vm4866_vm5, %v4835_v42  ;;  %5582 = vmatmul.f32.vlgmr.msrb.gmra.mxu3 %v5370_v21  ;;  %v5624_v6 = vpop.f32.mrf.mxu2 }
 0x7ed   : > { %v5488_v12 = vpop.f32.mrf.mxu0 }
 0x7ee   : > { %v5158_v2 = vpop.permute.xlu0 %5157  ;;  %v5553_v61 = vpop.f32.mrf.mxu1 }
 0x7ef   : > { %5197 = vst.msk [vmem:[#allocation6 + $0xc8] sm:$0xff] %vm4866_vm5, %v5158_v2  ;;  %v4932_v20 = vpop.permute.xlu1 %4931 }
 0x7f0   : > { %4972 = vst.msk [vmem:[#allocation6 + $0xc0] sm:$0xff] %vm4963_vm6, %v4932_v20  ;;  %v4837_v40 = vpop.permute.xlu2 %4836 }
 0x7f1   : > { %5293 = vst.msk [vmem:[#allocation6 + $0xc8] sm:$0xff] %vm4963_vm6, %v5254_v50 }
 0x7f6   : > { %v5071_v41 = vpop.permute.xlu0 %5070 }
 0x7f7   : > { %5105 = vst.msk [vmem:[#allocation6 + $0x140] sm:$0xff] %vm4769_vm4, %v5071_v41  ;;  %v5168_v32 = vpop.permute.xlu1 %5167  ;;  %v5357_v5 = vld [vmem:[#allocation6 + $0xc0] sm:$0xff] }
 0x7f8   : > { %5202 = vst.msk [vmem:[#allocation6 + $0x140] sm:$0xff] %vm4866_vm5, %v5168_v32  ;;  %5505 = vmatmul.f32.gmra.mxu0 %v5357_v5  ;;  %v5358_v51 = vld [vmem:[#allocation6 + $0xc8] sm:$0xff]  ;;  %v5256_v18 = vpop.permute.xlu2 %5255 }
 0x7f9   : > { %5298 = vst.msk [vmem:[#allocation6 + $0x140] sm:$0xff] %vm4963_vm6, %v5264_v11  ;;  %5570 = vmatmul.f32.gmra.mxu1 %v5358_v51 }
 0x7fd   : > { %v5491_v58 = vpop.f32.mrf.mxu0 }
 0x7fe   : > { %v4740_v8 = vpop.permute.xlu0 %4739  ;;  %v5556_v53 = vpop.f32.mrf.mxu1 }
 0x7ff   : > { %4779 = vst.msk [vmem:[#allocation6 + $0xd8] sm:$0xff] %vm4769_vm4, %v4740_v8  ;;  %v5063_v48 = vpop.permute.xlu1 %5062 }
 0x800   : > { %5101 = vst.msk [vmem:[#allocation6 + $0xe0] sm:$0xff] %vm4769_vm4, %v5063_v48  ;;  %v5373_v31 = vld [vmem:[#allocation6 + $0x140] sm:$0xff]  ;;  %v5266_v3 = vpop.permute.xlu2 %5265 }
 0x801   : > { %4876 = vst.msk [vmem:[#allocation6 + $0xd8] sm:$0xff] %vm4866_vm5, %v4837_v40  ;;  %5585 = vmatmul.f32.gmra.mxu3 %v5373_v31  ;;  %v5551_v31 = vadd.f32 %v5550_v30, %v5485_v47 }
 0x806   : > { %v5160_v59 = vpop.permute.xlu0 %5159 }
 0x807   : > { %5198 = vst.msk [vmem:[#allocation6 + $0xe0] sm:$0xff] %vm4866_vm5, %v5160_v59  ;;  %v4934_v4 = vpop.permute.xlu1 %4933  ;;  %v5557_v59 = vadd.f32 %v5556_v53, %v5491_v58 }
 0x808   : > { %4973 = vst.msk [vmem:[#allocation6 + $0xd8] sm:$0xff] %vm4963_vm6, %v4934_v4  ;;  %v4839_v0 = vpop.permute.xlu2 %4838  ;;  %v5627_v22 = vpop.f32.mrf.mxu2 }
 0x809   : > { %5294 = vst.msk [vmem:[#allocation6 + $0xe0] sm:$0xff] %vm4963_vm6, %v5256_v18  ;;  %v9669_v56 = vadd.f32 %v5621_v39, %v5557_v59 }
 0x80c   : > { %v9647_v50 = vpop.f32.mrf.mxu3 }
 0x80e   : > { %v5073_v25 = vpop.permute.xlu0 %5072 }
 0x80f   : > { %5106 = vst.msk [vmem:[#allocation6 + $0x158] sm:$0xff] %vm4769_vm4, %v5073_v25  ;;  %v5170_v54 = vpop.permute.xlu1 %5169  ;;  %v5360_v7 = vld [vmem:[#allocation6 + $0xd8] sm:$0xff]  ;;  %v9663_v25 = vadd.f32 %v5615_v49, %v5551_v31 }
 0x810   : > { %5203 = vst.msk [vmem:[#allocation6 + $0x158] sm:$0xff] %vm4866_vm5, %v5170_v54  ;;  %5508 = vmatmul.f32.gmra.mxu0 %v5360_v7  ;;  %v5361_v1 = vld [vmem:[#allocation6 + $0xe0] sm:$0xff]  ;;  %v5258_v23 = vpop.permute.xlu2 %5257  ;;  %v5630_v42 = vpop.f32.mrf.mxu2 }
 0x811   : > { %5299 = vst.msk [vmem:[#allocation6 + $0x158] sm:$0xff] %vm4963_vm6, %v5266_v3  ;;  %5573 = vmatmul.f32.gmra.mxu1 %v5361_v1  ;;  %v5554_v3 = vadd.f32 %v5553_v61, %v5488_v12 }
 0x813   : > { %v9667_v7 = vadd.f32 %v5618_v29, %v5554_v3 }
 0x815   : > { %v5494_v38 = vpop.f32.mrf.mxu0 }
 0x816   : > { %v4742_v44 = vpop.permute.xlu0 %4741  ;;  %v5559_v37 = vpop.f32.mrf.mxu1 }
 0x817   : > { %4780 = vst.msk [vmem:[#allocation6 + $0xf0] sm:$0xff] %vm4769_vm4, %v4742_v44  ;;  %v5065_v45 = vpop.permute.xlu1 %5064  ;;  %v5698_v44 = vmul.f32 %v9663_v25, %v9663_v25 }
 0x818   : > { %5102 = vst.msk [vmem:[#allocation6 + $0xf8] sm:$0xff] %vm4769_vm4, %v5065_v45  ;;  %v5376_v16 = vld [vmem:[#allocation6 + $0x158] sm:$0xff]  ;;  %v5268_v33 = vpop.permute.xlu2 %5267 }
 0x819   : > { %4877 = vst.msk [vmem:[#allocation6 + $0xf0] sm:$0xff] %vm4866_vm5, %v4839_v0  ;;  %5588 = vmatmul.f32.gmra.mxu3 %v5376_v16  ;;  %v5560_v0 = vadd.f32 %v5559_v37, %v5494_v38  ;;  %v5697_v16 = vmul.f32 %v9601_v9, %v9601_v9 }
 0x81e   : > { %v5162_v28 = vpop.permute.xlu0 %5161 }
 0x81f   : > { %5199 = vst.msk [vmem:[#allocation6 + $0xf8] sm:$0xff] %vm4866_vm5, %v5162_v28  ;;  %v4936_v17 = vpop.permute.xlu1 %4935  ;;  %v5661_v28 = vsel %vm4560_vm12, %v9663_v25, 0.0 }
 0x820   : > { %4974 = vst.msk [vmem:[#allocation6 + $0xf0] sm:$0xff] %vm4963_vm6, %v4936_v17  ;;  %v4841_v52 = vpop.permute.xlu2 %4840  ;;  %v5633_v62 = vpop.f32.mrf.mxu2  ;;  %v5699_v17 = vmul.f32 %v9667_v7, %v9667_v7 }
 0x821   : > { %5295 = vst.msk [vmem:[#allocation6 + $0xf8] sm:$0xff] %vm4963_vm6, %v5258_v23  ;;  %v9675_v23 = vadd.f32 %v5624_v6, %v5560_v0 }
 0x824   : > { %v9649_v55 = vpop.f32.mrf.mxu3 }
 0x826   : > { %v5075_v46 = vpop.permute.xlu0 %5074 }
 0x827   : > { %5107 = vst.msk [vmem:[#allocation6 + $0x170] sm:$0xff] %vm4769_vm4, %v5075_v46  ;;  %v5172_v13 = vpop.permute.xlu1 %5171  ;;  %v5363_v34 = vld [vmem:[#allocation6 + $0xf0] sm:$0xff]  ;;  %v5660_v46 = vsel %vm4560_vm12, %v9601_v9, 0.0 }
 0x828   : > { %5204 = vst.msk [vmem:[#allocation6 + $0x170] sm:$0xff] %vm4866_vm5, %v5172_v13  ;;  %5511 = vmatmul.f32.gmra.mxu0 %v5363_v34  ;;  %v5364_v27 = vld [vmem:[#allocation6 + $0xf8] sm:$0xff]  ;;  %v5260_v60 = vpop.permute.xlu2 %5259  ;;  %v5636_v57 = vpop.f32.mrf.mxu2  ;;  %v5700_v13 = vmul.f32 %v9669_v56, %v9669_v56  ;;  %v5714_v34 = vsel %vm4560_vm12, %v5698_v44, 0.0 }
 0x829   : > { %5300 = vst.msk [vmem:[#allocation6 + $0x170] sm:$0xff] %vm4963_vm6, %v5268_v33  ;;  %5576 = vmatmul.f32.gmra.mxu1 %v5364_v27  ;;  %v5663_v27 = vsel %vm4560_vm12, %v9667_v7, 0.0 }
 0x82a   : > { %v5718_v6 = vsel %vm4560_vm12, %v5700_v13, 0.0 }
 0x82d   : > { %v5497_v11 = vpop.f32.mrf.mxu0 }
 0x82e   : > { %v4744_v35 = vpop.permute.xlu0 %4743  ;;  %v5562_v21 = vpop.f32.mrf.mxu1 }
 0x82f   : > { %4781 = vst.msk [vmem:[#allocation6 + $0x108] sm:$0xff] %vm4769_vm4, %v4744_v35  ;;  %v5067_v15 = vpop.permute.xlu1 %5066  ;;  %v5563_v45 = vadd.f32 %v5562_v21, %v5497_v11 }
 0x830   : > { %5103 = vst.msk [vmem:[#allocation6 + $0x110] sm:$0xff] %vm4769_vm4, %v5067_v15  ;;  %v5379_v36 = vld [vmem:[#allocation6 + $0x170] sm:$0xff]  ;;  %v9653_v20 = vpop.f32.mrf.mxu2  ;;  %v5713_v15 = vsel %vm4560_vm12, %v5697_v16, 0.0 }
 0x831   : > { %4878 = vst.msk [vmem:[#allocation6 + $0x108] sm:$0xff] %vm4866_vm5, %v4841_v52  ;;  %5591 = vmatmul.f32.gmra.mxu3 %v5379_v36  ;;  %v9688_v52 = vadd.f32 %v5627_v22, %v5563_v45  ;;  %v5662_v36 = vadd.f32 %v5661_v28, %v5660_v46  ;;  %v5715_v29 = vadd.f32 %v5714_v34, %v5713_v15  ;;  %v5667_v22 = vsel %vm4560_vm12, %v9675_v23, 0.0 }
 0x833   : > { %v5664_v39 = vadd.f32 %v5663_v27, %v5662_v36  ;;  %v5702_v12 = vmul.f32 %v9688_v52, %v9688_v52  ;;  %v5669_v37 = vsel %vm4560_vm12, %v9688_v52, 0.0 }
 0x836   : > { %v5164_v24 = vpop.permute.xlu0 %5163 }
 0x837   : > { %5200 = vst.msk [vmem:[#allocation6 + $0x110] sm:$0xff] %vm4866_vm5, %v5164_v24  ;;  %v4938_v26 = vpop.permute.xlu1 %4937  ;;  %v5701_v24 = vmul.f32 %v9675_v23, %v9675_v23 }
 0x838   : > { %4975 = vst.msk [vmem:[#allocation6 + $0x108] sm:$0xff] %vm4963_vm6, %v4938_v26  ;;  %v9657_v18 = vpop.f32.mrf.mxu2  ;;  %v5716_v26 = vsel %vm4560_vm12, %v5699_v17, 0.0 }
 0x839   : > { %5296 = vst.msk [vmem:[#allocation6 + $0x110] sm:$0xff] %vm4963_vm6, %v5260_v60  ;;  %6566 = vmatmul.msk.f32.vlgmr.msra.gmra.mxu3 %vm4560_vm12, %v5380_v10  ;;  %v5717_v53 = vadd.f32 %v5716_v26, %v5715_v29 }
 0x83c   : > { %v9651_v2 = vpop.f32.mrf.mxu3 }
 0x83f   : > { %v5366_v63 = vld [vmem:[#allocation6 + $0x108] sm:$0xff] }
 0x840   : > { %5514 = vmatmul.f32.gmra.mxu0 %v5366_v63  ;;  %v5367_v43 = vld [vmem:[#allocation6 + $0x110] sm:$0xff]  ;;  %v9661_v4 = vpop.f32.mrf.mxu2  ;;  %v5665_v63 = vsel %vm4560_vm12, %v9669_v56, 0.0 }
 0x841   : > { %5579 = vmatmul.f32.gmra.mxu1 %v5367_v43  ;;  %v5666_v38 = vadd.f32 %v5665_v63, %v5664_v39 }
 0x845   : > { %v5500_v40 = vpop.f32.mrf.mxu0 }
 0x846   : > { %v5565_v41 = vpop.f32.mrf.mxu1 }
 0x847   : > { %v5566_v33 = vadd.f32 %v5565_v41, %v5500_v40  ;;  %v5719_v41 = vadd.f32 %v5718_v6, %v5717_v53 }
 0x848   : > { %v5648_v60 = vpop.f32.mrf.mxu2 }
 0x849   : > { %v9696_v43 = vadd.f32 %v5630_v42, %v5566_v33  ;;  %v5720_v42 = vsel %vm4560_vm12, %v5701_v24, 0.0 }
 0x84a   : > { %v5721_v31 = vadd.f32 %v5720_v42, %v5719_v41 }
 0x84b   : > { %v5703_v11 = vmul.f32 %v9696_v43, %v9696_v43 }
 0x850   : > { %v5651_v59 = vpop.f32.mrf.mxu2 }
 0x854   : > { %v9655_v32 = vpop.f32.mrf.mxu3 }
 0x858   : > { %v5654_v39 = vpop.f32.mrf.mxu2 }
 0x85d   : > { %v5503_v5 = vpop.f32.mrf.mxu0 }
 0x85e   : > { %v5568_v51 = vpop.f32.mrf.mxu1 }
 0x85f   : > { %v5569_v35 = vadd.f32 %v5568_v51, %v5503_v5  ;;  %v5668_v5 = vadd.f32 %v5667_v22, %v5666_v38  ;;  %v5722_v51 = vsel %vm4560_vm12, %v5702_v12, 0.0 }
 0x860   : > { %v5723_v45 = vadd.f32 %v5722_v51, %v5721_v31 }
 0x861   : > { %v9703_v61 = vadd.f32 %v5633_v62, %v5569_v35  ;;  %v5671_v62 = vsel %vm4560_vm12, %v9696_v43, 0.0  ;;  %v5670_v3 = vadd.f32 %v5669_v37, %v5668_v5 }
 0x863   : > { %v5672_v16 = vadd.f32 %v5671_v62, %v5670_v3 }
 0x86c   : > { %v9659_v19 = vpop.f32.mrf.mxu3 }
 0x875   : > { %v5506_v8 = vpop.f32.mrf.mxu0 }
 0x876   : > { %v5571_v48 = vpop.f32.mrf.mxu1 }
 0x877   : > { %v5572_v49 = vadd.f32 %v5571_v48, %v5506_v8  ;;  %v5704_v8 = vmul.f32 %v9703_v61, %v9703_v61 }
 0x879   : > { %v9710_v21 = vadd.f32 %v5636_v57, %v5572_v49  ;;  %v5724_v57 = vsel %vm4560_vm12, %v5703_v11, 0.0  ;;  %v5726_v28 = vsel %vm4560_vm12, %v5704_v8, 0.0 }
 0x87a   : > { %v5725_v46 = vadd.f32 %v5724_v57, %v5723_v45 }
 0x87b   : > { %v5675_v17 = vsel %vm4560_vm12, %v9710_v21, 0.0 }
 0x87c   : > { %v5727_v35 = vadd.f32 %v5726_v28, %v5725_v46 }
 0x884   : > { %v9665_v54 = vpop.f32.mrf.mxu3 }
 0x88d   : > { %v5509_v1 = vpop.f32.mrf.mxu0 }
 0x88e   : > { %v5574_v14 = vpop.f32.mrf.mxu1 }
 0x88f   : > { %v5575_v58 = vadd.f32 %v5574_v14, %v5509_v1  ;;  %v5673_v1 = vsel %vm4560_vm12, %v9703_v61, 0.0  ;;  %v5705_v14 = vmul.f32 %v9710_v21, %v9710_v21 }
 0x890   : > { %v5674_v13 = vadd.f32 %v5673_v1, %v5672_v16 }
 0x891   : > { %v9718_v48 = vadd.f32 %v9653_v20, %v5575_v58  ;;  %v5584_v20 = vadd.f32 %v9659_v19, %v9647_v50  ;;  %v5728_v34 = vsel %vm4560_vm12, %v5705_v14, 0.0 }
 0x892   : > { %v5676_v36 = vadd.f32 %v5675_v17, %v5674_v13 }
 0x893   : > { %v5706_v33 = vmul.f32 %v9718_v48, %v9718_v48  ;;  %v5677_v27 = vsel %vm4560_vm12, %v9718_v48, 0.0  ;;  %v9742_v15 = vadd.f32 %v5648_v60, %v5584_v20 }
 0x894   : > { %v5678_v29 = vadd.f32 %v5677_v27, %v5676_v36 }
 0x895   : > { %v5730_v26 = vsel %vm4560_vm12, %v5706_v33, 0.0 }
 0x89c   : > { %v5589_v10 = vpop.f32.mrf.mxu3 }
 0x89d   : > { %v5590_v63 = vadd.f32 %v5589_v10, %v9651_v2 }
 0x89f   : > { %v9756_v10 = vadd.f32 %v5654_v39, %v5590_v63 }
 0x8a1   : > { %v5711_v8 = vmul.f32 %v9756_v10, %v9756_v10 }
 0x8a3   : > { %v5740_v45 = vsel %vm4560_vm12, %v5711_v8, 0.0 }
 0x8a5   : > { %v5512_v47 = vpop.f32.mrf.mxu0 }
 0x8a6   : > { %v5577_v30 = vpop.f32.mrf.mxu1 }
 0x8a7   : > { %v5578_v40 = vadd.f32 %v5577_v30, %v5512_v47  ;;  %v5709_v30 = vmul.f32 %v9742_v15, %v9742_v15 }
 0x8a9   : > { %v9726_v44 = vadd.f32 %v9657_v18, %v5578_v40  ;;  %v5587_v18 = vadd.f32 %v9665_v54, %v9649_v55  ;;  %v5729_v54 = vadd.f32 %v5728_v34, %v5727_v35  ;;  %v5736_v51 = vsel %vm4560_vm12, %v5709_v30, 0.0 }
 0x8ab   : > { %v5707_v50 = vmul.f32 %v9726_v44, %v9726_v44  ;;  %v5679_v49 = vsel %vm4560_vm12, %v9726_v44, 0.0  ;;  %v9748_v6 = vadd.f32 %v5651_v59, %v5587_v18  ;;  %v5731_v22 = vadd.f32 %v5730_v26, %v5729_v54 }
 0x8ac   : > { %v5680_v12 = vadd.f32 %v5679_v49, %v5678_v29 }
 0x8ad   : > { %v5732_v47 = vsel %vm4560_vm12, %v5707_v50, 0.0  ;;  %v5710_v11 = vmul.f32 %v9748_v6, %v9748_v6  ;;  %v5685_v62 = vsel %vm4560_vm12, %v9748_v6, 0.0 }
 0x8ae   : > { %v5733_v42 = vadd.f32 %v5732_v47, %v5731_v22 }
 0x8af   : > { %v5738_v59 = vsel %vm4560_vm12, %v5710_v11, 0.0 }
 0x8b4   : > { %v5592_v0 = vpop.f32.mrf.mxu3 }
 0x8b5   : > { %v5593_v58 = vadd.f32 %v5592_v0, %v9655_v32  ;;  %v5687_v0 = vsel %vm4560_vm12, %v9756_v10, 0.0 }
 0x8bc   : > { %v5657_v2 = vpop.f32.mrf.mxu3 }
 0x8bd   : > { %v5515_v19 = vpop.f32.mrf.mxu0  ;;  %v9767_v40 = vadd.f32 %v5657_v2, %v5593_v58 }
 0x8be   : > { %v5580_v24 = vpop.f32.mrf.mxu1 }
 0x8bf   : > { %v5581_v55 = vadd.f32 %v5580_v24, %v5515_v19  ;;  %v5712_v57 = vmul.f32 %v9767_v40, %v9767_v40  ;;  %v5689_v16 = vsel %vm4560_vm12, %v9767_v40, 0.0 }
 0x8c1   : > { %v9752_v60 = vadd.f32 %v9661_v4, %v5581_v55  ;;  %v5683_v4 = vsel %vm4560_vm12, %v9742_v15, 0.0  ;;  %v5742_v17 = vsel %vm4560_vm12, %v5712_v57, 0.0 }
 0x8c3   : > { %v5681_v53 = vsel %vm4560_vm12, %v9752_v60, 0.0  ;;  %v5708_v38 = vmul.f32 %v9752_v60, %v9752_v60 }
 0x8c4   : > { %v5682_v37 = vadd.f32 %v5681_v53, %v5680_v12 }
 0x8c5   : > { %v5734_v41 = vsel %vm4560_vm12, %v5708_v38, 0.0 }
 0x8c6   : > { %v5684_v5 = vadd.f32 %v5683_v4, %v5682_v37  ;;  %v5735_v32 = vadd.f32 %v5734_v41, %v5733_v42 }
 0x8c8   : > { %v5686_v31 = vadd.f32 %v5685_v62, %v5684_v5  ;;  %v5737_v3 = vadd.f32 %v5736_v51, %v5735_v32 }
 0x8ca   : > { %v5688_v1 = vadd.f32 %v5687_v0, %v5686_v31  ;;  %v5739_v14 = vadd.f32 %v5738_v59, %v5737_v3 }
 0x8cc   : > { %v5690_v20 = vadd.f32 %v5689_v16, %v5688_v1  ;;  %v5741_v28 = vadd.f32 %v5740_v45, %v5739_v14 }
 0x8ce   : > { %v5691_v33 = vrot.slane %v5690_v20, 4  ;;  %v5743_v46 = vadd.f32 %v5742_v17, %v5741_v28 }
 0x8d0   : > { %v5692_v13 = vadd.f32 %v5691_v33, %v5690_v20  ;;  %v5744_v34 = vrot.slane %v5743_v46, 4 }
 0x8d2   : > { %v5693_v18 = vrot.slane %v5692_v13, 2  ;;  %v5745_v27 = vadd.f32 %v5744_v34, %v5743_v46 }
 0x8d4   : > { %v5694_v50 = vadd.f32 %v5693_v18, %v5692_v13  ;;  %v5746_v19 = vrot.slane %v5745_v27, 2 }
 0x8d6   : > { %v5695_v35 = vrot.slane %v5694_v50, 1  ;;  %v5747_v36 = vadd.f32 %v5746_v19, %v5745_v27 }
 0x8d8   : > { %v5696_v24 = vadd.f32 %v5695_v35, %v5694_v50  ;;  %v5748_v26 = vrot.slane %v5747_v36, 1 }
 0x8da   : > { %v5749_v63 = vadd.f32 %v5748_v26, %v5747_v36  ;;  %v9784_v49 = vmul.f32 0.0078125, %v5696_v24 }
 0x8dc   : > { %v5751_v55 = vmul.f32 0.0078125, %v5749_v63  ;;  %v5752_v54 = vmul.f32 %v9784_v49, %v9784_v49  ;;  %v5754_v53 = vsub.f32 %v9601_v9, %v9784_v49  ;;  %v5755_v38 = vsub.f32 %v9663_v25, %v9784_v49  ;;  %v9801_v9 = vld [vmem:[%s10262_s4] ss:$0 sm:$0xff]  ;;  %s6699_s4 = smov (%p4620_p0), 64  }
 0x8dd   : > { %v5756_v42 = vsub.f32 %v9667_v7, %v9784_v49  ;;  %v5757_v37 = vsub.f32 %v9669_v56, %v9784_v49  ;;  %v5758_v11 = vsub.f32 %v9675_v23, %v9784_v49  ;;  %v5759_v25 = vsub.f32 %v9688_v52, %v9784_v49 }
 0x8de   : > { %v5753_v29 = vsub.f32 %v5751_v55, %v5752_v54  ;;  %v5760_v51 = vsub.f32 %v9696_v43, %v9784_v49  ;;  %v5761_v62 = vsub.f32 %v9703_v61, %v9784_v49  ;;  %v5762_v23 = vsub.f32 %v9710_v21, %v9784_v49  ;;  %v9819_v43 = vld [vmem:[%s10263_s5] ss:$0 sm:$0xff]  ;;  %s6700_s5 = smov (%p4620_p0), 96  }
 0x8df   : > { %v5763_v8 = vsub.f32 %v9718_v48, %v9784_v49  ;;  %v5764_v61 = vsub.f32 %v9726_v44, %v9784_v49  ;;  %v5765_v21 = vsub.f32 %v9752_v60, %v9784_v49  ;;  %v5766_v1 = vsub.f32 %v9742_v15, %v9784_v49 }
 0x8e0   : > { %v5770_v39 = vadd.f32 1e-05, %v5753_v29  ;;  %v5767_v14 = vsub.f32 %v9748_v6, %v9784_v49  ;;  %v5768_v20 = vsub.f32 %v9756_v10, %v9784_v49  ;;  %v5769_v6 = vsub.f32 %v9767_v40, %v9784_v49 }
 0x8e2   : > { %6644 = vrsqrt.f32 %v5770_v39  ;;  %vm5777_vm8 = vweird.f32 %v5770_v39 }
 0x8e8   : > { %v6645_v47 = vpop.eup %6644 }
 0x8e9   : > { %v5772_v30 = vmul.f32 %v6645_v47, %v5770_v39  ;;  %vm5778_vm7 = vweird.f32 %v6645_v47 }
 0x8ea   : > { %vm5779_vm9 = vmor %vm5777_vm8, %vm5778_vm7 }
 0x8eb   : > { %v5773_v22 = vmul.f32 %v6645_v47, %v5772_v30  ;;  %v5853_v30 = vld [vmem:[#allocation4] sm:$0xff] }
 0x8ed   : > { %v5774_v12 = vmul.f32 0.5, %v5773_v22  ;;  %v5854_v22 = vld [vmem:[#allocation4 + $0x8] sm:$0xff] }
 0x8ef   : > { %v5775_v2 = vsub.f32 1.5, %v5774_v12  ;;  %v5855_v12 = vld [vmem:[#allocation4 + $0x10] sm:$0xff] }
 0x8f1   : > { %v5776_v58 = vmul.f32 %v6645_v47, %v5775_v2 }
 0x8f3   : > { %v5780_v4 = vsel %vm5779_vm9, %v6645_v47, %v5776_v58 }
 0x8f4   : > { %v5781_v41 = vmul.f32 %v5780_v4, %v5754_v53  ;;  %v5782_v5 = vmul.f32 %v5780_v4, %v5755_v38  ;;  %v5783_v32 = vmul.f32 %v5780_v4, %v5756_v42  ;;  %v5784_v7 = vmul.f32 %v5780_v4, %v5757_v37  ;;  %v5856_v42 = vld [vmem:[#allocation4 + $0x18] sm:$0xff] }
 0x8f5   : > { %v5785_v56 = vmul.f32 %v5780_v4, %v5758_v11  ;;  %v5786_v31 = vmul.f32 %v5780_v4, %v5759_v25  ;;  %v5787_v3 = vmul.f32 %v5780_v4, %v5760_v51  ;;  %v5788_v48 = vmul.f32 %v5780_v4, %v5761_v62  ;;  %v5858_v25 = vld [vmem:[#allocation4 + $0x28] sm:$0xff] }
 0x8f6   : > { %v5801_v59 = vmul.f32 %v9801_v9, %v5781_v41  ;;  %v5802_v52 = vmul.f32 %v9801_v9, %v5782_v5  ;;  %v5803_v0 = vmul.f32 %v9801_v9, %v5783_v32  ;;  %v5804_v57 = vmul.f32 %v9801_v9, %v5784_v7  ;;  %v5857_v5 = vld [vmem:[#allocation4 + $0x20] sm:$0xff] }
 0x8f7   : > { %v5789_v45 = vmul.f32 %v5780_v4, %v5762_v23  ;;  %v5805_v16 = vmul.f32 %v9801_v9, %v5785_v56  ;;  %v5790_v28 = vmul.f32 %v5780_v4, %v5763_v8  ;;  %v5791_v44 = vmul.f32 %v5780_v4, %v5764_v61 }
 0x8f8   : > { %v5806_v17 = vmul.f32 %v9801_v9, %v5786_v31  ;;  %v5807_v60 = vmul.f32 %v9801_v9, %v5787_v3  ;;  %v5821_v33 = vadd.f32 %v9819_v43, %v5801_v59  ;;  %v5822_v46 = vadd.f32 %v9819_v43, %v5802_v52  ;;  %v5859_v31 = vld [vmem:[#allocation4 + $0x30] sm:$0xff] }
 0x8f9   : > { %v5823_v15 = vadd.f32 %v9819_v43, %v5803_v0  ;;  %v5792_v13 = vmul.f32 %v5780_v4, %v5765_v21  ;;  %v5808_v34 = vmul.f32 %v9801_v9, %v5788_v48  ;;  %v5824_v10 = vadd.f32 %v9819_v43, %v5804_v57  ;;  %v5860_v0 = vld [vmem:[#allocation4 + $0x38] sm:$0xff]  ;;  %v5861_v57 = vld [vmem:[#allocation4 + $0x40] sm:$0xff] }
 0x8fa   : > { %v5793_v18 = vmul.f32 %v5780_v4, %v5766_v1  ;;  %v5794_v27 = vmul.f32 %v5780_v4, %v5767_v14  ;;  %v5809_v50 = vmul.f32 %v9801_v9, %v5789_v45  ;;  %v5825_v19 = vadd.f32 %v9819_v43, %v5805_v16  ;;  %v5862_v45 = vld [vmem:[#allocation4 + $0x48] sm:$0xff] }
 0x8fb   : > { %v5795_v35 = vmul.f32 %v5780_v4, %v5768_v20  ;;  %v5810_v36 = vmul.f32 %v9801_v9, %v5790_v28  ;;  %v5811_v24 = vmul.f32 %v9801_v9, %v5791_v44  ;;  %v5826_v26 = vadd.f32 %v9819_v43, %v5806_v17  ;;  %v5863_v44 = vld [vmem:[#allocation4 + $0x50] sm:$0xff] }
 0x8fc   : > { %v5827_v40 = vadd.f32 %v9819_v43, %v5807_v60  ;;  %v5837_v63 = vmax.f32 %v5821_v33, 0.0  ;;  %v5838_v49 = vmax.f32 %v5822_v46, 0.0  ;;  %v5839_v55 = vmax.f32 %v5823_v15, 0.0  ;;  %v5864_v33 = vld [vmem:[#allocation4 + $0x58] sm:$0xff] }
 0x8fd   : > { %v5796_v54 = vmul.f32 %v5780_v4, %v5769_v6  ;;  %v5812_v29 = vmul.f32 %v9801_v9, %v5792_v13  ;;  %v5828_v39 = vadd.f32 %v9819_v43, %v5808_v34  ;;  %v5840_v47 = vmax.f32 %v5824_v10, 0.0  ;;  %v5865_v6 = vld [vmem:[#allocation4 + $0x60] sm:$0xff]  ;;  %v5866_v10 = vld [vmem:[#allocation4 + $0x68] sm:$0xff] }
 0x8fe   : > { %v5813_v2 = vmul.f32 %v9801_v9, %v5793_v18  ;;  %v5814_v58 = vmul.f32 %v9801_v9, %v5794_v27  ;;  %v5829_v53 = vadd.f32 %v9819_v43, %v5809_v50  ;;  %v5841_v38 = vmax.f32 %v5825_v19, 0.0  ;;  %v5867_v27 = vld [vmem:[#allocation4 + $0x70] sm:$0xff]  ;;  %v5868_v19 = vld [vmem:[#allocation4 + $0x78] sm:$0xff] }
 0x8ff   : > { %v5815_v37 = vmul.f32 %v9801_v9, %v5795_v35  ;;  %v5830_v4 = vadd.f32 %v9819_v43, %v5810_v36  ;;  %v5831_v11 = vadd.f32 %v9819_v43, %v5811_v24  ;;  %v5842_v41 = vmax.f32 %v5826_v26, 0.0 }
 0x900   : > { %v5843_v32 = vmax.f32 %v5827_v40, 0.0  ;;  %v5869_v7 = vadd.f32 %v5853_v30, %v5837_v63  ;;  %v5870_v51 = vadd.f32 %v5854_v22, %v5838_v49  ;;  %v5871_v56 = vadd.f32 %v5855_v12, %v5839_v55 }
 0x901   : > { %v5816_v62 = vmul.f32 %v9801_v9, %v5796_v54  ;;  %v5832_v23 = vadd.f32 %v9819_v43, %v5812_v29  ;;  %v5844_v8 = vmax.f32 %v5828_v39, 0.0  ;;  %v5872_v3 = vadd.f32 %v5856_v42, %v5840_v47 }
 0x902   : > { %v5833_v59 = vadd.f32 %v9819_v43, %v5813_v2  ;;  %v5845_v52 = vmax.f32 %v5829_v53, 0.0  ;;  %v5873_v61 = vadd.f32 %v5857_v5, %v5841_v38  ;;  %5885 = vst.msk [vmem:[#allocation4] sm:$0xff] %vm4560_vm12, %v5869_v7  ;;  %v5834_v21 = vadd.f32 %v9819_v43, %v5814_v58 }
 0x903   : > { %v5846_v48 = vmax.f32 %v5830_v4, 0.0  ;;  %v5874_v1 = vadd.f32 %v5858_v25, %v5842_v41  ;;  %5886 = vst.msk [vmem:[#allocation4 + $0x8] sm:$0xff] %vm4560_vm12, %v5870_v51  ;;  %v5835_v9 = vadd.f32 %v9819_v43, %v5815_v37  ;;  %v5847_v14 = vmax.f32 %v5831_v11, 0.0 }
 0x904   : > { %v5875_v16 = vadd.f32 %v5859_v31, %v5843_v32  ;;  %5887 = vst.msk [vmem:[#allocation4 + $0x10] sm:$0xff] %vm4560_vm12, %v5871_v56  ;;  %v5836_v20 = vadd.f32 %v9819_v43, %v5816_v62  ;;  %v5848_v28 = vmax.f32 %v5832_v23, 0.0  ;;  %v5876_v17 = vadd.f32 %v5860_v0, %v5844_v8 }
 0x905   : > { %5888 = vst.msk [vmem:[#allocation4 + $0x18] sm:$0xff] %vm4560_vm12, %v5872_v3  ;;  %v5849_v60 = vmax.f32 %v5833_v59, 0.0  ;;  %v5877_v46 = vadd.f32 %v5861_v57, %v5845_v52  ;;  %v5850_v15 = vmax.f32 %v5834_v21, 0.0  ;;  %v5878_v13 = vadd.f32 %v5862_v45, %v5846_v48 }
 0x906   : > { %5889 = vst.msk [vmem:[#allocation4 + $0x20] sm:$0xff] %vm4560_vm12, %v5873_v61  ;;  %v5851_v34 = vmax.f32 %v5835_v9, 0.0  ;;  %v5879_v18 = vadd.f32 %v5863_v44, %v5847_v14  ;;  %v5852_v43 = vmax.f32 %v5836_v20, 0.0  ;;  %v5880_v50 = vadd.f32 %v5864_v33, %v5848_v28 }
 0x907   : > { %5890 = vst.msk [vmem:[#allocation4 + $0x28] sm:$0xff] %vm4560_vm12, %v5874_v1  ;;  %v5881_v35 = vadd.f32 %v5865_v6, %v5849_v60  ;;  %v5882_v36 = vadd.f32 %v5866_v10, %v5850_v15 }
 0x908   : > { %5891 = vst.msk [vmem:[#allocation4 + $0x30] sm:$0xff] %vm4560_vm12, %v5875_v16  ;;  %v5883_v24 = vadd.f32 %v5867_v27, %v5851_v34  ;;  %v5884_v26 = vadd.f32 %v5868_v19, %v5852_v43 }
 0x909   : > { %5892 = vst.msk [vmem:[#allocation4 + $0x38] sm:$0xff] %vm4560_vm12, %v5876_v17  ;;  %v5901_v40 = vld [vmem:[#allocation4] sm:$0xff] (%p4620_p0) }
 0x90a   : > { %5893 = vst.msk [vmem:[#allocation4 + $0x40] sm:$0xff] %vm4560_vm12, %v5877_v46  ;;  %v5902_v63 = vld [vmem:[#allocation4 + $0x8] sm:$0xff] (%p4620_p0)  ;;  %v5919_v54 = vrot.slane (%p4620_p0), %v5901_v40, 1 }
 0x90b   : > { %5894 = vst.msk [vmem:[#allocation4 + $0x48] sm:$0xff] %vm4560_vm12, %v5878_v13  ;;  %v5927_v39 = vrot.slane (%p4620_p0), %v5902_v63, 1  ;;  %v5903_v4 = vld [vmem:[#allocation4 + $0x10] sm:$0xff] (%p4620_p0) }
 0x90c   : > { %5895 = vst.msk [vmem:[#allocation4 + $0x50] sm:$0xff] %vm4560_vm12, %v5879_v18  ;;  %v5923_v30 = vmax.f32 (%p4620_p0), %v5901_v40, %v5919_v54  ;;  %v5904_v11 = vld [vmem:[#allocation4 + $0x18] sm:$0xff] (%p4620_p0)  ;;  %v6008_v7 = vrot.slane (%p4620_p0), %v5903_v4, 1 }
 0x90d   : > { %5896 = vst.msk [vmem:[#allocation4 + $0x58] sm:$0xff] %vm4560_vm12, %v5880_v50  ;;  %v5931_v12 = vmax.f32 (%p4620_p0), %v5902_v63, %v5927_v39  ;;  %v6016_v51 = vrot.slane (%p4620_p0), %v5904_v11, 1  ;;  %v5905_v45 = vld [vmem:[#allocation4 + $0x20] sm:$0xff] (%p4620_p0) }
 0x90e   : > { %5897 = vst.msk [vmem:[#allocation4 + $0x60] sm:$0xff] %vm4560_vm12, %v5881_v35  ;;  %v6012_v59 = vmax.f32 (%p4620_p0), %v5903_v4, %v6008_v7  ;;  %v5906_v16 = vld [vmem:[#allocation4 + $0x28] sm:$0xff] (%p4620_p0)  ;;  %v6088_v44 = vrot.slane (%p4620_p0), %v5905_v45, 1 }
 0x90f   : > { %5898 = vst.msk [vmem:[#allocation4 + $0x68] sm:$0xff] %vm4560_vm12, %v5882_v36  ;;  %v9881_v58 = vmax.f32 (%p4620_p0), %v5923_v30, %v5931_v12  ;;  %v6020_v52 = vmax.f32 (%p4620_p0), %v5904_v11, %v6016_v51  ;;  %v6096_v17 = vrot.slane (%p4620_p0), %v5906_v16, 1 }
 0x910   : > { %5899 = vst.msk [vmem:[#allocation4 + $0x70] sm:$0xff] %vm4560_vm12, %v5883_v24  ;;  %v6092_v6 = vmax.f32 (%p4620_p0), %v5905_v45, %v6088_v44  ;;  %v5908_v54 = vld [vmem:[#allocation4 + $0x38] sm:$0xff] (%p4620_p0) }
 0x911   : > { %5900 = vst.msk [vmem:[#allocation4 + $0x78] sm:$0xff] %vm4560_vm12, %v5884_v26  ;;  %4622 = sbr.rel (!%p4620_p0) target bundleno = 1737 (0x6c9), region = 95  ;;  %v5909_v49 = vld [vmem:[#allocation4 + $0x40] sm:$0xff] (%p4620_p0)  ;;  %vm5946_vm12 = vcmask (%p4620_p0), 1045509   ;;  %v9900_v21 = vmax.f32 (%p4620_p0), %v6012_v59, %v6020_v52  ;;  %v6100_v13 = vmax.f32 (%p4620_p0), %v5906_v16, %v6096_v17 }
 0x912   :  { %v5910_v55 = vld [vmem:[#allocation4 + $0x48] sm:$0xff] (%p4620_p0)  ;;  %v5920_v29 = vrot.slane (%p4620_p0), %v5909_v49, 1  ;;  %5952 = vst.sshfl [vmem:[#allocation1] sm:$0xff pattern:$0x73625140] (%p4620_p0), %v9881_v58 }
 0x913   :  { %v5928_v47 = vrot.slane (%p4620_p0), %v5910_v55, 1  ;;  %v5911_v41 = vld [vmem:[#allocation4 + $0x50] sm:$0xff] (%p4620_p0)  ;;  %v9918_v18 = vmax.f32 (%p4620_p0), %v6092_v6, %v6100_v13 }
 0x914   :  { %v5924_v22 = vmax.f32 (%p4620_p0), %v5909_v49, %v5920_v29  ;;  %v5912_v5 = vld [vmem:[#allocation4 + $0x58] sm:$0xff] (%p4620_p0)  ;;  %v6009_v62 = vrot.slane (%p4620_p0), %v5911_v41, 1  ;;  %v5907_v49 = vld [vmem:[#allocation4 + $0x30] sm:$0xff] (%p4620_p0) }
 0x915   :  { %v5932_v2 = vmax.f32 (%p4620_p0), %v5910_v55, %v5928_v47  ;;  %v6017_v23 = vrot.slane (%p4620_p0), %v5912_v5, 1  ;;  %v5913_v20 = vld [vmem:[#allocation4 + $0x60] sm:$0xff] (%p4620_p0) }
 0x916   :  { %v6013_v0 = vmax.f32 %v5911_v41, %v6009_v62  ;;  %v5914_v28 = vld [vmem:[#allocation4 + $0x68] sm:$0xff]  ;;  %v6089_v60 = vrot.slane %v5913_v20, 1 }
 0x917   :  { %v9883_v53 = vmax.f32 %v5924_v22, %v5932_v2  ;;  %v6021_v61 = vmax.f32 %v5912_v5, %v6017_v23  ;;  %v6097_v33 = vrot.slane %v5914_v28, 1  ;;  %v5915_v29 = vld [vmem:[#allocation4 + $0x70] sm:$0xff]  ;;  %v6168_v22 = vrot.slane %v5907_v49, 1 }
 0x918   :  { %v6093_v34 = vmax.f32 %v5913_v20, %v6089_v60  ;;  %v5916_v39 = vld [vmem:[#allocation4 + $0x78] sm:$0xff]  ;;  %v6169_v12 = vrot.slane %v5915_v29, 1  ;;  %v6176_v2 = vrot.slane %v5908_v54, 1 }
 0x919   :  { %5955 = vst.sshfl [vmem:[#allocation1 + $0x20] sm:$0xff pattern:$0x73625140] %v9883_v53  ;;  %v5954_v38 = vld [vmem:[#allocation1 + $0x1] ss:$4 sm:$0xff]  ;;  %v9902_v48 = vmax.f32 %v6013_v0, %v6021_v61  ;;  %v6101_v10 = vmax.f32 %v5914_v28, %v6097_v33  ;;  %v6172_v41 = vmax.f32 %v5907_v49, %v6168_v22 }
 0x91a   :  { %5970 = vst.sshfl [vmem:[#allocation1] sm:$0xff pattern:$0x73625140] %v9881_v58  ;;  %v6173_v5 = vmax.f32 %v5915_v29, %v6169_v12 }
 0x91b   :  { %v9920_v43 = vmax.f32 %v6093_v34, %v6101_v10 }
 0x920   :  { %v5957_v42 = vld [vmem:[#allocation1 + $0x21] ss:$4 sm:$0xff] }
 0x921   :  { %v5960_v37 = vrot.slane %v5957_v42, 7  ;;  %5973 = vst.sshfl [vmem:[#allocation1 + $0x20] sm:$0xff pattern:$0x73625140] %v9883_v53  ;;  %v9894_v31 = vld [vmem:[#allocation1 + $0x2] ss:$4 sm:$0xff] }
 0x922   :  { %5988 = vst.sshfl [vmem:[#allocation1] sm:$0xff pattern:$0x73625140] %v9881_v58  ;;  %v6177_v42 = vrot.slane %v5916_v39, 1 }
 0x923   :  { %v5961_v32 = vsel %vm5942_vm10, %v5960_v37, %v5954_v38 }
 0x924   :  { %v5962_v25 = vsel %vm5944_vm11, %v5960_v37, %v5961_v32  ;;  %v6180_v32 = vmax.f32 %v5908_v54, %v6176_v2 }
 0x925   :  { %v5963_v56 = vsel %vm5946_vm12, %v5960_v37, %v5962_v25  ;;  %v6181_v25 = vmax.f32 %v5916_v39, %v6177_v42 }
 0x926   :  { %v5964_v8 = vsel %vm5948_vm13, %v5960_v37, %v5963_v56  ;;  %v9943_v59 = vmax.f32 %v6172_v41, %v6180_v32 }
 0x927   :  { %5965 = vrot.lane.b32.xlu0 %v5964_v8, %s6698_s3  ;;  %v9947_v61 = vmax.f32 %v6173_v5, %v6181_v25 }
 0x928   :  { %v9896_v3 = vld [vmem:[#allocation1 + $0x22] ss:$4 sm:$0xff] }
 0x929   :  { %5991 = vst.sshfl [vmem:[#allocation1 + $0x20] sm:$0xff pattern:$0x73625140] %v9883_v53  ;;  %v9904_v57 = vld [vmem:[#allocation1 + $0x3] ss:$4 sm:$0xff]  ;;  %v5978_v51 = vrot.slane %v9896_v3, 7 }
 0x92a   :  { %6035 = vst.sshfl [vmem:[#allocation1] sm:$0xff pattern:$0x73625140] %v9900_v21 }
 0x92b   :  { %v5979_v23 = vsel %vm5942_vm10, %v5978_v51, %v9894_v31 }
 0x92c   :  { %v5980_v0 = vsel %vm5944_vm11, %v5978_v51, %v5979_v23  ;;  %v6188_v23 = vrot.slane %v9947_v61, 7 }
 0x92d   :  { %v5981_v3 = vsel %vm5946_vm12, %v5978_v51, %v5980_v0 }
 0x92e   :  { %v5982_v45 = vsel %vm5948_vm13, %v5978_v51, %v5981_v3 }
 0x92f   :  { %5983 = vrot.lane.b32.xlu2 %v5982_v45, %s6699_s4 }
 0x930   :  { %v9906_v1 = vld [vmem:[#allocation1 + $0x23] ss:$4 sm:$0xff] }
 0x931   :  { %6038 = vst.sshfl [vmem:[#allocation1 + $0x20] sm:$0xff pattern:$0x73625140] %v9902_v48  ;;  %v6037_v9 = vld [vmem:[#allocation1 + $0x1] ss:$4 sm:$0xff]  ;;  %v5996_v20 = vrot.slane %v9906_v1, 7 }
 0x932   :  { %6052 = vst.sshfl [vmem:[#allocation1] sm:$0xff pattern:$0x73625140] %v9900_v21 }
 0x933   :  { %v5997_v60 = vsel %vm5942_vm10, %v5996_v20, %v9904_v57 }
 0x934   :  { %v5998_v33 = vsel %vm5944_vm11, %v5996_v20, %v5997_v60  ;;  %v6277_v60 = vld [vmem:[%s10264_s6 + $0xf0] sm:$0xff] }
 0x935   :  { %v5999_v6 = vsel %vm5946_vm12, %v5996_v20, %v5998_v33  ;;  %v6293_v33 = vld [vmem:[%s10264_s6 + $0x170] sm:$0xff] }
 0x938   :  { %v6040_v14 = vld [vmem:[#allocation1 + $0x21] ss:$4 sm:$0xff] }
 0x939   :  { %6055 = vst.sshfl [vmem:[#allocation1 + $0x20] sm:$0xff pattern:$0x73625140] %v9902_v48  ;;  %v9912_v46 = vld [vmem:[#allocation1 + $0x2] ss:$4 sm:$0xff]  ;;  %v6043_v19 = vrot.slane %v6040_v14, 7 }
 0x93a   :  { %6069 = vst.sshfl [vmem:[#allocation1] sm:$0xff pattern:$0x73625140] %v9900_v21 }
 0x93b   :  { %v6044_v35 = vsel %vm5942_vm10, %v6043_v19, %v6037_v9 }
 0x93c   :  { %v6045_v36 = vsel %vm5944_vm11, %v6043_v19, %v6044_v35 }
 0x93d   :  { %v6046_v24 = vsel %vm5946_vm12, %v6043_v19, %v6045_v36 }
 0x93e   :  { %v6047_v26 = vsel %vm5948_vm13, %v6043_v19, %v6046_v24 }
 0x93f   :  { %6048 = vrot.lane.b32.xlu0 %v6047_v26, %s6698_s3 }
 0x940   :  { %v9914_v15 = vld [vmem:[#allocation1 + $0x22] ss:$4 sm:$0xff] }
 0x941   :  { %6072 = vst.sshfl [vmem:[#allocation1 + $0x20] sm:$0xff pattern:$0x73625140] %v9902_v48  ;;  %v6071_v27 = vld [vmem:[#allocation1 + $0x3] ss:$4 sm:$0xff]  ;;  %v6060_v28 = vrot.slane %v9914_v15, 7  ;;  %v6000_v15 = vsel %vm5948_vm13, %v5996_v20, %v5999_v6 }
 0x942   :  { %6115 = vst.sshfl [vmem:[#allocation1] sm:$0xff pattern:$0x73625140] %v9918_v18  ;;  %6001 = vrot.lane.b32.xlu2 %v6000_v15, %s6700_s5  ;;  %v6309_v6 = vld [vmem:[%s10264_s6 + $0x1f0] sm:$0xff]  ;;  %v6292_v15 = vld [vmem:[%s10264_s6 + $0x168] sm:$0xff] }
 0x943   :  { %v6061_v13 = vsel %vm5942_vm10, %v6060_v28, %v9912_v46 }
 0x944   :  { %v6062_v34 = vsel %vm5944_vm11, %v6060_v28, %v6061_v13  ;;  %v6260_v13 = vld [vmem:[%s10264_s6 + $0x68] sm:$0xff] }
 0x945   :  { %v6063_v46 = vsel %vm5946_vm12, %v6060_v28, %v6062_v34  ;;  %v6308_v34 = vld [vmem:[%s10264_s6 + $0x1e8] sm:$0xff] }
 0x946   :  { %v6064_v35 = vsel %vm5948_vm13, %v6060_v28, %v6063_v46  ;;  %v6294_v28 = vld [vmem:[%s10264_s6 + $0x178] sm:$0xff]  ;;  %v6307_v46 = vld [vmem:[%s10264_s6 + $0x1e0] sm:$0xff] }
 0x947   :  { %6365 = vmatpush.msra.mxu2 %v6294_v28  ;;  %v6279_v28 = vld [vmem:[%s10264_s6 + $0x100] sm:$0xff] }
 0x948   :  { %v6074_v50 = vld [vmem:[#allocation1 + $0x23] ss:$4 sm:$0xff] }
 0x949   :  { %6118 = vst.sshfl [vmem:[#allocation1 + $0x20] sm:$0xff pattern:$0x73625140] %v9920_v43  ;;  %v6117_v40 = vld [vmem:[#allocation1 + $0x1] ss:$4 sm:$0xff]  ;;  %v6077_v56 = vrot.slane %v6074_v50, 7  ;;  %6366 = vmatpush.msra.mxu2 %v6293_v33 }
 0x94a   :  { %6132 = vst.sshfl [vmem:[#allocation1] sm:$0xff pattern:$0x73625140] %v9918_v18  ;;  %6065 = vrot.lane.b32.xlu2 %v6064_v35, %s6699_s4  ;;  %v6258_v35 = vld [vmem:[%s10264_s6 + $0x58] sm:$0xff] }
 0x94b   :  { %v6078_v8 = vsel %vm5942_vm10, %v6077_v56, %v6071_v27  ;;  %6367 = vmatpush.msra.mxu2 %v6292_v15 }
 0x94c   :  { %v6079_v31 = vsel %vm5944_vm11, %v6077_v56, %v6078_v8  ;;  %v6189_v8 = vsel %vm5942_vm10, %v6188_v23, %v9943_v59 }
 0x94d   :  { %v6080_v17 = vsel %vm5946_vm12, %v6077_v56, %v6079_v31 }
 0x94e   :  { %v6081_v1 = vsel %vm5948_vm13, %v6077_v56, %v6080_v17  ;;  %v6261_v17 = vld [vmem:[%s10264_s6 + $0x70] sm:$0xff] }
 0x950   :  { %v6120_v63 = vld [vmem:[#allocation1 + $0x21] ss:$4 sm:$0xff] }
 0x951   :  { %v6123_v55 = vrot.slane %v6120_v63, 7  ;;  %6135 = vst.sshfl [vmem:[#allocation1 + $0x20] sm:$0xff pattern:$0x73625140] %v9920_v43  ;;  %v6134_v4 = vld [vmem:[#allocation1 + $0x2] ss:$4 sm:$0xff] }
 0x952   :  { %6149 = vst.sshfl [vmem:[#allocation1] sm:$0xff pattern:$0x73625140] %v9918_v18 }
 0x953   :  { %v6124_v47 = vsel %vm5942_vm10, %v6123_v55, %v6117_v40 }
 0x954   :  { %v6125_v30 = vsel %vm5944_vm11, %v6123_v55, %v6124_v47  ;;  %v5941_v47 = vrot.slane %v9883_v53, 7 }
 0x955   :  { %v6126_v38 = vsel %vm5946_vm12, %v6123_v55, %v6125_v30 }
 0x956   :  { %v6127_v37 = vsel %vm5948_vm13, %v6123_v55, %v6126_v38 }
 0x957   :  { %6128 = vrot.lane.b32.xlu1 %v6127_v37, %s6698_s3  ;;  %v5943_v37 = vsel %vm5942_vm10, %v5941_v47, %v9881_v58 }
 0x958   :  { %v6137_v11 = vld [vmem:[#allocation1 + $0x22] ss:$4 sm:$0xff] }
 0x959   :  { %6152 = vst.sshfl [vmem:[#allocation1 + $0x20] sm:$0xff pattern:$0x73625140] %v9920_v43  ;;  %v6140_v7 = vrot.slane %v6137_v11, 7  ;;  %v6151_v16 = vld [vmem:[#allocation1 + $0x3] ss:$4 sm:$0xff] }
 0x95a   :  { %6195 = vst.sshfl [vmem:[#allocation1] sm:$0xff pattern:$0x73625140] %v9943_v59  ;;  %v6108_v11 = vrot.slane %v9920_v43, 7 }
 0x95b   :  { %v6141_v62 = vsel %vm5942_vm10, %v6140_v7, %v6134_v4  ;;  %v5945_v4 = vsel %vm5944_vm11, %v5941_v47, %v5943_v37  ;;  %v6270_v37 = vld [vmem:[%s10264_s6 + $0xb8] sm:$0xff] }
 0x95c   :  { %v6142_v52 = vsel %vm5944_vm11, %v6140_v7, %v6141_v62  ;;  %v5947_v41 = vsel %vm5946_vm12, %v5941_v47, %v5945_v4  ;;  %v6286_v4 = vld [vmem:[%s10264_s6 + $0x138] sm:$0xff] }
 0x95d   :  { %v6143_v9 = vsel %vm5946_vm12, %v6140_v7, %v6142_v52  ;;  %v5949_v25 = vsel %vm5948_vm13, %v5941_v47, %v5947_v41  ;;  %v6190_v52 = vsel %vm5944_vm11, %v6188_v23, %v6189_v8  ;;  %v6304_v47 = vld [vmem:[%s10264_s6 + $0x1c8] sm:$0xff]  ;;  %v6269_v41 = vld [vmem:[%s10264_s6 + $0xb0] sm:$0xff]  ;;  %v6266_v8 = vld [vmem:[%s10264_s6 + $0x98] sm:$0xff] }
 0x95e   :  { %v6144_v14 = vsel %vm5948_vm13, %v6140_v7, %v6143_v9  ;;  %v6109_v7 = vsel %vm5942_vm10, %v6108_v11, %v9918_v18  ;;  %5951 = vst.msk [vmem:[#allocation7] sm:$0x3] %vm4578_vm3, %v5949_v25  ;;  %v6191_v0 = vsel %vm5946_vm12, %v6188_v23, %v6190_v52  ;;  %v6252_v25 = vld [vmem:[%s10264_s6 + $0x28] sm:$0xff] }
 0x95f   :  { %6145 = vrot.lane.b32.xlu0 %v6144_v14, %s6699_s4  ;;  %v6110_v58 = vsel %vm5944_vm11, %v6108_v11, %v6109_v7  ;;  %v6192_v9 = vsel %vm5948_vm13, %v6188_v23, %v6191_v0  ;;  %v6028_v14 = vrot.slane %v9902_v48, 7  ;;  %v6262_v48 = vld [vmem:[%s10264_s6 + $0x78] sm:$0xff]  ;;  %v6268_v7 = vld [vmem:[%s10264_s6 + $0xa8] sm:$0xff] }
 0x960   :  { %v6154_v44 = vld [vmem:[#allocation1 + $0x23] ss:$4 sm:$0xff]  ;;  %v6111_v56 = vsel %vm5946_vm12, %v6108_v11, %v6110_v58  ;;  %6194 = vst.msk [vmem:[#allocation7 + $0x6] sm:$0x3] %vm4578_vm3, %v6192_v9  ;;  %6325 = vmatpush.msra.mxu0 %v6262_v48 }
 0x961   :  { %6198 = vst.sshfl [vmem:[#allocation1 + $0x20] sm:$0xff pattern:$0x73625140] %v9947_v61  ;;  %v6197_v10 = vld [vmem:[#allocation1 + $0x1] ss:$4 sm:$0xff]  ;;  %v6157_v40 = vrot.slane %v6154_v44, 7  ;;  %v6112_v62 = vsel %vm5948_vm13, %v6108_v11, %v6111_v56 }
 0x962   :  { %6212 = vst.sshfl [vmem:[#allocation1] sm:$0xff pattern:$0x73625140] %v9943_v59  ;;  %v6310_v44 = vld [vmem:[%s10264_s6 + $0x1f8] sm:$0xff]  ;;  %6326 = vmatpush.msra.mxu0 %v6261_v17  ;;  %v6300_v58 = vld [vmem:[%s10264_s6 + $0x1a8] sm:$0xff]  ;;  %v6267_v56 = vld [vmem:[%s10264_s6 + $0xa0] sm:$0xff] }
 0x963   :  { %v6158_v54 = vsel %vm5942_vm10, %v6157_v40, %v6151_v16  ;;  %6114 = vst.msk [vmem:[#allocation7 + $0x4] sm:$0x3] %vm4578_vm3, %v6112_v62  ;;  %6385 = vmatpush.msra.mxu3 %v6310_v44  ;;  %v6302_v11 = vld [vmem:[%s10264_s6 + $0x1b8] sm:$0xff]  ;;  %v6283_v62 = vld [vmem:[%s10264_s6 + $0x120] sm:$0xff] }
 0x964   :  { %v6159_v22 = vsel %vm5944_vm11, %v6157_v40, %v6158_v54  ;;  %6327 = vmatpush.msra.mxu0 %v6260_v13  ;;  %v6256_v54 = vld [vmem:[%s10264_s6 + $0x48] sm:$0xff]  ;;  %v6250_v23 = vld [vmem:[%s10264_s6 + $0x18] sm:$0xff]  ;;  %v6247_v48 = vld [vmem:[%s10264_s6] sm:$0xff] }
 0x965   :  { %v6160_v38 = vsel %vm5946_vm12, %v6157_v40, %v6159_v22  ;;  %6386 = vmatpush.msra.mxu3 %v6309_v6  ;;  %v6271_v22 = vld [vmem:[%s10264_s6 + $0xc0] sm:$0xff]  ;;  %v6282_v0 = vld [vmem:[%s10264_s6 + $0x118] sm:$0xff] }
 0x966   :  { %v6161_v5 = vsel %vm5948_vm13, %v6157_v40, %v6160_v38  ;;  %v6257_v40 = vld [vmem:[%s10264_s6 + $0x50] sm:$0xff]  ;;  %v6298_v9 = vld [vmem:[%s10264_s6 + $0x198] sm:$0xff]  ;;  %v6295_v44 = vld [vmem:[%s10264_s6 + $0x180] sm:$0xff] }
 0x967   :  { %6082 = vrot.lane.b32.xlu0 %v6081_v1, %s6700_s5  ;;  %v6276_v1 = vld [vmem:[%s10264_s6 + $0xe8] sm:$0xff]  ;;  %6387 = vmatpush.msra.mxu3 %v6308_v34 }
 0x968   :  { %v6200_v57 = vld [vmem:[#allocation1 + $0x21] ss:$4 sm:$0xff] }
 0x969   :  { %v6203_v27 = vrot.slane %v6200_v57, 7  ;;  %6215 = vst.sshfl [vmem:[#allocation1 + $0x20] sm:$0xff pattern:$0x73625140] %v9947_v61  ;;  %v6214_v26 = vld [vmem:[#allocation1 + $0x2] ss:$4 sm:$0xff]  ;;  %6388 = vmatpush.msra.mxu3 %v6307_v46 }
 0x96a   :  { %6229 = vst.sshfl [vmem:[#allocation1] sm:$0xff pattern:$0x73625140] %v9943_v59  ;;  %v6275_v57 = vld [vmem:[%s10264_s6 + $0xe0] sm:$0xff]  ;;  %v6408_v46 = vld [vmem:[%s10266_s8 + $0x10] sm:$0xff] }
 0x96b   :  { %v6204_v50 = vsel %vm5942_vm10, %v6203_v27, %v6197_v10  ;;  %v6259_v10 = vld [vmem:[%s10264_s6 + $0x60] sm:$0xff] }
 0x96c   :  { %v6205_v19 = vsel %vm5944_vm11, %v6203_v27, %v6204_v50  ;;  %6328 = vmatpush.msra.mxu0 %v6259_v10 }
 0x96d   :  { %v6206_v36 = vsel %vm5946_vm12, %v6203_v27, %v6205_v19 }
 0x96e   :  { %v6207_v24 = vsel %vm5948_vm13, %v6203_v27, %v6206_v36  ;;  %v6291_v27 = vld [vmem:[%s10264_s6 + $0x160] sm:$0xff]  ;;  %v6274_v36 = vld [vmem:[%s10264_s6 + $0xd8] sm:$0xff]  ;;  %6329 = vmatpush.msra.mxu0 %v6258_v35 }
 0x96f   :  { %6208 = vrot.lane.b32.xlu1 %v6207_v24, %s6698_s3  ;;  %6368 = vmatpush.msra.mxu2 %v6291_v27  ;;  %v6290_v24 = vld [vmem:[%s10264_s6 + $0x158] sm:$0xff]  ;;  %v6646_v35 = vld [vmem:[%s10265_s7] ss:$0 sm:$0xff]  ;;  %s6701_s7 = smov [#allocation8]  }
 0x970   :  { %v6217_v63 = vld [vmem:[#allocation1 + $0x22] ss:$4 sm:$0xff]  ;;  %6330 = vmatpush.msra.mxu0 %v6257_v40 }
 0x971   :  { %v6220_v49 = vrot.slane %v6217_v63, 7  ;;  %6232 = vst.sshfl [vmem:[#allocation1 + $0x20] sm:$0xff pattern:$0x73625140] %v9947_v61  ;;  %v6231_v12 = vld [vmem:[#allocation1 + $0x3] ss:$4 sm:$0xff]  ;;  %v6029_v61 = vsel %vm5942_vm10, %v6028_v14, %v9900_v21  ;;  %6369 = vmatpush.msra.mxu2 %v6290_v24 }
 0x972   :  { %v6030_v45 = vsel %vm5944_vm11, %v6028_v14, %v6029_v61  ;;  %v6278_v21 = vld [vmem:[%s10264_s6 + $0xf8] sm:$0xff]  ;;  %v6273_v63 = vld [vmem:[%s10264_s6 + $0xd0] sm:$0xff]  ;;  %6331 = vmatpush.msra.mxu0 %v6256_v54 }
 0x973   :  { %v6221_v55 = vsel %vm5942_vm10, %v6220_v49, %v6214_v26  ;;  %v6031_v59 = vsel %vm5946_vm12, %v6028_v14, %v6030_v45  ;;  %6345 = vmatpush.msra.mxu1 %v6278_v21  ;;  %v6306_v26 = vld [vmem:[%s10264_s6 + $0x1d8] sm:$0xff]  ;;  %v6281_v61 = vld [vmem:[%s10264_s6 + $0x110] sm:$0xff]  ;;  %v6263_v21 = vld [vmem:[%s10264_s6 + $0x80] sm:$0xff] }
 0x974   :  { %v6222_v29 = vsel %vm5944_vm11, %v6220_v49, %v6221_v55  ;;  %v6032_v31 = vsel %vm5948_vm13, %v6028_v14, %v6031_v59  ;;  %6389 = vmatpush.msra.mxu3 %v6306_v26  ;;  %v6305_v55 = vld [vmem:[%s10264_s6 + $0x1d0] sm:$0xff]  ;;  %v6248_v59 = vld [vmem:[%s10264_s6 + $0x8] sm:$0xff]  ;;  %v6409_v27 = vld [vmem:[%s10266_s8 + $0x18] sm:$0xff] }
 0x975   :  { %v6223_v39 = vsel %vm5946_vm12, %v6220_v49, %v6222_v29  ;;  %6034 = vst.msk [vmem:[#allocation7 + $0x2] sm:$0x3] %vm4578_vm3, %v6032_v31  ;;  %6346 = vmatpush.msra.mxu1 %v6277_v60  ;;  %v6272_v29 = vld [vmem:[%s10264_s6 + $0xc8] sm:$0xff]  ;;  %v6265_v14 = vld [vmem:[%s10264_s6 + $0x90] sm:$0xff] }
 0x976   :  { %v6224_v30 = vsel %vm5948_vm13, %v6220_v49, %v6223_v39  ;;  %v6289_v49 = vld [vmem:[%s10264_s6 + $0x150] sm:$0xff]  ;;  %v6288_v39 = vld [vmem:[%s10264_s6 + $0x148] sm:$0xff]  ;;  %6390 = vmatpush.msra.mxu3 %v6305_v55 }
 0x977   :  { %6225 = vrot.lane.b32.xlu1 %v6224_v30, %s6699_s4  ;;  %6347 = vmatpush.msra.mxu1 %v6276_v1  ;;  %v6255_v30 = vld [vmem:[%s10264_s6 + $0x40] sm:$0xff]  ;;  %v6297_v45 = vld [vmem:[%s10264_s6 + $0x190] sm:$0xff]  ;;  %v6264_v31 = vld [vmem:[%s10264_s6 + $0x88] sm:$0xff] }
 0x978   :  { %v6234_v2 = vld [vmem:[#allocation1 + $0x23] ss:$4 sm:$0xff]  ;;  %6370 = vmatpush.msra.mxu2 %v6289_v49  ;;  %6391 = vmatpush.msra.mxu3 %v6304_v47 }
 0x979   :  { %v6237_v42 = vrot.slane %v6234_v2, 7  ;;  %6348 = vmatpush.msra.mxu1 %v6275_v57  ;;  %v6303_v2 = vld [vmem:[%s10264_s6 + $0x1c0] sm:$0xff]  ;;  %6332 = vmatpush.msra.mxu0 %v6255_v30 }
 0x97a   :  { %6371 = vmatpush.msra.mxu2 %v6288_v39  ;;  %6392 = vmatpush.msra.mxu3 %v6303_v2  ;;  %v6410_v57 = vld [vmem:[%s10266_s8 + $0x20] sm:$0xff] }
 0x97b   :  { %v6238_v53 = vsel %vm5942_vm10, %v6237_v42, %v6231_v12  ;;  %6349 = vmatpush.msra.mxu1 %v6274_v36  ;;  %v6287_v12 = vld [vmem:[%s10264_s6 + $0x140] sm:$0xff] }
 0x97c   :  { %v6239_v32 = vsel %vm5944_vm11, %v6237_v42, %v6238_v53  ;;  %6372 = vmatpush.msra.mxu2 %v6287_v12  ;;  %v6253_v53 = vld [vmem:[%s10264_s6 + $0x30] sm:$0xff]  ;;  %6393 = vmatpush.msra.mxu3 %v6302_v11  ;;  %v6647_v39 = vld [vmem:[%s10267_s9] ss:$0 sm:$0xff] }
 0x97d   :  { %v6240_v51 = vsel %vm5946_vm12, %v6237_v42, %v6239_v32  ;;  %6350 = vmatpush.msra.mxu1 %v6273_v63  ;;  %v6301_v32 = vld [vmem:[%s10264_s6 + $0x1b0] sm:$0xff] }
 0x97e   :  { %v6241_v43 = vsel %vm5948_vm13, %v6237_v42, %v6240_v51  ;;  %v6254_v42 = vld [vmem:[%s10264_s6 + $0x38] sm:$0xff]  ;;  %6373 = vmatpush.msra.mxu2 %v6286_v4  ;;  %v6284_v51 = vld [vmem:[%s10264_s6 + $0x128] sm:$0xff]  ;;  %6394 = vmatpush.msra.mxu3 %v6301_v32 }
 0x97f   :  { %6162 = vrot.lane.b32.xlu1 %v6161_v5, %s6700_s5  ;;  %6242 = vrot.lane.b32.xlu2 %v6241_v43, %s6700_s5  ;;  %v6285_v5 = vld [vmem:[%s10264_s6 + $0x130] sm:$0xff]  ;;  %v6251_v43 = vld [vmem:[%s10264_s6 + $0x20] sm:$0xff] }
 0x980   :  { %6351 = vmatpush.msra.mxu1 %v6272_v29  ;;  %6333 = vmatpush.msra.mxu0 %v6254_v42 }
 0x981   :  { %6374 = vmatpush.msra.mxu2 %v6285_v5  ;;  %6395 = vmatpush.msra.mxu3 %v6300_v58 }
 0x982   :  { %6352 = vmatpush.msra.mxu1 %v6271_v22  ;;  %6334 = vmatpush.msra.mxu0 %v6253_v53 }
 0x983   :  { %6375 = vmatpush.msra.mxu2 %v6284_v51 }
 0x984   :  { %6353 = vmatpush.msra.mxu1 %v6270_v37  ;;  %6335 = vmatpush.msra.mxu0 %v6252_v25 }
 0x985   :  { %6376 = vmatpush.msra.mxu2 %v6283_v62 }
 0x986   :  { %6354 = vmatpush.msra.mxu1 %v6269_v41  ;;  %6336 = vmatpush.msra.mxu0 %v6251_v43 }
 0x987   :  { %6377 = vmatpush.msra.mxu2 %v6282_v0 }
 0x988   :  { %6355 = vmatpush.msra.mxu1 %v6268_v7  ;;  %6337 = vmatpush.msra.mxu0 %v6250_v23 }
 0x989   :  { %v5984_v3 = vpop.permute.xlu2 %5983  ;;  %6378 = vmatpush.msra.mxu2 %v6281_v61 }
 0x98a   :  { %6356 = vmatpush.msra.mxu1 %v6267_v56 }
 0x98c   :  { %6357 = vmatpush.msra.mxu1 %v6266_v8 }
 0x98e   :  { %6358 = vmatpush.msra.mxu1 %v6265_v14 }
 0x990   :  { %6359 = vmatpush.msra.mxu1 %v6264_v31 }
 0x992   :  { %6360 = vmatpush.msra.mxu1 %v6263_v21 }
 0x999   :  { %v5966_v18 = vpop.permute.xlu0 %5965 }
 0x99a   :  { %5969 = vst.msk [vmem:[#allocation7] sm:$0x3] %vm5968_vm14, %v5966_v18  ;;  %v6299_v18 = vld [vmem:[%s10264_s6 + $0x1a0] sm:$0xff] }
 0x99b   :  { %5987 = vst.msk [vmem:[#allocation7] sm:$0x3] %vm5986_vm15, %v5984_v3  ;;  %6396 = vmatpush.msra.mxu3 %v6299_v18  ;;  %v6249_v3 = vld [vmem:[%s10264_s6 + $0x10] sm:$0xff] }
 0x99c   :  { %v6002_v16 = vpop.permute.xlu2 %6001  ;;  %6338 = vmatpush.msra.mxu0 %v6249_v3 }
 0x99d   :  { %6005 = vst.msk [vmem:[#allocation7] sm:$0x3] %vm6004_vm0, %v6002_v16  ;;  %6397 = vmatpush.msra.mxu3 %v6298_v9  ;;  %v6280_v16 = vld [vmem:[%s10264_s6 + $0x108] sm:$0xff] }
 0x99e   :  { %6339 = vmatpush.msra.mxu0 %v6248_v59  ;;  %6379 = vmatpush.msra.mxu2 %v6280_v16 }
 0x99f   :  { %6398 = vmatpush.msra.mxu3 %v6297_v45 }
 0x9a0   :  { %6340 = vmatpush.msra.mxu0 %v6247_v48  ;;  %6380 = vmatpush.msra.mxu2 %v6279_v28 }
 0x9a2   :  { %6430 = vmatpush.msrb.mxu0 %v6410_v57 }
 0x9a4   :  { %v6066_v19 = vpop.permute.xlu2 %6065  ;;  %6431 = vmatpush.msrb.mxu0 %v6409_v27 }
 0x9a6   :  { %6432 = vmatpush.msrb.mxu0 %v6408_v46 }
 0x9b1   :  { %v6049_v20 = vpop.permute.xlu0 %6048 }
 0x9b2   :  { %6051 = vst.msk [vmem:[#allocation7 + $0x2] sm:$0x3] %vm5968_vm14, %v6049_v20  ;;  %v6296_v20 = vld [vmem:[%s10264_s6 + $0x188] sm:$0xff] }
 0x9b3   :  { %6068 = vst.msk [vmem:[#allocation7 + $0x2] sm:$0x3] %vm5986_vm15, %v6066_v19  ;;  %6399 = vmatpush.msra.mxu3 %v6296_v20  ;;  %v6406_v19 = vld [vmem:[%s10266_s8] sm:$0xff] }
 0x9b5   :  { %6400 = vmatpush.msra.mxu3 %v6295_v44 }
 0x9c9   :  { %v6129_v50 = vpop.permute.xlu1 %6128 }
 0x9ca   :  { %6131 = vst.msk [vmem:[#allocation7 + $0x4] sm:$0x3] %vm5968_vm14, %v6129_v50  ;;  %v6407_v50 = vld [vmem:[%s10266_s8 + $0x8] sm:$0xff]  ;;  %s6470_s8 = sshll.u32 %s6701_s7, 4  ;;  %s6471_s8 = int_to_ptr.vmem [resolvable:$true] %s6470_s8 }
 0x9cb   :  { %6433 = vmatpush.msrb.mxu0 %v6407_v50 }
 0x9cd   :  { %6434 = vmatpush.msrb.mxu0 %v6406_v19 }
 0x9d1   :  { %v6146_v38 = vpop.permute.xlu0 %6145 }
 0x9d2   :  { %6148 = vst.msk [vmem:[#allocation7 + $0x4] sm:$0x3] %vm5986_vm15, %v6146_v38 }
 0x9d9   :  { %v6083_v52 = vpop.permute.xlu0 %6082  ;;  %v6243_v60 = vpop.permute.xlu2 %6242 }
 0x9da   :  { %6085 = vst.msk [vmem:[#allocation7 + $0x2] sm:$0x3] %vm6004_vm0, %v6083_v52 }
 0x9e1   :  { %v6209_v17 = vpop.permute.xlu1 %6208 }
 0x9e2   :  { %6211 = vst.msk [vmem:[#allocation7 + $0x6] sm:$0x3] %vm5968_vm14, %v6209_v17 }
 0x9e9   :  { %v6226_v33 = vpop.permute.xlu1 %6225 }
 0x9ea   :  { %6228 = vst.msk [vmem:[#allocation7 + $0x6] sm:$0x3] %vm5986_vm15, %v6226_v33 }
 0x9eb   :  { %6245 = vst.msk [vmem:[#allocation7 + $0x6] sm:$0x3] %vm6004_vm0, %v6243_v60 }
 0x9f1   :  { %v6163_v6 = vpop.permute.xlu1 %6162 }
 0x9f2   :  { %6165 = vst.msk [vmem:[#allocation7 + $0x4] sm:$0x3] %vm6004_vm0, %v6163_v6 }
 0x9f9   :  { %v6246_v13 = vld [vmem:[#allocation7] sm:$0xff] }
 0x9fa   :  { %6316 = vst [vmem:[#allocation1] ss:$4 sm:$0xff] %v6246_v13 }
 0xa01   :  { %v6317_v1 = vld.sshfl [vmem:[#allocation1] sm:$0xff pattern:$0x73625140]  ;;  %v6318_v15 = vld.sshfl [vmem:[#allocation1 + $0x8] sm:$0xff pattern:$0x73625140] }
 0xa02   :  { %6341 = vmatmul.f32.vlgmr.msra.gmra.mxu0 %v6317_v1  ;;  %6361 = vmatmul.f32.vlgmr.msra.gmra.mxu1 %v6318_v15  ;;  %v6319_v34 = vld.sshfl [vmem:[#allocation1 + $0x10] sm:$0xff pattern:$0x73625140]  ;;  %v6320_v10 = vld.sshfl [vmem:[#allocation1 + $0x18] sm:$0xff pattern:$0x73625140] }
 0xa03   :  { %6381 = vmatmul.f32.vlgmr.msra.gmra.mxu2 %v6319_v34  ;;  %6401 = vmatmul.f32.vlgmr.msra.gmra.mxu3 %v6320_v10 }
 0xa7f   :  { %v6342_v36 = vpop.f32.mrf.mxu0  ;;  %v6362_v26 = vpop.f32.mrf.mxu1 }
 0xa80   :  { %v6343_v24 = vadd.f32 %v6646_v35, %v6342_v36 }
 0xa82   :  { %v6363_v40 = vadd.f32 %v6362_v26, %v6343_v24 }
 0xa86   :  { %v6382_v63 = vpop.f32.mrf.mxu2  ;;  %v6402_v55 = vpop.f32.mrf.mxu3 }
 0xa87   :  { %v6383_v49 = vadd.f32 %v6382_v63, %v6363_v40 }
 0xa89   :  { %v6403_v54 = vadd.f32 %v6402_v55, %v6383_v49 }
 0xa8b   :  { %v6405_v29 = vmax.f32 %v6403_v54, 0.0 }
 0xa8d   :  { %6567 = vmatmul.msk.f32.vlgmr.msrb.gmra.mxu0 %vm6415_vm1, %v6405_v29 }
 0xb0a   :  { %v6436_v47 = vpop.f32.mrf.mxu0 }
 0xb0b   :  { %v6437_v30 = vadd.f32 %v6647_v39, %v6436_v47 }
 0xb0d   :  { %v6440_v22 = vsel %vm6439_vm2, %v6437_v30, -inf }
 0xb0e   :  { %6441 = vmax.xlane.f32.xlu0 %v6440_v22 }
 0xb81   :  { %v6442_v12 = vpop.xlane.xlu0 %6441 }
 0xb82   :  { %v6443_v2 = vsub.f32 %v6437_v30, %v6442_v12 }
 0xb84   :  { %v6444_v38 = vmul.f32 1.442695, %v6443_v2 }
 0xb86   :  { %6648 = vpow2.f32 %v6444_v38 }
 0xb8c   :  { %v6649_v42 = vpop.eup %6648 }
 0xb8d   :  { %v6446_v37 = vsel %vm6439_vm2, %v6649_v42, 0.0 }
 0xb8e   :  { %6447 = vadd.xlane.f32.xlu1 %v6446_v37 }
 0xc01   :  { %v6448_v4 = vpop.xlane.xlu1 %6447 }
 0xc02   :  { %6650 = vrcp.f32 %v6448_v4  ;;  %v6460_v5 = vand.u32 2147483648, %v6448_v4  ;;  %v6458_v25 = vand.u32 2147483647, %v6448_v4  ;;  %vm6454_vm4 = vweird.f32 %v6448_v4 }
 0xc04   :  { %v6461_v51 = vor.u32 1.1754944e-38, %v6460_v5  ;;  %vm6459_vm6 = vcmp.eq.f32.partialorder %v6458_v25, 8.507059e+37 }
 0xc08   :  { %v6651_v11 = vpop.eup %6650 }
 0xc09   :  { %v6450_v53 = vmul.f32 %v6651_v11, %v6448_v4  ;;  %vm6455_vm3 = vweird.f32 %v6651_v11 }
 0xc0a   :  { %vm6456_vm5 = vmor %vm6454_vm4, %vm6455_vm3 }
 0xc0b   :  { %v6451_v41 = vsub.f32 1.0, %v6450_v53 }
 0xc0d   :  { %v6452_v32 = vmul.f32 %v6651_v11, %v6451_v41 }
 0xc0f   :  { %v6453_v7 = vadd.f32 %v6651_v11, %v6452_v32 }
 0xc11   :  { %v6457_v58 = vsel %vm6456_vm5, %v6651_v11, %v6453_v7 }
 0xc12   :  { %v6462_v43 = vsel %vm6459_vm6, %v6461_v51, %v6457_v58 }
 0xc13   :  { %v6463_v56 = vmul.f32 %v6649_v42, %v6462_v43 }
 0xc15   :  { %6464 = vst.msk [vmem:[#allocation8] sm:$0x3] %vm6439_vm2, %v6463_v56 }
 0xc16   :  { %6475 = dma.vmem_to_hbm [thread:$0]  %s6471_s8, 32, %s6473_s15, [#allocation9]  }
 0xc17   :  { %6680 = dma.done.wait [#allocation9], 32  }
 0xc18   :  { %6681 = vsyncadd [#allocation9], 4294967264 }
 0xc19   :  { %6480 = vsyncpa [#allocation9], 1 }

</bundles_post_ra>
